<compile_context>
chip_gen: v6e
topology: v6e:2x2x1
jax: 0.10.0
libtpu: 0.0.40
codegen_flags: <defaults>
</compile_context>

<pallas_src>
import functools
import math

import jax
import jax.numpy as jnp
from jax.experimental import pallas as pl
from jax.experimental.pallas import tpu as pltpu

_BF16 = jnp.bfloat16
_F32 = jnp.float32


# ---------------------------------------------------------------------------
# in-kernel math helpers (values / refs inside a kernel body)
# ---------------------------------------------------------------------------

def _layernorm(x, g, b, eps=1e-5):
    """LayerNorm over last dim, biased variance (PyTorch semantics), f32 math."""
    mu = jnp.mean(x, axis=-1, keepdims=True)
    var = jnp.mean(jnp.square(x - mu), axis=-1, keepdims=True)
    return (x - mu) * jax.lax.rsqrt(var + eps) * g + b


def _attention(q, k, v, B, Sq, Sk, nhead):
    """Scaled dot-product attention. q:(B*Sq,D), k/v:(B*Sk,D) f32 -> (B*Sq,D) f32 (pre o-proj)."""
    D = q.shape[-1]
    dh = D // nhead
    scale = 1.0 / math.sqrt(dh)
    q3 = q.reshape(B, Sq, D)
    k3 = k.reshape(B, Sk, D)
    v3 = v.reshape(B, Sk, D)
    heads = []
    for h in range(nhead):                                   # tiny static unroll (H=4)
        sl = slice(h * dh, (h + 1) * dh)
        qh = q3[:, :, sl].astype(_BF16)
        kh = k3[:, :, sl].astype(_BF16)
        vh = v3[:, :, sl].astype(_BF16)
        s = jnp.einsum("bqd,bkd->bqk", qh, kh, preferred_element_type=_F32) * scale
        s = s - jnp.max(s, axis=-1, keepdims=True)
        p = jnp.exp(s)
        p = p * pl.reciprocal(jnp.sum(p, axis=-1, keepdims=True), approx=True)
        heads.append(jnp.einsum("bqk,bkd->bqd", p.astype(_BF16), vh,
                                preferred_element_type=_F32))
    o = jnp.concatenate(heads, axis=-1)                      # (B, Sq, D)
    return o.reshape(B * Sq, D)


def _self_attn(x, B, S, wqkv, bqkv, wo, bo, nhead):
    """Self-attention block: one fused QKV matmul + one concat-heads o-proj matmul."""
    D = x.shape[-1]
    qkv = jnp.dot(x.astype(_BF16), wqkv[...], preferred_element_type=_F32) + bqkv[...]
    q, k, v = qkv[:, :D], qkv[:, D:2 * D], qkv[:, 2 * D:]
    o = _attention(q, k, v, B, S, S, nhead)
    return jnp.dot(o.astype(_BF16), wo[...], preferred_element_type=_F32) + bo[...]


def _cross_attn(x, mem, B, St, Ss, wq, bq, wkv, bkv, wo, bo, nhead):
    """Cross-attention block: Q from decoder state, fused KV from encoder memory."""
    D = x.shape[-1]
    q = jnp.dot(x.astype(_BF16), wq[...], preferred_element_type=_F32) + bq[...]
    kv = jnp.dot(mem.astype(_BF16), wkv[...], preferred_element_type=_F32) + bkv[...]
    k, v = kv[:, :D], kv[:, D:]
    o = _attention(q, k, v, B, St, Ss, nhead)
    return jnp.dot(o.astype(_BF16), wo[...], preferred_element_type=_F32) + bo[...]


def _ffn(h, w1, b1, w2, b2, chunk):
    """relu(h @ W1 + b1) @ W2 + b2, chunked over dff; the (M, dff) intermediate never exists."""
    M, D = h.shape
    dff = w1.shape[-1]
    hb = h.astype(_BF16)
    acc = jnp.zeros((M, D), _F32)
    for c in range(0, dff, chunk):                           # static slices of the weight refs
        f = jnp.dot(hb, w1[:, c:c + chunk], preferred_element_type=_F32) + b1[:, c:c + chunk]
        f = jnp.maximum(f, 0.0).astype(_BF16)
        acc = acc + jnp.dot(f, w2[c:c + chunk, :], preferred_element_type=_F32)
    return acc + b2[...]


# ---------------------------------------------------------------------------
# fused stack kernels (one pallas_call per stack, grid over layers)
# ---------------------------------------------------------------------------

def _encoder_stack_kernel(nhead, dff_chunk,
                          src_ref, win, bin_,
                          wqkv, bqkv, wo, bo, g1, be1,
                          w1, b1, w2, b2, g2, be2,
                          gn, bn,
                          mem_ref, x_scr):
    B, Ss, Di = src_ref.shape
    l = pl.program_id(0)

    @pl.when(l == 0)                                          # shared input projection (source)
    def _():
        s2 = src_ref[...].reshape(B * Ss, Di).astype(_BF16)
        x_scr[...] = jnp.dot(s2, win[...], preferred_element_type=_F32) + bin_[...]

    x = x_scr[...]                                            # carried activation (f32)
    attn = _self_attn(x, B, Ss, wqkv, bqkv, wo, bo, nhead)
    h = _layernorm(attn + x, g1[...], be1[...])               # add & norm (post-norm)
    f = _ffn(h, w1, b1, w2, b2, dff_chunk)
    y = _layernorm(f + h, g2[...], be2[...])                  # add & norm
    x_scr[...] = y

    @pl.when(l == pl.num_programs(0) - 1)                     # final encoder norm, write once
    def _():
        mem_ref[...] = _layernorm(y, gn[...], bn[...]).astype(mem_ref.dtype)


def _decoder_stack_kernel(nhead, dff_chunk,
                          tgt_ref, win, bin_, mem_ref,
                          s_wqkv, s_bqkv, s_wo, s_bo, g1, be1,
                          c_wq, c_bq, c_wkv, c_bkv, c_wo, c_bo, g2, be2,
                          w1, b1, w2, b2, g3, be3,
                          gn, bn, wout, bout,
                          out_ref, x_scr):
    B, St, Di = tgt_ref.shape
    D = x_scr.shape[-1]
    Ss = mem_ref.shape[0] // B
    l = pl.program_id(0)

    @pl.when(l == 0)                                          # shared input projection (target)
    def _():
        t2 = tgt_ref[...].reshape(B * St, Di).astype(_BF16)
        x_scr[...] = jnp.dot(t2, win[...], preferred_element_type=_F32) + bin_[...]

    x = x_scr[...]
    mem = mem_ref[...]

    # self-attention (no causal mask — matches the reference forward, which passes no masks)
    sa = _self_attn(x, B, St, s_wqkv, s_bqkv, s_wo, s_bo, nhead)
    h = _layernorm(sa + x, g1[...], be1[...])

    # cross-attention against encoder memory
    ca = _cross_attn(h, mem, B, St, Ss, c_wq, c_bq, c_wkv, c_bkv, c_wo, c_bo, nhead)
    h = _layernorm(ca + h, g2[...], be2[...])

    # feed-forward
    f = _ffn(h, w1, b1, w2, b2, dff_chunk)
    y = _layernorm(f + h, g3[...], be3[...])
    x_scr[...] = y

    @pl.when(l == pl.num_programs(0) - 1)
    def _():
        # module returns output[:, -1, :] -> final dec norm + output_proj on last step only
        last = y.reshape(B, St, D)[:, St - 1, :]              # (B, D)
        last = _layernorm(last, gn[...], bn[...])
        out = jnp.dot(last.astype(_BF16), wout[...], preferred_element_type=_F32) + bout[...]
        out_ref[...] = out.astype(out_ref.dtype)


# ---------------------------------------------------------------------------
# pallas_call wrappers
# ---------------------------------------------------------------------------

def _const_spec(shape):
    """Full-array block, same for every grid step (resident across all layers)."""
    nd = len(shape)
    return pl.BlockSpec(tuple(shape), lambda l, _z=(0,) * nd: _z)


def _layer_spec(shape):
    """Per-layer block of an (L, ...) stacked weight; leading dim squeezed in the kernel."""
    rest = tuple(int(s) for s in shape[1:])
    nd = len(rest)
    return pl.BlockSpec((None,) + rest, lambda l, _z=(0,) * nd: (l,) + _z)


_VMEM_LIMIT = 32 * 1024 * 1024   # covers double-buffered stacked weights; fits v5e/v6e/v7x


def encoder_forward(source, params, nhead, dff_chunk=512):
    B, Ss, Di = source.shape
    D = params["bin"].shape[-1]
    enc = params["enc"]
    L = enc["wqkv"].shape[0]
    M = B * Ss

    inputs = [source, params["win"], params["bin"]]
    specs = [_const_spec(source.shape), _const_spec(params["win"].shape),
             _const_spec(params["bin"].shape)]
    for name in ("wqkv", "bqkv", "wo", "bo", "ln1_g", "ln1_b",
                 "w1", "b1", "w2", "b2", "ln2_g", "ln2_b"):
        inputs.append(enc[name])
        specs.append(_layer_spec(enc[name].shape))
    inputs += [params["enc_norm"]["g"], params["enc_norm"]["b"]]
    specs += [_const_spec(params["enc_norm"]["g"].shape),
              _const_spec(params["enc_norm"]["b"].shape)]

    return pl.pallas_call(
        functools.partial(_encoder_stack_kernel, nhead, dff_chunk),
        out_shape=jax.ShapeDtypeStruct((M, D), jnp.float32),
        grid_spec=pltpu.PrefetchScalarGridSpec(
            num_scalar_prefetch=0,
            grid=(L,),
            in_specs=specs,
            out_specs=_const_spec((M, D)),
            scratch_shapes=[pltpu.VMEM((M, D), jnp.float32)]),
        compiler_params=pltpu.CompilerParams(
            dimension_semantics=("arbitrary",),
            vmem_limit_bytes=_VMEM_LIMIT),
    )(*inputs)


def decoder_forward(target, memory, params, nhead, dff_chunk=512):
    B, St, Di = target.shape
    D = params["bin"].shape[-1]
    dec = params["dec"]
    L = dec["s_wqkv"].shape[0]
    out_len = params["bout"].shape[-1]

    inputs = [target, params["win"], params["bin"], memory]
    specs = [_const_spec(target.shape), _const_spec(params["win"].shape),
             _const_spec(params["bin"].shape), _const_spec(memory.shape)]
    for name in ("s_wqkv", "s_bqkv", "s_wo", "s_bo", "ln1_g", "ln1_b",
                 "c_wq", "c_bq", "c_wkv", "c_bkv", "c_wo", "c_bo", "ln2_g", "ln2_b",
                 "w1", "b1", "w2", "b2", "ln3_g", "ln3_b"):
        inputs.append(dec[name])
        specs.append(_layer_spec(dec[name].shape))
    inputs += [params["dec_norm"]["g"], params["dec_norm"]["b"],
               params["wout"], params["bout"]]
    specs += [_const_spec(params["dec_norm"]["g"].shape),
              _const_spec(params["dec_norm"]["b"].shape),
              _const_spec(params["wout"].shape),
              _const_spec(params["bout"].shape)]

    return pl.pallas_call(
        functools.partial(_decoder_stack_kernel, nhead, dff_chunk),
        out_shape=jax.ShapeDtypeStruct((B, out_len), jnp.float32),
        grid_spec=pltpu.PrefetchScalarGridSpec(
            num_scalar_prefetch=0,
            grid=(L,),
            in_specs=specs,
            out_specs=_const_spec((B, out_len)),
            scratch_shapes=[pltpu.VMEM((B * St, D), jnp.float32)]),
        compiler_params=pltpu.CompilerParams(
            dimension_semantics=("arbitrary",),
            vmem_limit_bytes=_VMEM_LIMIT),
    )(*inputs)


def transformer_forward(params, source, target, nhead, dff_chunk=512):
    """Full forward: 2 pallas_calls (encoder stack incl. input-proj + final norm;
    decoder stack incl. input-proj + final norm + output-proj of last time step)."""
    memory = encoder_forward(source, params, nhead, dff_chunk)
    return decoder_forward(target, memory, params, nhead, dff_chunk)


# ---------------------------------------------------------------------------
# deterministic parameter construction (PyTorch-equivalent shapes, re-laid-out:
# per-layer weights stacked along a leading L axis, matmul weights stored bf16)
# ---------------------------------------------------------------------------

def init_params(key, input_dim, d_model, nhead, dff, num_layers, output_length):
    keys = iter(jax.random.split(key, 4096))

    def randn(shape, scale=0.05):
        return jax.random.normal(next(keys), shape, jnp.float32) * scale

    def ones_ln():
        return jnp.ones((1, d_model), jnp.float32), jnp.zeros((1, d_model), jnp.float32)

    def attn_raw():
        # nn.MultiheadAttention: in_proj_weight (3D, D), in_proj_bias (3D,), out_proj (D, D)+(D,)
        return (randn((3 * d_model, d_model)), randn((3 * d_model,)),
                randn((d_model, d_model)), randn((d_model,)))

    def ffn_raw():
        return (randn((dff, d_model)), randn((dff,)), randn((d_model, dff)), randn((d_model,)))

    def enc_layer():
        in_w, in_b, out_w, out_b = attn_raw()
        l1w, l1b, l2w, l2b = ffn_raw()
        g1, b1 = ones_ln()
        g2, b2 = ones_ln()
        return {
            "wqkv": in_w.T.astype(_BF16), "bqkv": in_b[None, :],
            "wo": out_w.T.astype(_BF16), "bo": out_b[None, :],
            "ln1_g": g1, "ln1_b": b1,
            "w1": l1w.T.astype(_BF16), "b1": l1b[None, :],
            "w2": l2w.T.astype(_BF16), "b2": l2b[None, :],
            "ln2_g": g2, "ln2_b": b2,
        }

    def dec_layer():
        s_in_w, s_in_b, s_out_w, s_out_b = attn_raw()
        c_in_w, c_in_b, c_out_w, c_out_b = attn_raw()
        l1w, l1b, l2w, l2b = ffn_raw()
        g1, b1 = ones_ln()
        g2, b2 = ones_ln()
        g3, b3 = ones_ln()
        return {
            "s_wqkv": s_in_w.T.astype(_BF16), "s_bqkv": s_in_b[None, :],
            "s_wo": s_out_w.T.astype(_BF16), "s_bo": s_out_b[None, :],
            "ln1_g": g1, "ln1_b": b1,
            "c_wq": c_in_w[:d_model].T.astype(_BF16), "c_bq": c_in_b[None, :d_model],
            "c_wkv": c_in_w[d_model:].T.astype(_BF16), "c_bkv": c_in_b[None, d_model:],
            "c_wo": c_out_w.T.astype(_BF16), "c_bo": c_out_b[None, :],
            "ln2_g": g2, "ln2_b": b2,
            "w1": l1w.T.astype(_BF16), "b1": l1b[None, :],
            "w2": l2w.T.astype(_BF16), "b2": l2b[None, :],
            "ln3_g": g3, "ln3_b": b3,
        }

    def stack(layers):
        return jax.tree_util.tree_map(lambda *xs: jnp.stack(xs, axis=0), *layers)

    win = randn((d_model, input_dim))
    wout = randn((output_length, d_model))
    return {
        "win": win.T.astype(_BF16), "bin": randn((d_model,))[None, :],
        "wout": wout.T.astype(_BF16), "bout": randn((output_length,))[None, :],
        "enc": stack([enc_layer() for _ in range(num_layers)]),
        "enc_norm": {"g": jnp.ones((1, d_model), jnp.float32),
                     "b": jnp.zeros((1, d_model), jnp.float32)},
        "dec": stack([dec_layer() for _ in range(num_layers)]),
        "dec_norm": {"g": jnp.ones((1, d_model), jnp.float32),
                     "b": jnp.zeros((1, d_model), jnp.float32)},
    }


# ---------------------------------------------------------------------------
# main
# ---------------------------------------------------------------------------

if __name__ == "__main__":
    INPUT_DIM = 16
    OUTPUT_LENGTH = 10
    D_MODEL = 32
    NHEAD = 4
    NUM_LAYERS = 2
    DFF = 2048                 # nn.Transformer default dim_feedforward
    B, S_SRC, S_TGT = 2, 8, 8

    key = jax.random.PRNGKey(0)
    k_params, k_src, k_tgt = jax.random.split(key, 3)

    params = init_params(k_params, INPUT_DIM, D_MODEL, NHEAD, DFF, NUM_LAYERS, OUTPUT_LENGTH)
    source = jax.random.normal(k_src, (B, S_SRC, INPUT_DIM), jnp.float32)
    target = jax.random.normal(k_tgt, (B, S_TGT, INPUT_DIM), jnp.float32)

    fwd = jax.jit(functools.partial(transformer_forward, nhead=NHEAD))
    out = jax.block_until_ready(fwd(params, source, target))

    assert out.shape == (B, OUTPUT_LENGTH), out.shape
    assert bool(jnp.all(jnp.isfinite(out)))
    print("KERNEL_OK")
</pallas_src>

<mosaic_0001>
module attributes {stable_mosaic.version = 11 : i64} {
  func.func @_encoder_stack_kernel(%arg0: i32, %arg1: memref<2x8x16xf32, #tpu.memory_space<vmem>>, %arg2: memref<16x32xbf16, #tpu.memory_space<vmem>>, %arg3: memref<1x32xf32, #tpu.memory_space<vmem>>, %arg4: memref<1x32x96xbf16, #tpu.memory_space<vmem>>, %arg5: memref<1x1x96xf32, #tpu.memory_space<vmem>>, %arg6: memref<1x32x32xbf16, #tpu.memory_space<vmem>>, %arg7: memref<1x1x32xf32, #tpu.memory_space<vmem>>, %arg8: memref<1x1x32xf32, #tpu.memory_space<vmem>>, %arg9: memref<1x1x32xf32, #tpu.memory_space<vmem>>, %arg10: memref<1x32x2048xbf16, #tpu.memory_space<vmem>>, %arg11: memref<1x1x2048xf32, #tpu.memory_space<vmem>>, %arg12: memref<1x2048x32xbf16, #tpu.memory_space<vmem>>, %arg13: memref<1x1x32xf32, #tpu.memory_space<vmem>>, %arg14: memref<1x1x32xf32, #tpu.memory_space<vmem>>, %arg15: memref<1x1x32xf32, #tpu.memory_space<vmem>>, %arg16: memref<1x32xf32, #tpu.memory_space<vmem>>, %arg17: memref<1x32xf32, #tpu.memory_space<vmem>>, %arg18: memref<16x32xf32, #tpu.memory_space<vmem>>, %arg19: memref<16x32xf32, #tpu.memory_space<vmem>>) attributes {dimension_semantics = [#tpu.dimension_semantics<arbitrary>], iteration_bounds = array<i64: 2>, scalar_prefetch = 0 : i64, scratch_operands = 1 : i64, tpu.core_type = #tpu.core_type<tc>, window_params = [{pipeline_mode = #tpu.pipeline_mode<synchronous>, transform_indices = @transform_0, window_bounds = array<i64: 2, 8, 16>}, {pipeline_mode = #tpu.pipeline_mode<synchronous>, transform_indices = @transform_1, window_bounds = array<i64: 16, 32>}, {pipeline_mode = #tpu.pipeline_mode<synchronous>, transform_indices = @transform_2, window_bounds = array<i64: 1, 32>}, {transform_indices = @transform_3, window_bounds = array<i64: 1, 32, 96>}, {transform_indices = @transform_4, window_bounds = array<i64: 1, 1, 96>}, {transform_indices = @transform_5, window_bounds = array<i64: 1, 32, 32>}, {transform_indices = @transform_6, window_bounds = array<i64: 1, 1, 32>}, {transform_indices = @transform_7, window_bounds = array<i64: 1, 1, 32>}, {transform_indices = @transform_8, window_bounds = array<i64: 1, 1, 32>}, {transform_indices = @transform_9, window_bounds = array<i64: 1, 32, 2048>}, {transform_indices = @transform_10, window_bounds = array<i64: 1, 1, 2048>}, {transform_indices = @transform_11, window_bounds = array<i64: 1, 2048, 32>}, {transform_indices = @transform_12, window_bounds = array<i64: 1, 1, 32>}, {transform_indices = @transform_13, window_bounds = array<i64: 1, 1, 32>}, {transform_indices = @transform_14, window_bounds = array<i64: 1, 1, 32>}, {pipeline_mode = #tpu.pipeline_mode<synchronous>, transform_indices = @transform_15, window_bounds = array<i64: 1, 32>}, {pipeline_mode = #tpu.pipeline_mode<synchronous>, transform_indices = @transform_16, window_bounds = array<i64: 1, 32>}, {pipeline_mode = #tpu.pipeline_mode<synchronous>, transform_indices = @transform_17, window_bounds = array<i64: 16, 32>}]} {
    %c0_i32 = arith.constant 0 : i32
    %0 = arith.cmpi eq, %arg0, %c0_i32 : i32
    %1 = arith.extui %0 : i1 to i32
    %c0_i32_0 = arith.constant 0 : i32
    %2 = arith.cmpi ne, %1, %c0_i32_0 : i32
    scf.if %2 {
      %c0_109 = arith.constant 0 : index
      %c0_110 = arith.constant 0 : index
      %c0_111 = arith.constant 0 : index
      %232 = vector.load %arg1[%c0_109, %c0_110, %c0_111] : memref<2x8x16xf32, #tpu.memory_space<vmem>>, vector<2x8x16xf32>
      %233 = vector.shape_cast %232 : vector<2x8x16xf32> to vector<16x16xf32>
      %234 = arith.truncf %233 : vector<16x16xf32> to vector<16x16xbf16>
      %c0_112 = arith.constant 0 : index
      %c0_113 = arith.constant 0 : index
      %235 = vector.load %arg2[%c0_112, %c0_113] : memref<16x32xbf16, #tpu.memory_space<vmem>>, vector<16x32xbf16>
      %cst_114 = arith.constant dense<0.000000e+00> : vector<16x32xf32>
      %236 = tpu.matmul %234, %235, %cst_114 {dimension_numbers = #tpu.dot_dimension_numbers<[1], [0], [0], [1], [0, 0, 1, 1], [], []>} : vector<16x16xbf16>, vector<16x32xbf16>, vector<16x32xf32> -> vector<16x32xf32>
      %c0_115 = arith.constant 0 : index
      %c0_116 = arith.constant 0 : index
      %237 = vector.load %arg3[%c0_115, %c0_116] : memref<1x32xf32, #tpu.memory_space<vmem>>, vector<1x32xf32>
      %238 = vector.broadcast %237 : vector<1x32xf32> to vector<16x32xf32>
      %239 = arith.addf %236, %238 : vector<16x32xf32>
      %c0_117 = arith.constant 0 : index
      %c0_118 = arith.constant 0 : index
      %240 = vector.load %arg19[%c0_117, %c0_118] : memref<16x32xf32, #tpu.memory_space<vmem>>, vector<16x32xf32>
      tpu.vector_store %arg19[%c0_117, %c0_118], %239 {strides = array<i32>} : memref<16x32xf32, #tpu.memory_space<vmem>>, vector<16x32xf32>,
    } else {
    }
    %c0 = arith.constant 0 : index
    %c0_1 = arith.constant 0 : index
    %3 = vector.load %arg19[%c0, %c0_1] : memref<16x32xf32, #tpu.memory_space<vmem>>, vector<16x32xf32>
    %4 = arith.truncf %3 : vector<16x32xf32> to vector<16x32xbf16>
    %c0_2 = arith.constant 0 : index
    %c0_3 = arith.constant 0 : index
    %c0_4 = arith.constant 0 : index
    %5 = vector.load %arg4[%c0_2, %c0_3, %c0_4] : memref<1x32x96xbf16, #tpu.memory_space<vmem>>, vector<1x32x96xbf16>
    %6 = vector.shape_cast %5 : vector<1x32x96xbf16> to vector<32x96xbf16>
    %cst = arith.constant dense<0.000000e+00> : vector<16x96xf32>
    %7 = tpu.matmul %4, %6, %cst {dimension_numbers = #tpu.dot_dimension_numbers<[1], [0], [0], [1], [0, 0, 1, 1], [], []>} : vector<16x32xbf16>, vector<32x96xbf16>, vector<16x96xf32> -> vector<16x96xf32>
    %c0_5 = arith.constant 0 : index
    %c0_6 = arith.constant 0 : index
    %c0_7 = arith.constant 0 : index
    %8 = vector.load %arg5[%c0_5, %c0_6, %c0_7] : memref<1x1x96xf32, #tpu.memory_space<vmem>>, vector<1x1x96xf32>
    %9 = vector.shape_cast %8 : vector<1x1x96xf32> to vector<1x96xf32>
    %10 = vector.broadcast %9 : vector<1x96xf32> to vector<16x96xf32>
    %11 = arith.addf %7, %10 : vector<16x96xf32>
    %12 = vector.extract_strided_slice %11 {offsets = [0, 0], sizes = [16, 32], strides = [1, 1]} : vector<16x96xf32> to vector<16x32xf32>
    %13 = vector.extract_strided_slice %11 {offsets = [0, 32], sizes = [16, 32], strides = [1, 1]} : vector<16x96xf32> to vector<16x32xf32>
    %14 = vector.extract_strided_slice %11 {offsets = [0, 64], sizes = [16, 32], strides = [1, 1]} : vector<16x96xf32> to vector<16x32xf32>
    %15 = vector.shape_cast %12 : vector<16x32xf32> to vector<2x8x32xf32>
    %16 = vector.shape_cast %13 : vector<16x32xf32> to vector<2x8x32xf32>
    %17 = vector.shape_cast %14 : vector<16x32xf32> to vector<2x8x32xf32>
    %18 = vector.extract_strided_slice %15 {offsets = [0, 0, 0], sizes = [2, 8, 8], strides = [1, 1, 1]} : vector<2x8x32xf32> to vector<2x8x8xf32>
    %19 = arith.truncf %18 : vector<2x8x8xf32> to vector<2x8x8xbf16>
    %20 = vector.extract_strided_slice %16 {offsets = [0, 0, 0], sizes = [2, 8, 8], strides = [1, 1, 1]} : vector<2x8x32xf32> to vector<2x8x8xf32>
    %21 = arith.truncf %20 : vector<2x8x8xf32> to vector<2x8x8xbf16>
    %22 = vector.extract_strided_slice %17 {offsets = [0, 0, 0], sizes = [2, 8, 8], strides = [1, 1, 1]} : vector<2x8x32xf32> to vector<2x8x8xf32>
    %23 = arith.truncf %22 : vector<2x8x8xf32> to vector<2x8x8xbf16>
    "tpu.trace_start"() <{level = 10 : i32, message = "bqd,bkd->bqk"}> : () -> ()
    %cst_8 = arith.constant dense<0.000000e+00> : vector<2x8x8xf32>
    %24 = tpu.matmul %19, %21, %cst_8 {dimension_numbers = #tpu.dot_dimension_numbers<[2], [2], [1], [1], [0, 0, 0, 1, 1, 1], [0], [0]>} : vector<2x8x8xbf16>, vector<2x8x8xbf16>, vector<2x8x8xf32> -> vector<2x8x8xf32>
    "tpu.trace_stop"() : () -> ()
    %cst_9 = arith.constant 0.353553385 : f32
    %25 = vector.broadcast %cst_9 : f32 to vector<2x8x8xf32>
    %26 = arith.mulf %24, %25 : vector<2x8x8xf32>
    %cst_10 = arith.constant dense<0xFF800000> : vector<2x8xf32>
    %27 = vector.multi_reduction <maximumf>, %26, %cst_10 [2] : vector<2x8x8xf32> to vector<2x8xf32>
    %28 = vector.shape_cast %27 : vector<2x8xf32> to vector<2x8x1xf32>
    %29 = vector.broadcast %28 : vector<2x8x1xf32> to vector<2x8x8xf32>
    %30 = arith.subf %26, %29 : vector<2x8x8xf32>
    %31 = math.exp %30 : vector<2x8x8xf32>
    %cst_11 = arith.constant dense<0.000000e+00> : vector<2x8xf32>
    %32 = vector.multi_reduction <add>, %31, %cst_11 [2] : vector<2x8x8xf32> to vector<2x8xf32>
    %33 = vector.shape_cast %32 : vector<2x8xf32> to vector<2x8x1xf32>
    %34 = tpu.reciprocal %33 {approx = true} : vector<2x8x1xf32> -> vector<2x8x1xf32>
    %35 = vector.broadcast %34 : vector<2x8x1xf32> to vector<2x8x8xf32>
    %36 = arith.mulf %31, %35 : vector<2x8x8xf32>
    %37 = arith.truncf %36 : vector<2x8x8xf32> to vector<2x8x8xbf16>
    "tpu.trace_start"() <{level = 10 : i32, message = "bqk,bkd->bqd"}> : () -> ()
    %cst_12 = arith.constant dense<0.000000e+00> : vector<2x8x8xf32>
    %38 = tpu.matmul %37, %23, %cst_12 {dimension_numbers = #tpu.dot_dimension_numbers<[2], [1], [1], [2], [0, 0, 0, 1, 1, 2], [0], [0]>} : vector<2x8x8xbf16>, vector<2x8x8xbf16>, vector<2x8x8xf32> -> vector<2x8x8xf32>
    "tpu.trace_stop"() : () -> ()
    %39 = vector.extract_strided_slice %15 {offsets = [0, 0, 8], sizes = [2, 8, 8], strides = [1, 1, 1]} : vector<2x8x32xf32> to vector<2x8x8xf32>
    %40 = arith.truncf %39 : vector<2x8x8xf32> to vector<2x8x8xbf16>
    %41 = vector.extract_strided_slice %16 {offsets = [0, 0, 8], sizes = [2, 8, 8], strides = [1, 1, 1]} : vector<2x8x32xf32> to vector<2x8x8xf32>
    %42 = arith.truncf %41 : vector<2x8x8xf32> to vector<2x8x8xbf16>
    %43 = vector.extract_strided_slice %17 {offsets = [0, 0, 8], sizes = [2, 8, 8], strides = [1, 1, 1]} : vector<2x8x32xf32> to vector<2x8x8xf32>
    %44 = arith.truncf %43 : vector<2x8x8xf32> to vector<2x8x8xbf16>
    "tpu.trace_start"() <{level = 10 : i32, message = "bqd,bkd->bqk"}> : () -> ()
    %cst_13 = arith.constant dense<0.000000e+00> : vector<2x8x8xf32>
    %45 = tpu.matmul %40, %42, %cst_13 {dimension_numbers = #tpu.dot_dimension_numbers<[2], [2], [1], [1], [0, 0, 0, 1, 1, 1], [0], [0]>} : vector<2x8x8xbf16>, vector<2x8x8xbf16>, vector<2x8x8xf32> -> vector<2x8x8xf32>
    "tpu.trace_stop"() : () -> ()
    %cst_14 = arith.constant 0.353553385 : f32
    %46 = vector.broadcast %cst_14 : f32 to vector<2x8x8xf32>
    %47 = arith.mulf %45, %46 : vector<2x8x8xf32>
    %cst_15 = arith.constant dense<0xFF800000> : vector<2x8xf32>
    %48 = vector.multi_reduction <maximumf>, %47, %cst_15 [2] : vector<2x8x8xf32> to vector<2x8xf32>
    %49 = vector.shape_cast %48 : vector<2x8xf32> to vector<2x8x1xf32>
    %50 = vector.broadcast %49 : vector<2x8x1xf32> to vector<2x8x8xf32>
    %51 = arith.subf %47, %50 : vector<2x8x8xf32>
    %52 = math.exp %51 : vector<2x8x8xf32>
    %cst_16 = arith.constant dense<0.000000e+00> : vector<2x8xf32>
    %53 = vector.multi_reduction <add>, %52, %cst_16 [2] : vector<2x8x8xf32> to vector<2x8xf32>
    %54 = vector.shape_cast %53 : vector<2x8xf32> to vector<2x8x1xf32>
    %55 = tpu.reciprocal %54 {approx = true} : vector<2x8x1xf32> -> vector<2x8x1xf32>
    %56 = vector.broadcast %55 : vector<2x8x1xf32> to vector<2x8x8xf32>
    %57 = arith.mulf %52, %56 : vector<2x8x8xf32>
    %58 = arith.truncf %57 : vector<2x8x8xf32> to vector<2x8x8xbf16>
    "tpu.trace_start"() <{level = 10 : i32, message = "bqk,bkd->bqd"}> : () -> ()
    %cst_17 = arith.constant dense<0.000000e+00> : vector<2x8x8xf32>
    %59 = tpu.matmul %58, %44, %cst_17 {dimension_numbers = #tpu.dot_dimension_numbers<[2], [1], [1], [2], [0, 0, 0, 1, 1, 2], [0], [0]>} : vector<2x8x8xbf16>, vector<2x8x8xbf16>, vector<2x8x8xf32> -> vector<2x8x8xf32>
    "tpu.trace_stop"() : () -> ()
    %60 = vector.extract_strided_slice %15 {offsets = [0, 0, 16], sizes = [2, 8, 8], strides = [1, 1, 1]} : vector<2x8x32xf32> to vector<2x8x8xf32>
    %61 = arith.truncf %60 : vector<2x8x8xf32> to vector<2x8x8xbf16>
    %62 = vector.extract_strided_slice %16 {offsets = [0, 0, 16], sizes = [2, 8, 8], strides = [1, 1, 1]} : vector<2x8x32xf32> to vector<2x8x8xf32>
    %63 = arith.truncf %62 : vector<2x8x8xf32> to vector<2x8x8xbf16>
    %64 = vector.extract_strided_slice %17 {offsets = [0, 0, 16], sizes = [2, 8, 8], strides = [1, 1, 1]} : vector<2x8x32xf32> to vector<2x8x8xf32>
    %65 = arith.truncf %64 : vector<2x8x8xf32> to vector<2x8x8xbf16>
    "tpu.trace_start"() <{level = 10 : i32, message = "bqd,bkd->bqk"}> : () -> ()
    %cst_18 = arith.constant dense<0.000000e+00> : vector<2x8x8xf32>
    %66 = tpu.matmul %61, %63, %cst_18 {dimension_numbers = #tpu.dot_dimension_numbers<[2], [2], [1], [1], [0, 0, 0, 1, 1, 1], [0], [0]>} : vector<2x8x8xbf16>, vector<2x8x8xbf16>, vector<2x8x8xf32> -> vector<2x8x8xf32>
    "tpu.trace_stop"() : () -> ()
    %cst_19 = arith.constant 0.353553385 : f32
    %67 = vector.broadcast %cst_19 : f32 to vector<2x8x8xf32>
    %68 = arith.mulf %66, %67 : vector<2x8x8xf32>
    %cst_20 = arith.constant dense<0xFF800000> : vector<2x8xf32>
    %69 = vector.multi_reduction <maximumf>, %68, %cst_20 [2] : vector<2x8x8xf32> to vector<2x8xf32>
    %70 = vector.shape_cast %69 : vector<2x8xf32> to vector<2x8x1xf32>
    %71 = vector.broadcast %70 : vector<2x8x1xf32> to vector<2x8x8xf32>
    %72 = arith.subf %68, %71 : vector<2x8x8xf32>
    %73 = math.exp %72 : vector<2x8x8xf32>
    %cst_21 = arith.constant dense<0.000000e+00> : vector<2x8xf32>
    %74 = vector.multi_reduction <add>, %73, %cst_21 [2] : vector<2x8x8xf32> to vector<2x8xf32>
    %75 = vector.shape_cast %74 : vector<2x8xf32> to vector<2x8x1xf32>
    %76 = tpu.reciprocal %75 {approx = true} : vector<2x8x1xf32> -> vector<2x8x1xf32>
    %77 = vector.broadcast %76 : vector<2x8x1xf32> to vector<2x8x8xf32>
    %78 = arith.mulf %73, %77 : vector<2x8x8xf32>
    %79 = arith.truncf %78 : vector<2x8x8xf32> to vector<2x8x8xbf16>
    "tpu.trace_start"() <{level = 10 : i32, message = "bqk,bkd->bqd"}> : () -> ()
    %cst_22 = arith.constant dense<0.000000e+00> : vector<2x8x8xf32>
    %80 = tpu.matmul %79, %65, %cst_22 {dimension_numbers = #tpu.dot_dimension_numbers<[2], [1], [1], [2], [0, 0, 0, 1, 1, 2], [0], [0]>} : vector<2x8x8xbf16>, vector<2x8x8xbf16>, vector<2x8x8xf32> -> vector<2x8x8xf32>
    "tpu.trace_stop"() : () -> ()
    %81 = vector.extract_strided_slice %15 {offsets = [0, 0, 24], sizes = [2, 8, 8], strides = [1, 1, 1]} : vector<2x8x32xf32> to vector<2x8x8xf32>
    %82 = arith.truncf %81 : vector<2x8x8xf32> to vector<2x8x8xbf16>
    %83 = vector.extract_strided_slice %16 {offsets = [0, 0, 24], sizes = [2, 8, 8], strides = [1, 1, 1]} : vector<2x8x32xf32> to vector<2x8x8xf32>
    %84 = arith.truncf %83 : vector<2x8x8xf32> to vector<2x8x8xbf16>
    %85 = vector.extract_strided_slice %17 {offsets = [0, 0, 24], sizes = [2, 8, 8], strides = [1, 1, 1]} : vector<2x8x32xf32> to vector<2x8x8xf32>
    %86 = arith.truncf %85 : vector<2x8x8xf32> to vector<2x8x8xbf16>
    "tpu.trace_start"() <{level = 10 : i32, message = "bqd,bkd->bqk"}> : () -> ()
    %cst_23 = arith.constant dense<0.000000e+00> : vector<2x8x8xf32>
    %87 = tpu.matmul %82, %84, %cst_23 {dimension_numbers = #tpu.dot_dimension_numbers<[2], [2], [1], [1], [0, 0, 0, 1, 1, 1], [0], [0]>} : vector<2x8x8xbf16>, vector<2x8x8xbf16>, vector<2x8x8xf32> -> vector<2x8x8xf32>
    "tpu.trace_stop"() : () -> ()
    %cst_24 = arith.constant 0.353553385 : f32
    %88 = vector.broadcast %cst_24 : f32 to vector<2x8x8xf32>
    %89 = arith.mulf %87, %88 : vector<2x8x8xf32>
    %cst_25 = arith.constant dense<0xFF800000> : vector<2x8xf32>
    %90 = vector.multi_reduction <maximumf>, %89, %cst_25 [2] : vector<2x8x8xf32> to vector<2x8xf32>
    %91 = vector.shape_cast %90 : vector<2x8xf32> to vector<2x8x1xf32>
    %92 = vector.broadcast %91 : vector<2x8x1xf32> to vector<2x8x8xf32>
    %93 = arith.subf %89, %92 : vector<2x8x8xf32>
    %94 = math.exp %93 : vector<2x8x8xf32>
    %cst_26 = arith.constant dense<0.000000e+00> : vector<2x8xf32>
    %95 = vector.multi_reduction <add>, %94, %cst_26 [2] : vector<2x8x8xf32> to vector<2x8xf32>
    %96 = vector.shape_cast %95 : vector<2x8xf32> to vector<2x8x1xf32>
    %97 = tpu.reciprocal %96 {approx = true} : vector<2x8x1xf32> -> vector<2x8x1xf32>
    %98 = vector.broadcast %97 : vector<2x8x1xf32> to vector<2x8x8xf32>
    %99 = arith.mulf %94, %98 : vector<2x8x8xf32>
    %100 = arith.truncf %99 : vector<2x8x8xf32> to vector<2x8x8xbf16>
    "tpu.trace_start"() <{level = 10 : i32, message = "bqk,bkd->bqd"}> : () -> ()
    %cst_27 = arith.constant dense<0.000000e+00> : vector<2x8x8xf32>
    %101 = tpu.matmul %100, %86, %cst_27 {dimension_numbers = #tpu.dot_dimension_numbers<[2], [1], [1], [2], [0, 0, 0, 1, 1, 2], [0], [0]>} : vector<2x8x8xbf16>, vector<2x8x8xbf16>, vector<2x8x8xf32> -> vector<2x8x8xf32>
    "tpu.trace_stop"() : () -> ()
    %102 = tpu.concatenate %38, %59, %80, %101 in 2 : vector<2x8x8xf32>, vector<2x8x8xf32>, vector<2x8x8xf32>, vector<2x8x8xf32> -> vector<2x8x32xf32>
    %103 = vector.shape_cast %102 : vector<2x8x32xf32> to vector<16x32xf32>
    %104 = arith.truncf %103 : vector<16x32xf32> to vector<16x32xbf16>
    %c0_28 = arith.constant 0 : index
    %c0_29 = arith.constant 0 : index
    %c0_30 = arith.constant 0 : index
    %105 = vector.load %arg6[%c0_28, %c0_29, %c0_30] : memref<1x32x32xbf16, #tpu.memory_space<vmem>>, vector<1x32x32xbf16>
    %106 = vector.shape_cast %105 : vector<1x32x32xbf16> to vector<32x32xbf16>
    %cst_31 = arith.constant dense<0.000000e+00> : vector<16x32xf32>
    %107 = tpu.matmul %104, %106, %cst_31 {dimension_numbers = #tpu.dot_dimension_numbers<[1], [0], [0], [1], [0, 0, 1, 1], [], []>} : vector<16x32xbf16>, vector<32x32xbf16>, vector<16x32xf32> -> vector<16x32xf32>
    %c0_32 = arith.constant 0 : index
    %c0_33 = arith.constant 0 : index
    %c0_34 = arith.constant 0 : index
    %108 = vector.load %arg7[%c0_32, %c0_33, %c0_34] : memref<1x1x32xf32, #tpu.memory_space<vmem>>, vector<1x1x32xf32>
    %109 = vector.shape_cast %108 : vector<1x1x32xf32> to vector<1x32xf32>
    %110 = vector.broadcast %109 : vector<1x32xf32> to vector<16x32xf32>
    %111 = arith.addf %107, %110 : vector<16x32xf32>
    %112 = arith.addf %111, %3 : vector<16x32xf32>
    %c0_35 = arith.constant 0 : index
    %c0_36 = arith.constant 0 : index
    %c0_37 = arith.constant 0 : index
    %113 = vector.load %arg8[%c0_35, %c0_36, %c0_37] : memref<1x1x32xf32, #tpu.memory_space<vmem>>, vector<1x1x32xf32>
    %114 = vector.shape_cast %113 : vector<1x1x32xf32> to vector<1x32xf32>
    %c0_38 = arith.constant 0 : index
    %c0_39 = arith.constant 0 : index
    %c0_40 = arith.constant 0 : index
    %115 = vector.load %arg9[%c0_38, %c0_39, %c0_40] : memref<1x1x32xf32, #tpu.memory_space<vmem>>, vector<1x1x32xf32>
    %116 = vector.shape_cast %115 : vector<1x1x32xf32> to vector<1x32xf32>
    %cst_41 = arith.constant dense<0.000000e+00> : vector<16xf32>
    %117 = vector.multi_reduction <add>, %112, %cst_41 [1] : vector<16x32xf32> to vector<16xf32>
    %118 = vector.shape_cast %117 : vector<16xf32> to vector<16x1xf32>
    %cst_42 = arith.constant 3.200000e+01 : f32
    %119 = vector.broadcast %cst_42 : f32 to vector<16x1xf32>
    %120 = arith.divf %118, %119 : vector<16x1xf32>
    %121 = vector.broadcast %120 : vector<16x1xf32> to vector<16x32xf32>
    %122 = arith.subf %112, %121 : vector<16x32xf32>
    %123 = arith.mulf %122, %122 : vector<16x32xf32>
    %cst_43 = arith.constant dense<0.000000e+00> : vector<16xf32>
    %124 = vector.multi_reduction <add>, %123, %cst_43 [1] : vector<16x32xf32> to vector<16xf32>
    %125 = vector.shape_cast %124 : vector<16xf32> to vector<16x1xf32>
    %cst_44 = arith.constant 3.200000e+01 : f32
    %126 = vector.broadcast %cst_44 : f32 to vector<16x1xf32>
    %127 = arith.divf %125, %126 : vector<16x1xf32>
    %128 = vector.broadcast %120 : vector<16x1xf32> to vector<16x32xf32>
    %129 = arith.subf %112, %128 : vector<16x32xf32>
    %cst_45 = arith.constant 9.99999974E-6 : f32
    %130 = vector.broadcast %cst_45 : f32 to vector<16x1xf32>
    %131 = arith.addf %127, %130 : vector<16x1xf32>
    %132 = math.rsqrt %131 : vector<16x1xf32>
    %133 = vector.broadcast %132 : vector<16x1xf32> to vector<16x32xf32>
    %134 = arith.mulf %129, %133 : vector<16x32xf32>
    %135 = vector.broadcast %114 : vector<1x32xf32> to vector<16x32xf32>
    %136 = arith.mulf %134, %135 : vector<16x32xf32>
    %137 = vector.broadcast %116 : vector<1x32xf32> to vector<16x32xf32>
    %138 = arith.addf %136, %137 : vector<16x32xf32>
    %139 = arith.truncf %138 : vector<16x32xf32> to vector<16x32xbf16>
    %cst_46 = arith.constant 0.000000e+00 : f32
    %140 = vector.broadcast %cst_46 : f32 to vector<16x32xf32>
    %c0_47 = arith.constant 0 : index
    %c0_48 = arith.constant 0 : index
    %c0_49 = arith.constant 0 : index
    %141 = vector.load %arg10[%c0_47, %c0_48, %c0_49] : memref<1x32x2048xbf16, #tpu.memory_space<vmem>>, vector<1x32x512xbf16>
    %142 = vector.shape_cast %141 : vector<1x32x512xbf16> to vector<32x512xbf16>
    %cst_50 = arith.constant dense<0.000000e+00> : vector<16x512xf32>
    %143 = tpu.matmul %139, %142, %cst_50 {dimension_numbers = #tpu.dot_dimension_numbers<[1], [0], [0], [1], [0, 0, 1, 1], [], []>} : vector<16x32xbf16>, vector<32x512xbf16>, vector<16x512xf32> -> vector<16x512xf32>
    %c0_51 = arith.constant 0 : index
    %c0_52 = arith.constant 0 : index
    %c0_53 = arith.constant 0 : index
    %144 = vector.load %arg11[%c0_51, %c0_52, %c0_53] : memref<1x1x2048xf32, #tpu.memory_space<vmem>>, vector<1x1x512xf32>
    %145 = vector.shape_cast %144 : vector<1x1x512xf32> to vector<1x512xf32>
    %146 = vector.broadcast %145 : vector<1x512xf32> to vector<16x512xf32>
    %147 = arith.addf %143, %146 : vector<16x512xf32>
    %cst_54 = arith.constant 0.000000e+00 : f32
    %148 = vector.broadcast %cst_54 : f32 to vector<16x512xf32>
    %149 = arith.maximumf %147, %148 : vector<16x512xf32>
    %150 = arith.truncf %149 : vector<16x512xf32> to vector<16x512xbf16>
    %c0_55 = arith.constant 0 : index
    %c0_56 = arith.constant 0 : index
    %c0_57 = arith.constant 0 : index
    %151 = vector.load %arg12[%c0_55, %c0_56, %c0_57] : memref<1x2048x32xbf16, #tpu.memory_space<vmem>>, vector<1x512x32xbf16>
    %152 = vector.shape_cast %151 : vector<1x512x32xbf16> to vector<512x32xbf16>
    %cst_58 = arith.constant dense<0.000000e+00> : vector<16x32xf32>
    %153 = tpu.matmul %150, %152, %cst_58 {dimension_numbers = #tpu.dot_dimension_numbers<[1], [0], [0], [1], [0, 0, 1, 1], [], []>} : vector<16x512xbf16>, vector<512x32xbf16>, vector<16x32xf32> -> vector<16x32xf32>
    %154 = arith.addf %140, %153 : vector<16x32xf32>
    %c0_59 = arith.constant 0 : index
    %c0_60 = arith.constant 0 : index
    %c512 = arith.constant 512 : index
    %155 = vector.load %arg10[%c0_59, %c0_60, %c512] : memref<1x32x2048xbf16, #tpu.memory_space<vmem>>, vector<1x32x512xbf16>
    %156 = vector.shape_cast %155 : vector<1x32x512xbf16> to vector<32x512xbf16>
    %cst_61 = arith.constant dense<0.000000e+00> : vector<16x512xf32>
    %157 = tpu.matmul %139, %156, %cst_61 {dimension_numbers = #tpu.dot_dimension_numbers<[1], [0], [0], [1], [0, 0, 1, 1], [], []>} : vector<16x32xbf16>, vector<32x512xbf16>, vector<16x512xf32> -> vector<16x512xf32>
    %c0_62 = arith.constant 0 : index
    %c0_63 = arith.constant 0 : index
    %c512_64 = arith.constant 512 : index
    %158 = vector.load %arg11[%c0_62, %c0_63, %c512_64] : memref<1x1x2048xf32, #tpu.memory_space<vmem>>, vector<1x1x512xf32>
    %159 = vector.shape_cast %158 : vector<1x1x512xf32> to vector<1x512xf32>
    %160 = vector.broadcast %159 : vector<1x512xf32> to vector<16x512xf32>
    %161 = arith.addf %157, %160 : vector<16x512xf32>
    %cst_65 = arith.constant 0.000000e+00 : f32
    %162 = vector.broadcast %cst_65 : f32 to vector<16x512xf32>
    %163 = arith.maximumf %161, %162 : vector<16x512xf32>
    %164 = arith.truncf %163 : vector<16x512xf32> to vector<16x512xbf16>
    %c0_66 = arith.constant 0 : index
    %c512_67 = arith.constant 512 : index
    %c0_68 = arith.constant 0 : index
    %165 = vector.load %arg12[%c0_66, %c512_67, %c0_68] : memref<1x2048x32xbf16, #tpu.memory_space<vmem>>, vector<1x512x32xbf16>
    %166 = vector.shape_cast %165 : vector<1x512x32xbf16> to vector<512x32xbf16>
    %cst_69 = arith.constant dense<0.000000e+00> : vector<16x32xf32>
    %167 = tpu.matmul %164, %166, %cst_69 {dimension_numbers = #tpu.dot_dimension_numbers<[1], [0], [0], [1], [0, 0, 1, 1], [], []>} : vector<16x512xbf16>, vector<512x32xbf16>, vector<16x32xf32> -> vector<16x32xf32>
    %168 = arith.addf %154, %167 : vector<16x32xf32>
    %c0_70 = arith.constant 0 : index
    %c0_71 = arith.constant 0 : index
    %c1024 = arith.constant 1024 : index
    %169 = vector.load %arg10[%c0_70, %c0_71, %c1024] : memref<1x32x2048xbf16, #tpu.memory_space<vmem>>, vector<1x32x512xbf16>
    %170 = vector.shape_cast %169 : vector<1x32x512xbf16> to vector<32x512xbf16>
    %cst_72 = arith.constant dense<0.000000e+00> : vector<16x512xf32>
    %171 = tpu.matmul %139, %170, %cst_72 {dimension_numbers = #tpu.dot_dimension_numbers<[1], [0], [0], [1], [0, 0, 1, 1], [], []>} : vector<16x32xbf16>, vector<32x512xbf16>, vector<16x512xf32> -> vector<16x512xf32>
    %c0_73 = arith.constant 0 : index
    %c0_74 = arith.constant 0 : index
    %c1024_75 = arith.constant 1024 : index
    %172 = vector.load %arg11[%c0_73, %c0_74, %c1024_75] : memref<1x1x2048xf32, #tpu.memory_space<vmem>>, vector<1x1x512xf32>
    %173 = vector.shape_cast %172 : vector<1x1x512xf32> to vector<1x512xf32>
    %174 = vector.broadcast %173 : vector<1x512xf32> to vector<16x512xf32>
    %175 = arith.addf %171, %174 : vector<16x512xf32>
    %cst_76 = arith.constant 0.000000e+00 : f32
    %176 = vector.broadcast %cst_76 : f32 to vector<16x512xf32>
    %177 = arith.maximumf %175, %176 : vector<16x512xf32>
    %178 = arith.truncf %177 : vector<16x512xf32> to vector<16x512xbf16>
    %c0_77 = arith.constant 0 : index
    %c1024_78 = arith.constant 1024 : index
    %c0_79 = arith.constant 0 : index
    %179 = vector.load %arg12[%c0_77, %c1024_78, %c0_79] : memref<1x2048x32xbf16, #tpu.memory_space<vmem>>, vector<1x512x32xbf16>
    %180 = vector.shape_cast %179 : vector<1x512x32xbf16> to vector<512x32xbf16>
    %cst_80 = arith.constant dense<0.000000e+00> : vector<16x32xf32>
    %181 = tpu.matmul %178, %180, %cst_80 {dimension_numbers = #tpu.dot_dimension_numbers<[1], [0], [0], [1], [0, 0, 1, 1], [], []>} : vector<16x512xbf16>, vector<512x32xbf16>, vector<16x32xf32> -> vector<16x32xf32>
    %182 = arith.addf %168, %181 : vector<16x32xf32>
    %c0_81 = arith.constant 0 : index
    %c0_82 = arith.constant 0 : index
    %c1536 = arith.constant 1536 : index
    %183 = vector.load %arg10[%c0_81, %c0_82, %c1536] : memref<1x32x2048xbf16, #tpu.memory_space<vmem>>, vector<1x32x512xbf16>
    %184 = vector.shape_cast %183 : vector<1x32x512xbf16> to vector<32x512xbf16>
    %cst_83 = arith.constant dense<0.000000e+00> : vector<16x512xf32>
    %185 = tpu.matmul %139, %184, %cst_83 {dimension_numbers = #tpu.dot_dimension_numbers<[1], [0], [0], [1], [0, 0, 1, 1], [], []>} : vector<16x32xbf16>, vector<32x512xbf16>, vector<16x512xf32> -> vector<16x512xf32>
    %c0_84 = arith.constant 0 : index
    %c0_85 = arith.constant 0 : index
    %c1536_86 = arith.constant 1536 : index
    %186 = vector.load %arg11[%c0_84, %c0_85, %c1536_86] : memref<1x1x2048xf32, #tpu.memory_space<vmem>>, vector<1x1x512xf32>
    %187 = vector.shape_cast %186 : vector<1x1x512xf32> to vector<1x512xf32>
    %188 = vector.broadcast %187 : vector<1x512xf32> to vector<16x512xf32>
    %189 = arith.addf %185, %188 : vector<16x512xf32>
    %cst_87 = arith.constant 0.000000e+00 : f32
    %190 = vector.broadcast %cst_87 : f32 to vector<16x512xf32>
    %191 = arith.maximumf %189, %190 : vector<16x512xf32>
    %192 = arith.truncf %191 : vector<16x512xf32> to vector<16x512xbf16>
    %c0_88 = arith.constant 0 : index
    %c1536_89 = arith.constant 1536 : index
    %c0_90 = arith.constant 0 : index
    %193 = vector.load %arg12[%c0_88, %c1536_89, %c0_90] : memref<1x2048x32xbf16, #tpu.memory_space<vmem>>, vector<1x512x32xbf16>
    %194 = vector.shape_cast %193 : vector<1x512x32xbf16> to vector<512x32xbf16>
    %cst_91 = arith.constant dense<0.000000e+00> : vector<16x32xf32>
    %195 = tpu.matmul %192, %194, %cst_91 {dimension_numbers = #tpu.dot_dimension_numbers<[1], [0], [0], [1], [0, 0, 1, 1], [], []>} : vector<16x512xbf16>, vector<512x32xbf16>, vector<16x32xf32> -> vector<16x32xf32>
    %196 = arith.addf %182, %195 : vector<16x32xf32>
    %c0_92 = arith.constant 0 : index
    %c0_93 = arith.constant 0 : index
    %c0_94 = arith.constant 0 : index
    %197 = vector.load %arg13[%c0_92, %c0_93, %c0_94] : memref<1x1x32xf32, #tpu.memory_space<vmem>>, vector<1x1x32xf32>
    %198 = vector.shape_cast %197 : vector<1x1x32xf32> to vector<1x32xf32>
    %199 = vector.broadcast %198 : vector<1x32xf32> to vector<16x32xf32>
    %200 = arith.addf %196, %199 : vector<16x32xf32>
    %201 = arith.addf %200, %138 : vector<16x32xf32>
    %c0_95 = arith.constant 0 : index
    %c0_96 = arith.constant 0 : index
    %c0_97 = arith.constant 0 : index
    %202 = vector.load %arg14[%c0_95, %c0_96, %c0_97] : memref<1x1x32xf32, #tpu.memory_space<vmem>>, vector<1x1x32xf32>
    %203 = vector.shape_cast %202 : vector<1x1x32xf32> to vector<1x32xf32>
    %c0_98 = arith.constant 0 : index
    %c0_99 = arith.constant 0 : index
    %c0_100 = arith.constant 0 : index
    %204 = vector.load %arg15[%c0_98, %c0_99, %c0_100] : memref<1x1x32xf32, #tpu.memory_space<vmem>>, vector<1x1x32xf32>
    %205 = vector.shape_cast %204 : vector<1x1x32xf32> to vector<1x32xf32>
    %cst_101 = arith.constant dense<0.000000e+00> : vector<16xf32>
    %206 = vector.multi_reduction <add>, %201, %cst_101 [1] : vector<16x32xf32> to vector<16xf32>
    %207 = vector.shape_cast %206 : vector<16xf32> to vector<16x1xf32>
    %cst_102 = arith.constant 3.200000e+01 : f32
    %208 = vector.broadcast %cst_102 : f32 to vector<16x1xf32>
    %209 = arith.divf %207, %208 : vector<16x1xf32>
    %210 = vector.broadcast %209 : vector<16x1xf32> to vector<16x32xf32>
    %211 = arith.subf %201, %210 : vector<16x32xf32>
    %212 = arith.mulf %211, %211 : vector<16x32xf32>
    %cst_103 = arith.constant dense<0.000000e+00> : vector<16xf32>
    %213 = vector.multi_reduction <add>, %212, %cst_103 [1] : vector<16x32xf32> to vector<16xf32>
    %214 = vector.shape_cast %213 : vector<16xf32> to vector<16x1xf32>
    %cst_104 = arith.constant 3.200000e+01 : f32
    %215 = vector.broadcast %cst_104 : f32 to vector<16x1xf32>
    %216 = arith.divf %214, %215 : vector<16x1xf32>
    %217 = vector.broadcast %209 : vector<16x1xf32> to vector<16x32xf32>
    %218 = arith.subf %201, %217 : vector<16x32xf32>
    %cst_105 = arith.constant 9.99999974E-6 : f32
    %219 = vector.broadcast %cst_105 : f32 to vector<16x1xf32>
    %220 = arith.addf %216, %219 : vector<16x1xf32>
    %221 = math.rsqrt %220 : vector<16x1xf32>
    %222 = vector.broadcast %221 : vector<16x1xf32> to vector<16x32xf32>
    %223 = arith.mulf %218, %222 : vector<16x32xf32>
    %224 = vector.broadcast %203 : vector<1x32xf32> to vector<16x32xf32>
    %225 = arith.mulf %223, %224 : vector<16x32xf32>
    %226 = vector.broadcast %205 : vector<1x32xf32> to vector<16x32xf32>
    %227 = arith.addf %225, %226 : vector<16x32xf32>
    %c0_106 = arith.constant 0 : index
    %c0_107 = arith.constant 0 : index
    %228 = vector.load %arg19[%c0_106, %c0_107] : memref<16x32xf32, #tpu.memory_space<vmem>>, vector<16x32xf32>
    tpu.vector_store %arg19[%c0_106, %c0_107], %227 {strides = array<i32>} : memref<16x32xf32, #tpu.memory_space<vmem>>, vector<16x32xf32>,
    %c1_i32 = arith.constant 1 : i32
    %229 = arith.cmpi eq, %arg0, %c1_i32 : i32
    %230 = arith.extui %229 : i1 to i32
    %c0_i32_108 = arith.constant 0 : i32
    %231 = arith.cmpi ne, %230, %c0_i32_108 : i32
    scf.if %231 {
      %c0_109 = arith.constant 0 : index
      %c0_110 = arith.constant 0 : index
      %232 = vector.load %arg16[%c0_109, %c0_110] : memref<1x32xf32, #tpu.memory_space<vmem>>, vector<1x32xf32>
      %c0_111 = arith.constant 0 : index
      %c0_112 = arith.constant 0 : index
      %233 = vector.load %arg17[%c0_111, %c0_112] : memref<1x32xf32, #tpu.memory_space<vmem>>, vector<1x32xf32>
      %cst_113 = arith.constant dense<0.000000e+00> : vector<16xf32>
      %234 = vector.multi_reduction <add>, %227, %cst_113 [1] : vector<16x32xf32> to vector<16xf32>
      %235 = vector.shape_cast %234 : vector<16xf32> to vector<16x1xf32>
      %cst_114 = arith.constant 3.200000e+01 : f32
      %236 = vector.broadcast %cst_114 : f32 to vector<16x1xf32>
      %237 = arith.divf %235, %236 : vector<16x1xf32>
      %238 = vector.broadcast %237 : vector<16x1xf32> to vector<16x32xf32>
      %239 = arith.subf %227, %238 : vector<16x32xf32>
      %240 = arith.mulf %239, %239 : vector<16x32xf32>
      %cst_115 = arith.constant dense<0.000000e+00> : vector<16xf32>
      %241 = vector.multi_reduction <add>, %240, %cst_115 [1] : vector<16x32xf32> to vector<16xf32>
      %242 = vector.shape_cast %241 : vector<16xf32> to vector<16x1xf32>
      %cst_116 = arith.constant 3.200000e+01 : f32
      %243 = vector.broadcast %cst_116 : f32 to vector<16x1xf32>
      %244 = arith.divf %242, %243 : vector<16x1xf32>
      %245 = vector.broadcast %237 : vector<16x1xf32> to vector<16x32xf32>
      %246 = arith.subf %227, %245 : vector<16x32xf32>
      %cst_117 = arith.constant 9.99999974E-6 : f32
      %247 = vector.broadcast %cst_117 : f32 to vector<16x1xf32>
      %248 = arith.addf %244, %247 : vector<16x1xf32>
      %249 = math.rsqrt %248 : vector<16x1xf32>
      %250 = vector.broadcast %249 : vector<16x1xf32> to vector<16x32xf32>
      %251 = arith.mulf %246, %250 : vector<16x32xf32>
      %252 = vector.broadcast %232 : vector<1x32xf32> to vector<16x32xf32>
      %253 = arith.mulf %251, %252 : vector<16x32xf32>
      %254 = vector.broadcast %233 : vector<1x32xf32> to vector<16x32xf32>
      %255 = arith.addf %253, %254 : vector<16x32xf32>
      %c0_118 = arith.constant 0 : index
      %c0_119 = arith.constant 0 : index
      %256 = vector.load %arg18[%c0_118, %c0_119] : memref<16x32xf32, #tpu.memory_space<vmem>>, vector<16x32xf32>
      tpu.vector_store %arg18[%c0_118, %c0_119], %255 {strides = array<i32>} : memref<16x32xf32, #tpu.memory_space<vmem>>, vector<16x32xf32>,
    } else {
    }
    return
  }
  func.func @transform_0(%arg0: i32) -> (i32, i32, i32) {
    %c0_i32 = arith.constant 0 : i32
    %c0_i32_0 = arith.constant 0 : i32
    %c0_i32_1 = arith.constant 0 : i32
    %c0_i32_2 = arith.constant 0 : i32
    return %c0_i32, %c0_i32_0, %c0_i32_1 : i32, i32, i32
  }
  func.func @transform_1(%arg0: i32) -> (i32, i32) {
    %c0_i32 = arith.constant 0 : i32
    %c0_i32_0 = arith.constant 0 : i32
    %c0_i32_1 = arith.constant 0 : i32
    return %c0_i32, %c0_i32_0 : i32, i32
  }
  func.func @transform_2(%arg0: i32) -> (i32, i32) {
    %c0_i32 = arith.constant 0 : i32
    %c0_i32_0 = arith.constant 0 : i32
    %c0_i32_1 = arith.constant 0 : i32
    return %c0_i32, %c0_i32_0 : i32, i32
  }
  func.func @transform_3(%arg0: i32) -> (i32, i32, i32) {
    %c0_i32 = arith.constant 0 : i32
    %c0_i32_0 = arith.constant 0 : i32
    %c0_i32_1 = arith.constant 0 : i32
    return %arg0, %c0_i32, %c0_i32_0 : i32, i32, i32
  }
  func.func @transform_4(%arg0: i32) -> (i32, i32, i32) {
    %c0_i32 = arith.constant 0 : i32
    %c0_i32_0 = arith.constant 0 : i32
    %c0_i32_1 = arith.constant 0 : i32
    return %arg0, %c0_i32, %c0_i32_0 : i32, i32, i32
  }
  func.func @transform_5(%arg0: i32) -> (i32, i32, i32) {
    %c0_i32 = arith.constant 0 : i32
    %c0_i32_0 = arith.constant 0 : i32
    %c0_i32_1 = arith.constant 0 : i32
    return %arg0, %c0_i32, %c0_i32_0 : i32, i32, i32
  }
  func.func @transform_6(%arg0: i32) -> (i32, i32, i32) {
    %c0_i32 = arith.constant 0 : i32
    %c0_i32_0 = arith.constant 0 : i32
    %c0_i32_1 = arith.constant 0 : i32
    return %arg0, %c0_i32, %c0_i32_0 : i32, i32, i32
  }
  func.func @transform_7(%arg0: i32) -> (i32, i32, i32) {
    %c0_i32 = arith.constant 0 : i32
    %c0_i32_0 = arith.constant 0 : i32
    %c0_i32_1 = arith.constant 0 : i32
    return %arg0, %c0_i32, %c0_i32_0 : i32, i32, i32
  }
  func.func @transform_8(%arg0: i32) -> (i32, i32, i32) {
    %c0_i32 = arith.constant 0 : i32
    %c0_i32_0 = arith.constant 0 : i32
    %c0_i32_1 = arith.constant 0 : i32
    return %arg0, %c0_i32, %c0_i32_0 : i32, i32, i32
  }
  func.func @transform_9(%arg0: i32) -> (i32, i32, i32) {
    %c0_i32 = arith.constant 0 : i32
    %c0_i32_0 = arith.constant 0 : i32
    %c0_i32_1 = arith.constant 0 : i32
    return %arg0, %c0_i32, %c0_i32_0 : i32, i32, i32
  }
  func.func @transform_10(%arg0: i32) -> (i32, i32, i32) {
    %c0_i32 = arith.constant 0 : i32
    %c0_i32_0 = arith.constant 0 : i32
    %c0_i32_1 = arith.constant 0 : i32
    return %arg0, %c0_i32, %c0_i32_0 : i32, i32, i32
  }
  func.func @transform_11(%arg0: i32) -> (i32, i32, i32) {
    %c0_i32 = arith.constant 0 : i32
    %c0_i32_0 = arith.constant 0 : i32
    %c0_i32_1 = arith.constant 0 : i32
    return %arg0, %c0_i32, %c0_i32_0 : i32, i32, i32
  }
  func.func @transform_12(%arg0: i32) -> (i32, i32, i32) {
    %c0_i32 = arith.constant 0 : i32
    %c0_i32_0 = arith.constant 0 : i32
    %c0_i32_1 = arith.constant 0 : i32
    return %arg0, %c0_i32, %c0_i32_0 : i32, i32, i32
  }
  func.func @transform_13(%arg0: i32) -> (i32, i32, i32) {
    %c0_i32 = arith.constant 0 : i32
    %c0_i32_0 = arith.constant 0 : i32
    %c0_i32_1 = arith.constant 0 : i32
    return %arg0, %c0_i32, %c0_i32_0 : i32, i32, i32
  }
  func.func @transform_14(%arg0: i32) -> (i32, i32, i32) {
    %c0_i32 = arith.constant 0 : i32
    %c0_i32_0 = arith.constant 0 : i32
    %c0_i32_1 = arith.constant 0 : i32
    return %arg0, %c0_i32, %c0_i32_0 : i32, i32, i32
  }
  func.func @transform_15(%arg0: i32) -> (i32, i32) {
    %c0_i32 = arith.constant 0 : i32
    %c0_i32_0 = arith.constant 0 : i32
    %c0_i32_1 = arith.constant 0 : i32
    return %c0_i32, %c0_i32_0 : i32, i32
  }
  func.func @transform_16(%arg0: i32) -> (i32, i32) {
    %c0_i32 = arith.constant 0 : i32
    %c0_i32_0 = arith.constant 0 : i32
    %c0_i32_1 = arith.constant 0 : i32
    return %c0_i32, %c0_i32_0 : i32, i32
  }
  func.func @transform_17(%arg0: i32) -> (i32, i32) {
    %c0_i32 = arith.constant 0 : i32
    %c0_i32_0 = arith.constant 0 : i32
    %c0_i32_1 = arith.constant 0 : i32
    return %c0_i32, %c0_i32_0 : i32, i32
  }
}

module attributes {stable_mosaic.version = 11 : i64} {
  func.func @_decoder_stack_kernel(%arg0: i32, %arg1: memref<2x8x16xf32, #tpu.memory_space<vmem>>, %arg2: memref<16x32xbf16, #tpu.memory_space<vmem>>, %arg3: memref<1x32xf32, #tpu.memory_space<vmem>>, %arg4: memref<16x32xf32, #tpu.memory_space<vmem>>, %arg5: memref<1x32x96xbf16, #tpu.memory_space<vmem>>, %arg6: memref<1x1x96xf32, #tpu.memory_space<vmem>>, %arg7: memref<1x32x32xbf16, #tpu.memory_space<vmem>>, %arg8: memref<1x1x32xf32, #tpu.memory_space<vmem>>, %arg9: memref<1x1x32xf32, #tpu.memory_space<vmem>>, %arg10: memref<1x1x32xf32, #tpu.memory_space<vmem>>, %arg11: memref<1x32x32xbf16, #tpu.memory_space<vmem>>, %arg12: memref<1x1x32xf32, #tpu.memory_space<vmem>>, %arg13: memref<1x32x64xbf16, #tpu.memory_space<vmem>>, %arg14: memref<1x1x64xf32, #tpu.memory_space<vmem>>, %arg15: memref<1x32x32xbf16, #tpu.memory_space<vmem>>, %arg16: memref<1x1x32xf32, #tpu.memory_space<vmem>>, %arg17: memref<1x1x32xf32, #tpu.memory_space<vmem>>, %arg18: memref<1x1x32xf32, #tpu.memory_space<vmem>>, %arg19: memref<1x32x2048xbf16, #tpu.memory_space<vmem>>, %arg20: memref<1x1x2048xf32, #tpu.memory_space<vmem>>, %arg21: memref<1x2048x32xbf16, #tpu.memory_space<vmem>>, %arg22: memref<1x1x32xf32, #tpu.memory_space<vmem>>, %arg23: memref<1x1x32xf32, #tpu.memory_space<vmem>>, %arg24: memref<1x1x32xf32, #tpu.memory_space<vmem>>, %arg25: memref<1x32xf32, #tpu.memory_space<vmem>>, %arg26: memref<1x32xf32, #tpu.memory_space<vmem>>, %arg27: memref<32x10xbf16, #tpu.memory_space<vmem>>, %arg28: memref<1x10xf32, #tpu.memory_space<vmem>>, %arg29: memref<2x10xf32, #tpu.memory_space<vmem>>, %arg30: memref<16x32xf32, #tpu.memory_space<vmem>>) attributes {dimension_semantics = [#tpu.dimension_semantics<arbitrary>], iteration_bounds = array<i64: 2>, scalar_prefetch = 0 : i64, scratch_operands = 1 : i64, tpu.core_type = #tpu.core_type<tc>, window_params = [{pipeline_mode = #tpu.pipeline_mode<synchronous>, transform_indices = @transform_0, window_bounds = array<i64: 2, 8, 16>}, {pipeline_mode = #tpu.pipeline_mode<synchronous>, transform_indices = @transform_1, window_bounds = array<i64: 16, 32>}, {pipeline_mode = #tpu.pipeline_mode<synchronous>, transform_indices = @transform_2, window_bounds = array<i64: 1, 32>}, {pipeline_mode = #tpu.pipeline_mode<synchronous>, transform_indices = @transform_3, window_bounds = array<i64: 16, 32>}, {transform_indices = @transform_4, window_bounds = array<i64: 1, 32, 96>}, {transform_indices = @transform_5, window_bounds = array<i64: 1, 1, 96>}, {transform_indices = @transform_6, window_bounds = array<i64: 1, 32, 32>}, {transform_indices = @transform_7, window_bounds = array<i64: 1, 1, 32>}, {transform_indices = @transform_8, window_bounds = array<i64: 1, 1, 32>}, {transform_indices = @transform_9, window_bounds = array<i64: 1, 1, 32>}, {transform_indices = @transform_10, window_bounds = array<i64: 1, 32, 32>}, {transform_indices = @transform_11, window_bounds = array<i64: 1, 1, 32>}, {transform_indices = @transform_12, window_bounds = array<i64: 1, 32, 64>}, {transform_indices = @transform_13, window_bounds = array<i64: 1, 1, 64>}, {transform_indices = @transform_14, window_bounds = array<i64: 1, 32, 32>}, {transform_indices = @transform_15, window_bounds = array<i64: 1, 1, 32>}, {transform_indices = @transform_16, window_bounds = array<i64: 1, 1, 32>}, {transform_indices = @transform_17, window_bounds = array<i64: 1, 1, 32>}, {transform_indices = @transform_18, window_bounds = array<i64: 1, 32, 2048>}, {transform_indices = @transform_19, window_bounds = array<i64: 1, 1, 2048>}, {transform_indices = @transform_20, window_bounds = array<i64: 1, 2048, 32>}, {transform_indices = @transform_21, window_bounds = array<i64: 1, 1, 32>}, {transform_indices = @transform_22, window_bounds = array<i64: 1, 1, 32>}, {transform_indices = @transform_23, window_bounds = array<i64: 1, 1, 32>}, {pipeline_mode = #tpu.pipeline_mode<synchronous>, transform_indices = @transform_24, window_bounds = array<i64: 1, 32>}, {pipeline_mode = #tpu.pipeline_mode<synchronous>, transform_indices = @transform_25, window_bounds = array<i64: 1, 32>}, {pipeline_mode = #tpu.pipeline_mode<synchronous>, transform_indices = @transform_26, window_bounds = array<i64: 32, 10>}, {pipeline_mode = #tpu.pipeline_mode<synchronous>, transform_indices = @transform_27, window_bounds = array<i64: 1, 10>}, {pipeline_mode = #tpu.pipeline_mode<synchronous>, transform_indices = @transform_28, window_bounds = array<i64: 2, 10>}]} {
    %c0_i32 = arith.constant 0 : i32
    %0 = arith.cmpi eq, %arg0, %c0_i32 : i32
    %1 = arith.extui %0 : i1 to i32
    %c0_i32_0 = arith.constant 0 : i32
    %2 = arith.cmpi ne, %1, %c0_i32_0 : i32
    scf.if %2 {
      %c0_163 = arith.constant 0 : index
      %c0_164 = arith.constant 0 : index
      %c0_165 = arith.constant 0 : index
      %375 = vector.load %arg1[%c0_163, %c0_164, %c0_165] : memref<2x8x16xf32, #tpu.memory_space<vmem>>, vector<2x8x16xf32>
      %376 = vector.shape_cast %375 : vector<2x8x16xf32> to vector<16x16xf32>
      %377 = arith.truncf %376 : vector<16x16xf32> to vector<16x16xbf16>
      %c0_166 = arith.constant 0 : index
      %c0_167 = arith.constant 0 : index
      %378 = vector.load %arg2[%c0_166, %c0_167] : memref<16x32xbf16, #tpu.memory_space<vmem>>, vector<16x32xbf16>
      %cst_168 = arith.constant dense<0.000000e+00> : vector<16x32xf32>
      %379 = tpu.matmul %377, %378, %cst_168 {dimension_numbers = #tpu.dot_dimension_numbers<[1], [0], [0], [1], [0, 0, 1, 1], [], []>} : vector<16x16xbf16>, vector<16x32xbf16>, vector<16x32xf32> -> vector<16x32xf32>
      %c0_169 = arith.constant 0 : index
      %c0_170 = arith.constant 0 : index
      %380 = vector.load %arg3[%c0_169, %c0_170] : memref<1x32xf32, #tpu.memory_space<vmem>>, vector<1x32xf32>
      %381 = vector.broadcast %380 : vector<1x32xf32> to vector<16x32xf32>
      %382 = arith.addf %379, %381 : vector<16x32xf32>
      %c0_171 = arith.constant 0 : index
      %c0_172 = arith.constant 0 : index
      %383 = vector.load %arg30[%c0_171, %c0_172] : memref<16x32xf32, #tpu.memory_space<vmem>>, vector<16x32xf32>
      tpu.vector_store %arg30[%c0_171, %c0_172], %382 {strides = array<i32>} : memref<16x32xf32, #tpu.memory_space<vmem>>, vector<16x32xf32>,
    } else {
    }
    %c0 = arith.constant 0 : index
    %c0_1 = arith.constant 0 : index
    %3 = vector.load %arg30[%c0, %c0_1] : memref<16x32xf32, #tpu.memory_space<vmem>>, vector<16x32xf32>
    %c0_2 = arith.constant 0 : index
    %c0_3 = arith.constant 0 : index
    %4 = vector.load %arg4[%c0_2, %c0_3] : memref<16x32xf32, #tpu.memory_space<vmem>>, vector<16x32xf32>
    %5 = arith.truncf %3 : vector<16x32xf32> to vector<16x32xbf16>
    %c0_4 = arith.constant 0 : index
    %c0_5 = arith.constant 0 : index
    %c0_6 = arith.constant 0 : index
    %6 = vector.load %arg5[%c0_4, %c0_5, %c0_6] : memref<1x32x96xbf16, #tpu.memory_space<vmem>>, vector<1x32x96xbf16>
    %7 = vector.shape_cast %6 : vector<1x32x96xbf16> to vector<32x96xbf16>
    %cst = arith.constant dense<0.000000e+00> : vector<16x96xf32>
    %8 = tpu.matmul %5, %7, %cst {dimension_numbers = #tpu.dot_dimension_numbers<[1], [0], [0], [1], [0, 0, 1, 1], [], []>} : vector<16x32xbf16>, vector<32x96xbf16>, vector<16x96xf32> -> vector<16x96xf32>
    %c0_7 = arith.constant 0 : index
    %c0_8 = arith.constant 0 : index
    %c0_9 = arith.constant 0 : index
    %9 = vector.load %arg6[%c0_7, %c0_8, %c0_9] : memref<1x1x96xf32, #tpu.memory_space<vmem>>, vector<1x1x96xf32>
    %10 = vector.shape_cast %9 : vector<1x1x96xf32> to vector<1x96xf32>
    %11 = vector.broadcast %10 : vector<1x96xf32> to vector<16x96xf32>
    %12 = arith.addf %8, %11 : vector<16x96xf32>
    %13 = vector.extract_strided_slice %12 {offsets = [0, 0], sizes = [16, 32], strides = [1, 1]} : vector<16x96xf32> to vector<16x32xf32>
    %14 = vector.extract_strided_slice %12 {offsets = [0, 32], sizes = [16, 32], strides = [1, 1]} : vector<16x96xf32> to vector<16x32xf32>
    %15 = vector.extract_strided_slice %12 {offsets = [0, 64], sizes = [16, 32], strides = [1, 1]} : vector<16x96xf32> to vector<16x32xf32>
    %16 = vector.shape_cast %13 : vector<16x32xf32> to vector<2x8x32xf32>
    %17 = vector.shape_cast %14 : vector<16x32xf32> to vector<2x8x32xf32>
    %18 = vector.shape_cast %15 : vector<16x32xf32> to vector<2x8x32xf32>
    %19 = vector.extract_strided_slice %16 {offsets = [0, 0, 0], sizes = [2, 8, 8], strides = [1, 1, 1]} : vector<2x8x32xf32> to vector<2x8x8xf32>
    %20 = arith.truncf %19 : vector<2x8x8xf32> to vector<2x8x8xbf16>
    %21 = vector.extract_strided_slice %17 {offsets = [0, 0, 0], sizes = [2, 8, 8], strides = [1, 1, 1]} : vector<2x8x32xf32> to vector<2x8x8xf32>
    %22 = arith.truncf %21 : vector<2x8x8xf32> to vector<2x8x8xbf16>
    %23 = vector.extract_strided_slice %18 {offsets = [0, 0, 0], sizes = [2, 8, 8], strides = [1, 1, 1]} : vector<2x8x32xf32> to vector<2x8x8xf32>
    %24 = arith.truncf %23 : vector<2x8x8xf32> to vector<2x8x8xbf16>
    "tpu.trace_start"() <{level = 10 : i32, message = "bqd,bkd->bqk"}> : () -> ()
    %cst_10 = arith.constant dense<0.000000e+00> : vector<2x8x8xf32>
    %25 = tpu.matmul %20, %22, %cst_10 {dimension_numbers = #tpu.dot_dimension_numbers<[2], [2], [1], [1], [0, 0, 0, 1, 1, 1], [0], [0]>} : vector<2x8x8xbf16>, vector<2x8x8xbf16>, vector<2x8x8xf32> -> vector<2x8x8xf32>
    "tpu.trace_stop"() : () -> ()
    %cst_11 = arith.constant 0.353553385 : f32
    %26 = vector.broadcast %cst_11 : f32 to vector<2x8x8xf32>
    %27 = arith.mulf %25, %26 : vector<2x8x8xf32>
    %cst_12 = arith.constant dense<0xFF800000> : vector<2x8xf32>
    %28 = vector.multi_reduction <maximumf>, %27, %cst_12 [2] : vector<2x8x8xf32> to vector<2x8xf32>
    %29 = vector.shape_cast %28 : vector<2x8xf32> to vector<2x8x1xf32>
    %30 = vector.broadcast %29 : vector<2x8x1xf32> to vector<2x8x8xf32>
    %31 = arith.subf %27, %30 : vector<2x8x8xf32>
    %32 = math.exp %31 : vector<2x8x8xf32>
    %cst_13 = arith.constant dense<0.000000e+00> : vector<2x8xf32>
    %33 = vector.multi_reduction <add>, %32, %cst_13 [2] : vector<2x8x8xf32> to vector<2x8xf32>
    %34 = vector.shape_cast %33 : vector<2x8xf32> to vector<2x8x1xf32>
    %35 = tpu.reciprocal %34 {approx = true} : vector<2x8x1xf32> -> vector<2x8x1xf32>
    %36 = vector.broadcast %35 : vector<2x8x1xf32> to vector<2x8x8xf32>
    %37 = arith.mulf %32, %36 : vector<2x8x8xf32>
    %38 = arith.truncf %37 : vector<2x8x8xf32> to vector<2x8x8xbf16>
    "tpu.trace_start"() <{level = 10 : i32, message = "bqk,bkd->bqd"}> : () -> ()
    %cst_14 = arith.constant dense<0.000000e+00> : vector<2x8x8xf32>
    %39 = tpu.matmul %38, %24, %cst_14 {dimension_numbers = #tpu.dot_dimension_numbers<[2], [1], [1], [2], [0, 0, 0, 1, 1, 2], [0], [0]>} : vector<2x8x8xbf16>, vector<2x8x8xbf16>, vector<2x8x8xf32> -> vector<2x8x8xf32>
    "tpu.trace_stop"() : () -> ()
    %40 = vector.extract_strided_slice %16 {offsets = [0, 0, 8], sizes = [2, 8, 8], strides = [1, 1, 1]} : vector<2x8x32xf32> to vector<2x8x8xf32>
    %41 = arith.truncf %40 : vector<2x8x8xf32> to vector<2x8x8xbf16>
    %42 = vector.extract_strided_slice %17 {offsets = [0, 0, 8], sizes = [2, 8, 8], strides = [1, 1, 1]} : vector<2x8x32xf32> to vector<2x8x8xf32>
    %43 = arith.truncf %42 : vector<2x8x8xf32> to vector<2x8x8xbf16>
    %44 = vector.extract_strided_slice %18 {offsets = [0, 0, 8], sizes = [2, 8, 8], strides = [1, 1, 1]} : vector<2x8x32xf32> to vector<2x8x8xf32>
    %45 = arith.truncf %44 : vector<2x8x8xf32> to vector<2x8x8xbf16>
    "tpu.trace_start"() <{level = 10 : i32, message = "bqd,bkd->bqk"}> : () -> ()
    %cst_15 = arith.constant dense<0.000000e+00> : vector<2x8x8xf32>
    %46 = tpu.matmul %41, %43, %cst_15 {dimension_numbers = #tpu.dot_dimension_numbers<[2], [2], [1], [1], [0, 0, 0, 1, 1, 1], [0], [0]>} : vector<2x8x8xbf16>, vector<2x8x8xbf16>, vector<2x8x8xf32> -> vector<2x8x8xf32>
    "tpu.trace_stop"() : () -> ()
    %cst_16 = arith.constant 0.353553385 : f32
    %47 = vector.broadcast %cst_16 : f32 to vector<2x8x8xf32>
    %48 = arith.mulf %46, %47 : vector<2x8x8xf32>
    %cst_17 = arith.constant dense<0xFF800000> : vector<2x8xf32>
    %49 = vector.multi_reduction <maximumf>, %48, %cst_17 [2] : vector<2x8x8xf32> to vector<2x8xf32>
    %50 = vector.shape_cast %49 : vector<2x8xf32> to vector<2x8x1xf32>
    %51 = vector.broadcast %50 : vector<2x8x1xf32> to vector<2x8x8xf32>
    %52 = arith.subf %48, %51 : vector<2x8x8xf32>
    %53 = math.exp %52 : vector<2x8x8xf32>
    %cst_18 = arith.constant dense<0.000000e+00> : vector<2x8xf32>
    %54 = vector.multi_reduction <add>, %53, %cst_18 [2] : vector<2x8x8xf32> to vector<2x8xf32>
    %55 = vector.shape_cast %54 : vector<2x8xf32> to vector<2x8x1xf32>
    %56 = tpu.reciprocal %55 {approx = true} : vector<2x8x1xf32> -> vector<2x8x1xf32>
    %57 = vector.broadcast %56 : vector<2x8x1xf32> to vector<2x8x8xf32>
    %58 = arith.mulf %53, %57 : vector<2x8x8xf32>
    %59 = arith.truncf %58 : vector<2x8x8xf32> to vector<2x8x8xbf16>
    "tpu.trace_start"() <{level = 10 : i32, message = "bqk,bkd->bqd"}> : () -> ()
    %cst_19 = arith.constant dense<0.000000e+00> : vector<2x8x8xf32>
    %60 = tpu.matmul %59, %45, %cst_19 {dimension_numbers = #tpu.dot_dimension_numbers<[2], [1], [1], [2], [0, 0, 0, 1, 1, 2], [0], [0]>} : vector<2x8x8xbf16>, vector<2x8x8xbf16>, vector<2x8x8xf32> -> vector<2x8x8xf32>
    "tpu.trace_stop"() : () -> ()
    %61 = vector.extract_strided_slice %16 {offsets = [0, 0, 16], sizes = [2, 8, 8], strides = [1, 1, 1]} : vector<2x8x32xf32> to vector<2x8x8xf32>
    %62 = arith.truncf %61 : vector<2x8x8xf32> to vector<2x8x8xbf16>
    %63 = vector.extract_strided_slice %17 {offsets = [0, 0, 16], sizes = [2, 8, 8], strides = [1, 1, 1]} : vector<2x8x32xf32> to vector<2x8x8xf32>
    %64 = arith.truncf %63 : vector<2x8x8xf32> to vector<2x8x8xbf16>
    %65 = vector.extract_strided_slice %18 {offsets = [0, 0, 16], sizes = [2, 8, 8], strides = [1, 1, 1]} : vector<2x8x32xf32> to vector<2x8x8xf32>
    %66 = arith.truncf %65 : vector<2x8x8xf32> to vector<2x8x8xbf16>
    "tpu.trace_start"() <{level = 10 : i32, message = "bqd,bkd->bqk"}> : () -> ()
    %cst_20 = arith.constant dense<0.000000e+00> : vector<2x8x8xf32>
    %67 = tpu.matmul %62, %64, %cst_20 {dimension_numbers = #tpu.dot_dimension_numbers<[2], [2], [1], [1], [0, 0, 0, 1, 1, 1], [0], [0]>} : vector<2x8x8xbf16>, vector<2x8x8xbf16>, vector<2x8x8xf32> -> vector<2x8x8xf32>
    "tpu.trace_stop"() : () -> ()
    %cst_21 = arith.constant 0.353553385 : f32
    %68 = vector.broadcast %cst_21 : f32 to vector<2x8x8xf32>
    %69 = arith.mulf %67, %68 : vector<2x8x8xf32>
    %cst_22 = arith.constant dense<0xFF800000> : vector<2x8xf32>
    %70 = vector.multi_reduction <maximumf>, %69, %cst_22 [2] : vector<2x8x8xf32> to vector<2x8xf32>
    %71 = vector.shape_cast %70 : vector<2x8xf32> to vector<2x8x1xf32>
    %72 = vector.broadcast %71 : vector<2x8x1xf32> to vector<2x8x8xf32>
    %73 = arith.subf %69, %72 : vector<2x8x8xf32>
    %74 = math.exp %73 : vector<2x8x8xf32>
    %cst_23 = arith.constant dense<0.000000e+00> : vector<2x8xf32>
    %75 = vector.multi_reduction <add>, %74, %cst_23 [2] : vector<2x8x8xf32> to vector<2x8xf32>
    %76 = vector.shape_cast %75 : vector<2x8xf32> to vector<2x8x1xf32>
    %77 = tpu.reciprocal %76 {approx = true} : vector<2x8x1xf32> -> vector<2x8x1xf32>
    %78 = vector.broadcast %77 : vector<2x8x1xf32> to vector<2x8x8xf32>
    %79 = arith.mulf %74, %78 : vector<2x8x8xf32>
    %80 = arith.truncf %79 : vector<2x8x8xf32> to vector<2x8x8xbf16>
    "tpu.trace_start"() <{level = 10 : i32, message = "bqk,bkd->bqd"}> : () -> ()
    %cst_24 = arith.constant dense<0.000000e+00> : vector<2x8x8xf32>
    %81 = tpu.matmul %80, %66, %cst_24 {dimension_numbers = #tpu.dot_dimension_numbers<[2], [1], [1], [2], [0, 0, 0, 1, 1, 2], [0], [0]>} : vector<2x8x8xbf16>, vector<2x8x8xbf16>, vector<2x8x8xf32> -> vector<2x8x8xf32>
    "tpu.trace_stop"() : () -> ()
    %82 = vector.extract_strided_slice %16 {offsets = [0, 0, 24], sizes = [2, 8, 8], strides = [1, 1, 1]} : vector<2x8x32xf32> to vector<2x8x8xf32>
    %83 = arith.truncf %82 : vector<2x8x8xf32> to vector<2x8x8xbf16>
    %84 = vector.extract_strided_slice %17 {offsets = [0, 0, 24], sizes = [2, 8, 8], strides = [1, 1, 1]} : vector<2x8x32xf32> to vector<2x8x8xf32>
    %85 = arith.truncf %84 : vector<2x8x8xf32> to vector<2x8x8xbf16>
    %86 = vector.extract_strided_slice %18 {offsets = [0, 0, 24], sizes = [2, 8, 8], strides = [1, 1, 1]} : vector<2x8x32xf32> to vector<2x8x8xf32>
    %87 = arith.truncf %86 : vector<2x8x8xf32> to vector<2x8x8xbf16>
    "tpu.trace_start"() <{level = 10 : i32, message = "bqd,bkd->bqk"}> : () -> ()
    %cst_25 = arith.constant dense<0.000000e+00> : vector<2x8x8xf32>
    %88 = tpu.matmul %83, %85, %cst_25 {dimension_numbers = #tpu.dot_dimension_numbers<[2], [2], [1], [1], [0, 0, 0, 1, 1, 1], [0], [0]>} : vector<2x8x8xbf16>, vector<2x8x8xbf16>, vector<2x8x8xf32> -> vector<2x8x8xf32>
    "tpu.trace_stop"() : () -> ()
    %cst_26 = arith.constant 0.353553385 : f32
    %89 = vector.broadcast %cst_26 : f32 to vector<2x8x8xf32>
    %90 = arith.mulf %88, %89 : vector<2x8x8xf32>
    %cst_27 = arith.constant dense<0xFF800000> : vector<2x8xf32>
    %91 = vector.multi_reduction <maximumf>, %90, %cst_27 [2] : vector<2x8x8xf32> to vector<2x8xf32>
    %92 = vector.shape_cast %91 : vector<2x8xf32> to vector<2x8x1xf32>
    %93 = vector.broadcast %92 : vector<2x8x1xf32> to vector<2x8x8xf32>
    %94 = arith.subf %90, %93 : vector<2x8x8xf32>
    %95 = math.exp %94 : vector<2x8x8xf32>
    %cst_28 = arith.constant dense<0.000000e+00> : vector<2x8xf32>
    %96 = vector.multi_reduction <add>, %95, %cst_28 [2] : vector<2x8x8xf32> to vector<2x8xf32>
    %97 = vector.shape_cast %96 : vector<2x8xf32> to vector<2x8x1xf32>
    %98 = tpu.reciprocal %97 {approx = true} : vector<2x8x1xf32> -> vector<2x8x1xf32>
    %99 = vector.broadcast %98 : vector<2x8x1xf32> to vector<2x8x8xf32>
    %100 = arith.mulf %95, %99 : vector<2x8x8xf32>
    %101 = arith.truncf %100 : vector<2x8x8xf32> to vector<2x8x8xbf16>
    "tpu.trace_start"() <{level = 10 : i32, message = "bqk,bkd->bqd"}> : () -> ()
    %cst_29 = arith.constant dense<0.000000e+00> : vector<2x8x8xf32>
    %102 = tpu.matmul %101, %87, %cst_29 {dimension_numbers = #tpu.dot_dimension_numbers<[2], [1], [1], [2], [0, 0, 0, 1, 1, 2], [0], [0]>} : vector<2x8x8xbf16>, vector<2x8x8xbf16>, vector<2x8x8xf32> -> vector<2x8x8xf32>
    "tpu.trace_stop"() : () -> ()
    %103 = tpu.concatenate %39, %60, %81, %102 in 2 : vector<2x8x8xf32>, vector<2x8x8xf32>, vector<2x8x8xf32>, vector<2x8x8xf32> -> vector<2x8x32xf32>
    %104 = vector.shape_cast %103 : vector<2x8x32xf32> to vector<16x32xf32>
    %105 = arith.truncf %104 : vector<16x32xf32> to vector<16x32xbf16>
    %c0_30 = arith.constant 0 : index
    %c0_31 = arith.constant 0 : index
    %c0_32 = arith.constant 0 : index
    %106 = vector.load %arg7[%c0_30, %c0_31, %c0_32] : memref<1x32x32xbf16, #tpu.memory_space<vmem>>, vector<1x32x32xbf16>
    %107 = vector.shape_cast %106 : vector<1x32x32xbf16> to vector<32x32xbf16>
    %cst_33 = arith.constant dense<0.000000e+00> : vector<16x32xf32>
    %108 = tpu.matmul %105, %107, %cst_33 {dimension_numbers = #tpu.dot_dimension_numbers<[1], [0], [0], [1], [0, 0, 1, 1], [], []>} : vector<16x32xbf16>, vector<32x32xbf16>, vector<16x32xf32> -> vector<16x32xf32>
    %c0_34 = arith.constant 0 : index
    %c0_35 = arith.constant 0 : index
    %c0_36 = arith.constant 0 : index
    %109 = vector.load %arg8[%c0_34, %c0_35, %c0_36] : memref<1x1x32xf32, #tpu.memory_space<vmem>>, vector<1x1x32xf32>
    %110 = vector.shape_cast %109 : vector<1x1x32xf32> to vector<1x32xf32>
    %111 = vector.broadcast %110 : vector<1x32xf32> to vector<16x32xf32>
    %112 = arith.addf %108, %111 : vector<16x32xf32>
    %113 = arith.addf %112, %3 : vector<16x32xf32>
    %c0_37 = arith.constant 0 : index
    %c0_38 = arith.constant 0 : index
    %c0_39 = arith.constant 0 : index
    %114 = vector.load %arg9[%c0_37, %c0_38, %c0_39] : memref<1x1x32xf32, #tpu.memory_space<vmem>>, vector<1x1x32xf32>
    %115 = vector.shape_cast %114 : vector<1x1x32xf32> to vector<1x32xf32>
    %c0_40 = arith.constant 0 : index
    %c0_41 = arith.constant 0 : index
    %c0_42 = arith.constant 0 : index
    %116 = vector.load %arg10[%c0_40, %c0_41, %c0_42] : memref<1x1x32xf32, #tpu.memory_space<vmem>>, vector<1x1x32xf32>
    %117 = vector.shape_cast %116 : vector<1x1x32xf32> to vector<1x32xf32>
    %cst_43 = arith.constant dense<0.000000e+00> : vector<16xf32>
    %118 = vector.multi_reduction <add>, %113, %cst_43 [1] : vector<16x32xf32> to vector<16xf32>
    %119 = vector.shape_cast %118 : vector<16xf32> to vector<16x1xf32>
    %cst_44 = arith.constant 3.200000e+01 : f32
    %120 = vector.broadcast %cst_44 : f32 to vector<16x1xf32>
    %121 = arith.divf %119, %120 : vector<16x1xf32>
    %122 = vector.broadcast %121 : vector<16x1xf32> to vector<16x32xf32>
    %123 = arith.subf %113, %122 : vector<16x32xf32>
    %124 = arith.mulf %123, %123 : vector<16x32xf32>
    %cst_45 = arith.constant dense<0.000000e+00> : vector<16xf32>
    %125 = vector.multi_reduction <add>, %124, %cst_45 [1] : vector<16x32xf32> to vector<16xf32>
    %126 = vector.shape_cast %125 : vector<16xf32> to vector<16x1xf32>
    %cst_46 = arith.constant 3.200000e+01 : f32
    %127 = vector.broadcast %cst_46 : f32 to vector<16x1xf32>
    %128 = arith.divf %126, %127 : vector<16x1xf32>
    %129 = vector.broadcast %121 : vector<16x1xf32> to vector<16x32xf32>
    %130 = arith.subf %113, %129 : vector<16x32xf32>
    %cst_47 = arith.constant 9.99999974E-6 : f32
    %131 = vector.broadcast %cst_47 : f32 to vector<16x1xf32>
    %132 = arith.addf %128, %131 : vector<16x1xf32>
    %133 = math.rsqrt %132 : vector<16x1xf32>
    %134 = vector.broadcast %133 : vector<16x1xf32> to vector<16x32xf32>
    %135 = arith.mulf %130, %134 : vector<16x32xf32>
    %136 = vector.broadcast %115 : vector<1x32xf32> to vector<16x32xf32>
    %137 = arith.mulf %135, %136 : vector<16x32xf32>
    %138 = vector.broadcast %117 : vector<1x32xf32> to vector<16x32xf32>
    %139 = arith.addf %137, %138 : vector<16x32xf32>
    %140 = arith.truncf %139 : vector<16x32xf32> to vector<16x32xbf16>
    %c0_48 = arith.constant 0 : index
    %c0_49 = arith.constant 0 : index
    %c0_50 = arith.constant 0 : index
    %141 = vector.load %arg11[%c0_48, %c0_49, %c0_50] : memref<1x32x32xbf16, #tpu.memory_space<vmem>>, vector<1x32x32xbf16>
    %142 = vector.shape_cast %141 : vector<1x32x32xbf16> to vector<32x32xbf16>
    %cst_51 = arith.constant dense<0.000000e+00> : vector<16x32xf32>
    %143 = tpu.matmul %140, %142, %cst_51 {dimension_numbers = #tpu.dot_dimension_numbers<[1], [0], [0], [1], [0, 0, 1, 1], [], []>} : vector<16x32xbf16>, vector<32x32xbf16>, vector<16x32xf32> -> vector<16x32xf32>
    %c0_52 = arith.constant 0 : index
    %c0_53 = arith.constant 0 : index
    %c0_54 = arith.constant 0 : index
    %144 = vector.load %arg12[%c0_52, %c0_53, %c0_54] : memref<1x1x32xf32, #tpu.memory_space<vmem>>, vector<1x1x32xf32>
    %145 = vector.shape_cast %144 : vector<1x1x32xf32> to vector<1x32xf32>
    %146 = vector.broadcast %145 : vector<1x32xf32> to vector<16x32xf32>
    %147 = arith.addf %143, %146 : vector<16x32xf32>
    %148 = arith.truncf %4 : vector<16x32xf32> to vector<16x32xbf16>
    %c0_55 = arith.constant 0 : index
    %c0_56 = arith.constant 0 : index
    %c0_57 = arith.constant 0 : index
    %149 = vector.load %arg13[%c0_55, %c0_56, %c0_57] : memref<1x32x64xbf16, #tpu.memory_space<vmem>>, vector<1x32x64xbf16>
    %150 = vector.shape_cast %149 : vector<1x32x64xbf16> to vector<32x64xbf16>
    %cst_58 = arith.constant dense<0.000000e+00> : vector<16x64xf32>
    %151 = tpu.matmul %148, %150, %cst_58 {dimension_numbers = #tpu.dot_dimension_numbers<[1], [0], [0], [1], [0, 0, 1, 1], [], []>} : vector<16x32xbf16>, vector<32x64xbf16>, vector<16x64xf32> -> vector<16x64xf32>
    %c0_59 = arith.constant 0 : index
    %c0_60 = arith.constant 0 : index
    %c0_61 = arith.constant 0 : index
    %152 = vector.load %arg14[%c0_59, %c0_60, %c0_61] : memref<1x1x64xf32, #tpu.memory_space<vmem>>, vector<1x1x64xf32>
    %153 = vector.shape_cast %152 : vector<1x1x64xf32> to vector<1x64xf32>
    %154 = vector.broadcast %153 : vector<1x64xf32> to vector<16x64xf32>
    %155 = arith.addf %151, %154 : vector<16x64xf32>
    %156 = vector.extract_strided_slice %155 {offsets = [0, 0], sizes = [16, 32], strides = [1, 1]} : vector<16x64xf32> to vector<16x32xf32>
    %157 = vector.extract_strided_slice %155 {offsets = [0, 32], sizes = [16, 32], strides = [1, 1]} : vector<16x64xf32> to vector<16x32xf32>
    %158 = vector.shape_cast %147 : vector<16x32xf32> to vector<2x8x32xf32>
    %159 = vector.shape_cast %156 : vector<16x32xf32> to vector<2x8x32xf32>
    %160 = vector.shape_cast %157 : vector<16x32xf32> to vector<2x8x32xf32>
    %161 = vector.extract_strided_slice %158 {offsets = [0, 0, 0], sizes = [2, 8, 8], strides = [1, 1, 1]} : vector<2x8x32xf32> to vector<2x8x8xf32>
    %162 = arith.truncf %161 : vector<2x8x8xf32> to vector<2x8x8xbf16>
    %163 = vector.extract_strided_slice %159 {offsets = [0, 0, 0], sizes = [2, 8, 8], strides = [1, 1, 1]} : vector<2x8x32xf32> to vector<2x8x8xf32>
    %164 = arith.truncf %163 : vector<2x8x8xf32> to vector<2x8x8xbf16>
    %165 = vector.extract_strided_slice %160 {offsets = [0, 0, 0], sizes = [2, 8, 8], strides = [1, 1, 1]} : vector<2x8x32xf32> to vector<2x8x8xf32>
    %166 = arith.truncf %165 : vector<2x8x8xf32> to vector<2x8x8xbf16>
    "tpu.trace_start"() <{level = 10 : i32, message = "bqd,bkd->bqk"}> : () -> ()
    %cst_62 = arith.constant dense<0.000000e+00> : vector<2x8x8xf32>
    %167 = tpu.matmul %162, %164, %cst_62 {dimension_numbers = #tpu.dot_dimension_numbers<[2], [2], [1], [1], [0, 0, 0, 1, 1, 1], [0], [0]>} : vector<2x8x8xbf16>, vector<2x8x8xbf16>, vector<2x8x8xf32> -> vector<2x8x8xf32>
    "tpu.trace_stop"() : () -> ()
    %cst_63 = arith.constant 0.353553385 : f32
    %168 = vector.broadcast %cst_63 : f32 to vector<2x8x8xf32>
    %169 = arith.mulf %167, %168 : vector<2x8x8xf32>
    %cst_64 = arith.constant dense<0xFF800000> : vector<2x8xf32>
    %170 = vector.multi_reduction <maximumf>, %169, %cst_64 [2] : vector<2x8x8xf32> to vector<2x8xf32>
    %171 = vector.shape_cast %170 : vector<2x8xf32> to vector<2x8x1xf32>
    %172 = vector.broadcast %171 : vector<2x8x1xf32> to vector<2x8x8xf32>
    %173 = arith.subf %169, %172 : vector<2x8x8xf32>
    %174 = math.exp %173 : vector<2x8x8xf32>
    %cst_65 = arith.constant dense<0.000000e+00> : vector<2x8xf32>
    %175 = vector.multi_reduction <add>, %174, %cst_65 [2] : vector<2x8x8xf32> to vector<2x8xf32>
    %176 = vector.shape_cast %175 : vector<2x8xf32> to vector<2x8x1xf32>
    %177 = tpu.reciprocal %176 {approx = true} : vector<2x8x1xf32> -> vector<2x8x1xf32>
    %178 = vector.broadcast %177 : vector<2x8x1xf32> to vector<2x8x8xf32>
    %179 = arith.mulf %174, %178 : vector<2x8x8xf32>
    %180 = arith.truncf %179 : vector<2x8x8xf32> to vector<2x8x8xbf16>
    "tpu.trace_start"() <{level = 10 : i32, message = "bqk,bkd->bqd"}> : () -> ()
    %cst_66 = arith.constant dense<0.000000e+00> : vector<2x8x8xf32>
    %181 = tpu.matmul %180, %166, %cst_66 {dimension_numbers = #tpu.dot_dimension_numbers<[2], [1], [1], [2], [0, 0, 0, 1, 1, 2], [0], [0]>} : vector<2x8x8xbf16>, vector<2x8x8xbf16>, vector<2x8x8xf32> -> vector<2x8x8xf32>
    "tpu.trace_stop"() : () -> ()
    %182 = vector.extract_strided_slice %158 {offsets = [0, 0, 8], sizes = [2, 8, 8], strides = [1, 1, 1]} : vector<2x8x32xf32> to vector<2x8x8xf32>
    %183 = arith.truncf %182 : vector<2x8x8xf32> to vector<2x8x8xbf16>
    %184 = vector.extract_strided_slice %159 {offsets = [0, 0, 8], sizes = [2, 8, 8], strides = [1, 1, 1]} : vector<2x8x32xf32> to vector<2x8x8xf32>
    %185 = arith.truncf %184 : vector<2x8x8xf32> to vector<2x8x8xbf16>
    %186 = vector.extract_strided_slice %160 {offsets = [0, 0, 8], sizes = [2, 8, 8], strides = [1, 1, 1]} : vector<2x8x32xf32> to vector<2x8x8xf32>
    %187 = arith.truncf %186 : vector<2x8x8xf32> to vector<2x8x8xbf16>
    "tpu.trace_start"() <{level = 10 : i32, message = "bqd,bkd->bqk"}> : () -> ()
    %cst_67 = arith.constant dense<0.000000e+00> : vector<2x8x8xf32>
    %188 = tpu.matmul %183, %185, %cst_67 {dimension_numbers = #tpu.dot_dimension_numbers<[2], [2], [1], [1], [0, 0, 0, 1, 1, 1], [0], [0]>} : vector<2x8x8xbf16>, vector<2x8x8xbf16>, vector<2x8x8xf32> -> vector<2x8x8xf32>
    "tpu.trace_stop"() : () -> ()
    %cst_68 = arith.constant 0.353553385 : f32
    %189 = vector.broadcast %cst_68 : f32 to vector<2x8x8xf32>
    %190 = arith.mulf %188, %189 : vector<2x8x8xf32>
    %cst_69 = arith.constant dense<0xFF800000> : vector<2x8xf32>
    %191 = vector.multi_reduction <maximumf>, %190, %cst_69 [2] : vector<2x8x8xf32> to vector<2x8xf32>
    %192 = vector.shape_cast %191 : vector<2x8xf32> to vector<2x8x1xf32>
    %193 = vector.broadcast %192 : vector<2x8x1xf32> to vector<2x8x8xf32>
    %194 = arith.subf %190, %193 : vector<2x8x8xf32>
    %195 = math.exp %194 : vector<2x8x8xf32>
    %cst_70 = arith.constant dense<0.000000e+00> : vector<2x8xf32>
    %196 = vector.multi_reduction <add>, %195, %cst_70 [2] : vector<2x8x8xf32> to vector<2x8xf32>
    %197 = vector.shape_cast %196 : vector<2x8xf32> to vector<2x8x1xf32>
    %198 = tpu.reciprocal %197 {approx = true} : vector<2x8x1xf32> -> vector<2x8x1xf32>
    %199 = vector.broadcast %198 : vector<2x8x1xf32> to vector<2x8x8xf32>
    %200 = arith.mulf %195, %199 : vector<2x8x8xf32>
    %201 = arith.truncf %200 : vector<2x8x8xf32> to vector<2x8x8xbf16>
    "tpu.trace_start"() <{level = 10 : i32, message = "bqk,bkd->bqd"}> : () -> ()
    %cst_71 = arith.constant dense<0.000000e+00> : vector<2x8x8xf32>
    %202 = tpu.matmul %201, %187, %cst_71 {dimension_numbers = #tpu.dot_dimension_numbers<[2], [1], [1], [2], [0, 0, 0, 1, 1, 2], [0], [0]>} : vector<2x8x8xbf16>, vector<2x8x8xbf16>, vector<2x8x8xf32> -> vector<2x8x8xf32>
    "tpu.trace_stop"() : () -> ()
    %203 = vector.extract_strided_slice %158 {offsets = [0, 0, 16], sizes = [2, 8, 8], strides = [1, 1, 1]} : vector<2x8x32xf32> to vector<2x8x8xf32>
    %204 = arith.truncf %203 : vector<2x8x8xf32> to vector<2x8x8xbf16>
    %205 = vector.extract_strided_slice %159 {offsets = [0, 0, 16], sizes = [2, 8, 8], strides = [1, 1, 1]} : vector<2x8x32xf32> to vector<2x8x8xf32>
    %206 = arith.truncf %205 : vector<2x8x8xf32> to vector<2x8x8xbf16>
    %207 = vector.extract_strided_slice %160 {offsets = [0, 0, 16], sizes = [2, 8, 8], strides = [1, 1, 1]} : vector<2x8x32xf32> to vector<2x8x8xf32>
    %208 = arith.truncf %207 : vector<2x8x8xf32> to vector<2x8x8xbf16>
    "tpu.trace_start"() <{level = 10 : i32, message = "bqd,bkd->bqk"}> : () -> ()
    %cst_72 = arith.constant dense<0.000000e+00> : vector<2x8x8xf32>
    %209 = tpu.matmul %204, %206, %cst_72 {dimension_numbers = #tpu.dot_dimension_numbers<[2], [2], [1], [1], [0, 0, 0, 1, 1, 1], [0], [0]>} : vector<2x8x8xbf16>, vector<2x8x8xbf16>, vector<2x8x8xf32> -> vector<2x8x8xf32>
    "tpu.trace_stop"() : () -> ()
    %cst_73 = arith.constant 0.353553385 : f32
    %210 = vector.broadcast %cst_73 : f32 to vector<2x8x8xf32>
    %211 = arith.mulf %209, %210 : vector<2x8x8xf32>
    %cst_74 = arith.constant dense<0xFF800000> : vector<2x8xf32>
    %212 = vector.multi_reduction <maximumf>, %211, %cst_74 [2] : vector<2x8x8xf32> to vector<2x8xf32>
    %213 = vector.shape_cast %212 : vector<2x8xf32> to vector<2x8x1xf32>
    %214 = vector.broadcast %213 : vector<2x8x1xf32> to vector<2x8x8xf32>
    %215 = arith.subf %211, %214 : vector<2x8x8xf32>
    %216 = math.exp %215 : vector<2x8x8xf32>
    %cst_75 = arith.constant dense<0.000000e+00> : vector<2x8xf32>
    %217 = vector.multi_reduction <add>, %216, %cst_75 [2] : vector<2x8x8xf32> to vector<2x8xf32>
    %218 = vector.shape_cast %217 : vector<2x8xf32> to vector<2x8x1xf32>
    %219 = tpu.reciprocal %218 {approx = true} : vector<2x8x1xf32> -> vector<2x8x1xf32>
    %220 = vector.broadcast %219 : vector<2x8x1xf32> to vector<2x8x8xf32>
    %221 = arith.mulf %216, %220 : vector<2x8x8xf32>
    %222 = arith.truncf %221 : vector<2x8x8xf32> to vector<2x8x8xbf16>
    "tpu.trace_start"() <{level = 10 : i32, message = "bqk,bkd->bqd"}> : () -> ()
    %cst_76 = arith.constant dense<0.000000e+00> : vector<2x8x8xf32>
    %223 = tpu.matmul %222, %208, %cst_76 {dimension_numbers = #tpu.dot_dimension_numbers<[2], [1], [1], [2], [0, 0, 0, 1, 1, 2], [0], [0]>} : vector<2x8x8xbf16>, vector<2x8x8xbf16>, vector<2x8x8xf32> -> vector<2x8x8xf32>
    "tpu.trace_stop"() : () -> ()
    %224 = vector.extract_strided_slice %158 {offsets = [0, 0, 24], sizes = [2, 8, 8], strides = [1, 1, 1]} : vector<2x8x32xf32> to vector<2x8x8xf32>
    %225 = arith.truncf %224 : vector<2x8x8xf32> to vector<2x8x8xbf16>
    %226 = vector.extract_strided_slice %159 {offsets = [0, 0, 24], sizes = [2, 8, 8], strides = [1, 1, 1]} : vector<2x8x32xf32> to vector<2x8x8xf32>
    %227 = arith.truncf %226 : vector<2x8x8xf32> to vector<2x8x8xbf16>
    %228 = vector.extract_strided_slice %160 {offsets = [0, 0, 24], sizes = [2, 8, 8], strides = [1, 1, 1]} : vector<2x8x32xf32> to vector<2x8x8xf32>
    %229 = arith.truncf %228 : vector<2x8x8xf32> to vector<2x8x8xbf16>
    "tpu.trace_start"() <{level = 10 : i32, message = "bqd,bkd->bqk"}> : () -> ()
    %cst_77 = arith.constant dense<0.000000e+00> : vector<2x8x8xf32>
    %230 = tpu.matmul %225, %227, %cst_77 {dimension_numbers = #tpu.dot_dimension_numbers<[2], [2], [1], [1], [0, 0, 0, 1, 1, 1], [0], [0]>} : vector<2x8x8xbf16>, vector<2x8x8xbf16>, vector<2x8x8xf32> -> vector<2x8x8xf32>
    "tpu.trace_stop"() : () -> ()
    %cst_78 = arith.constant 0.353553385 : f32
    %231 = vector.broadcast %cst_78 : f32 to vector<2x8x8xf32>
    %232 = arith.mulf %230, %231 : vector<2x8x8xf32>
    %cst_79 = arith.constant dense<0xFF800000> : vector<2x8xf32>
    %233 = vector.multi_reduction <maximumf>, %232, %cst_79 [2] : vector<2x8x8xf32> to vector<2x8xf32>
    %234 = vector.shape_cast %233 : vector<2x8xf32> to vector<2x8x1xf32>
    %235 = vector.broadcast %234 : vector<2x8x1xf32> to vector<2x8x8xf32>
    %236 = arith.subf %232, %235 : vector<2x8x8xf32>
    %237 = math.exp %236 : vector<2x8x8xf32>
    %cst_80 = arith.constant dense<0.000000e+00> : vector<2x8xf32>
    %238 = vector.multi_reduction <add>, %237, %cst_80 [2] : vector<2x8x8xf32> to vector<2x8xf32>
    %239 = vector.shape_cast %238 : vector<2x8xf32> to vector<2x8x1xf32>
    %240 = tpu.reciprocal %239 {approx = true} : vector<2x8x1xf32> -> vector<2x8x1xf32>
    %241 = vector.broadcast %240 : vector<2x8x1xf32> to vector<2x8x8xf32>
    %242 = arith.mulf %237, %241 : vector<2x8x8xf32>
    %243 = arith.truncf %242 : vector<2x8x8xf32> to vector<2x8x8xbf16>
    "tpu.trace_start"() <{level = 10 : i32, message = "bqk,bkd->bqd"}> : () -> ()
    %cst_81 = arith.constant dense<0.000000e+00> : vector<2x8x8xf32>
    %244 = tpu.matmul %243, %229, %cst_81 {dimension_numbers = #tpu.dot_dimension_numbers<[2], [1], [1], [2], [0, 0, 0, 1, 1, 2], [0], [0]>} : vector<2x8x8xbf16>, vector<2x8x8xbf16>, vector<2x8x8xf32> -> vector<2x8x8xf32>
    "tpu.trace_stop"() : () -> ()
    %245 = tpu.concatenate %181, %202, %223, %244 in 2 : vector<2x8x8xf32>, vector<2x8x8xf32>, vector<2x8x8xf32>, vector<2x8x8xf32> -> vector<2x8x32xf32>
    %246 = vector.shape_cast %245 : vector<2x8x32xf32> to vector<16x32xf32>
    %247 = arith.truncf %246 : vector<16x32xf32> to vector<16x32xbf16>
    %c0_82 = arith.constant 0 : index
    %c0_83 = arith.constant 0 : index
    %c0_84 = arith.constant 0 : index
    %248 = vector.load %arg15[%c0_82, %c0_83, %c0_84] : memref<1x32x32xbf16, #tpu.memory_space<vmem>>, vector<1x32x32xbf16>
    %249 = vector.shape_cast %248 : vector<1x32x32xbf16> to vector<32x32xbf16>
    %cst_85 = arith.constant dense<0.000000e+00> : vector<16x32xf32>
    %250 = tpu.matmul %247, %249, %cst_85 {dimension_numbers = #tpu.dot_dimension_numbers<[1], [0], [0], [1], [0, 0, 1, 1], [], []>} : vector<16x32xbf16>, vector<32x32xbf16>, vector<16x32xf32> -> vector<16x32xf32>
    %c0_86 = arith.constant 0 : index
    %c0_87 = arith.constant 0 : index
    %c0_88 = arith.constant 0 : index
    %251 = vector.load %arg16[%c0_86, %c0_87, %c0_88] : memref<1x1x32xf32, #tpu.memory_space<vmem>>, vector<1x1x32xf32>
    %252 = vector.shape_cast %251 : vector<1x1x32xf32> to vector<1x32xf32>
    %253 = vector.broadcast %252 : vector<1x32xf32> to vector<16x32xf32>
    %254 = arith.addf %250, %253 : vector<16x32xf32>
    %255 = arith.addf %254, %139 : vector<16x32xf32>
    %c0_89 = arith.constant 0 : index
    %c0_90 = arith.constant 0 : index
    %c0_91 = arith.constant 0 : index
    %256 = vector.load %arg17[%c0_89, %c0_90, %c0_91] : memref<1x1x32xf32, #tpu.memory_space<vmem>>, vector<1x1x32xf32>
    %257 = vector.shape_cast %256 : vector<1x1x32xf32> to vector<1x32xf32>
    %c0_92 = arith.constant 0 : index
    %c0_93 = arith.constant 0 : index
    %c0_94 = arith.constant 0 : index
    %258 = vector.load %arg18[%c0_92, %c0_93, %c0_94] : memref<1x1x32xf32, #tpu.memory_space<vmem>>, vector<1x1x32xf32>
    %259 = vector.shape_cast %258 : vector<1x1x32xf32> to vector<1x32xf32>
    %cst_95 = arith.constant dense<0.000000e+00> : vector<16xf32>
    %260 = vector.multi_reduction <add>, %255, %cst_95 [1] : vector<16x32xf32> to vector<16xf32>
    %261 = vector.shape_cast %260 : vector<16xf32> to vector<16x1xf32>
    %cst_96 = arith.constant 3.200000e+01 : f32
    %262 = vector.broadcast %cst_96 : f32 to vector<16x1xf32>
    %263 = arith.divf %261, %262 : vector<16x1xf32>
    %264 = vector.broadcast %263 : vector<16x1xf32> to vector<16x32xf32>
    %265 = arith.subf %255, %264 : vector<16x32xf32>
    %266 = arith.mulf %265, %265 : vector<16x32xf32>
    %cst_97 = arith.constant dense<0.000000e+00> : vector<16xf32>
    %267 = vector.multi_reduction <add>, %266, %cst_97 [1] : vector<16x32xf32> to vector<16xf32>
    %268 = vector.shape_cast %267 : vector<16xf32> to vector<16x1xf32>
    %cst_98 = arith.constant 3.200000e+01 : f32
    %269 = vector.broadcast %cst_98 : f32 to vector<16x1xf32>
    %270 = arith.divf %268, %269 : vector<16x1xf32>
    %271 = vector.broadcast %263 : vector<16x1xf32> to vector<16x32xf32>
    %272 = arith.subf %255, %271 : vector<16x32xf32>
    %cst_99 = arith.constant 9.99999974E-6 : f32
    %273 = vector.broadcast %cst_99 : f32 to vector<16x1xf32>
    %274 = arith.addf %270, %273 : vector<16x1xf32>
    %275 = math.rsqrt %274 : vector<16x1xf32>
    %276 = vector.broadcast %275 : vector<16x1xf32> to vector<16x32xf32>
    %277 = arith.mulf %272, %276 : vector<16x32xf32>
    %278 = vector.broadcast %257 : vector<1x32xf32> to vector<16x32xf32>
    %279 = arith.mulf %277, %278 : vector<16x32xf32>
    %280 = vector.broadcast %259 : vector<1x32xf32> to vector<16x32xf32>
    %281 = arith.addf %279, %280 : vector<16x32xf32>
    %282 = arith.truncf %281 : vector<16x32xf32> to vector<16x32xbf16>
    %cst_100 = arith.constant 0.000000e+00 : f32
    %283 = vector.broadcast %cst_100 : f32 to vector<16x32xf32>
    %c0_101 = arith.constant 0 : index
    %c0_102 = arith.constant 0 : index
    %c0_103 = arith.constant 0 : index
    %284 = vector.load %arg19[%c0_101, %c0_102, %c0_103] : memref<1x32x2048xbf16, #tpu.memory_space<vmem>>, vector<1x32x512xbf16>
    %285 = vector.shape_cast %284 : vector<1x32x512xbf16> to vector<32x512xbf16>
    %cst_104 = arith.constant dense<0.000000e+00> : vector<16x512xf32>
    %286 = tpu.matmul %282, %285, %cst_104 {dimension_numbers = #tpu.dot_dimension_numbers<[1], [0], [0], [1], [0, 0, 1, 1], [], []>} : vector<16x32xbf16>, vector<32x512xbf16>, vector<16x512xf32> -> vector<16x512xf32>
    %c0_105 = arith.constant 0 : index
    %c0_106 = arith.constant 0 : index
    %c0_107 = arith.constant 0 : index
    %287 = vector.load %arg20[%c0_105, %c0_106, %c0_107] : memref<1x1x2048xf32, #tpu.memory_space<vmem>>, vector<1x1x512xf32>
    %288 = vector.shape_cast %287 : vector<1x1x512xf32> to vector<1x512xf32>
    %289 = vector.broadcast %288 : vector<1x512xf32> to vector<16x512xf32>
    %290 = arith.addf %286, %289 : vector<16x512xf32>
    %cst_108 = arith.constant 0.000000e+00 : f32
    %291 = vector.broadcast %cst_108 : f32 to vector<16x512xf32>
    %292 = arith.maximumf %290, %291 : vector<16x512xf32>
    %293 = arith.truncf %292 : vector<16x512xf32> to vector<16x512xbf16>
    %c0_109 = arith.constant 0 : index
    %c0_110 = arith.constant 0 : index
    %c0_111 = arith.constant 0 : index
    %294 = vector.load %arg21[%c0_109, %c0_110, %c0_111] : memref<1x2048x32xbf16, #tpu.memory_space<vmem>>, vector<1x512x32xbf16>
    %295 = vector.shape_cast %294 : vector<1x512x32xbf16> to vector<512x32xbf16>
    %cst_112 = arith.constant dense<0.000000e+00> : vector<16x32xf32>
    %296 = tpu.matmul %293, %295, %cst_112 {dimension_numbers = #tpu.dot_dimension_numbers<[1], [0], [0], [1], [0, 0, 1, 1], [], []>} : vector<16x512xbf16>, vector<512x32xbf16>, vector<16x32xf32> -> vector<16x32xf32>
    %297 = arith.addf %283, %296 : vector<16x32xf32>
    %c0_113 = arith.constant 0 : index
    %c0_114 = arith.constant 0 : index
    %c512 = arith.constant 512 : index
    %298 = vector.load %arg19[%c0_113, %c0_114, %c512] : memref<1x32x2048xbf16, #tpu.memory_space<vmem>>, vector<1x32x512xbf16>
    %299 = vector.shape_cast %298 : vector<1x32x512xbf16> to vector<32x512xbf16>
    %cst_115 = arith.constant dense<0.000000e+00> : vector<16x512xf32>
    %300 = tpu.matmul %282, %299, %cst_115 {dimension_numbers = #tpu.dot_dimension_numbers<[1], [0], [0], [1], [0, 0, 1, 1], [], []>} : vector<16x32xbf16>, vector<32x512xbf16>, vector<16x512xf32> -> vector<16x512xf32>
    %c0_116 = arith.constant 0 : index
    %c0_117 = arith.constant 0 : index
    %c512_118 = arith.constant 512 : index
    %301 = vector.load %arg20[%c0_116, %c0_117, %c512_118] : memref<1x1x2048xf32, #tpu.memory_space<vmem>>, vector<1x1x512xf32>
    %302 = vector.shape_cast %301 : vector<1x1x512xf32> to vector<1x512xf32>
    %303 = vector.broadcast %302 : vector<1x512xf32> to vector<16x512xf32>
    %304 = arith.addf %300, %303 : vector<16x512xf32>
    %cst_119 = arith.constant 0.000000e+00 : f32
    %305 = vector.broadcast %cst_119 : f32 to vector<16x512xf32>
    %306 = arith.maximumf %304, %305 : vector<16x512xf32>
    %307 = arith.truncf %306 : vector<16x512xf32> to vector<16x512xbf16>
    %c0_120 = arith.constant 0 : index
    %c512_121 = arith.constant 512 : index
    %c0_122 = arith.constant 0 : index
    %308 = vector.load %arg21[%c0_120, %c512_121, %c0_122] : memref<1x2048x32xbf16, #tpu.memory_space<vmem>>, vector<1x512x32xbf16>
    %309 = vector.shape_cast %308 : vector<1x512x32xbf16> to vector<512x32xbf16>
    %cst_123 = arith.constant dense<0.000000e+00> : vector<16x32xf32>
    %310 = tpu.matmul %307, %309, %cst_123 {dimension_numbers = #tpu.dot_dimension_numbers<[1], [0], [0], [1], [0, 0, 1, 1], [], []>} : vector<16x512xbf16>, vector<512x32xbf16>, vector<16x32xf32> -> vector<16x32xf32>
    %311 = arith.addf %297, %310 : vector<16x32xf32>
    %c0_124 = arith.constant 0 : index
    %c0_125 = arith.constant 0 : index
    %c1024 = arith.constant 1024 : index
    %312 = vector.load %arg19[%c0_124, %c0_125, %c1024] : memref<1x32x2048xbf16, #tpu.memory_space<vmem>>, vector<1x32x512xbf16>
    %313 = vector.shape_cast %312 : vector<1x32x512xbf16> to vector<32x512xbf16>
    %cst_126 = arith.constant dense<0.000000e+00> : vector<16x512xf32>
    %314 = tpu.matmul %282, %313, %cst_126 {dimension_numbers = #tpu.dot_dimension_numbers<[1], [0], [0], [1], [0, 0, 1, 1], [], []>} : vector<16x32xbf16>, vector<32x512xbf16>, vector<16x512xf32> -> vector<16x512xf32>
    %c0_127 = arith.constant 0 : index
    %c0_128 = arith.constant 0 : index
    %c1024_129 = arith.constant 1024 : index
    %315 = vector.load %arg20[%c0_127, %c0_128, %c1024_129] : memref<1x1x2048xf32, #tpu.memory_space<vmem>>, vector<1x1x512xf32>
    %316 = vector.shape_cast %315 : vector<1x1x512xf32> to vector<1x512xf32>
    %317 = vector.broadcast %316 : vector<1x512xf32> to vector<16x512xf32>
    %318 = arith.addf %314, %317 : vector<16x512xf32>
    %cst_130 = arith.constant 0.000000e+00 : f32
    %319 = vector.broadcast %cst_130 : f32 to vector<16x512xf32>
    %320 = arith.maximumf %318, %319 : vector<16x512xf32>
    %321 = arith.truncf %320 : vector<16x512xf32> to vector<16x512xbf16>
    %c0_131 = arith.constant 0 : index
    %c1024_132 = arith.constant 1024 : index
    %c0_133 = arith.constant 0 : index
    %322 = vector.load %arg21[%c0_131, %c1024_132, %c0_133] : memref<1x2048x32xbf16, #tpu.memory_space<vmem>>, vector<1x512x32xbf16>
    %323 = vector.shape_cast %322 : vector<1x512x32xbf16> to vector<512x32xbf16>
    %cst_134 = arith.constant dense<0.000000e+00> : vector<16x32xf32>
    %324 = tpu.matmul %321, %323, %cst_134 {dimension_numbers = #tpu.dot_dimension_numbers<[1], [0], [0], [1], [0, 0, 1, 1], [], []>} : vector<16x512xbf16>, vector<512x32xbf16>, vector<16x32xf32> -> vector<16x32xf32>
    %325 = arith.addf %311, %324 : vector<16x32xf32>
    %c0_135 = arith.constant 0 : index
    %c0_136 = arith.constant 0 : index
    %c1536 = arith.constant 1536 : index
    %326 = vector.load %arg19[%c0_135, %c0_136, %c1536] : memref<1x32x2048xbf16, #tpu.memory_space<vmem>>, vector<1x32x512xbf16>
    %327 = vector.shape_cast %326 : vector<1x32x512xbf16> to vector<32x512xbf16>
    %cst_137 = arith.constant dense<0.000000e+00> : vector<16x512xf32>
    %328 = tpu.matmul %282, %327, %cst_137 {dimension_numbers = #tpu.dot_dimension_numbers<[1], [0], [0], [1], [0, 0, 1, 1], [], []>} : vector<16x32xbf16>, vector<32x512xbf16>, vector<16x512xf32> -> vector<16x512xf32>
    %c0_138 = arith.constant 0 : index
    %c0_139 = arith.constant 0 : index
    %c1536_140 = arith.constant 1536 : index
    %329 = vector.load %arg20[%c0_138, %c0_139, %c1536_140] : memref<1x1x2048xf32, #tpu.memory_space<vmem>>, vector<1x1x512xf32>
    %330 = vector.shape_cast %329 : vector<1x1x512xf32> to vector<1x512xf32>
    %331 = vector.broadcast %330 : vector<1x512xf32> to vector<16x512xf32>
    %332 = arith.addf %328, %331 : vector<16x512xf32>
    %cst_141 = arith.constant 0.000000e+00 : f32
    %333 = vector.broadcast %cst_141 : f32 to vector<16x512xf32>
    %334 = arith.maximumf %332, %333 : vector<16x512xf32>
    %335 = arith.truncf %334 : vector<16x512xf32> to vector<16x512xbf16>
    %c0_142 = arith.constant 0 : index
    %c1536_143 = arith.constant 1536 : index
    %c0_144 = arith.constant 0 : index
    %336 = vector.load %arg21[%c0_142, %c1536_143, %c0_144] : memref<1x2048x32xbf16, #tpu.memory_space<vmem>>, vector<1x512x32xbf16>
    %337 = vector.shape_cast %336 : vector<1x512x32xbf16> to vector<512x32xbf16>
    %cst_145 = arith.constant dense<0.000000e+00> : vector<16x32xf32>
    %338 = tpu.matmul %335, %337, %cst_145 {dimension_numbers = #tpu.dot_dimension_numbers<[1], [0], [0], [1], [0, 0, 1, 1], [], []>} : vector<16x512xbf16>, vector<512x32xbf16>, vector<16x32xf32> -> vector<16x32xf32>
    %339 = arith.addf %325, %338 : vector<16x32xf32>
    %c0_146 = arith.constant 0 : index
    %c0_147 = arith.constant 0 : index
    %c0_148 = arith.constant 0 : index
    %340 = vector.load %arg22[%c0_146, %c0_147, %c0_148] : memref<1x1x32xf32, #tpu.memory_space<vmem>>, vector<1x1x32xf32>
    %341 = vector.shape_cast %340 : vector<1x1x32xf32> to vector<1x32xf32>
    %342 = vector.broadcast %341 : vector<1x32xf32> to vector<16x32xf32>
    %343 = arith.addf %339, %342 : vector<16x32xf32>
    %344 = arith.addf %343, %281 : vector<16x32xf32>
    %c0_149 = arith.constant 0 : index
    %c0_150 = arith.constant 0 : index
    %c0_151 = arith.constant 0 : index
    %345 = vector.load %arg23[%c0_149, %c0_150, %c0_151] : memref<1x1x32xf32, #tpu.memory_space<vmem>>, vector<1x1x32xf32>
    %346 = vector.shape_cast %345 : vector<1x1x32xf32> to vector<1x32xf32>
    %c0_152 = arith.constant 0 : index
    %c0_153 = arith.constant 0 : index
    %c0_154 = arith.constant 0 : index
    %347 = vector.load %arg24[%c0_152, %c0_153, %c0_154] : memref<1x1x32xf32, #tpu.memory_space<vmem>>, vector<1x1x32xf32>
    %348 = vector.shape_cast %347 : vector<1x1x32xf32> to vector<1x32xf32>
    %cst_155 = arith.constant dense<0.000000e+00> : vector<16xf32>
    %349 = vector.multi_reduction <add>, %344, %cst_155 [1] : vector<16x32xf32> to vector<16xf32>
    %350 = vector.shape_cast %349 : vector<16xf32> to vector<16x1xf32>
    %cst_156 = arith.constant 3.200000e+01 : f32
    %351 = vector.broadcast %cst_156 : f32 to vector<16x1xf32>
    %352 = arith.divf %350, %351 : vector<16x1xf32>
    %353 = vector.broadcast %352 : vector<16x1xf32> to vector<16x32xf32>
    %354 = arith.subf %344, %353 : vector<16x32xf32>
    %355 = arith.mulf %354, %354 : vector<16x32xf32>
    %cst_157 = arith.constant dense<0.000000e+00> : vector<16xf32>
    %356 = vector.multi_reduction <add>, %355, %cst_157 [1] : vector<16x32xf32> to vector<16xf32>
    %357 = vector.shape_cast %356 : vector<16xf32> to vector<16x1xf32>
    %cst_158 = arith.constant 3.200000e+01 : f32
    %358 = vector.broadcast %cst_158 : f32 to vector<16x1xf32>
    %359 = arith.divf %357, %358 : vector<16x1xf32>
    %360 = vector.broadcast %352 : vector<16x1xf32> to vector<16x32xf32>
    %361 = arith.subf %344, %360 : vector<16x32xf32>
    %cst_159 = arith.constant 9.99999974E-6 : f32
    %362 = vector.broadcast %cst_159 : f32 to vector<16x1xf32>
    %363 = arith.addf %359, %362 : vector<16x1xf32>
    %364 = math.rsqrt %363 : vector<16x1xf32>
    %365 = vector.broadcast %364 : vector<16x1xf32> to vector<16x32xf32>
    %366 = arith.mulf %361, %365 : vector<16x32xf32>
    %367 = vector.broadcast %346 : vector<1x32xf32> to vector<16x32xf32>
    %368 = arith.mulf %366, %367 : vector<16x32xf32>
    %369 = vector.broadcast %348 : vector<1x32xf32> to vector<16x32xf32>
    %370 = arith.addf %368, %369 : vector<16x32xf32>
    %c0_160 = arith.constant 0 : index
    %c0_161 = arith.constant 0 : index
    %371 = vector.load %arg30[%c0_160, %c0_161] : memref<16x32xf32, #tpu.memory_space<vmem>>, vector<16x32xf32>
    tpu.vector_store %arg30[%c0_160, %c0_161], %370 {strides = array<i32>} : memref<16x32xf32, #tpu.memory_space<vmem>>, vector<16x32xf32>,
    %c1_i32 = arith.constant 1 : i32
    %372 = arith.cmpi eq, %arg0, %c1_i32 : i32
    %373 = arith.extui %372 : i1 to i32
    %c0_i32_162 = arith.constant 0 : i32
    %374 = arith.cmpi ne, %373, %c0_i32_162 : i32
    scf.if %374 {
      %375 = vector.shape_cast %370 : vector<16x32xf32> to vector<2x8x32xf32>
      %376 = vector.extract_strided_slice %375 {offsets = [0, 7, 0], sizes = [2, 1, 32], strides = [1, 1, 1]} : vector<2x8x32xf32> to vector<2x1x32xf32>
      %377 = vector.shape_cast %376 : vector<2x1x32xf32> to vector<2x32xf32>
      %c0_163 = arith.constant 0 : index
      %c0_164 = arith.constant 0 : index
      %378 = vector.load %arg25[%c0_163, %c0_164] : memref<1x32xf32, #tpu.memory_space<vmem>>, vector<1x32xf32>
      %c0_165 = arith.constant 0 : index
      %c0_166 = arith.constant 0 : index
      %379 = vector.load %arg26[%c0_165, %c0_166] : memref<1x32xf32, #tpu.memory_space<vmem>>, vector<1x32xf32>
      %cst_167 = arith.constant dense<0.000000e+00> : vector<2xf32>
      %380 = vector.multi_reduction <add>, %377, %cst_167 [1] : vector<2x32xf32> to vector<2xf32>
      %381 = vector.shape_cast %380 : vector<2xf32> to vector<2x1xf32>
      %cst_168 = arith.constant 3.200000e+01 : f32
      %382 = vector.broadcast %cst_168 : f32 to vector<2x1xf32>
      %383 = arith.divf %381, %382 : vector<2x1xf32>
      %384 = vector.broadcast %383 : vector<2x1xf32> to vector<2x32xf32>
      %385 = arith.subf %377, %384 : vector<2x32xf32>
      %386 = arith.mulf %385, %385 : vector<2x32xf32>
      %cst_169 = arith.constant dense<0.000000e+00> : vector<2xf32>
      %387 = vector.multi_reduction <add>, %386, %cst_169 [1] : vector<2x32xf32> to vector<2xf32>
      %388 = vector.shape_cast %387 : vector<2xf32> to vector<2x1xf32>
      %cst_170 = arith.constant 3.200000e+01 : f32
      %389 = vector.broadcast %cst_170 : f32 to vector<2x1xf32>
      %390 = arith.divf %388, %389 : vector<2x1xf32>
      %391 = vector.broadcast %383 : vector<2x1xf32> to vector<2x32xf32>
      %392 = arith.subf %377, %391 : vector<2x32xf32>
      %cst_171 = arith.constant 9.99999974E-6 : f32
      %393 = vector.broadcast %cst_171 : f32 to vector<2x1xf32>
      %394 = arith.addf %390, %393 : vector<2x1xf32>
      %395 = math.rsqrt %394 : vector<2x1xf32>
      %396 = vector.broadcast %395 : vector<2x1xf32> to vector<2x32xf32>
      %397 = arith.mulf %392, %396 : vector<2x32xf32>
      %398 = vector.broadcast %378 : vector<1x32xf32> to vector<2x32xf32>
      %399 = arith.mulf %397, %398 : vector<2x32xf32>
      %400 = vector.broadcast %379 : vector<1x32xf32> to vector<2x32xf32>
      %401 = arith.addf %399, %400 : vector<2x32xf32>
      %402 = arith.truncf %401 : vector<2x32xf32> to vector<2x32xbf16>
      %c0_172 = arith.constant 0 : index
      %c0_173 = arith.constant 0 : index
      %403 = vector.load %arg27[%c0_172, %c0_173] : memref<32x10xbf16, #tpu.memory_space<vmem>>, vector<32x10xbf16>
      %cst_174 = arith.constant dense<0.000000e+00> : vector<2x10xf32>
      %404 = tpu.matmul %402, %403, %cst_174 {dimension_numbers = #tpu.dot_dimension_numbers<[1], [0], [0], [1], [0, 0, 1, 1], [], []>} : vector<2x32xbf16>, vector<32x10xbf16>, vector<2x10xf32> -> vector<2x10xf32>
      %c0_175 = arith.constant 0 : index
      %c0_176 = arith.constant 0 : index
      %405 = vector.load %arg28[%c0_175, %c0_176] : memref<1x10xf32, #tpu.memory_space<vmem>>, vector<1x10xf32>
      %406 = vector.broadcast %405 : vector<1x10xf32> to vector<2x10xf32>
      %407 = arith.addf %404, %406 : vector<2x10xf32>
      %c0_177 = arith.constant 0 : index
      %c0_178 = arith.constant 0 : index
      %408 = vector.load %arg29[%c0_177, %c0_178] : memref<2x10xf32, #tpu.memory_space<vmem>>, vector<2x10xf32>
      tpu.vector_store %arg29[%c0_177, %c0_178], %407 {strides = array<i32>} : memref<2x10xf32, #tpu.memory_space<vmem>>, vector<2x10xf32>,
    } else {
    }
    return
  }
  func.func @transform_0(%arg0: i32) -> (i32, i32, i32) {
    %c0_i32 = arith.constant 0 : i32
    %c0_i32_0 = arith.constant 0 : i32
    %c0_i32_1 = arith.constant 0 : i32
    %c0_i32_2 = arith.constant 0 : i32
    return %c0_i32, %c0_i32_0, %c0_i32_1 : i32, i32, i32
  }
  func.func @transform_1(%arg0: i32) -> (i32, i32) {
    %c0_i32 = arith.constant 0 : i32
    %c0_i32_0 = arith.constant 0 : i32
    %c0_i32_1 = arith.constant 0 : i32
    return %c0_i32, %c0_i32_0 : i32, i32
  }
  func.func @transform_2(%arg0: i32) -> (i32, i32) {
    %c0_i32 = arith.constant 0 : i32
    %c0_i32_0 = arith.constant 0 : i32
    %c0_i32_1 = arith.constant 0 : i32
    return %c0_i32, %c0_i32_0 : i32, i32
  }
  func.func @transform_3(%arg0: i32) -> (i32, i32) {
    %c0_i32 = arith.constant 0 : i32
    %c0_i32_0 = arith.constant 0 : i32
    %c0_i32_1 = arith.constant 0 : i32
    return %c0_i32, %c0_i32_0 : i32, i32
  }
  func.func @transform_4(%arg0: i32) -> (i32, i32, i32) {
    %c0_i32 = arith.constant 0 : i32
    %c0_i32_0 = arith.constant 0 : i32
    %c0_i32_1 = arith.constant 0 : i32
    return %arg0, %c0_i32, %c0_i32_0 : i32, i32, i32
  }
  func.func @transform_5(%arg0: i32) -> (i32, i32, i32) {
    %c0_i32 = arith.constant 0 : i32
    %c0_i32_0 = arith.constant 0 : i32
    %c0_i32_1 = arith.constant 0 : i32
    return %arg0, %c0_i32, %c0_i32_0 : i32, i32, i32
  }
  func.func @transform_6(%arg0: i32) -> (i32, i32, i32) {
    %c0_i32 = arith.constant 0 : i32
    %c0_i32_0 = arith.constant 0 : i32
    %c0_i32_1 = arith.constant 0 : i32
    return %arg0, %c0_i32, %c0_i32_0 : i32, i32, i32
  }
  func.func @transform_7(%arg0: i32) -> (i32, i32, i32) {
    %c0_i32 = arith.constant 0 : i32
    %c0_i32_0 = arith.constant 0 : i32
    %c0_i32_1 = arith.constant 0 : i32
    return %arg0, %c0_i32, %c0_i32_0 : i32, i32, i32
  }
  func.func @transform_8(%arg0: i32) -> (i32, i32, i32) {
    %c0_i32 = arith.constant 0 : i32
    %c0_i32_0 = arith.constant 0 : i32
    %c0_i32_1 = arith.constant 0 : i32
    return %arg0, %c0_i32, %c0_i32_0 : i32, i32, i32
  }
  func.func @transform_9(%arg0: i32) -> (i32, i32, i32) {
    %c0_i32 = arith.constant 0 : i32
    %c0_i32_0 = arith.constant 0 : i32
    %c0_i32_1 = arith.constant 0 : i32
    return %arg0, %c0_i32, %c0_i32_0 : i32, i32, i32
  }
  func.func @transform_10(%arg0: i32) -> (i32, i32, i32) {
    %c0_i32 = arith.constant 0 : i32
    %c0_i32_0 = arith.constant 0 : i32
    %c0_i32_1 = arith.constant 0 : i32
    return %arg0, %c0_i32, %c0_i32_0 : i32, i32, i32
  }
  func.func @transform_11(%arg0: i32) -> (i32, i32, i32) {
    %c0_i32 = arith.constant 0 : i32
    %c0_i32_0 = arith.constant 0 : i32
    %c0_i32_1 = arith.constant 0 : i32
    return %arg0, %c0_i32, %c0_i32_0 : i32, i32, i32
  }
  func.func @transform_12(%arg0: i32) -> (i32, i32, i32) {
    %c0_i32 = arith.constant 0 : i32
    %c0_i32_0 = arith.constant 0 : i32
    %c0_i32_1 = arith.constant 0 : i32
    return %arg0, %c0_i32, %c0_i32_0 : i32, i32, i32
  }
  func.func @transform_13(%arg0: i32) -> (i32, i32, i32) {
    %c0_i32 = arith.constant 0 : i32
    %c0_i32_0 = arith.constant 0 : i32
    %c0_i32_1 = arith.constant 0 : i32
    return %arg0, %c0_i32, %c0_i32_0 : i32, i32, i32
  }
  func.func @transform_14(%arg0: i32) -> (i32, i32, i32) {
    %c0_i32 = arith.constant 0 : i32
    %c0_i32_0 = arith.constant 0 : i32
    %c0_i32_1 = arith.constant 0 : i32
    return %arg0, %c0_i32, %c0_i32_0 : i32, i32, i32
  }
  func.func @transform_15(%arg0: i32) -> (i32, i32, i32) {
    %c0_i32 = arith.constant 0 : i32
    %c0_i32_0 = arith.constant 0 : i32
    %c0_i32_1 = arith.constant 0 : i32
    return %arg0, %c0_i32, %c0_i32_0 : i32, i32, i32
  }
  func.func @transform_16(%arg0: i32) -> (i32, i32, i32) {
    %c0_i32 = arith.constant 0 : i32
    %c0_i32_0 = arith.constant 0 : i32
    %c0_i32_1 = arith.constant 0 : i32
    return %arg0, %c0_i32, %c0_i32_0 : i32, i32, i32
  }
  func.func @transform_17(%arg0: i32) -> (i32, i32, i32) {
    %c0_i32 = arith.constant 0 : i32
    %c0_i32_0 = arith.constant 0 : i32
    %c0_i32_1 = arith.constant 0 : i32
    return %arg0, %c0_i32, %c0_i32_0 : i32, i32, i32
  }
  func.func @transform_18(%arg0: i32) -> (i32, i32, i32) {
    %c0_i32 = arith.constant 0 : i32
    %c0_i32_0 = arith.constant 0 : i32
    %c0_i32_1 = arith.constant 0 : i32
    return %arg0, %c0_i32, %c0_i32_0 : i32, i32, i32
  }
  func.func @transform_19(%arg0: i32) -> (i32, i32, i32) {
    %c0_i32 = arith.constant 0 : i32
    %c0_i32_0 = arith.constant 0 : i32
    %c0_i32_1 = arith.constant 0 : i32
    return %arg0, %c0_i32, %c0_i32_0 : i32, i32, i32
  }
  func.func @transform_20(%arg0: i32) -> (i32, i32, i32) {
    %c0_i32 = arith.constant 0 : i32
    %c0_i32_0 = arith.constant 0 : i32
    %c0_i32_1 = arith.constant 0 : i32
    return %arg0, %c0_i32, %c0_i32_0 : i32, i32, i32
  }
  func.func @transform_21(%arg0: i32) -> (i32, i32, i32) {
    %c0_i32 = arith.constant 0 : i32
    %c0_i32_0 = arith.constant 0 : i32
    %c0_i32_1 = arith.constant 0 : i32
    return %arg0, %c0_i32, %c0_i32_0 : i32, i32, i32
  }
  func.func @transform_22(%arg0: i32) -> (i32, i32, i32) {
    %c0_i32 = arith.constant 0 : i32
    %c0_i32_0 = arith.constant 0 : i32
    %c0_i32_1 = arith.constant 0 : i32
    return %arg0, %c0_i32, %c0_i32_0 : i32, i32, i32
  }
  func.func @transform_23(%arg0: i32) -> (i32, i32, i32) {
    %c0_i32 = arith.constant 0 : i32
    %c0_i32_0 = arith.constant 0 : i32
    %c0_i32_1 = arith.constant 0 : i32
    return %arg0, %c0_i32, %c0_i32_0 : i32, i32, i32
  }
  func.func @transform_24(%arg0: i32) -> (i32, i32) {
    %c0_i32 = arith.constant 0 : i32
    %c0_i32_0 = arith.constant 0 : i32
    %c0_i32_1 = arith.constant 0 : i32
    return %c0_i32, %c0_i32_0 : i32, i32
  }
  func.func @transform_25(%arg0: i32) -> (i32, i32) {
    %c0_i32 = arith.constant 0 : i32
    %c0_i32_0 = arith.constant 0 : i32
    %c0_i32_1 = arith.constant 0 : i32
    return %c0_i32, %c0_i32_0 : i32, i32
  }
  func.func @transform_26(%arg0: i32) -> (i32, i32) {
    %c0_i32 = arith.constant 0 : i32
    %c0_i32_0 = arith.constant 0 : i32
    %c0_i32_1 = arith.constant 0 : i32
    return %c0_i32, %c0_i32_0 : i32, i32
  }
  func.func @transform_27(%arg0: i32) -> (i32, i32) {
    %c0_i32 = arith.constant 0 : i32
    %c0_i32_0 = arith.constant 0 : i32
    %c0_i32_1 = arith.constant 0 : i32
    return %c0_i32, %c0_i32_0 : i32, i32
  }
  func.func @transform_28(%arg0: i32) -> (i32, i32) {
    %c0_i32 = arith.constant 0 : i32
    %c0_i32_0 = arith.constant 0 : i32
    %c0_i32_1 = arith.constant 0 : i32
    return %c0_i32, %c0_i32_0 : i32, i32
  }
}

</mosaic_0001>

<bundles_post_ra>
// kernel: transformer_forward.2
= control target key start
LH: loop header
LB: loop body
LE: loop exit
PB: predicated region body
PF: predicated region fallthrough
CT: control target
= control target key end

     0   :  { %s5061_s24 = smov 0   ;;  %s5634_s0 = inlined_call_operand.vmem [shape: f32[2,8,16], index: 0, kind: input, shape index: {}]   ;;  %s5635_s1 = inlined_call_operand.vmem [shape: bf16[16,32], index: 1, kind: input, shape index: {}]   ;;  %s5636_s2 = inlined_call_operand.vmem [shape: f32[1,32], index: 2, kind: input, shape index: {}]   ;;  %s5637_s3 = inlined_call_operand.vmem [shape: bf16[2,32,96], index: 3, kind: input, shape index: {}]   ;;  %s5638_s4 = inlined_call_operand.vmem [shape: f32[2,1,96], index: 4, kind: input, shape index: {}]   ;;  %s5639_s5 = inlined_call_operand.vmem [shape: bf16[2,32,32], index: 5, kind: input, shape index: {}]   ;;  %s5640_s6 = inlined_call_operand.vmem [shape: f32[2,1,32], index: 6, kind: input, shape index: {}]   ;;  %s5641_s7 = inlined_call_operand.vmem [shape: f32[2,1,32], index: 7, kind: input, shape index: {}]   ;;  %s5642_s8 = inlined_call_operand.vmem [shape: f32[2,1,32], index: 8, kind: input, shape index: {}]   ;;  %s5643_s9 = inlined_call_operand.vmem [shape: bf16[2,32,2048], index: 9, kind: input, shape index: {}]   ;;  %s5644_s10 = inlined_call_operand.vmem [shape: f32[2,1,2048], index: 10, kind: input, shape index: {}]   ;;  %s5645_s11 = inlined_call_operand.vmem [shape: bf16[2,2048,32], index: 11, kind: input, shape index: {}]   ;;  %s5646_s12 = inlined_call_operand.vmem [shape: f32[2,1,32], index: 12, kind: input, shape index: {}]   ;;  %s5647_s13 = inlined_call_operand.vmem [shape: f32[2,1,32], index: 13, kind: input, shape index: {}]   ;;  %s5648_s14 = inlined_call_operand.vmem [shape: f32[2,1,32], index: 14, kind: input, shape index: {}]   ;;  %s5649_s15 = inlined_call_operand.vmem [shape: f32[1,32], index: 15, kind: input, shape index: {}]   ;;  %s5650_s16 = inlined_call_operand.vmem [shape: f32[1,32], index: 16, kind: input, shape index: {}]   ;;  %s5651_s17 = inlined_call_operand.vmem [shape: f32[16,32], index: 17, kind: output, shape index: {}]  }
   0x1   :  { %5655 = sst [smem:[#allocation4_spill]] %s5634_s0 }
   0x2   :  { %5656 = sst [smem:[#allocation5_spill]] %s5635_s1 }
   0x3   :  { %5657 = sst [smem:[#allocation6_spill]] %s5637_s3 }
   0x4   :  { %5658 = sst [smem:[#allocation7_spill]] %s5638_s4 }
   0x5   :  { %5659 = sst [smem:[#allocation8_spill]] %s5639_s5 }
   0x6   :  { %5660 = sst [smem:[#allocation9_spill]] %s5649_s15 }
   0x7   :  { %5661 = sst [smem:[#allocation10_spill]] %s5650_s16 }
   0x8   :  { %5662 = sst [smem:[#allocation11_spill]] %s5651_s17 }
   0x9 LB: > { %5663 = sst [smem:[#allocation3_spill]] %s4950_s24  ;;  %s5067_s25 = sadd.s32 4294967295, %s4950_s24   ;;  %s4950_s24 = sphi %s5061_s24, %s27_s24  }
   0xa   : > { %p4169_p0 = scmp.ge.s32.totalorder %s4950_s24, 1  ;;  %p577_p1 = scmp.lt.s32.totalorder %s4950_s24, 3 }
   0xc   : > { %p578_p2 = pnand %p4169_p0, %p577_p1 }
   0xd   : > { %p664_p3 = scmp.lt.s32.totalorder (!%p578_p2), %s5067_s25, 1  ;;  %s5665_s3 = sld [smem:[#allocation6_spill]] (!%p578_p2) }
   0xe   : > { %581 = sbr.rel (%p578_p2) target bundleno = 4960 (0x1360), region = 88  ;;  %s5666_s5 = sld [smem:[#allocation8_spill]] (!%p578_p2) }
   0xf   : > { %p4179_p4 = scmp.ne.s32.totalorder (!%p578_p2), %s5067_s25, 0 }
  0x13   : > { %s5073_s26 = scalar_select %p664_p3, %s5067_s25, 1 }
  0x14   : > { %s5667_s24 = sld [smem:[#allocation5_spill]] (!%p4179_p4) }
  0x15   : > { %s4385_s27 = sshll.u32 %s5073_s26, 4  ;;  %s4387_s30 = sshll.u32 %s5073_s26, 8 }
  0x16   : > { %s5083_s19 = scalar_lea.vmem %s5665_s3, %s4385_s27  ;;  %s5088_s21 = scalar_lea.vmem %s5666_s5, %s4385_s27 }
  0x17   : > { %s5106_s4 = scalar_lea.vmem %s5643_s9, %s4387_s30  ;;  %s5111_s5 = scalar_lea.vmem %s5644_s10, %s4385_s27 }
  0x18   : > { %s4388_s22 = sshll.u32 %s5073_s26, 10  ;;  %s702_s16 = scalar_lea.vmem %s5646_s12, %s5073_s26 }
  0x19   : > { %s5121_s28 = scalar_lea.vmem %s5645_s11, %s4388_s22  ;;  %s705_s3 = scalar_lea.vmem %s5647_s13, %s5073_s26 }
  0x1a   : > { %s708_s1 = scalar_lea.vmem %s5648_s14, %s5073_s26  ;;  %713 = sbr.rel (%p4179_p4) target bundleno = 236 (0xec), region = 92 }
  0x1b   : > { %s5668_s23 = sld [smem:[#allocation4_spill]] (!%p4179_p4) }
  0x1f   : > { %v4750_v0 = vld [vmem:[%s5667_s24] sm:$0xff]   ;;  %v4952_v1 = vmov 0.0   ;;  %vm4953_vm0 = vmmov 0   ;;  %vm732_vm1 = vcmask 130048   ;;  %vm777_vm2 = vcmask 261120  }
  0x20   : > { %4605 = vmatprep.subr.bf16.mxu0 %v4952_v1  ;;  %4607 = vmatprep.mubr.msk.bf16.mxu0 %vm4953_vm0, %v4952_v1  ;;  %v4180_v5 = vld [vmem:[%s5636_s2] ss:$0 sm:$0xff] }
  0x21   : > { %v714_v2 = vld [vmem:[%s5668_s23] sm:$0xff]  ;;  %v715_v3 = vld [vmem:[%s5668_s23 + $0x8] sm:$0xff]  ;;  %4606 = vmatpush3.bf16.msra.mxu0 %v4750_v0 }
  0x22   : > { %v716_v4 = vpack.c.bf16 %v715_v3, %v714_v2 }
  0x24   : > { %4608 = vmatmul.mubr.msk.bf16.vlgmr.msra.gmra.mxu0 %vm732_vm1, %v716_v4 }
  0xe4   : > { %v770_v6 = vpop.f32.mrf.mxu0 }
  0xe5   : > { %v771_v7 = vadd.f32 %v4180_v5, %v770_v6 }
  0xe6   : > { %v4609_v8 = vpop.f32.mrf.mxu0 }
  0xe7   : > { %778 = vst.msk [vmem:[#allocation2] sm:$0xff] %vm777_vm2, %v771_v7 }
  0xe8   : > { %v773_v9 = vpop.f32.mrf.mxu0 }
  0xe9   : > { %v774_v10 = vadd.f32 %v4180_v5, %v773_v9 }
  0xea   : > { %v4610_v11 = vpop.f32.mrf.mxu0 }
  0xeb   : > { %779 = vst.msk [vmem:[#allocation2 + $0x8] sm:$0xff] %vm777_vm2, %v774_v10 }
  0xec PF: > { %v4766_v12 = vld [vmem:[%s5083_s19 + $0x8] sm:$0xff]   ;;  %v4954_v13 = vmov 0.0   ;;  %v4767_v14 = vld [vmem:[%s5083_s19] sm:$0xff]   ;;  %vm4955_vm3 = vmmov 0   ;;  %vm806_vm4 = vcmask 261120   ;;  %s5669_s27 = sld [smem:[#allocation7_spill]] }
  0xed   : > { %4611 = vmatprep.subr.bf16.mxu0 %v4954_v13  ;;  %4619 = vmatprep.subr.bf16.mxu1 %v4954_v13  ;;  %s4956_s24 = smov 96   ;;  %vm856_vm5 = vcmask 64512   ;;  %s4957_s15 = smov 64   ;;  %vm983_vm6 = vcmask 1043456   ;;  %vm1767_vm7 = vcmask 130048   ;;  %vm1770_vm8 = vcmask 195584  }
  0xee   : > { %4612 = vmatpush3.bf16.msra.mxu0 %v4766_v12  ;;  %4615 = vmatprep.mubr.msk.bf16.mxu0 %vm4955_vm3, %v4954_v13  ;;  %v780_v15 = vld [vmem:[#allocation2] sm:$0xff]  ;;  %s4958_s22 = smov 88   ;;  %s4959_s17 = smov 120  }
  0xef   : > { %4613 = vmatprep.subr.bf16.mxu0 %v4954_v13  ;;  %4621 = vmatprep.mubr.msk.bf16.mxu1 %vm4955_vm3, %v4954_v13  ;;  %s4960_s0 = smov 56   ;;  %s4961_s29 = smov 80  }
  0xf0   : > { %s4962_s30 = smov 112   ;;  %s4963_s19 = smov 48  }
  0xf1   : > { %s4964_s18 = smov 72   ;;  %p4380_p5 = scmp.ne.s32.totalorder %s5067_s25, 1 }
  0xf2   : > { %v781_v16 = vld [vmem:[#allocation2 + $0x8] sm:$0xff]  ;;  %4614 = vmatpush3.bf16.msra.mxu0 %v4767_v14  ;;  %s5670_s20 = scalar_lea.vmem %s5669_s27, %s5073_s26  ;;  %s4965_s27 = smov 104  }
  0xf3   : > { %v782_v17 = vpack.c.bf16 %v781_v16, %v780_v15  ;;  %4625 = vmatprep.subr.bf16.mxu0 %v4954_v13  ;;  %v4183_v18 = vld [vmem:[%s5670_s20] ss:$0 sm:$0xff]  ;;  %s4966_s20 = smov 40  }
  0xf5   : > { %4616 = vmatmul.mubr.msk.bf16.vlgmr.msra.gmra.mxu0 %vm806_vm4, %v782_v17 }
  0xf6   : > { %4627 = vmatprep.mubr.msk.bf16.mxu0 %vm4955_vm3, %v4954_v13 }
 0x1b5   : > { %v844_v19 = vpop.f32.mrf.mxu0 }
 0x1b6   : > { %v845_v20 = vadd.f32 %v4183_v18, %v844_v19 }
 0x1b7   : > { %v4617_v21 = vpop.f32.mrf.mxu0 }
 0x1b8   : > { %v5162_v22 = vpack.c.bf16 %v845_v20, %v845_v20 }
 0x1b9   : > { %v847_v23 = vpop.f32.mrf.mxu0 }
 0x1ba   : > { %v848_v24 = vadd.f32 %v4183_v18, %v847_v23  ;;  %854 = vrot.lane.b32.xlu0 %v5162_v22, %s4956_s24 }
 0x1bb   : > { %v4618_v25 = vpop.f32.mrf.mxu0 }
 0x1bc   : > { %v5165_v26 = vpack.c.bf16 %v848_v24, %v848_v24 }
 0x1be   : > { %904 = vrot.lane.b32.xlu0 %v5165_v26, %s4956_s24  ;;  %s4967_s24 = smov 8  }
 0x22c   : > { %v855_v27 = vpop.permute.xlu0 %854 }
 0x22d   : > { %v861_v28 = vsel %vm856_vm5, %v855_v27, 0 }
 0x22e   : > { %4620 = vmatpush3.bf16.xpose.msra.mxu1 %v861_v28 }
 0x22f   : > { %4631 = vmatprep.subr.bf16.mxu1 %v4954_v13 }
 0x230   : > { %v905_v29 = vpop.permute.xlu0 %904 }
 0x231   : > { %v910_v30 = vsel %vm856_vm5, %v905_v29, 0 }
 0x232   : > { %4626 = vmatpush3.bf16.xpose.msra.mxu0 %v910_v30 }
 0x233   : > { %4637 = vmatprep.subr.bf16.mxu0 %v4954_v13 }
 0x235   : > { %4622 = vmatmul.mubr.msk.bf16.vlgmr.msra.gmra.mxu1 %vm856_vm5, %v5162_v22 }
 0x236   : > { %4633 = vmatprep.mubr.msk.bf16.mxu1 %vm4955_vm3, %v4954_v13 }
 0x239   : > { %4628 = vmatmul.mubr.msk.bf16.vlgmr.msra.gmra.mxu0 %vm856_vm5, %v5165_v26 }
 0x23a   : > { %4639 = vmatprep.mubr.msk.bf16.mxu0 %vm4955_vm3, %v4954_v13 }
 0x2f5   : > { %v897_v31 = vpop.f32.mrf.mxu1 }
 0x2f6   : > { %v952_v32 = vmul.f32 0.35355338, %v897_v31 }
 0x2f7   : > { %v4623_v33 = vpop.f32.mrf.mxu1 }
 0x2f8   : > { %v954_v34 = vsel %vm856_vm5, %v952_v32, -inf }
 0x2f9   : > { %955 = vmax.xlane.f32.xlu1 %v954_v34  ;;  %v900_v35 = vpop.f32.mrf.mxu1  ;;  %v946_v36 = vpop.f32.mrf.mxu0 }
 0x2fa   : > { %v953_v37 = vmul.f32 0.35355338, %v946_v36 }
 0x2fb   : > { %v4624_v38 = vpop.f32.mrf.mxu1  ;;  %v4629_v39 = vpop.f32.mrf.mxu0 }
 0x2fc   : > { %v957_v40 = vsel %vm856_vm5, %v953_v37, -inf }
 0x2fd   : > { %958 = vmax.xlane.f32.xlu1 %v957_v40  ;;  %v949_v41 = vpop.f32.mrf.mxu0 }
 0x2ff   : > { %v4630_v42 = vpop.f32.mrf.mxu0 }
 0x30e   : > { %978 = vrot.lane.b32.xlu1 %v5162_v22, %s4957_s15 }
 0x312   : > { %1027 = vrot.lane.b32.xlu1 %v5165_v26, %s4957_s15  ;;  %s4968_s15 = smov 16  }
 0x316   : > { %1077 = vrot.lane.b32.xlu1 %v5162_v22, %s4958_s22 }
 0x382   : > { %v956_v43 = vpop.xlane.xlu1 %955 }
 0x383   : > { %v960_v44 = vsub.f32 %v952_v32, %v956_v43 }
 0x385   : > { %v962_v45 = vmul.f32 1.442695, %v960_v44 }
 0x386   : > { %v959_v46 = vpop.xlane.xlu1 %958 }
 0x387   : > { %4898 = vpow2.f32 %v962_v45  ;;  %v961_v47 = vsub.f32 %v953_v37, %v959_v46 }
 0x389   : > { %v964_v48 = vmul.f32 1.442695, %v961_v47 }
 0x38a   : > { %v979_v49 = vpop.permute.xlu1 %978 }
 0x38b   : > { %4900 = vpow2.f32 %v964_v48  ;;  %v985_v50 = vsel %vm983_vm6, %v979_v49, 0 }
 0x38c   : > { %4632 = vmatpush3.bf16.msra.mxu1 %v985_v50 }
 0x38d   : > { %4643 = vmatprep.subr.bf16.mxu1 %v4954_v13 }
 0x38e   : > { %v1028_v51 = vpop.permute.xlu1 %1027 }
 0x38f   : > { %v1033_v52 = vsel %vm983_vm6, %v1028_v51, 0 }
 0x390   : > { %4638 = vmatpush3.bf16.msra.mxu0 %v1033_v52 }
 0x391   : > { %4649 = vmatprep.subr.bf16.mxu0 %v4954_v13 }
 0x392   : > { %v1078_v57 = vpop.permute.xlu1 %1077 }
 0x393   : > { %v1083_v0 = vsel %vm856_vm5, %v1078_v57, 0 }
 0x394   : > { %v4899_v53 = vpop.eup %4898 }
 0x395   : > { %v966_v54 = vsel %vm856_vm5, %v4899_v53, 0.0 }
 0x396   : > { %967 = vadd.xlane.f32.xlu0 %v966_v54 }
 0x398   : > { %v4901_v55 = vpop.eup %4900 }
 0x399   : > { %v969_v56 = vsel %vm856_vm5, %v4901_v55, 0.0 }
 0x39a   : > { %970 = vadd.xlane.f32.xlu1 %v969_v56 }
 0x3ab   : > { %1127 = vrot.lane.b32.xlu1 %v5165_v26, %s4958_s22  ;;  %s4969_s22 = smov 24  }
 0x3ac   : > { %1075 = vrot.lane.b32.xlu0 %v5162_v22, %s4959_s17 }
 0x3af   : > { %1125 = vrot.lane.b32.xlu1 %v5165_v26, %s4959_s17 }
 0x41f   : > { %v968_v58 = vpop.xlane.xlu0 %967 }
 0x420   : > { %4902 = vrcp.f32 %v968_v58 }
 0x423   : > { %v971_v59 = vpop.xlane.xlu1 %970  ;;  %v1076_v5 = vpop.permute.xlu0 %1075 }
 0x424   : > { %4904 = vrcp.f32 %v971_v59 }
 0x427   : > { %v1128_v2 = vpop.permute.xlu1 %1127 }
 0x428   : > { %v1133_v4 = vsel %vm856_vm5, %v1128_v2, 0 }
 0x42b   : > { %v1126_v6 = vpop.permute.xlu1 %1125 }
 0x42d   : > { %v4903_v60 = vpop.eup %4902 }
 0x42e   : > { %v974_v61 = vmul.f32 %v4903_v60, %v4899_v53 }
 0x430   : > { %v976_v62 = vpack.c.bf16 %v974_v61, %v974_v61 }
 0x431   : > { %v4905_v63 = vpop.eup %4904 }
 0x432   : > { %4634 = vmatmul.mubr.msk.bf16.vlgmr.msra.gmra.mxu1 %vm856_vm5, %v976_v62  ;;  %v975_v1 = vmul.f32 %v4905_v63, %v4901_v55 }
 0x433   : > { %4644 = vmatpush3.bf16.xpose.msra.mxu1 %v1083_v0  ;;  %4645 = vmatprep.mubr.msk.bf16.mxu1 %vm4955_vm3, %v4954_v13 }
 0x434   : > { %v977_v3 = vpack.c.bf16 %v975_v1, %v975_v1  ;;  %4655 = vmatprep.subr.bf16.mxu1 %v4954_v13 }
 0x436   : > { %4640 = vmatmul.mubr.msk.bf16.vlgmr.msra.gmra.mxu0 %vm856_vm5, %v977_v3 }
 0x437   : > { %4650 = vmatpush3.bf16.xpose.msra.mxu0 %v1133_v4  ;;  %4651 = vmatprep.mubr.msk.bf16.mxu0 %vm4955_vm3, %v4954_v13 }
 0x438   : > { %4661 = vmatprep.subr.bf16.mxu0 %v4954_v13 }
 0x43a   : > { %4646 = vmatmul.mubr.msk.bf16.vlgmr.msra.gmra.mxu1 %vm856_vm5, %v1076_v5 }
 0x43b   : > { %4657 = vmatprep.mubr.msk.bf16.mxu1 %vm4955_vm3, %v4954_v13 }
 0x43e   : > { %4652 = vmatmul.mubr.msk.bf16.vlgmr.msra.gmra.mxu0 %vm856_vm5, %v1126_v6 }
 0x43f   : > { %4663 = vmatprep.mubr.msk.bf16.mxu0 %vm4955_vm3, %v4954_v13 }
 0x4f2   : > { %v5210_v7 = vpop.f32.mrf.mxu1 }
 0x4f4   : > { %v4635_v8 = vpop.f32.mrf.mxu1 }
 0x4f6   : > { %v1024_v9 = vpop.f32.mrf.mxu1  ;;  %v5212_v10 = vpop.f32.mrf.mxu0 }
 0x4f8   : > { %v4636_v11 = vpop.f32.mrf.mxu1  ;;  %v4641_v12 = vpop.f32.mrf.mxu0 }
 0x4fa   : > { %v1072_v14 = vpop.f32.mrf.mxu0  ;;  %v1119_v15 = vpop.f32.mrf.mxu1 }
 0x4fb   : > { %v1175_v16 = vmul.f32 0.35355338, %v1119_v15 }
 0x4fc   : > { %v4642_v17 = vpop.f32.mrf.mxu0  ;;  %v4647_v18 = vpop.f32.mrf.mxu1 }
 0x4fd   : > { %v1177_v19 = vsel %vm856_vm5, %v1175_v16, -inf }
 0x4fe   : > { %1178 = vmax.xlane.f32.xlu1 %v1177_v19  ;;  %v1122_v20 = vpop.f32.mrf.mxu1  ;;  %v1169_v21 = vpop.f32.mrf.mxu0 }
 0x4ff   : > { %v1176_v23 = vmul.f32 0.35355338, %v1169_v21 }
 0x500   : > { %v4648_v24 = vpop.f32.mrf.mxu1  ;;  %v4653_v25 = vpop.f32.mrf.mxu0 }
 0x501   : > { %v1180_v27 = vsel %vm856_vm5, %v1176_v23, -inf }
 0x502   : > { %1181 = vmax.xlane.f32.xlu0 %v1180_v27  ;;  %v1172_v28 = vpop.f32.mrf.mxu0 }
 0x504   : > { %v4654_v29 = vpop.f32.mrf.mxu0 }
 0x50f   : > { %1201 = vrot.lane.b32.xlu1 %v5162_v22, %s4960_s0 }
 0x513   : > { %1299 = vrot.lane.b32.xlu1 %v5162_v22, %s4961_s29 }
 0x518   : > { %1249 = vrot.lane.b32.xlu0 %v5165_v26, %s4960_s0  ;;  %s5671_s0 = scalar_lea.vmem %s5640_s6, %s5073_s26 }
 0x51c   : > { %1297 = vrot.lane.b32.xlu0 %v5162_v22, %s4962_s30 }
 0x587   : > { %v1179_v30 = vpop.xlane.xlu1 %1178 }
 0x588   : > { %v1183_v31 = vsub.f32 %v1175_v16, %v1179_v30 }
 0x58a   : > { %v1185_v32 = vmul.f32 1.442695, %v1183_v31 }
 0x58b   : > { %v1202_v33 = vpop.permute.xlu1 %1201  ;;  %v1182_v34 = vpop.xlane.xlu0 %1181 }
 0x58c   : > { %4906 = vpow2.f32 %v1185_v32  ;;  %v1207_v35 = vsel %vm983_vm6, %v1202_v33, 0  ;;  %v1184_v36 = vsub.f32 %v1176_v23, %v1182_v34 }
 0x58d   : > { %4656 = vmatpush3.bf16.msra.mxu1 %v1207_v35 }
 0x58e   : > { %v1187_v37 = vmul.f32 1.442695, %v1184_v36  ;;  %4667 = vmatprep.subr.bf16.mxu1 %v4954_v13 }
 0x58f   : > { %v1250_v38 = vpop.permute.xlu0 %1249  ;;  %v1300_v44 = vpop.permute.xlu1 %1299 }
 0x590   : > { %4908 = vpow2.f32 %v1187_v37  ;;  %v1255_v39 = vsel %vm983_vm6, %v1250_v38, 0  ;;  %v1305_v51 = vsel %vm856_vm5, %v1300_v44, 0 }
 0x591   : > { %4662 = vmatpush3.bf16.msra.mxu0 %v1255_v39 }
 0x592   : > { %4673 = vmatprep.subr.bf16.mxu0 %v4954_v13 }
 0x593   : > { %v1298_v56 = vpop.permute.xlu0 %1297 }
 0x599   : > { %v4907_v40 = vpop.eup %4906 }
 0x59a   : > { %v1189_v41 = vsel %vm856_vm5, %v4907_v40, 0.0 }
 0x59b   : > { %1190 = vadd.xlane.f32.xlu1 %v1189_v41 }
 0x59d   : > { %v4909_v42 = vpop.eup %4908 }
 0x59e   : > { %v1192_v43 = vsel %vm856_vm5, %v4909_v42, 0.0 }
 0x59f   : > { %1193 = vadd.xlane.f32.xlu1 %v1192_v43 }
 0x5b0   : > { %1349 = vrot.lane.b32.xlu1 %v5165_v26, %s4961_s29  ;;  %s5676_s29 = sld [smem:[#allocation11_spill]] (!%p4380_p5) }
 0x5b4   : > { %1347 = vrot.lane.b32.xlu1 %v5165_v26, %s4962_s30 }
 0x624   : > { %v1191_v45 = vpop.xlane.xlu1 %1190 }
 0x625   : > { %4910 = vrcp.f32 %v1191_v45 }
 0x628   : > { %v1194_v46 = vpop.xlane.xlu1 %1193 }
 0x629   : > { %4912 = vrcp.f32 %v1194_v46 }
 0x62c   : > { %v1350_v53 = vpop.permute.xlu1 %1349 }
 0x62d   : > { %v1355_v55 = vsel %vm856_vm5, %v1350_v53, 0 }
 0x630   : > { %v1348_v57 = vpop.permute.xlu1 %1347 }
 0x632   : > { %v4911_v47 = vpop.eup %4910 }
 0x633   : > { %v1197_v48 = vmul.f32 %v4911_v47, %v4907_v40 }
 0x635   : > { %v1199_v49 = vpack.c.bf16 %v1197_v48, %v1197_v48 }
 0x636   : > { %v4913_v50 = vpop.eup %4912 }
 0x637   : > { %4658 = vmatmul.mubr.msk.bf16.vlgmr.msra.gmra.mxu1 %vm856_vm5, %v1199_v49  ;;  %v1198_v52 = vmul.f32 %v4913_v50, %v4909_v42 }
 0x638   : > { %4668 = vmatpush3.bf16.xpose.msra.mxu1 %v1305_v51  ;;  %4669 = vmatprep.mubr.msk.bf16.mxu1 %vm4955_vm3, %v4954_v13 }
 0x639   : > { %v1200_v54 = vpack.c.bf16 %v1198_v52, %v1198_v52  ;;  %4679 = vmatprep.subr.bf16.mxu1 %v4954_v13 }
 0x63b   : > { %4664 = vmatmul.mubr.msk.bf16.vlgmr.msra.gmra.mxu0 %vm856_vm5, %v1200_v54 }
 0x63c   : > { %4674 = vmatpush3.bf16.xpose.msra.mxu0 %v1355_v55  ;;  %4675 = vmatprep.mubr.msk.bf16.mxu0 %vm4955_vm3, %v4954_v13 }
 0x63d   : > { %4685 = vmatprep.subr.bf16.mxu0 %v4954_v13 }
 0x63f   : > { %4670 = vmatmul.mubr.msk.bf16.vlgmr.msra.gmra.mxu1 %vm856_vm5, %v1298_v56 }
 0x640   : > { %4681 = vmatprep.mubr.msk.bf16.mxu1 %vm4955_vm3, %v4954_v13 }
 0x643   : > { %4676 = vmatmul.mubr.msk.bf16.vlgmr.msra.gmra.mxu0 %vm856_vm5, %v1348_v57 }
 0x644   : > { %4687 = vmatprep.mubr.msk.bf16.mxu0 %vm4955_vm3, %v4954_v13 }
 0x6f7   : > { %v5244_v58 = vpop.f32.mrf.mxu1 }
 0x6f9   : > { %v4659_v59 = vpop.f32.mrf.mxu1 }
 0x6fb   : > { %v1246_v60 = vpop.f32.mrf.mxu1  ;;  %v5246_v61 = vpop.f32.mrf.mxu0 }
 0x6fc   : > { %v4751_v62 = vpack.i.bf16 %v5246_v61, %v5244_v58 }
 0x6fd   : > { %v4660_v63 = vpop.f32.mrf.mxu1  ;;  %v4665_v0 = vpop.f32.mrf.mxu0 }
 0x6ff   : > { %v1294_v1 = vpop.f32.mrf.mxu0  ;;  %v1341_v2 = vpop.f32.mrf.mxu1 }
 0x700   : > { %v1397_v3 = vmul.f32 0.35355338, %v1341_v2 }
 0x701   : > { %v4666_v4 = vpop.f32.mrf.mxu0  ;;  %v4671_v5 = vpop.f32.mrf.mxu1 }
 0x702   : > { %v1399_v6 = vsel %vm856_vm5, %v1397_v3, -inf }
 0x703   : > { %1400 = vmax.xlane.f32.xlu0 %v1399_v6  ;;  %v1344_v8 = vpop.f32.mrf.mxu1  ;;  %v1391_v9 = vpop.f32.mrf.mxu0 }
 0x704   : > { %v1398_v11 = vmul.f32 0.35355338, %v1391_v9 }
 0x705   : > { %v4672_v12 = vpop.f32.mrf.mxu1  ;;  %v4677_v14 = vpop.f32.mrf.mxu0 }
 0x706   : > { %v1402_v15 = vsel %vm856_vm5, %v1398_v11, -inf }
 0x707   : > { %1403 = vmax.xlane.f32.xlu1 %v1402_v15  ;;  %v1394_v16 = vpop.f32.mrf.mxu0 }
 0x709   : > { %v4678_v17 = vpop.f32.mrf.mxu0 }
 0x718   : > { %1423 = vrot.lane.b32.xlu1 %v5162_v22, %s4963_s19 }
 0x71c   : > { %1521 = vrot.lane.b32.xlu1 %v5162_v22, %s4964_s18 }
 0x720   : > { %1571 = vrot.lane.b32.xlu1 %v5165_v26, %s4964_s18 }
 0x724   : > { %1569 = vrot.lane.b32.xlu1 %v5165_v26, %s4965_s27 }
 0x78c   : > { %v1401_v18 = vpop.xlane.xlu0 %1400 }
 0x78d   : > { %v1405_v19 = vsub.f32 %v1397_v3, %v1401_v18 }
 0x78f   : > { %v1407_v20 = vmul.f32 1.442695, %v1405_v19 }
 0x790   : > { %v1404_v21 = vpop.xlane.xlu1 %1403 }
 0x791   : > { %4914 = vpow2.f32 %v1407_v20  ;;  %v1406_v23 = vsub.f32 %v1398_v11, %v1404_v21 }
 0x793   : > { %v1409_v24 = vmul.f32 1.442695, %v1406_v23 }
 0x794   : > { %v1424_v25 = vpop.permute.xlu1 %1423 }
 0x795   : > { %4916 = vpow2.f32 %v1409_v24  ;;  %v1429_v27 = vsel %vm983_vm6, %v1424_v25, 0 }
 0x796   : > { %4680 = vmatpush3.bf16.msra.mxu1 %v1429_v27 }
 0x797   : > { %4691 = vmatprep.subr.bf16.mxu1 %v4954_v13 }
 0x798   : > { %v1522_v37 = vpop.permute.xlu1 %1521 }
 0x799   : > { %v1527_v41 = vsel %vm856_vm5, %v1522_v37, 0 }
 0x79c   : > { %v1572_v43 = vpop.permute.xlu1 %1571 }
 0x79d   : > { %v1577_v45 = vsel %vm856_vm5, %v1572_v43, 0 }
 0x79e   : > { %v4915_v28 = vpop.eup %4914 }
 0x79f   : > { %v1411_v29 = vsel %vm856_vm5, %v4915_v28, 0.0 }
 0x7a0   : > { %1412 = vadd.xlane.f32.xlu0 %v1411_v29  ;;  %v1570_v47 = vpop.permute.xlu1 %1569 }
 0x7a2   : > { %v4917_v30 = vpop.eup %4916 }
 0x7a3   : > { %v1414_v31 = vsel %vm856_vm5, %v4917_v30, 0.0 }
 0x7a4   : > { %1415 = vadd.xlane.f32.xlu0 %v1414_v31  ;;  %v4769_v31 = vld [vmem:[%s5088_s21] sm:$0xff]  }
 0x7ba   : > { %1471 = vrot.lane.b32.xlu0 %v5165_v26, %s4963_s19  ;;  %s5672_s19 = scalar_lea.vmem %s5641_s7, %s5073_s26 }
 0x7be   : > { %1519 = vrot.lane.b32.xlu0 %v5162_v22, %s4965_s27 }
 0x829   : > { %v1413_v32 = vpop.xlane.xlu0 %1412 }
 0x82a   : > { %4918 = vrcp.f32 %v1413_v32 }
 0x82d   : > { %v1416_v33 = vpop.xlane.xlu0 %1415 }
 0x82e   : > { %4920 = vrcp.f32 %v1416_v33 }
 0x831   : > { %v1472_v34 = vpop.permute.xlu0 %1471 }
 0x832   : > { %v1477_v35 = vsel %vm983_vm6, %v1472_v34, 0 }
 0x833   : > { %4686 = vmatpush3.bf16.msra.mxu0 %v1477_v35 }
 0x834   : > { %4697 = vmatprep.subr.bf16.mxu0 %v4954_v13 }
 0x835   : > { %v1520_v46 = vpop.permute.xlu0 %1519 }
 0x837   : > { %v4919_v36 = vpop.eup %4918 }
 0x838   : > { %v1419_v38 = vmul.f32 %v4919_v36, %v4915_v28 }
 0x83a   : > { %v1421_v39 = vpack.c.bf16 %v1419_v38, %v1419_v38 }
 0x83b   : > { %v4921_v40 = vpop.eup %4920 }
 0x83c   : > { %4682 = vmatmul.mubr.msk.bf16.vlgmr.msra.gmra.mxu1 %vm856_vm5, %v1421_v39  ;;  %v1420_v42 = vmul.f32 %v4921_v40, %v4917_v30  ;;  %v4768_v30 = vld [vmem:[%s5088_s21 + $0x8] sm:$0xff]   ;;  %s5675_s21 = sld [smem:[#allocation10_spill]] (!%p4380_p5) }
 0x83d   : > { %4692 = vmatpush3.bf16.xpose.msra.mxu1 %v1527_v41  ;;  %4693 = vmatprep.mubr.msk.bf16.mxu1 %vm4955_vm3, %v4954_v13 }
 0x83e   : > { %v1422_v44 = vpack.c.bf16 %v1420_v42, %v1420_v42  ;;  %4703 = vmatprep.subr.bf16.mxu1 %v4954_v13 }
 0x840   : > { %4688 = vmatmul.mubr.msk.bf16.vlgmr.msra.gmra.mxu0 %vm856_vm5, %v1422_v44 }
 0x841   : > { %4698 = vmatpush3.bf16.xpose.msra.mxu0 %v1577_v45  ;;  %4699 = vmatprep.mubr.msk.bf16.mxu0 %vm4955_vm3, %v4954_v13 }
 0x842   : > { %4709 = vmatprep.subr.bf16.mxu0 %v4954_v13 }
 0x844   : > { %4694 = vmatmul.mubr.msk.bf16.vlgmr.msra.gmra.mxu1 %vm856_vm5, %v1520_v46 }
 0x845   : > { %4705 = vmatprep.mubr.msk.bf16.mxu1 %vm4955_vm3, %v4954_v13 }
 0x848   : > { %4700 = vmatmul.mubr.msk.bf16.vlgmr.msra.gmra.mxu0 %vm856_vm5, %v1570_v47 }
 0x849   : > { %4711 = vmatprep.mubr.msk.bf16.mxu0 %vm4955_vm3, %v4954_v13 }
 0x8fc   : > { %v1465_v48 = vpop.f32.mrf.mxu1 }
 0x8fe   : > { %v4683_v49 = vpop.f32.mrf.mxu1 }
 0x900   : > { %v1468_v50 = vpop.f32.mrf.mxu1  ;;  %v1513_v51 = vpop.f32.mrf.mxu0 }
 0x901   : > { %v4756_v8 = vpack.i.bf16 %v1513_v51, %v1465_v48 }
 0x902   : > { %v4684_v52 = vpop.f32.mrf.mxu1  ;;  %v4689_v53 = vpop.f32.mrf.mxu0 }
 0x904   : > { %v1516_v54 = vpop.f32.mrf.mxu0  ;;  %v1563_v55 = vpop.f32.mrf.mxu1 }
 0x905   : > { %v1619_v56 = vmul.f32 0.35355338, %v1563_v55 }
 0x906   : > { %v4690_v57 = vpop.f32.mrf.mxu0  ;;  %v4695_v59 = vpop.f32.mrf.mxu1 }
 0x907   : > { %v1621_v60 = vsel %vm856_vm5, %v1619_v56, -inf }
 0x908   : > { %1622 = vmax.xlane.f32.xlu0 %v1621_v60  ;;  %v1566_v63 = vpop.f32.mrf.mxu1  ;;  %v1613_v0 = vpop.f32.mrf.mxu0  ;;  %v4938_v60 = vld [vmem:[#allocation2] sm:$0xff] }
 0x909   : > { %v1620_v1 = vmul.f32 0.35355338, %v1613_v0 }
 0x90a   : > { %v4696_v2 = vpop.f32.mrf.mxu1  ;;  %v4701_v3 = vpop.f32.mrf.mxu0 }
 0x90b   : > { %v1624_v4 = vsel %vm856_vm5, %v1620_v1, -inf  ;;  %v4939_v3 = vld [vmem:[#allocation2 + $0x8] sm:$0xff] }
 0x90c   : > { %1625 = vmax.xlane.f32.xlu1 %v1624_v4  ;;  %v1616_v5 = vpop.f32.mrf.mxu0 }
 0x90e   : > { %v4702_v6 = vpop.f32.mrf.mxu0 }
 0x91d   : > { %1645 = vrot.lane.b32.xlu1 %v5162_v22, %s4966_s20 }
 0x921   : > { %4752 = vrot.lane.b32.xlu1 %v4751_v62, %s4967_s24 }
 0x925   : > { %4757 = vrot.lane.b32.xlu1 %v4756_v8, %s4968_s15 }
 0x991   : > { %v1623_v9 = vpop.xlane.xlu0 %1622 }
 0x992   : > { %v1627_v11 = vsub.f32 %v1619_v56, %v1623_v9  ;;  %v4203_v56 = vld [vmem:[%s5671_s0] ss:$0 sm:$0xff] }
 0x994   : > { %v1629_v12 = vmul.f32 1.442695, %v1627_v11 }
 0x995   : > { %v1626_v14 = vpop.xlane.xlu1 %1625 }
 0x996   : > { %4922 = vpow2.f32 %v1629_v12  ;;  %v1628_v15 = vsub.f32 %v1620_v1, %v1626_v14 }
 0x998   : > { %v1631_v16 = vmul.f32 1.442695, %v1628_v15 }
 0x999   : > { %v1646_v17 = vpop.permute.xlu1 %1645 }
 0x99a   : > { %4924 = vpow2.f32 %v1631_v16  ;;  %v1651_v18 = vsel %vm983_vm6, %v1646_v17, 0 }
 0x99b   : > { %4704 = vmatpush3.bf16.msra.mxu1 %v1651_v18 }
 0x99c   : > { %4715 = vmatprep.subr.bf16.mxu1 %v4954_v13 }
 0x99d   : > { %v4753_v41 = vpop.permute.xlu1 %4752 }
 0x99e   : > { %v4755_v43 = vunpack.i.h.bf16 %v4753_v41  ;;  %v4754_v44 = vunpack.i.l.bf16 %v4753_v41 }
 0x9a0   : > { %v1766_v47 = vsel %vm856_vm5, %v5212_v10, %v4755_v43  ;;  %v1765_v48 = vsel %vm856_vm5, %v5210_v7, %v4754_v44 }
 0x9a1   : > { %v4758_v42 = vpop.permute.xlu1 %4757 }
 0x9a2   : > { %v4760_v45 = vunpack.i.h.bf16 %v4758_v42 }
 0x9a3   : > { %v4923_v22 = vpop.eup %4922 }
 0x9a4   : > { %v1633_v58 = vsel %vm856_vm5, %v4923_v22, 0.0  ;;  %v1769_v52 = vsel %vm1767_vm7, %v1766_v47, %v4760_v45 }
 0x9a5   : > { %1634 = vadd.xlane.f32.xlu0 %v1633_v58  ;;  %v1895_v58 = vld [vmem:[%s5106_s4 + $0xc0] sm:$0xff] }
 0x9a7   : > { %v4925_v61 = vpop.eup %4924 }
 0x9a8   : > { %v1636_v62 = vsel %vm856_vm5, %v4925_v61, 0.0 }
 0x9a9   : > { %1637 = vadd.xlane.f32.xlu0 %v1636_v62 }
 0x9bf   : > { %1693 = vrot.lane.b32.xlu0 %v5165_v26, %s4966_s20  ;;  %s5673_s20 = scalar_lea.vmem %s5642_s8, %s5073_s26 }
 0xa2e   : > { %v1635_v19 = vpop.xlane.xlu0 %1634 }
 0xa2f   : > { %4926 = vrcp.f32 %v1635_v19  ;;  %v1896_v19 = vld [vmem:[%s5106_s4 + $0xc8] sm:$0xff] }
 0xa32   : > { %v1638_v20 = vpop.xlane.xlu0 %1637 }
 0xa33   : > { %4928 = vrcp.f32 %v1638_v20 }
 0xa36   : > { %v1694_v21 = vpop.permute.xlu0 %1693 }
 0xa37   : > { %v1699_v23 = vsel %vm983_vm6, %v1694_v21, 0 }
 0xa38   : > { %4710 = vmatpush3.bf16.msra.mxu0 %v1699_v23 }
 0xa3c   : > { %v4927_v24 = vpop.eup %4926 }
 0xa3d   : > { %v1641_v25 = vmul.f32 %v4927_v24, %v4923_v22  ;;  %v1893_v22 = vld [vmem:[%s5106_s4 + $0x80] sm:$0xff] }
 0xa3e   : > { %v4214_v62 = vcombine.high %v1893_v22, %v1895_v58  ;;  %v4213_v20 = vcombine.low %v1893_v22, %v1895_v58  ;;  %v1889_v24 = vld [vmem:[%s5106_s4] sm:$0xff] }
 0xa3f   : > { %v1643_v27 = vpack.c.bf16 %v1641_v25, %v1641_v25  ;;  %v1891_v25 = vld [vmem:[%s5106_s4 + $0x40] sm:$0xff] }
 0xa40   : > { %v4929_v28 = vpop.eup %4928  ;;  %1974 = vmatprep.subr.bf16.mxu0 %v4214_v62  ;;  %v4784_v22 = vld [vmem:[%s5121_s28 + $0x120] sm:$0xff]   ;;  %v4787_v62 = vld [vmem:[%s5121_s28 + $0x1d8] sm:$0xff]  }
 0xa41   : > { %4706 = vmatmul.mubr.msk.bf16.vlgmr.msra.gmra.mxu1 %vm856_vm5, %v1643_v27  ;;  %v1642_v29 = vmul.f32 %v4929_v28, %v4925_v61  ;;  %v1894_v61 = vld [vmem:[%s5106_s4 + $0x88] sm:$0xff]  ;;  %v4210_v28 = vcombine.high %v1889_v24, %v1891_v25  ;;  %v4785_v58 = vld [vmem:[%s5121_s28 + $0x1a0] sm:$0xff]  }
 0xa42   : > { %4719 = vmatprep.mubr.msk.bf16.mxu1 %vm4955_vm3, %v4954_v13  ;;  %4716 = vmatpush3.bf16.msra.mxu1 %v4768_v30  ;;  %v4215_v21 = vcombine.low %v1894_v61, %v1896_v19  ;;  %v4216_v23 = vcombine.high %v1894_v61, %v1896_v19  ;;  %v1890_v27 = vld [vmem:[%s5106_s4 + $0x8] sm:$0xff]  ;;  %v4786_v61 = vld [vmem:[%s5121_s28 + $0x158] sm:$0xff]  }
 0xa43   : > { %v1644_v26 = vpack.c.bf16 %v1642_v29, %v1642_v29  ;;  %4717 = vmatprep.subr.bf16.mxu1 %v4954_v13  ;;  %v4759_v13 = vunpack.i.l.bf16 %v4758_v42  ;;  %v1892_v29 = vld [vmem:[%s5106_s4 + $0x48] sm:$0xff]  ;;  %v4788_v19 = vld [vmem:[%s5121_s28 + $0x118] sm:$0xff]  }
 0xa44   : > { %v4211_v30 = vcombine.low %v1890_v27, %v1892_v29 }
 0xa45   : > { %4712 = vmatmul.mubr.msk.bf16.vlgmr.msra.gmra.mxu0 %vm856_vm5, %v1644_v26  ;;  %v1768_v51 = vsel %vm1767_vm7, %v1765_v48, %v4759_v13  ;;  %v4209_v26 = vcombine.low %v1889_v24, %v1891_v25  ;;  %v4207_v48 = vld [vmem:[%s5672_s19] ss:$0 sm:$0xff]  ;;  %v4792_v24 = vld [vmem:[%s5121_s28 + $0x110] sm:$0xff]  }
 0xa46   : > { %4718 = vmatpush3.bf16.msra.mxu1 %v4769_v31  ;;  %1975 = vmatpush1.bf16.msra.mxu0 %v4213_v20  ;;  %v4212_v31 = vcombine.high %v1890_v27, %v1892_v29  ;;  %v4789_v20 = vld [vmem:[%s5121_s28 + $0x198] sm:$0xff]   ;;  %v4793_v25 = vld [vmem:[%s5121_s28 + $0x190] sm:$0xff]   ;;  %v4794_v27 = vld [vmem:[%s5121_s28 + $0x148] sm:$0xff]  }
 0xa47   : > { %2017 = vmatprep.subr.bf16.mxu1 %v4216_v23  ;;  %1976 = vmatprep.subr.bf16.mxu0 %v4210_v28  ;;  %v4791_v23 = vld [vmem:[%s5121_s28 + $0x1d0] sm:$0xff]   ;;  %v4795_v28 = vld [vmem:[%s5121_s28 + $0x1c8] sm:$0xff]  }
 0xa48   : > { %v4796_v29 = vld [vmem:[%s5121_s28 + $0x108] sm:$0xff]  }
 0xa4a   : > { %1977 = vmatpush1.bf16.msra.mxu0 %v4209_v26  ;;  %v4797_v26 = vld [vmem:[%s5121_s28 + $0x188] sm:$0xff]  }
 0xb01   : > { %v1687_v32 = vpop.f32.mrf.mxu1 }
 0xb03   : > { %v4707_v33 = vpop.f32.mrf.mxu1 }
 0xb04   : > { %v2130_v33 = vld [vmem:[%s5106_s4 + $0xd0] sm:$0xff] }
 0xb05   : > { %v1690_v34 = vpop.f32.mrf.mxu1  ;;  %v1735_v35 = vpop.f32.mrf.mxu0 }
 0xb06   : > { %v4761_v36 = vpack.i.bf16 %v1735_v35, %v1687_v32  ;;  %v2128_v32 = vld [vmem:[%s5106_s4 + $0x90] sm:$0xff]  ;;  %v2129_v34 = vld [vmem:[%s5106_s4 + $0x98] sm:$0xff]  ;;  %v4970_v35 = vmov 0  }
 0xb07   : > { %v4708_v37 = vpop.f32.mrf.mxu1  ;;  %v4713_v38 = vpop.f32.mrf.mxu0  ;;  %1994 = vmatprep.mubr.bf16.mxu0 %v4970_v35 }
 0xb08   : > { %4762 = vrot.lane.b32.xlu0 %v4761_v36, %s4969_s22  ;;  %v4224_v36 = vcombine.high %v2128_v32, %v2130_v33  ;;  %v2131_v37 = vld [vmem:[%s5106_s4 + $0xd8] sm:$0xff]  ;;  %v4223_v38 = vcombine.low %v2128_v32, %v2130_v33  ;;  %v4800_v32 = vld [vmem:[%s5121_s28 + $0x100] sm:$0xff]  }
 0xb09   : > { %v1738_v39 = vpop.f32.mrf.mxu0  ;;  %v4801_v33 = vld [vmem:[%s5121_s28 + $0x180] sm:$0xff]  }
 0xb0a   : > { %v4225_v39 = vcombine.low %v2129_v34, %v2131_v37  ;;  %2206 = vmatprep.subr.bf16.mxu0 %v4224_v36  ;;  %v4803_v36 = vld [vmem:[%s5121_s28 + $0xf8] sm:$0xff]  }
 0xb0b   : > { %v4714_v40 = vpop.f32.mrf.mxu0 }
 0xb0c   : > { %v4226_v40 = vcombine.high %v2129_v34, %v2131_v37  ;;  %v4802_v34 = vld [vmem:[%s5121_s28 + $0x78] sm:$0xff]   ;;  %v1899_v37 = vlaneseq }
 0xb7a   : > { %v4763_v46 = vpop.permute.xlu0 %4762 }
 0xb7b   : > { %v4765_v49 = vunpack.i.h.bf16 %v4763_v46  ;;  %v4764_v50 = vunpack.i.l.bf16 %v4763_v46 }
 0xb7d   : > { %v1772_v53 = vsel %vm1770_vm8, %v1769_v52, %v4765_v49  ;;  %v1771_v54 = vsel %vm1770_vm8, %v1768_v51, %v4764_v50  ;;  %v4208_v52 = vld [vmem:[%s5673_s20] ss:$0 sm:$0xff] }
 0xb7e   : > { %v1773_v55 = vpack.c.bf16 %v1772_v53, %v1771_v54  ;;  %v2124_v54 = vld [vmem:[%s5106_s4 + $0x10] sm:$0xff] }
 0xb80   : > { %4720 = vmatmul.mubr.msk.bf16.vlgmr.msra.gmra.mxu1 %vm806_vm4, %v1773_v55  ;;  %v2126_v55 = vld [vmem:[%s5106_s4 + $0x50] sm:$0xff] }
 0xb81   : > { %2018 = vmatpush1.bf16.msra.mxu1 %v4215_v21  ;;  %2037 = vmatprep.mubr.bf16.mxu1 %v4970_v35  ;;  %v4790_v21 = vld [vmem:[%s5121_s28 + $0x150] sm:$0xff]  }
 0xb82   : > { %2019 = vmatprep.subr.bf16.mxu1 %v4212_v31  ;;  %v4799_v31 = vld [vmem:[%s5121_s28 + $0x1c0] sm:$0xff]  }
 0xb85   : > { %2020 = vmatpush1.bf16.msra.mxu1 %v4211_v30  ;;  %v4798_v30 = vld [vmem:[%s5121_s28 + $0x140] sm:$0xff]  }
 0xb86   : > { %2249 = vmatprep.subr.bf16.mxu1 %v4226_v40 }
 0xc40   : > { %v1834_v57 = vpop.f32.mrf.mxu1 }
 0xc41   : > { %v1835_v59 = vadd.f32 %v4203_v56, %v1834_v57  ;;  %v2127_v57 = vld [vmem:[%s5106_s4 + $0x58] sm:$0xff] }
 0xc42   : > { %v4721_v10 = vpop.f32.mrf.mxu1 }
 0xc43   : > { %v1841_v63 = vadd.f32 %v4938_v60, %v1835_v59 }
 0xc44   : > { %v1837_v7 = vpop.f32.mrf.mxu1 }
 0xc45   : > { %v1838_v0 = vadd.f32 %v4203_v56, %v1837_v7  ;;  %v1845_v1 = vsel %vm806_vm4, %v1841_v63, 0.0  ;;  %v2125_v56 = vld [vmem:[%s5106_s4 + $0x18] sm:$0xff] }
 0xc46   : > { %1846 = vadd.xlane.f32.xlu1 %v1845_v1  ;;  %v4722_v2 = vpop.f32.mrf.mxu1  ;;  %v4222_v7 = vcombine.high %v2125_v56, %v2127_v57  ;;  %v4221_v1 = vcombine.low %v2125_v56, %v2127_v57 }
 0xc47   : > { %v1842_v4 = vadd.f32 %v4939_v3, %v1838_v0  ;;  %v4219_v0 = vcombine.low %v2124_v54, %v2126_v55  ;;  %v4770_v2 = vld [vmem:[%s5121_s28 + $0x178] sm:$0xff]  }
 0xc48   : > { %v4771_v3 = vld [vmem:[%s5121_s28 + $0x1f8] sm:$0xff]  }
 0xc49   : > { %v1848_v5 = vsel %vm806_vm4, %v1842_v4, 0.0 }
 0xc4a   : > { %1849 = vadd.xlane.f32.xlu0 %v1848_v5  ;;  %v4773_v5 = vld [vmem:[%s5121_s28 + $0x1b8] sm:$0xff]  }
 0xccf   : > { %v1847_v6 = vpop.xlane.xlu1 %1846 }
 0xcd0   : > { %v1852_v8 = vmul.f32 0.03125, %v1847_v6  ;;  %v4774_v6 = vld [vmem:[%s5121_s28 + $0x170] sm:$0xff]  }
 0xcd2   : > { %v1854_v9 = vsub.f32 %v1841_v63, %v1852_v8  ;;  %v4220_v63 = vcombine.high %v2124_v54, %v2126_v55  ;;  %v4775_v8 = vld [vmem:[%s5121_s28 + $0x1f0] sm:$0xff]  }
 0xcd3   : > { %v1850_v11 = vpop.xlane.xlu0 %1849 }
 0xcd4   : > { %v1853_v12 = vmul.f32 0.03125, %v1850_v11  ;;  %v1856_v14 = vmul.f32 %v1854_v9, %v1854_v9  ;;  %v4777_v11 = vld [vmem:[%s5121_s28 + $0x1b0] sm:$0xff]  }
 0xcd6   : > { %v1855_v15 = vsub.f32 %v1842_v4, %v1853_v12  ;;  %v1858_v16 = vsel %vm806_vm4, %v1856_v14, 0.0  ;;  %v4772_v4 = vld [vmem:[%s5121_s28 + $0x138] sm:$0xff]   ;;  %v4778_v12 = vld [vmem:[%s5121_s28 + $0x168] sm:$0xff]  }
 0xcd7   : > { %1859 = vadd.xlane.f32.xlu0 %v1858_v16  ;;  %v4779_v14 = vld [vmem:[%s5121_s28 + $0x1e8] sm:$0xff]  }
 0xcd8   : > { %v1857_v17 = vmul.f32 %v1855_v15, %v1855_v15  ;;  %v4781_v16 = vld [vmem:[%s5121_s28 + $0x1a8] sm:$0xff]  }
 0xcda   : > { %v1861_v18 = vsel %vm806_vm4, %v1857_v17, 0.0  ;;  %v4782_v17 = vld [vmem:[%s5121_s28 + $0x160] sm:$0xff]  }
 0xcdb   : > { %1862 = vadd.xlane.f32.xlu1 %v1861_v18  ;;  %v4783_v18 = vld [vmem:[%s5121_s28 + $0x1e0] sm:$0xff]  }
 0xd60   : > { %v1860_v41 = vpop.xlane.xlu0 %1859 }
 0xd61   : > { %v1864_v42 = vmul.f32 0.03125, %v1860_v41 }
 0xd63   : > { %v1866_v43 = vadd.f32 1e-05, %v1864_v42  ;;  %v1900_v42 = vshrl.u32 %v1899_v37, 7  ;;  %v4806_v37 = vld [vmem:[%s5121_s28 + $0x70] sm:$0xff]  }
 0xd64   : > { %v1863_v44 = vpop.xlane.xlu1 %1862 }
 0xd65   : > { %4930 = vrsqrt.f32 %v1866_v43  ;;  %v1865_v45 = vmul.f32 0.03125, %v1863_v44 }
 0xd67   : > { %v1867_v13 = vadd.f32 1e-05, %v1865_v45 }
 0xd69   : > { %4932 = vrsqrt.f32 %v1867_v13 }
 0xd72   : > { %v4931_v46 = vpop.eup %4930 }
 0xd73   : > { %v1870_v47 = vmul.f32 %v4931_v46, %v1854_v9  ;;  %v4776_v9 = vld [vmem:[%s5121_s28 + $0x130] sm:$0xff]   ;;  %v5401_v46 = vsub.s32 1, %v1900_v42 }
 0xd75   : > { %v1878_v50 = vmul.f32 %v4207_v48, %v1870_v47  ;;  %v5403_v47 = vsub.s32 3, %v1900_v42 }
 0xd76   : > { %v4933_v49 = vpop.eup %4932 }
 0xd77   : > { %v1871_v51 = vmul.f32 %v4933_v49, %v1855_v15  ;;  %v5341_v59 = vadd.f32 %v4208_v52, %v1878_v50  ;;  %v4780_v15 = vld [vmem:[%s5121_s28 + $0x128] sm:$0xff]   ;;  %v5406_v49 = vsub.s32 0, %v1900_v42  ;;  %v5408_v50 = vsub.s32 2, %v1900_v42 }
 0xd79   : > { %v1879_v53 = vmul.f32 %v4207_v48, %v1871_v51  ;;  %v2132_v48 = vld [vmem:[%s5111_s5 + $0x4] sm:$0xf] }
 0xd7a   : > { %v2149_v54 = vrot.slane %v2132_v48, %v5403_v47  ;;  %v2137_v55 = vrot.slane %v2132_v48, %v5406_v49  ;;  %v2145_v56 = vrot.slane %v2132_v48, %v5408_v50 }
 0xd7b   : > { %v5343_v10 = vadd.f32 %v4208_v52, %v1879_v53  ;;  %v2141_v53 = vrot.slane %v2132_v48, %v5401_v46  ;;  %v4810_v48 = vld [vmem:[%s5121_s28 + $0x68] sm:$0xff]  }
 0xd7d   : > { %v5347_v60 = vpack.c.bf16 %v5343_v10, %v5341_v59 }
 0xd7f   : > { %4217 = vmatmul.mubr.msk.bf16.vlgmr.msra.gmra.mxu0 %vm806_vm4, %v5347_v60  ;;  %4218 = vmatmul.mubr.msk.bf16.vlgmr.msra.gmra.mxu1 %vm806_vm4, %v5347_v60 }
 0xd80   : > { %2207 = vmatpush1.bf16.msra.mxu0 %v4223_v38  ;;  %2250 = vmatpush1.bf16.msra.mxu1 %v4225_v39 }
 0xd81   : > { %2208 = vmatprep.subr.bf16.mxu0 %v4220_v63  ;;  %2251 = vmatprep.subr.bf16.mxu1 %v4222_v7  ;;  %v5415_v7 = vld [vmem:[%s5111_s5] sm:$0xf] }
 0xd82   : > { %2226 = vmatprep.mubr.bf16.mxu0 %v4970_v35  ;;  %2269 = vmatprep.mubr.bf16.mxu1 %v4970_v35 }
 0xd84   : > { %2209 = vmatpush1.bf16.msra.mxu0 %v4219_v0  ;;  %2252 = vmatpush1.bf16.msra.mxu1 %v4221_v1  ;;  %v1906_v0 = vrot.slane %v5415_v7, %v5401_v46  ;;  %v1914_v1 = vrot.slane %v5415_v7, %v5403_v47 }
 0xd85   : > { %4429 = vmatprep.subr.bf16.mxu0 %v4770_v2  ;;  %4451 = vmatprep.subr.bf16.mxu1 %v4771_v3 }
 0xd87   : > { %4227 = vmatmul.mubr.msk.bf16.vlgmr.msra.gmra.mxu0 %vm806_vm4, %v5347_v60  ;;  %4228 = vmatmul.mubr.msk.bf16.vlgmr.msra.gmra.mxu1 %vm806_vm4, %v5347_v60 }
 0xd88   : > { %4430 = vmatpush3.bf16.msra.mxu0 %v4772_v4  ;;  %4452 = vmatpush3.bf16.msra.mxu1 %v4773_v5 }
 0xd89   : > { %4431 = vmatprep.subr.bf16.mxu0 %v4774_v6  ;;  %4453 = vmatprep.subr.bf16.mxu1 %v4775_v8 }
 0xd8c   : > { %4432 = vmatpush3.bf16.msra.mxu0 %v4776_v9  ;;  %4454 = vmatpush3.bf16.msra.mxu1 %v4777_v11 }
 0xd8d   : > { %4433 = vmatprep.subr.bf16.mxu0 %v4778_v12  ;;  %4455 = vmatprep.subr.bf16.mxu1 %v4779_v14 }
 0xd90   : > { %4434 = vmatpush3.bf16.msra.mxu0 %v4780_v15  ;;  %4456 = vmatpush3.bf16.msra.mxu1 %v4781_v16 }
 0xd91   : > { %4435 = vmatprep.subr.bf16.mxu0 %v4782_v17  ;;  %4457 = vmatprep.subr.bf16.mxu1 %v4783_v18 }
 0xd94   : > { %4436 = vmatpush3.bf16.msra.mxu0 %v4784_v22  ;;  %4458 = vmatpush3.bf16.msra.mxu1 %v4785_v58 }
 0xd95   : > { %4437 = vmatprep.subr.bf16.mxu0 %v4786_v61  ;;  %4459 = vmatprep.subr.bf16.mxu1 %v4787_v62 }
 0xd98   : > { %4438 = vmatpush3.bf16.msra.mxu0 %v4788_v19  ;;  %4460 = vmatpush3.bf16.msra.mxu1 %v4789_v20 }
 0xd99   : > { %4439 = vmatprep.subr.bf16.mxu0 %v4790_v21  ;;  %4461 = vmatprep.subr.bf16.mxu1 %v4791_v23 }
 0xd9c   : > { %4440 = vmatpush3.bf16.msra.mxu0 %v4792_v24  ;;  %4462 = vmatpush3.bf16.msra.mxu1 %v4793_v25 }
 0xd9d   : > { %4441 = vmatprep.subr.bf16.mxu0 %v4794_v27  ;;  %4463 = vmatprep.subr.bf16.mxu1 %v4795_v28 }
 0xda0   : > { %4442 = vmatpush3.bf16.msra.mxu0 %v4796_v29  ;;  %4464 = vmatpush3.bf16.msra.mxu1 %v4797_v26 }
 0xda1   : > { %4443 = vmatprep.subr.bf16.mxu0 %v4798_v30  ;;  %4465 = vmatprep.subr.bf16.mxu1 %v4799_v31  ;;  %v4804_v30 = vld [vmem:[%s5121_s28 + $0x38] sm:$0xff]  }
 0xda2   : > { %v4805_v31 = vld [vmem:[%s5121_s28 + $0xb8] sm:$0xff]  }
 0xda4   : > { %4444 = vmatpush3.bf16.msra.mxu0 %v4800_v32  ;;  %4466 = vmatpush3.bf16.msra.mxu1 %v4801_v33 }
 0xda5   : > { %4473 = vmatprep.subr.bf16.mxu0 %v4802_v34  ;;  %4495 = vmatprep.subr.bf16.mxu1 %v4803_v36 }
 0xe3f   : > { %v5393_v38 = vpop.f32.mrf.mxu0  ;;  %v5395_v39 = vpop.f32.mrf.mxu1 }
 0xe41   : > { %v1998_v40 = vpop.f32.mrf.mxu0  ;;  %v2041_v41 = vpop.f32.mrf.mxu1 }
 0xe42   : > { %v1999_v22 = vadd.f32 %v1998_v40, %v1906_v0  ;;  %v2042_v58 = vadd.f32 %v2041_v41, %v1914_v1  ;;  %v4807_v40 = vld [vmem:[%s5121_s28 + $0xf0] sm:$0xff]  }
 0xe43   : > { %v5397_v43 = vpop.f32.mrf.mxu0  ;;  %v5399_v44 = vpop.f32.mrf.mxu1 }
 0xe44   : > { %v2049_v32 = vmax.f32 %v1999_v22, 0.0  ;;  %v2051_v33 = vmax.f32 %v2042_v58, 0.0  ;;  %v4831_v22 = vld [vmem:[%s5121_s28 + $0xc0] sm:$0xff]  }
 0xe45   : > { %v2002_v45 = vpop.f32.mrf.mxu0  ;;  %v2045_v13 = vpop.f32.mrf.mxu1  ;;  %v2908_v58 = vld [vmem:[%s5106_s4 + $0xa0] sm:$0xff] }
 0xe46   : > { %v2003_v9 = vadd.f32 %v2002_v45, %v1906_v0  ;;  %v2046_v11 = vadd.f32 %v2045_v13, %v1914_v1  ;;  %v4808_v45 = vld [vmem:[%s5121_s28 + $0x30] sm:$0xff]   ;;  %v4819_v0 = vld [vmem:[%s5121_s28 + $0xd8] sm:$0xff]  }
 0xe47   : > { %v2228_v51 = vpop.f32.mrf.mxu0  ;;  %v2271_v52 = vpop.f32.mrf.mxu1  ;;  %v4809_v13 = vld [vmem:[%s5121_s28 + $0xb0] sm:$0xff]   ;;  %v4820_v1 = vld [vmem:[%s5121_s28 + $0x18] sm:$0xff]  }
 0xe48   : > { %v2229_v12 = vadd.f32 %v2228_v51, %v2137_v55  ;;  %v2272_v14 = vadd.f32 %v2271_v52, %v2145_v56  ;;  %v2053_v24 = vmax.f32 %v2003_v9, 0.0  ;;  %v2055_v25 = vmax.f32 %v2046_v11, 0.0  ;;  %v4811_v51 = vld [vmem:[%s5121_s28 + $0xe8] sm:$0xff]  }
 0xe49   : > { %v2230_v57 = vpop.f32.mrf.mxu0  ;;  %v2273_v63 = vpop.f32.mrf.mxu1  ;;  %v4812_v52 = vld [vmem:[%s5121_s28 + $0x28] sm:$0xff]   ;;  %v1902_v11 = vrot.slane %v5415_v7, %v5406_v49 }
 0xe4a   : > { %v2231_v4 = vadd.f32 %v2230_v57, %v2141_v53  ;;  %v2274_v5 = vadd.f32 %v2273_v63, %v2149_v54  ;;  %v2280_v27 = vmax.f32 %v2229_v12, 0.0  ;;  %v2282_v28 = vmax.f32 %v2272_v14, 0.0  ;;  %v4817_v57 = vld [vmem:[%s5121_s28 + $0xa0] sm:$0xff]   ;;  %v4818_v63 = vld [vmem:[%s5121_s28 + $0x58] sm:$0xff]   ;;  %v4827_v9 = vld [vmem:[%s5121_s28 + $0xc8] sm:$0xff]  }
 0xe4b   : > { %v2232_v2 = vpop.f32.mrf.mxu0  ;;  %v2275_v3 = vpop.f32.mrf.mxu1  ;;  %v2057_v41 = vpack.c.bf16 %v2053_v24, %v2049_v32  ;;  %v2059_v42 = vpack.c.bf16 %v2055_v25, %v2051_v33  ;;  %v1910_v12 = vrot.slane %v5415_v7, %v5408_v50  ;;  %v4828_v14 = vld [vmem:[%s5121_s28 + $0x8] sm:$0xff]  }
 0xe4c   : > { %v2233_v6 = vadd.f32 %v2232_v2, %v2137_v55  ;;  %v2276_v8 = vadd.f32 %v2275_v3, %v2145_v56  ;;  %v2281_v19 = vmax.f32 %v2231_v4, 0.0  ;;  %v2283_v20 = vmax.f32 %v2274_v5, 0.0  ;;  %v4815_v55 = vld [vmem:[%s5121_s28 + $0xe0] sm:$0xff]   ;;  %v4821_v2 = vld [vmem:[%s5121_s28 + $0x98] sm:$0xff]   ;;  %v4822_v3 = vld [vmem:[%s5121_s28 + $0x50] sm:$0xff]  }
 0xe4d   : > { %v2234_v15 = vpop.f32.mrf.mxu0  ;;  %v2277_v16 = vpop.f32.mrf.mxu1  ;;  %v4816_v56 = vld [vmem:[%s5121_s28 + $0x20] sm:$0xff]   ;;  %v4823_v4 = vld [vmem:[%s5121_s28 + $0xd0] sm:$0xff]   ;;  %v2911_v7 = vld [vmem:[%s5106_s4 + $0xe8] sm:$0xff] }
 0xe4e   : > { %v2235_v17 = vadd.f32 %v2234_v15, %v2141_v53  ;;  %v2278_v18 = vadd.f32 %v2277_v16, %v2149_v54  ;;  %v2284_v61 = vmax.f32 %v2233_v6, 0.0  ;;  %v2286_v62 = vmax.f32 %v2276_v8, 0.0  ;;  %v4813_v53 = vld [vmem:[%s5121_s28 + $0xa8] sm:$0xff]   ;;  %v4814_v54 = vld [vmem:[%s5121_s28 + $0x60] sm:$0xff]   ;;  %v4824_v5 = vld [vmem:[%s5121_s28 + $0x10] sm:$0xff]  }
 0xe4f   : > { %v4825_v6 = vld [vmem:[%s5121_s28 + $0x90] sm:$0xff]   ;;  %v4826_v8 = vld [vmem:[%s5121_s28 + $0x48] sm:$0xff]   ;;  %v2001_v16 = vadd.f32 %v5397_v43, %v1902_v11  ;;  %v4832_v43 = vld [vmem:[%s5121_s28] sm:$0xff]  }
 0xe50   : > { %v2285_v21 = vmax.f32 %v2235_v17, 0.0  ;;  %v2287_v23 = vmax.f32 %v2278_v18, 0.0  ;;  %v2288_v34 = vpack.c.bf16 %v2284_v61, %v2280_v27  ;;  %v2290_v36 = vpack.c.bf16 %v2286_v62, %v2282_v28  ;;  %v4829_v15 = vld [vmem:[%s5121_s28 + $0x88] sm:$0xff]   ;;  %v4830_v18 = vld [vmem:[%s5121_s28 + $0x40] sm:$0xff]  }
 0xe51   : > { %v2044_v17 = vadd.f32 %v5399_v44, %v1910_v12  ;;  %v2910_v61 = vld [vmem:[%s5106_s4 + $0xe0] sm:$0xff]  ;;  %v2909_v62 = vld [vmem:[%s5106_s4 + $0xa8] sm:$0xff] }
 0xe52   : > { %v2289_v29 = vpack.c.bf16 %v2285_v21, %v2281_v19  ;;  %v2291_v26 = vpack.c.bf16 %v2287_v23, %v2283_v20  ;;  %v1997_v19 = vadd.f32 %v5393_v38, %v1902_v11  ;;  %v2040_v20 = vadd.f32 %v5395_v39, %v1910_v12  ;;  %v4833_v44 = vld [vmem:[%s5121_s28 + $0x80] sm:$0xff]   ;;  %v4856_v11 = vld [vmem:[%s5121_s28 + $0x210] sm:$0xff]  }
 0xe53   : > { %v2052_v21 = vmax.f32 %v2001_v16, 0.0  ;;  %v2054_v23 = vmax.f32 %v2044_v17, 0.0  ;;  %v4298_v24 = vcombine.high %v2908_v58, %v2910_v61  ;;  %v4300_v25 = vcombine.high %v2909_v62, %v2911_v7  ;;  %v2904_v27 = vld [vmem:[%s5106_s4 + $0x20] sm:$0xff]  ;;  %v4857_v12 = vld [vmem:[%s5121_s28 + $0x290] sm:$0xff]   ;;  %v4860_v16 = vld [vmem:[%s5121_s28 + $0x208] sm:$0xff]  }
 0xe54   : > { %2580 = vmatprep.mubr.bf16.mxu0 %v2289_v29  ;;  %2621 = vmatprep.mubr.bf16.mxu1 %v2291_v26  ;;  %v2906_v28 = vld [vmem:[%s5106_s4 + $0x60] sm:$0xff]  ;;  %v2905_v29 = vld [vmem:[%s5106_s4 + $0x28] sm:$0xff]  ;;  %v4297_v38 = vcombine.low %v2908_v58, %v2910_v61  ;;  %v4299_v39 = vcombine.low %v2909_v62, %v2911_v7  ;;  %v5506_v62 = vld [vmem:[%s5106_s4 + $0xb0] sm:$0xff] }
 0xe55   : > { %2581 = vmatmul.mubr.bf16.vlgmr.msra.gmra.mxu0 %v2288_v34  ;;  %2622 = vmatmul.mubr.bf16.vlgmr.msra.gmra.mxu1 %v2290_v36  ;;  %v2907_v26 = vld [vmem:[%s5106_s4 + $0x68] sm:$0xff]  ;;  %v4294_v32 = vcombine.high %v2904_v27, %v2906_v28  ;;  %v4864_v58 = vld [vmem:[%s5121_s28 + $0x200] sm:$0xff]   ;;  %v5509_v7 = vld [vmem:[%s5106_s4 + $0xf0] sm:$0xff] }
 0xe56   : > { %4474 = vmatpush3.bf16.msra.mxu0 %v4804_v30  ;;  %4496 = vmatpush3.bf16.msra.mxu1 %v4805_v31  ;;  %v2048_v30 = vmax.f32 %v1997_v19, 0.0  ;;  %v2050_v31 = vmax.f32 %v2040_v20, 0.0  ;;  %v4296_v36 = vcombine.high %v2905_v29, %v2907_v26  ;;  %v4861_v17 = vld [vmem:[%s5121_s28 + $0x288] sm:$0xff]   ;;  %v4865_v61 = vld [vmem:[%s5121_s28 + $0x280] sm:$0xff]   ;;  %v5512_v19 = vld [vmem:[%s5106_s4 + $0xb8] sm:$0xff]  ;;  %v4340_v20 = vcombine.high %v5506_v62, %v5509_v7 }
 0xe57   : > { %2854 = vmatprep.mubr.bf16.mxu0 %v2057_v41  ;;  %2895 = vmatprep.mubr.bf16.mxu1 %v2059_v42  ;;  %v4834_v41 = vld [vmem:[%s5121_s28 + $0x278] sm:$0xff]  }
 0xe58   : > { %4475 = vmatprep.subr.bf16.mxu0 %v4806_v37  ;;  %4497 = vmatprep.subr.bf16.mxu1 %v4807_v40  ;;  %v2056_v33 = vpack.c.bf16 %v2052_v21, %v2048_v30  ;;  %v2058_v34 = vpack.c.bf16 %v2054_v23, %v2050_v31  ;;  %v4293_v37 = vcombine.low %v2904_v27, %v2906_v28  ;;  %v4835_v42 = vld [vmem:[%s5121_s28 + $0x2f8] sm:$0xff]  }
 0xe59   : > { %v4295_v40 = vcombine.low %v2905_v29, %v2907_v26 }
 0xe5a   : > { %4476 = vmatpush3.bf16.msra.mxu0 %v4808_v45  ;;  %4498 = vmatpush3.bf16.msra.mxu1 %v4809_v13  ;;  %v4836_v45 = vld [vmem:[%s5121_s28 + $0x238] sm:$0xff]  }
 0xe5b   : > { %4477 = vmatprep.subr.bf16.mxu0 %v4810_v48  ;;  %4499 = vmatprep.subr.bf16.mxu1 %v4811_v51  ;;  %v4837_v13 = vld [vmem:[%s5121_s28 + $0x2b8] sm:$0xff]   ;;  %v4838_v48 = vld [vmem:[%s5121_s28 + $0x270] sm:$0xff]  }
 0xe5c   : > { %v4839_v51 = vld [vmem:[%s5121_s28 + $0x2f0] sm:$0xff]  }
 0xe5e   : > { %4478 = vmatpush3.bf16.msra.mxu0 %v4812_v52  ;;  %4500 = vmatpush3.bf16.msra.mxu1 %v4813_v53  ;;  %v4840_v52 = vld [vmem:[%s5121_s28 + $0x230] sm:$0xff]  }
 0xe5f   : > { %4479 = vmatprep.subr.bf16.mxu0 %v4814_v54  ;;  %4501 = vmatprep.subr.bf16.mxu1 %v4815_v55  ;;  %v4841_v53 = vld [vmem:[%s5121_s28 + $0x2b0] sm:$0xff]   ;;  %v4842_v54 = vld [vmem:[%s5121_s28 + $0x268] sm:$0xff]  }
 0xe60   : > { %v4843_v55 = vld [vmem:[%s5121_s28 + $0x2e8] sm:$0xff]  }
 0xe62   : > { %4480 = vmatpush3.bf16.msra.mxu0 %v4816_v56  ;;  %4502 = vmatpush3.bf16.msra.mxu1 %v4817_v57  ;;  %v4844_v56 = vld [vmem:[%s5121_s28 + $0x228] sm:$0xff]  }
 0xe63   : > { %4481 = vmatprep.subr.bf16.mxu0 %v4818_v63  ;;  %4503 = vmatprep.subr.bf16.mxu1 %v4819_v0  ;;  %v4845_v57 = vld [vmem:[%s5121_s28 + $0x2a8] sm:$0xff]   ;;  %v4846_v63 = vld [vmem:[%s5121_s28 + $0x260] sm:$0xff]  }
 0xe64   : > { %v4847_v0 = vld [vmem:[%s5121_s28 + $0x2e0] sm:$0xff]  }
 0xe66   : > { %4482 = vmatpush3.bf16.msra.mxu0 %v4820_v1  ;;  %4504 = vmatpush3.bf16.msra.mxu1 %v4821_v2  ;;  %v4848_v1 = vld [vmem:[%s5121_s28 + $0x220] sm:$0xff]  }
 0xe67   : > { %4483 = vmatprep.subr.bf16.mxu0 %v4822_v3  ;;  %4505 = vmatprep.subr.bf16.mxu1 %v4823_v4  ;;  %v4849_v2 = vld [vmem:[%s5121_s28 + $0x2a0] sm:$0xff]   ;;  %v4850_v3 = vld [vmem:[%s5121_s28 + $0x258] sm:$0xff]  }
 0xe68   : > { %v4851_v4 = vld [vmem:[%s5121_s28 + $0x2d8] sm:$0xff]  }
 0xe6a   : > { %4484 = vmatpush3.bf16.msra.mxu0 %v4824_v5  ;;  %4506 = vmatpush3.bf16.msra.mxu1 %v4825_v6  ;;  %v4852_v5 = vld [vmem:[%s5121_s28 + $0x218] sm:$0xff]  }
 0xe6b   : > { %4485 = vmatprep.subr.bf16.mxu0 %v4826_v8  ;;  %4507 = vmatprep.subr.bf16.mxu1 %v4827_v9  ;;  %v4853_v6 = vld [vmem:[%s5121_s28 + $0x298] sm:$0xff]   ;;  %v4854_v8 = vld [vmem:[%s5121_s28 + $0x250] sm:$0xff]  }
 0xe6c   : > { %v4855_v9 = vld [vmem:[%s5121_s28 + $0x2d0] sm:$0xff]  }
 0xe6e   : > { %4486 = vmatpush3.bf16.msra.mxu0 %v4828_v14  ;;  %4508 = vmatpush3.bf16.msra.mxu1 %v4829_v15  ;;  %v4858_v14 = vld [vmem:[%s5121_s28 + $0x248] sm:$0xff]  }
 0xe6f   : > { %4487 = vmatprep.subr.bf16.mxu0 %v4830_v18  ;;  %4509 = vmatprep.subr.bf16.mxu1 %v4831_v22  ;;  %v4859_v15 = vld [vmem:[%s5121_s28 + $0x2c8] sm:$0xff]   ;;  %v4862_v18 = vld [vmem:[%s5121_s28 + $0x240] sm:$0xff]  }
 0xe70   : > { %v4863_v22 = vld [vmem:[%s5121_s28 + $0x2c0] sm:$0xff]  }
 0xe72   : > { %4488 = vmatpush3.bf16.msra.mxu0 %v4832_v43  ;;  %4510 = vmatpush3.bf16.msra.mxu1 %v4833_v44  ;;  %v5517_v43 = vld [vmem:[%s5106_s4 + $0xf8] sm:$0xff]  ;;  %v4339_v44 = vcombine.low %v5506_v62, %v5509_v7 }
 0xe73   : > { %2986 = vmatprep.subr.bf16.mxu0 %v4298_v24  ;;  %3029 = vmatprep.subr.bf16.mxu1 %v4300_v25  ;;  %v4341_v21 = vcombine.low %v5512_v19, %v5517_v43  ;;  %v4342_v23 = vcombine.high %v5512_v19, %v5517_v43  ;;  %v4868_v62 = vld [vmem:[%s5121_s28 + $0x338] sm:$0xff]   ;;  %v4870_v19 = vld [vmem:[%s5121_s28 + $0x370] sm:$0xff]  }
 0xe74   : > { %v4869_v7 = vld [vmem:[%s5121_s28 + $0x3b8] sm:$0xff]   ;;  %v4871_v43 = vld [vmem:[%s5121_s28 + $0x3f0] sm:$0xff]  }
 0xe75   : > { %2855 = vmatmul.mubr.bf16.vlgmr.msra.gmra.mxu0 %v2056_v33  ;;  %2896 = vmatmul.mubr.bf16.vlgmr.msra.gmra.mxu1 %v2058_v34 }
 0xe76   : > { %2987 = vmatpush1.bf16.msra.mxu0 %v4297_v38  ;;  %3030 = vmatpush1.bf16.msra.mxu1 %v4299_v39 }
 0xe77   : > { %2988 = vmatprep.subr.bf16.mxu0 %v4294_v32  ;;  %3031 = vmatprep.subr.bf16.mxu1 %v4296_v36 }
 0xe78   : > { %3006 = vmatprep.mubr.bf16.mxu0 %v4970_v35  ;;  %3049 = vmatprep.mubr.bf16.mxu1 %v4970_v35 }
 0xe7a   : > { %2989 = vmatpush1.bf16.msra.mxu0 %v4293_v37  ;;  %3032 = vmatpush1.bf16.msra.mxu1 %v4295_v40 }
 0xe7b   : > { %4517 = vmatprep.subr.bf16.mxu0 %v4834_v41  ;;  %4539 = vmatprep.subr.bf16.mxu1 %v4835_v42 }
 0xe7d   : > { %4301 = vmatmul.mubr.msk.bf16.vlgmr.msra.gmra.mxu0 %vm806_vm4, %v5347_v60  ;;  %4302 = vmatmul.mubr.msk.bf16.vlgmr.msra.gmra.mxu1 %vm806_vm4, %v5347_v60 }
 0xe7e   : > { %4518 = vmatpush3.bf16.msra.mxu0 %v4836_v45  ;;  %4540 = vmatpush3.bf16.msra.mxu1 %v4837_v13 }
 0xe7f   : > { %4519 = vmatprep.subr.bf16.mxu0 %v4838_v48  ;;  %4541 = vmatprep.subr.bf16.mxu1 %v4839_v51 }
 0xe82   : > { %4520 = vmatpush3.bf16.msra.mxu0 %v4840_v52  ;;  %4542 = vmatpush3.bf16.msra.mxu1 %v4841_v53 }
 0xe83   : > { %4521 = vmatprep.subr.bf16.mxu0 %v4842_v54  ;;  %4543 = vmatprep.subr.bf16.mxu1 %v4843_v55 }
 0xe86   : > { %4522 = vmatpush3.bf16.msra.mxu0 %v4844_v56  ;;  %4544 = vmatpush3.bf16.msra.mxu1 %v4845_v57 }
 0xe87   : > { %4523 = vmatprep.subr.bf16.mxu0 %v4846_v63  ;;  %4545 = vmatprep.subr.bf16.mxu1 %v4847_v0  ;;  %v2912_v63 = vld [vmem:[%s5111_s5 + $0x8] sm:$0xf] }
 0xe8a   : > { %4524 = vmatpush3.bf16.msra.mxu0 %v4848_v1  ;;  %4546 = vmatpush3.bf16.msra.mxu1 %v4849_v2 }
 0xe8b   : > { %4525 = vmatprep.subr.bf16.mxu0 %v4850_v3  ;;  %4547 = vmatprep.subr.bf16.mxu1 %v4851_v4  ;;  %v2921_v3 = vrot.slane %v2912_v63, %v5401_v46  ;;  %v2929_v4 = vrot.slane %v2912_v63, %v5403_v47 }
 0xe8e   : > { %4526 = vmatpush3.bf16.msra.mxu0 %v4852_v5  ;;  %4548 = vmatpush3.bf16.msra.mxu1 %v4853_v6  ;;  %v2917_v5 = vrot.slane %v2912_v63, %v5406_v49  ;;  %v2925_v6 = vrot.slane %v2912_v63, %v5408_v50  ;;  %v4880_v63 = vld [vmem:[%s5121_s28 + $0x320] sm:$0xff]  }
 0xe8f   : > { %4527 = vmatprep.subr.bf16.mxu0 %v4854_v8  ;;  %4549 = vmatprep.subr.bf16.mxu1 %v4855_v9 }
 0xe92   : > { %4528 = vmatpush3.bf16.msra.mxu0 %v4856_v11  ;;  %4550 = vmatpush3.bf16.msra.mxu1 %v4857_v12 }
 0xe93   : > { %4529 = vmatprep.subr.bf16.mxu0 %v4858_v14  ;;  %4551 = vmatprep.subr.bf16.mxu1 %v4859_v15 }
 0xe96   : > { %4530 = vmatpush3.bf16.msra.mxu0 %v4860_v16  ;;  %4552 = vmatpush3.bf16.msra.mxu1 %v4861_v17 }
 0xe97   : > { %4531 = vmatprep.subr.bf16.mxu0 %v4862_v18  ;;  %4553 = vmatprep.subr.bf16.mxu1 %v4863_v22 }
 0xe9a   : > { %4532 = vmatpush3.bf16.msra.mxu0 %v4864_v58  ;;  %4554 = vmatpush3.bf16.msra.mxu1 %v4865_v61 }
 0xe9b   : > { %3494 = vmatprep.subr.bf16.mxu0 %v4340_v20  ;;  %3537 = vmatprep.subr.bf16.mxu1 %v4342_v23 }
 0xf15   : > { %v4445_v24 = vpop.f32.mrf.mxu0  ;;  %v4467_v25 = vpop.f32.mrf.mxu1 }
 0xf17   : > { %v4446_v27 = vpop.f32.mrf.mxu0  ;;  %v4468_v28 = vpop.f32.mrf.mxu1 }
 0xf18   : > { %v4447_v29 = vadd.f32 %v4446_v27, %v4445_v24  ;;  %v4469_v26 = vadd.f32 %v4468_v28, %v4467_v25  ;;  %v3412_v28 = vld [vmem:[%s5106_s4 + $0x30] sm:$0xff] }
 0xf19   : > { %v4448_v30 = vpop.f32.mrf.mxu0  ;;  %v4470_v31 = vpop.f32.mrf.mxu1 }
 0xf1a   : > { %v2624_v38 = vadd.f32 %v4469_v26, %v4447_v29  ;;  %v3414_v29 = vld [vmem:[%s5106_s4 + $0x70] sm:$0xff] }
 0xf1b   : > { %v4449_v39 = vpop.f32.mrf.mxu0  ;;  %v4471_v32 = vpop.f32.mrf.mxu1 }
 0xf1c   : > { %v4450_v33 = vadd.f32 %v4449_v39, %v4448_v30  ;;  %v4472_v34 = vadd.f32 %v4471_v32, %v4470_v31  ;;  %v3413_v39 = vld [vmem:[%s5106_s4 + $0x38] sm:$0xff] }
 0xf1d   : > { %v3415_v32 = vld [vmem:[%s5106_s4 + $0x78] sm:$0xff] }
 0xf1e   : > { %v2627_v36 = vadd.f32 %v4472_v34, %v4450_v33 }
 0xf35   : > { %v4489_v37 = vpop.f32.mrf.mxu0  ;;  %v4511_v40 = vpop.f32.mrf.mxu1 }
 0xf37   : > { %v4490_v41 = vpop.f32.mrf.mxu0  ;;  %v4512_v42 = vpop.f32.mrf.mxu1 }
 0xf38   : > { %v4491_v45 = vadd.f32 %v4490_v41, %v4489_v37  ;;  %v4513_v13 = vadd.f32 %v4512_v42, %v4511_v40  ;;  %v4336_v42 = vcombine.high %v3412_v28, %v3414_v29 }
 0xf39   : > { %v4492_v48 = vpop.f32.mrf.mxu0  ;;  %v4514_v51 = vpop.f32.mrf.mxu1 }
 0xf3a   : > { %v2857_v52 = vadd.f32 %v4491_v45, %v2624_v38  ;;  %v4338_v45 = vcombine.high %v3413_v39, %v3415_v32 }
 0xf3b   : > { %v4493_v53 = vpop.f32.mrf.mxu0  ;;  %v4515_v54 = vpop.f32.mrf.mxu1 }
 0xf3c   : > { %v5525_v55 = vadd.f32 %v4513_v13, %v2857_v52  ;;  %v4494_v56 = vadd.f32 %v4493_v53, %v4492_v48  ;;  %v4516_v57 = vadd.f32 %v4515_v54, %v4514_v51  ;;  %v4335_v13 = vcombine.low %v3412_v28, %v3414_v29  ;;  %v4866_v51 = vld [vmem:[%s5121_s28 + $0x378] sm:$0xff]   ;;  %v4875_v53 = vld [vmem:[%s5121_s28 + $0x3e8] sm:$0xff]  }
 0xf3d   : > { %v3008_v0 = vpop.f32.mrf.mxu0  ;;  %v3051_v1 = vpop.f32.mrf.mxu1  ;;  %v4337_v48 = vcombine.low %v3413_v39, %v3415_v32  ;;  %v4867_v52 = vld [vmem:[%s5121_s28 + $0x3f8] sm:$0xff]   ;;  %v4876_v54 = vld [vmem:[%s5121_s28 + $0x328] sm:$0xff]  }
 0xf3e   : > { %v2860_v2 = vadd.f32 %v4494_v56, %v2627_v36  ;;  %v3009_v22 = vadd.f32 %v3008_v0, %v2917_v5  ;;  %v3052_v58 = vadd.f32 %v3051_v1, %v2925_v6  ;;  %v4877_v56 = vld [vmem:[%s5121_s28 + $0x3a8] sm:$0xff]   ;;  %v4881_v0 = vld [vmem:[%s5121_s28 + $0x3a0] sm:$0xff]   ;;  %v4882_v1 = vld [vmem:[%s5121_s28 + $0x358] sm:$0xff]  }
 0xf3f   : > { %v3010_v8 = vpop.f32.mrf.mxu0  ;;  %v3053_v9 = vpop.f32.mrf.mxu1 }
 0xf40   : > { %v5532_v11 = vadd.f32 %v4516_v57, %v2860_v2  ;;  %v3011_v15 = vadd.f32 %v3010_v8, %v2921_v3  ;;  %v3054_v16 = vadd.f32 %v3053_v9, %v2929_v4  ;;  %v3060_v33 = vmax.f32 %v3009_v22, 0.0  ;;  %v4879_v57 = vld [vmem:[%s5121_s28 + $0x3e0] sm:$0xff]   ;;  %v4883_v2 = vld [vmem:[%s5121_s28 + $0x3d8] sm:$0xff]   ;;  %v4888_v8 = vld [vmem:[%s5121_s28 + $0x310] sm:$0xff]  }
 0xf41   : > { %v3012_v12 = vpop.f32.mrf.mxu0  ;;  %v3055_v14 = vpop.f32.mrf.mxu1  ;;  %v3062_v34 = vmax.f32 %v3052_v58, 0.0  ;;  %v4889_v9 = vld [vmem:[%s5121_s28 + $0x390] sm:$0xff]   ;;  %v4896_v22 = vld [vmem:[%s5121_s28 + $0x300] sm:$0xff]  }
 0xf42   : > { %v3013_v17 = vadd.f32 %v3012_v12, %v2917_v5  ;;  %v3056_v18 = vadd.f32 %v3055_v14, %v2925_v6  ;;  %v3061_v26 = vmax.f32 %v3011_v15, 0.0  ;;  %v3063_v30 = vmax.f32 %v3054_v16, 0.0  ;;  %v4886_v5 = vld [vmem:[%s5121_s28 + $0x350] sm:$0xff]   ;;  %v4890_v12 = vld [vmem:[%s5121_s28 + $0x348] sm:$0xff]   ;;  %v4897_v58 = vld [vmem:[%s5121_s28 + $0x380] sm:$0xff]  }
 0xf43   : > { %v3014_v61 = vpop.f32.mrf.mxu0  ;;  %v3057_v20 = vpop.f32.mrf.mxu1  ;;  %v4887_v6 = vld [vmem:[%s5121_s28 + $0x3d0] sm:$0xff]   ;;  %v4891_v14 = vld [vmem:[%s5121_s28 + $0x3c8] sm:$0xff]  }
 0xf44   : > { %v3015_v23 = vadd.f32 %v3014_v61, %v2921_v3  ;;  %v3058_v24 = vadd.f32 %v3057_v20, %v2929_v4  ;;  %v3064_v25 = vmax.f32 %v3013_v17, 0.0  ;;  %v3066_v27 = vmax.f32 %v3056_v18, 0.0  ;;  %v4884_v3 = vld [vmem:[%s5121_s28 + $0x318] sm:$0xff]   ;;  %v4892_v15 = vld [vmem:[%s5121_s28 + $0x308] sm:$0xff]   ;;  %v4894_v17 = vld [vmem:[%s5121_s28 + $0x340] sm:$0xff]  }
 0xf45   : > { %v4885_v4 = vld [vmem:[%s5121_s28 + $0x398] sm:$0xff]   ;;  %v4893_v16 = vld [vmem:[%s5121_s28 + $0x388] sm:$0xff]   ;;  %v4895_v18 = vld [vmem:[%s5121_s28 + $0x3c0] sm:$0xff]  }
 0xf46   : > { %v3065_v31 = vmax.f32 %v3015_v23, 0.0  ;;  %v3067_v38 = vmax.f32 %v3058_v24, 0.0  ;;  %v3068_v40 = vpack.c.bf16 %v3064_v25, %v3060_v33  ;;  %v3070_v41 = vpack.c.bf16 %v3066_v27, %v3062_v34  ;;  %v3420_v33 = vld [vmem:[%s5111_s5 + $0xc] sm:$0xf] }
 0xf48   : > { %v3069_v36 = vpack.c.bf16 %v3065_v31, %v3061_v26  ;;  %v3071_v37 = vpack.c.bf16 %v3067_v38, %v3063_v30 }
 0xf4a   : > { %3360 = vmatprep.mubr.bf16.mxu0 %v3069_v36  ;;  %3401 = vmatprep.mubr.bf16.mxu1 %v3071_v37 }
 0xf4b   : > { %3361 = vmatmul.mubr.bf16.vlgmr.msra.gmra.mxu0 %v3068_v40  ;;  %3402 = vmatmul.mubr.bf16.vlgmr.msra.gmra.mxu1 %v3070_v41  ;;  %v3429_v40 = vrot.slane %v3420_v33, %v5401_v46  ;;  %v3437_v41 = vrot.slane %v3420_v33, %v5403_v47 }
 0xf4c   : > { %3495 = vmatpush1.bf16.msra.mxu0 %v4339_v44  ;;  %3538 = vmatpush1.bf16.msra.mxu1 %v4341_v21  ;;  %v4873_v44 = vld [vmem:[%s5121_s28 + $0x3b0] sm:$0xff]   ;;  %v4874_v21 = vld [vmem:[%s5121_s28 + $0x368] sm:$0xff]  }
 0xf4d   : > { %3496 = vmatprep.subr.bf16.mxu0 %v4336_v42  ;;  %3539 = vmatprep.subr.bf16.mxu1 %v4338_v45  ;;  %v3425_v42 = vrot.slane %v3420_v33, %v5406_v49  ;;  %v3433_v45 = vrot.slane %v3420_v33, %v5408_v50 }
 0xf4e   : > { %3514 = vmatprep.mubr.bf16.mxu0 %v4970_v35  ;;  %3557 = vmatprep.mubr.bf16.mxu1 %v4970_v35  ;;  %v4872_v35 = vld [vmem:[%s5121_s28 + $0x330] sm:$0xff]  }
 0xf50   : > { %3497 = vmatpush1.bf16.msra.mxu0 %v4335_v13  ;;  %3540 = vmatpush1.bf16.msra.mxu1 %v4337_v48 }
 0xf51   : > { %4561 = vmatprep.subr.bf16.mxu0 %v4866_v51  ;;  %4583 = vmatprep.subr.bf16.mxu1 %v4867_v52 }
 0xf53   : > { %4343 = vmatmul.mubr.msk.bf16.vlgmr.msra.gmra.mxu0 %vm806_vm4, %v5347_v60  ;;  %4344 = vmatmul.mubr.msk.bf16.vlgmr.msra.gmra.mxu1 %vm806_vm4, %v5347_v60  ;;  %v4878_v60 = vld [vmem:[%s5121_s28 + $0x360] sm:$0xff]  }
 0xf54   : > { %4562 = vmatpush3.bf16.msra.mxu0 %v4868_v62  ;;  %4584 = vmatpush3.bf16.msra.mxu1 %v4869_v7 }
 0xf55   : > { %4563 = vmatprep.subr.bf16.mxu0 %v4870_v19  ;;  %4585 = vmatprep.subr.bf16.mxu1 %v4871_v43 }
 0xf58   : > { %4564 = vmatpush3.bf16.msra.mxu0 %v4872_v35  ;;  %4586 = vmatpush3.bf16.msra.mxu1 %v4873_v44 }
 0xf59   : > { %4565 = vmatprep.subr.bf16.mxu0 %v4874_v21  ;;  %4587 = vmatprep.subr.bf16.mxu1 %v4875_v53 }
 0xf5c   : > { %4566 = vmatpush3.bf16.msra.mxu0 %v4876_v54  ;;  %4588 = vmatpush3.bf16.msra.mxu1 %v4877_v56 }
 0xf5d   : > { %4567 = vmatprep.subr.bf16.mxu0 %v4878_v60  ;;  %4589 = vmatprep.subr.bf16.mxu1 %v4879_v57 }
 0xf60   : > { %4568 = vmatpush3.bf16.msra.mxu0 %v4880_v63  ;;  %4590 = vmatpush3.bf16.msra.mxu1 %v4881_v0 }
 0xf61   : > { %4569 = vmatprep.subr.bf16.mxu0 %v4882_v1  ;;  %4591 = vmatprep.subr.bf16.mxu1 %v4883_v2 }
 0xf64   : > { %4570 = vmatpush3.bf16.msra.mxu0 %v4884_v3  ;;  %4592 = vmatpush3.bf16.msra.mxu1 %v4885_v4 }
 0xf65   : > { %4571 = vmatprep.subr.bf16.mxu0 %v4886_v5  ;;  %4593 = vmatprep.subr.bf16.mxu1 %v4887_v6 }
 0xf68   : > { %4572 = vmatpush3.bf16.msra.mxu0 %v4888_v8  ;;  %4594 = vmatpush3.bf16.msra.mxu1 %v4889_v9 }
 0xf69   : > { %4573 = vmatprep.subr.bf16.mxu0 %v4890_v12  ;;  %4595 = vmatprep.subr.bf16.mxu1 %v4891_v14 }
 0xf6c   : > { %4574 = vmatpush3.bf16.msra.mxu0 %v4892_v15  ;;  %4596 = vmatpush3.bf16.msra.mxu1 %v4893_v16 }
 0xf6d   : > { %4575 = vmatprep.subr.bf16.mxu0 %v4894_v17  ;;  %4597 = vmatprep.subr.bf16.mxu1 %v4895_v18 }
 0xf70   : > { %4576 = vmatpush3.bf16.msra.mxu0 %v4896_v22  ;;  %4598 = vmatpush3.bf16.msra.mxu1 %v4897_v58  ;;  %v4377_v22 = vld [vmem:[%s702_s16] ss:$0 sm:$0xff] }
0x100b   : > { %v4533_v61 = vpop.f32.mrf.mxu0  ;;  %v4555_v20 = vpop.f32.mrf.mxu1 }
0x100d   : > { %v4534_v23 = vpop.f32.mrf.mxu0  ;;  %v4556_v24 = vpop.f32.mrf.mxu1 }
0x100e   : > { %v4535_v25 = vadd.f32 %v4534_v23, %v4533_v61  ;;  %v4557_v27 = vadd.f32 %v4556_v24, %v4555_v20 }
0x100f   : > { %v4536_v28 = vpop.f32.mrf.mxu0  ;;  %v4558_v29 = vpop.f32.mrf.mxu1 }
0x1010   : > { %v3404_v26 = vadd.f32 %v4557_v27, %v4535_v25 }
0x1011   : > { %v4537_v30 = vpop.f32.mrf.mxu0  ;;  %v4559_v31 = vpop.f32.mrf.mxu1 }
0x1012   : > { %v3410_v38 = vadd.f32 %v3404_v26, %v5525_v55  ;;  %v4538_v39 = vadd.f32 %v4537_v30, %v4536_v28  ;;  %v4560_v32 = vadd.f32 %v4559_v31, %v4558_v29 }
0x1013   : > { %v3516_v34 = vpop.f32.mrf.mxu0  ;;  %v3559_v36 = vpop.f32.mrf.mxu1 }
0x1014   : > { %v3407_v37 = vadd.f32 %v4560_v32, %v4538_v39  ;;  %v3517_v35 = vadd.f32 %v3516_v34, %v3425_v42  ;;  %v3560_v44 = vadd.f32 %v3559_v36, %v3433_v45 }
0x1015   : > { %v3518_v13 = vpop.f32.mrf.mxu0  ;;  %v3561_v48 = vpop.f32.mrf.mxu1 }
0x1016   : > { %v3411_v51 = vadd.f32 %v3407_v37, %v5532_v11  ;;  %v3519_v62 = vadd.f32 %v3518_v13, %v3429_v40  ;;  %v3562_v7 = vadd.f32 %v3561_v48, %v3437_v41  ;;  %v3568_v63 = vmax.f32 %v3517_v35, 0.0 }
0x1017   : > { %v3520_v52 = vpop.f32.mrf.mxu0  ;;  %v3563_v55 = vpop.f32.mrf.mxu1  ;;  %v3570_v11 = vmax.f32 %v3560_v44, 0.0 }
0x1018   : > { %v3521_v19 = vadd.f32 %v3520_v52, %v3425_v42  ;;  %v3564_v43 = vadd.f32 %v3563_v55, %v3433_v45  ;;  %v3569_v56 = vmax.f32 %v3519_v62, 0.0  ;;  %v3571_v50 = vmax.f32 %v3562_v7, 0.0  ;;  %v4378_v52 = vld [vmem:[%s705_s3] ss:$0 sm:$0xff]  ;;  %s5674_s3 = sld [smem:[#allocation9_spill]] (!%p4380_p5) }
0x1019   : > { %v3522_v21 = vpop.f32.mrf.mxu0  ;;  %v3565_v46 = vpop.f32.mrf.mxu1  ;;  %v4379_v62 = vld [vmem:[%s708_s1] ss:$0 sm:$0xff] }
0x101a   : > { %v3523_v53 = vadd.f32 %v3522_v21, %v3429_v40  ;;  %v3566_v47 = vadd.f32 %v3565_v46, %v3437_v41  ;;  %v3572_v54 = vmax.f32 %v3521_v19, 0.0  ;;  %v3574_v49 = vmax.f32 %v3564_v43, 0.0 }
0x101c   : > { %v3573_v60 = vmax.f32 %v3523_v53, 0.0  ;;  %v3575_v57 = vmax.f32 %v3566_v47, 0.0  ;;  %v3576_v2 = vpack.c.bf16 %v3572_v54, %v3568_v63  ;;  %v3578_v3 = vpack.c.bf16 %v3574_v49, %v3570_v11 }
0x101e   : > { %v3577_v0 = vpack.c.bf16 %v3573_v60, %v3569_v56  ;;  %v3579_v1 = vpack.c.bf16 %v3575_v57, %v3571_v50 }
0x1020   : > { %3868 = vmatprep.mubr.bf16.mxu0 %v3577_v0  ;;  %3909 = vmatprep.mubr.bf16.mxu1 %v3579_v1 }
0x1021   : > { %3869 = vmatmul.mubr.bf16.vlgmr.msra.gmra.mxu0 %v3576_v2  ;;  %3910 = vmatmul.mubr.bf16.vlgmr.msra.gmra.mxu1 %v3578_v3 }
0x10e1   : > { %v4577_v4 = vpop.f32.mrf.mxu0  ;;  %v4599_v5 = vpop.f32.mrf.mxu1 }
0x10e3   : > { %v4578_v6 = vpop.f32.mrf.mxu0  ;;  %v4600_v8 = vpop.f32.mrf.mxu1 }
0x10e4   : > { %v4579_v9 = vadd.f32 %v4578_v6, %v4577_v4  ;;  %v4601_v12 = vadd.f32 %v4600_v8, %v4599_v5 }
0x10e5   : > { %v4580_v14 = vpop.f32.mrf.mxu0  ;;  %v4602_v15 = vpop.f32.mrf.mxu1 }
0x10e6   : > { %v3912_v16 = vadd.f32 %v4601_v12, %v4579_v9 }
0x10e7   : > { %v4581_v17 = vpop.f32.mrf.mxu0  ;;  %v4603_v18 = vpop.f32.mrf.mxu1 }
0x10e8   : > { %v3918_v58 = vadd.f32 %v3912_v16, %v3410_v38  ;;  %v4582_v61 = vadd.f32 %v4581_v17, %v4580_v14  ;;  %v4604_v20 = vadd.f32 %v4603_v18, %v4602_v15 }
0x10ea   : > { %v3915_v23 = vadd.f32 %v4604_v20, %v4582_v61  ;;  %v3927_v24 = vadd.f32 %v4377_v22, %v3918_v58 }
0x10ec   : > { %v3919_v25 = vadd.f32 %v3915_v23, %v3411_v51  ;;  %v3929_v27 = vadd.f32 %v3927_v24, %v5341_v59 }
0x10ee   : > { %v3933_v28 = vsel %vm806_vm4, %v3929_v27, 0.0  ;;  %v3928_v29 = vadd.f32 %v4377_v22, %v3919_v25 }
0x10ef   : > { %3934 = vadd.xlane.f32.xlu0 %v3933_v28 }
0x10f0   : > { %v3930_v26 = vadd.f32 %v3928_v29, %v5343_v10 }
0x10f2   : > { %v3936_v30 = vsel %vm806_vm4, %v3930_v26, 0.0 }
0x10f3   : > { %3937 = vadd.xlane.f32.xlu1 %v3936_v30 }
0x1178   : > { %v3935_v31 = vpop.xlane.xlu0 %3934 }
0x1179   : > { %v3939_v39 = vmul.f32 0.03125, %v3935_v31 }
0x117b   : > { %v3941_v32 = vsub.f32 %v3929_v27, %v3939_v39 }
0x117c   : > { %v3938_v38 = vpop.xlane.xlu1 %3937 }
0x117d   : > { %v3940_v33 = vmul.f32 0.03125, %v3938_v38  ;;  %v3943_v34 = vmul.f32 %v3941_v32, %v3941_v32 }
0x117f   : > { %v3942_v36 = vsub.f32 %v3930_v26, %v3940_v33  ;;  %v3945_v37 = vsel %vm806_vm4, %v3943_v34, 0.0 }
0x1180   : > { %3946 = vadd.xlane.f32.xlu0 %v3945_v37 }
0x1181   : > { %v3944_v59 = vmul.f32 %v3942_v36, %v3942_v36 }
0x1183   : > { %v3948_v40 = vsel %vm806_vm4, %v3944_v59, 0.0 }
0x1184   : > { %3949 = vadd.xlane.f32.xlu1 %v3948_v40 }
0x1209   : > { %v3947_v10 = vpop.xlane.xlu0 %3946 }
0x120a   : > { %v3951_v41 = vmul.f32 0.03125, %v3947_v10 }
0x120c   : > { %v3953_v42 = vadd.f32 1e-05, %v3951_v41 }
0x120d   : > { %v3950_v45 = vpop.xlane.xlu1 %3949 }
0x120e   : > { %4934 = vrsqrt.f32 %v3953_v42  ;;  %v3952_v13 = vmul.f32 0.03125, %v3950_v45 }
0x1210   : > { %v3954_v48 = vadd.f32 1e-05, %v3952_v13 }
0x1212   : > { %4936 = vrsqrt.f32 %v3954_v48 }
0x121b   : > { %v4935_v51 = vpop.eup %4934 }
0x121c   : > { %v3957_v55 = vmul.f32 %v4935_v51, %v3941_v32 }
0x121e   : > { %v3965_v7 = vmul.f32 %v4378_v52, %v3957_v55 }
0x121f   : > { %v4937_v19 = vpop.eup %4936 }
0x1220   : > { %v3973_v43 = vadd.f32 %v4379_v62, %v3965_v7  ;;  %v3958_v35 = vmul.f32 %v4937_v19, %v3942_v36 }
0x1222   : > { %3975 = vst.msk [vmem:[#allocation2] sm:$0xff] %vm806_vm4, %v3973_v43  ;;  %v3966_v44 = vmul.f32 %v4378_v52, %v3958_v35  ;;  %3980 = sbr.rel (%p4380_p5) target bundleno = 4960 (0x1360), region = 96 }
0x1224   : > { %v3974_v21 = vadd.f32 %v4379_v62, %v3966_v44 }
0x1226   : > { %3976 = vst.msk [vmem:[#allocation2 + $0x8] sm:$0xff] %vm806_vm4, %v3974_v21 }
0x1227   : > { %v3983_v46 = vsel %vm806_vm4, %v3973_v43, 0.0  ;;  %v3986_v53 = vsel %vm806_vm4, %v3974_v21, 0.0  ;;  %v4381_v9 = vld [vmem:[%s5674_s3] ss:$0 sm:$0xff] }
0x1228   : > { %3984 = vadd.xlane.f32.xlu0 %v3983_v46  ;;  %v4382_v14 = vld [vmem:[%s5675_s21] ss:$0 sm:$0xff] }
0x122c   : > { %3987 = vadd.xlane.f32.xlu0 %v3986_v53 }
0x12b1   : > { %v3985_v47 = vpop.xlane.xlu0 %3984 }
0x12b2   : > { %v3989_v54 = vmul.f32 0.03125, %v3985_v47 }
0x12b4   : > { %v3991_v49 = vsub.f32 %v3973_v43, %v3989_v54 }
0x12b5   : > { %v3988_v56 = vpop.xlane.xlu0 %3987 }
0x12b6   : > { %v3990_v50 = vmul.f32 0.03125, %v3988_v56  ;;  %v3993_v60 = vmul.f32 %v3991_v49, %v3991_v49 }
0x12b8   : > { %v3992_v57 = vsub.f32 %v3974_v21, %v3990_v50  ;;  %v3995_v63 = vsel %vm806_vm4, %v3993_v60, 0.0 }
0x12b9   : > { %3996 = vadd.xlane.f32.xlu1 %v3995_v63 }
0x12ba   : > { %v3994_v11 = vmul.f32 %v3992_v57, %v3992_v57 }
0x12bc   : > { %v3998_v0 = vsel %vm806_vm4, %v3994_v11, 0.0 }
0x12bd   : > { %3999 = vadd.xlane.f32.xlu1 %v3998_v0 }
0x1342   : > { %v3997_v1 = vpop.xlane.xlu1 %3996 }
0x1343   : > { %v4001_v2 = vmul.f32 0.03125, %v3997_v1 }
0x1345   : > { %v4003_v3 = vadd.f32 1e-05, %v4001_v2 }
0x1346   : > { %v4000_v4 = vpop.xlane.xlu1 %3999 }
0x1347   : > { %4940 = vrsqrt.f32 %v4003_v3  ;;  %v4002_v5 = vmul.f32 0.03125, %v4000_v4 }
0x1349   : > { %v4004_v6 = vadd.f32 1e-05, %v4002_v5 }
0x134b   : > { %4942 = vrsqrt.f32 %v4004_v6 }
0x1354   : > { %v4941_v8 = vpop.eup %4940 }
0x1355   : > { %v4007_v12 = vmul.f32 %v4941_v8, %v3991_v49 }
0x1357   : > { %v4015_v15 = vmul.f32 %v4381_v9, %v4007_v12 }
0x1358   : > { %v4943_v16 = vpop.eup %4942 }
0x1359   : > { %v4023_v17 = vadd.f32 %v4382_v14, %v4015_v15  ;;  %v4008_v18 = vmul.f32 %v4943_v16, %v3992_v57 }
0x135b   : > { %4025 = vst.msk [vmem:[%s5676_s29] sm:$0xff] %vm806_vm4, %v4023_v17  ;;  %v4016_v22 = vmul.f32 %v4381_v9, %v4008_v18 }
0x135d   : > { %v4024_v58 = vadd.f32 %v4382_v14, %v4016_v22 }
0x135f   : > { %4026 = vst.msk [vmem:[%s5676_s29 + $0x8] sm:$0xff] %vm806_vm4, %v4024_v58 }
0x1360 PF: > { %s5677_s18 = sld [smem:[#allocation3_spill]] }
0x1366   : > { %s27_s24 = sadd.s32 1, %s5677_s18  }
0x1367   : > { %p24_p6 = scmp.ge.s32.totalorder %s27_s24, 4  }
0x1369   :  { %26 = sbr.rel (!%p24_p6) target bundleno = 9 (0x9), region = 155 }

// kernel: transformer_forward.3
= control target key start
LH: loop header
LB: loop body
LE: loop exit
PB: predicated region body
PF: predicated region fallthrough
CT: control target
= control target key end

     0   :  { %s8107_s0 = inlined_call_operand.vmem [shape: f32[2,8,16], index: 0, kind: input, shape index: {}]   ;;  %s8108_s1 = inlined_call_operand.vmem [shape: bf16[16,32], index: 1, kind: input, shape index: {}]   ;;  %s8109_s2 = inlined_call_operand.vmem [shape: f32[1,32], index: 2, kind: input, shape index: {}]   ;;  %s8110_s3 = inlined_call_operand.vmem [shape: f32[16,32], index: 3, kind: input, shape index: {}]   ;;  %s8111_s4 = inlined_call_operand.vmem [shape: bf16[2,32,96], index: 4, kind: input, shape index: {}]   ;;  %s8112_s5 = inlined_call_operand.vmem [shape: f32[2,1,96], index: 5, kind: input, shape index: {}]   ;;  %s8113_s6 = inlined_call_operand.vmem [shape: bf16[2,32,32], index: 6, kind: input, shape index: {}]   ;;  %s8114_s7 = inlined_call_operand.vmem [shape: f32[2,1,32], index: 7, kind: input, shape index: {}]   ;;  %s8115_s8 = inlined_call_operand.vmem [shape: f32[2,1,32], index: 8, kind: input, shape index: {}]   ;;  %s8116_s9 = inlined_call_operand.vmem [shape: f32[2,1,32], index: 9, kind: input, shape index: {}]   ;;  %s8117_s10 = inlined_call_operand.vmem [shape: bf16[2,32,32], index: 10, kind: input, shape index: {}]   ;;  %s8118_s11 = inlined_call_operand.vmem [shape: f32[2,1,32], index: 11, kind: input, shape index: {}]   ;;  %s8119_s12 = inlined_call_operand.vmem [shape: bf16[2,32,64], index: 12, kind: input, shape index: {}]   ;;  %s8120_s13 = inlined_call_operand.vmem [shape: f32[2,1,64], index: 13, kind: input, shape index: {}]   ;;  %s8121_s14 = inlined_call_operand.vmem [shape: bf16[2,32,32], index: 14, kind: input, shape index: {}]   ;;  %s8122_s15 = inlined_call_operand.vmem [shape: f32[2,1,32], index: 15, kind: input, shape index: {}]   ;;  %s8123_s16 = inlined_call_operand.vmem [shape: f32[2,1,32], index: 16, kind: input, shape index: {}]   ;;  %s8124_s17 = inlined_call_operand.vmem [shape: f32[2,1,32], index: 17, kind: input, shape index: {}]   ;;  %s8125_s18 = inlined_call_operand.vmem [shape: bf16[2,32,2048], index: 18, kind: input, shape index: {}]   ;;  %s8126_s19 = inlined_call_operand.vmem [shape: f32[2,1,2048], index: 19, kind: input, shape index: {}]   ;;  %s8127_s20 = inlined_call_operand.vmem [shape: bf16[2,2048,32], index: 20, kind: input, shape index: {}]   ;;  %s8128_s21 = inlined_call_operand.vmem [shape: f32[2,1,32], index: 21, kind: input, shape index: {}]   ;;  %s8129_s22 = inlined_call_operand.vmem [shape: f32[2,1,32], index: 22, kind: input, shape index: {}]   ;;  %s8130_s23 = inlined_call_operand.vmem [shape: f32[2,1,32], index: 23, kind: input, shape index: {}]   ;;  %s8131_s24 = inlined_call_operand.vmem [shape: f32[1,32], index: 24, kind: input, shape index: {}]   ;;  %s8132_s25 = inlined_call_operand.vmem [shape: f32[1,32], index: 25, kind: input, shape index: {}]   ;;  %s8133_s26 = inlined_call_operand.vmem [shape: bf16[32,10], index: 26, kind: input, shape index: {}]   ;;  %s8134_s27 = inlined_call_operand.vmem [shape: f32[1,10], index: 27, kind: input, shape index: {}]   ;;  %s8135_s28 = inlined_call_operand.hbm [shape: f32[2,10], index: 28, kind: output, shape index: {}]  }
   0x1   :  { %8146 = sst [smem:[#allocation10_spill]] %s8107_s0 }
   0x2   :  { %8147 = sst [smem:[#allocation11_spill]] %s8108_s1 }
   0x3   :  { %8148 = sst [smem:[#allocation12_spill]] %s8109_s2 }
   0x4   :  { %8149 = sst [smem:[#allocation13_spill]] %s8110_s3 }
   0x5   :  { %8150 = sst [smem:[#allocation14_spill]] %s8111_s4 }
   0x6   :  { %8151 = sst [smem:[#allocation15_spill]] %s8112_s5 }
   0x7   :  { %8152 = sst [smem:[#allocation16_spill]] %s8113_s6 }
   0x8   :  { %8153 = sst [smem:[#allocation17_spill]] %s8114_s7 }
   0x9   :  { %8154 = sst [smem:[#allocation18_spill]] %s8115_s8 }
   0xa   :  { %8155 = sst [smem:[#allocation19_spill]] %s8116_s9 }
   0xb   :  { %8156 = sst [smem:[#allocation20_spill]] %s8117_s10 }
   0xc   :  { %8157 = sst [smem:[#allocation21_spill]] %s8118_s11 }
   0xd   :  { %8158 = sst [smem:[#allocation22_spill]] %s8119_s12 }
   0xe   :  { %8159 = sst [smem:[#allocation23_spill]] %s8121_s14 }
   0xf   :  { %8160 = sst [smem:[#allocation24_spill]] %s8125_s18 }
  0x10   :  { %8161 = sst [smem:[#allocation25_spill]] %s8130_s23 }
  0x11   :  { %8162 = sst [smem:[#allocation26_spill]] %s8131_s24 }
  0x12   :  { %8163 = sst [smem:[#allocation27_spill]] %s8132_s25 }
  0x13   :  { %8164 = sst [smem:[#allocation28_spill]] %s8133_s26 }
  0x14   :  { %8165 = sst [smem:[#allocation29_spill]] %s8134_s27 }
  0x15   :  { %8166 = sst [smem:[#allocation30_spill]] %s8135_s28 }
  0x16   :  { %33 = vsyncpa [#allocation4], 0  ;;  %s7228_s8 = smov 0  }
  0x17 LB: > { %8167 = sst [smem:[#allocation6_spill]] %s7059_s8  ;;  %s7234_s5 = sadd.s32 4294967295, %s7059_s8   ;;  %s7059_s8 = sphi %s7228_s8, %s39_s8  }
  0x18   : > { %8168 = sst [smem:[#allocation7_spill]] %s7234_s5  ;;  %p5965_p0 = scmp.ge.s32.totalorder %s7059_s8, 1 }
  0x19   : > { %p923_p1 = scmp.lt.s32.totalorder %s7059_s8, 3 }
  0x1b   : > { %p924_p2 = pnand %p5965_p0, %p923_p1 }
  0x1d   : > { %927 = sbr.rel (%p924_p2) target bundleno = 8316 (0x207c), region = 132 }
  0x22   : > { %p1062_p3 = scmp.lt.s32.totalorder %s7234_s5, 1  ;;  %s8170_s2 = sld [smem:[#allocation14_spill]] }
  0x23   : > { %s8172_s4 = sld [smem:[#allocation16_spill]] }
  0x24   : > { %s7240_s9 = scalar_select %p1062_p3, %s7234_s5, 1 }
  0x25   : > { %s8177_s12 = sld [smem:[#allocation20_spill]] }
  0x26   : > { %s6223_s30 = sshll.u32 %s7240_s9, 4  ;;  %s8179_s23 = sld [smem:[#allocation22_spill]] }
  0x27   : > { %s8180_s14 = sld [smem:[#allocation23_spill]]  ;;  %s6228_s28 = sshll.u32 %s7240_s9, 8 }
  0x28   : > { %s7250_s7 = scalar_lea.vmem %s8170_s2, %s6223_s30  ;;  %s8181_s18 = sld [smem:[#allocation24_spill]] }
  0x29   : > { %8171 = sst [smem:[#allocation8_spill]] %s7250_s7  ;;  %s7255_s8 = scalar_lea.vmem %s8172_s4, %s6223_s30 }
  0x2a   : > { %8173 = sst [smem:[#allocation9_spill]] %s7255_s8  ;;  %s7313_s6 = scalar_lea.vmem %s8126_s19, %s6223_s30 }
  0x2b   : > { %s7272_s1 = scalar_lea.vmem %s8177_s12, %s6223_s30  ;;  %s6229_s2 = sshll.u32 %s7240_s9, 10 }
  0x2c   : > { %s7281_s26 = scalar_lea.vmem %s8179_s23, %s6223_s30  ;;  %s7323_s24 = scalar_lea.vmem %s8127_s20, %s6229_s2 }
  0x2d   : > { %s7290_s7 = scalar_lea.vmem %s8180_s14, %s6223_s30  ;;  %s8183_s30 = sld [smem:[#allocation7_spill]] }
  0x2e   : > { %s7308_s0 = scalar_lea.vmem %s8181_s18, %s6228_s28 }
  0x33   : > { %p5981_p4 = scmp.ne.s32.totalorder %s8183_s30, 0 }
  0x34   : > { %s8184_s29 = sld [smem:[#allocation11_spill]] (!%p5981_p4) }
  0x35   : > { %1141 = sbr.rel (%p5981_p4) target bundleno = 263 (0x107), region = 136  ;;  %s8185_s12 = sld [smem:[#allocation10_spill]] (!%p5981_p4) }
  0x36   : > { %s8186_s18 = sld [smem:[#allocation12_spill]] (!%p5981_p4) }
  0x3a   : > { %v6772_v0 = vld [vmem:[%s8184_s29] sm:$0xff]   ;;  %v7061_v1 = vmov 0.0   ;;  %vm7062_vm0 = vmmov 0   ;;  %vm1160_vm1 = vcmask 130048   ;;  %vm1205_vm2 = vcmask 261120  }
  0x3b   : > { %6490 = vmatprep.subr.bf16.mxu0 %v7061_v1  ;;  %v1142_v2 = vld [vmem:[%s8185_s12] sm:$0xff]  ;;  %v1143_v3 = vld [vmem:[%s8185_s12 + $0x8] sm:$0xff]  ;;  %6492 = vmatprep.mubr.msk.bf16.mxu0 %vm7062_vm0, %v7061_v1 }
  0x3c   : > { %6491 = vmatpush3.bf16.msra.mxu0 %v6772_v0  ;;  %v1144_v4 = vpack.c.bf16 %v1143_v3, %v1142_v2  ;;  %v5982_v5 = vld [vmem:[%s8186_s18] ss:$0 sm:$0xff] }
  0x3f   : > { %6493 = vmatmul.mubr.msk.bf16.vlgmr.msra.gmra.mxu0 %vm1160_vm1, %v1144_v4 }
  0xff   : > { %v1198_v6 = vpop.f32.mrf.mxu0 }
 0x100   : > { %v1199_v7 = vadd.f32 %v5982_v5, %v1198_v6 }
 0x101   : > { %v6494_v8 = vpop.f32.mrf.mxu0 }
 0x102   : > { %1206 = vst.msk [vmem:[#allocation2] sm:$0xff] %vm1205_vm2, %v1199_v7 }
 0x103   : > { %v1201_v9 = vpop.f32.mrf.mxu0 }
 0x104   : > { %v1202_v10 = vadd.f32 %v5982_v5, %v1201_v9 }
 0x105   : > { %v6495_v11 = vpop.f32.mrf.mxu0 }
 0x106   : > { %1207 = vst.msk [vmem:[#allocation2 + $0x8] sm:$0xff] %vm1205_vm2, %v1202_v10 }
 0x107 PF: > { %s8187_s5 = sld [smem:[#allocation8_spill]]  ;;  %v7063_v13 = vmov 0.0   ;;  %vm7064_vm3 = vmmov 0   ;;  %vm1236_vm4 = vcmask 261120   ;;  %s7065_s27 = smov 96   ;;  %vm1286_vm5 = vcmask 64512  }
 0x108   : > { %6496 = vmatprep.subr.bf16.mxu0 %v7063_v13  ;;  %6504 = vmatprep.subr.bf16.mxu1 %v7063_v13  ;;  %s8188_s11 = sld [smem:[#allocation15_spill]]  ;;  %s7066_s2 = smov 64   ;;  %vm1413_vm6 = vcmask 1043456   ;;  %vm2197_vm7 = vcmask 130048   ;;  %vm2200_vm8 = vcmask 195584  }
 0x109   : > { %6500 = vmatprep.mubr.msk.bf16.mxu0 %vm7064_vm3, %v7063_v13  ;;  %v1208_v15 = vld [vmem:[#allocation2] sm:$0xff]  ;;  %6506 = vmatprep.mubr.msk.bf16.mxu1 %vm7064_vm3, %v7063_v13  ;;  %s7067_s4 = smov 88   ;;  %s7068_s25 = smov 120  }
 0x10a   : > { %s7069_s14 = smov 56   ;;  %s7070_s23 = smov 80  }
 0x10b   : > { %s7071_s18 = smov 112   ;;  %s7073_s3 = smov 72  }
 0x10c   : > { %s7074_s30 = smov 104   ;;  %s8191_s10 = sld [smem:[#allocation17_spill]] }
 0x10d   : > { %v6803_v12 = vld [vmem:[%s8187_s5 + $0x8] sm:$0xff]   ;;  %v6804_v14 = vld [vmem:[%s8187_s5] sm:$0xff]   ;;  %s7072_s5 = smov 48  }
 0x10e   : > { %6497 = vmatpush3.bf16.msra.mxu0 %v6803_v12  ;;  %v1209_v16 = vld [vmem:[#allocation2 + $0x8] sm:$0xff]  ;;  %s8189_s29 = scalar_lea.vmem %s8188_s11, %s7240_s9  ;;  %s7075_s11 = smov 40  }
 0x10f   : > { %6498 = vmatprep.subr.bf16.mxu0 %v7063_v13  ;;  %v1212_v17 = vpack.c.bf16 %v1209_v16, %v1208_v15  ;;  %v5985_v18 = vld [vmem:[%s8189_s29] ss:$0 sm:$0xff]  ;;  %s7076_s29 = smov 8  }
 0x112   : > { %6499 = vmatpush3.bf16.msra.mxu0 %v6804_v14  ;;  %s8192_s28 = scalar_lea.vmem %s8191_s10, %s7240_s9 }
 0x113   : > { %6510 = vmatprep.subr.bf16.mxu0 %v7063_v13 }
 0x115   : > { %6501 = vmatmul.mubr.msk.bf16.vlgmr.msra.gmra.mxu0 %vm1236_vm4, %v1212_v17 }
 0x116   : > { %6512 = vmatprep.mubr.msk.bf16.mxu0 %vm7064_vm3, %v7063_v13 }
 0x1d5   : > { %v1274_v19 = vpop.f32.mrf.mxu0 }
 0x1d6   : > { %v1275_v20 = vadd.f32 %v5985_v18, %v1274_v19 }
 0x1d7   : > { %v6502_v21 = vpop.f32.mrf.mxu0 }
 0x1d8   : > { %v7364_v22 = vpack.c.bf16 %v1275_v20, %v1275_v20 }
 0x1d9   : > { %v1277_v23 = vpop.f32.mrf.mxu0 }
 0x1da   : > { %v1278_v24 = vadd.f32 %v5985_v18, %v1277_v23  ;;  %1284 = vrot.lane.b32.xlu0 %v7364_v22, %s7065_s27 }
 0x1db   : > { %v6503_v25 = vpop.f32.mrf.mxu0 }
 0x1dc   : > { %v7368_v26 = vpack.c.bf16 %v1278_v24, %v1278_v24 }
 0x1de   : > { %1334 = vrot.lane.b32.xlu0 %v7368_v26, %s7065_s27 }
 0x24c   : > { %v1285_v27 = vpop.permute.xlu0 %1284 }
 0x24d   : > { %v1291_v28 = vsel %vm1286_vm5, %v1285_v27, 0 }
 0x24e   : > { %6505 = vmatpush3.bf16.xpose.msra.mxu1 %v1291_v28 }
 0x24f   : > { %6516 = vmatprep.subr.bf16.mxu1 %v7063_v13 }
 0x250   : > { %v1335_v29 = vpop.permute.xlu0 %1334 }
 0x251   : > { %v1340_v30 = vsel %vm1286_vm5, %v1335_v29, 0 }
 0x252   : > { %6511 = vmatpush3.bf16.xpose.msra.mxu0 %v1340_v30 }
 0x253   : > { %6522 = vmatprep.subr.bf16.mxu0 %v7063_v13 }
 0x255   : > { %6507 = vmatmul.mubr.msk.bf16.vlgmr.msra.gmra.mxu1 %vm1286_vm5, %v7364_v22 }
 0x256   : > { %6518 = vmatprep.mubr.msk.bf16.mxu1 %vm7064_vm3, %v7063_v13 }
 0x259   : > { %6513 = vmatmul.mubr.msk.bf16.vlgmr.msra.gmra.mxu0 %vm1286_vm5, %v7368_v26 }
 0x25a   : > { %6524 = vmatprep.mubr.msk.bf16.mxu0 %vm7064_vm3, %v7063_v13 }
 0x315   : > { %v1327_v31 = vpop.f32.mrf.mxu1 }
 0x316   : > { %v1382_v32 = vmul.f32 0.35355338, %v1327_v31 }
 0x317   : > { %v6508_v33 = vpop.f32.mrf.mxu1 }
 0x318   : > { %v1384_v34 = vsel %vm1286_vm5, %v1382_v32, -inf }
 0x319   : > { %1385 = vmax.xlane.f32.xlu1 %v1384_v34  ;;  %v1330_v35 = vpop.f32.mrf.mxu1  ;;  %v1376_v36 = vpop.f32.mrf.mxu0 }
 0x31a   : > { %v1383_v37 = vmul.f32 0.35355338, %v1376_v36 }
 0x31b   : > { %v6509_v38 = vpop.f32.mrf.mxu1  ;;  %v6514_v39 = vpop.f32.mrf.mxu0 }
 0x31c   : > { %v1387_v40 = vsel %vm1286_vm5, %v1383_v37, -inf }
 0x31d   : > { %1388 = vmax.xlane.f32.xlu1 %v1387_v40  ;;  %v1379_v41 = vpop.f32.mrf.mxu0 }
 0x31f   : > { %v6515_v42 = vpop.f32.mrf.mxu0 }
 0x32e   : > { %1408 = vrot.lane.b32.xlu1 %v7364_v22, %s7066_s2 }
 0x332   : > { %1457 = vrot.lane.b32.xlu1 %v7368_v26, %s7066_s2  ;;  %s8145_s2 = smov 16  }
 0x336   : > { %1507 = vrot.lane.b32.xlu1 %v7364_v22, %s7067_s4 }
 0x3a2   : > { %v1386_v43 = vpop.xlane.xlu1 %1385 }
 0x3a3   : > { %v1390_v44 = vsub.f32 %v1382_v32, %v1386_v43 }
 0x3a5   : > { %v1392_v45 = vmul.f32 1.442695, %v1390_v44 }
 0x3a6   : > { %v1389_v46 = vpop.xlane.xlu1 %1388 }
 0x3a7   : > { %6941 = vpow2.f32 %v1392_v45  ;;  %v1391_v47 = vsub.f32 %v1383_v37, %v1389_v46 }
 0x3a9   : > { %v1394_v48 = vmul.f32 1.442695, %v1391_v47 }
 0x3aa   : > { %v1409_v49 = vpop.permute.xlu1 %1408 }
 0x3ab   : > { %6943 = vpow2.f32 %v1394_v48  ;;  %v1415_v50 = vsel %vm1413_vm6, %v1409_v49, 0 }
 0x3ac   : > { %6517 = vmatpush3.bf16.msra.mxu1 %v1415_v50 }
 0x3ad   : > { %6528 = vmatprep.subr.bf16.mxu1 %v7063_v13 }
 0x3ae   : > { %v1458_v51 = vpop.permute.xlu1 %1457 }
 0x3af   : > { %v1463_v52 = vsel %vm1413_vm6, %v1458_v51, 0 }
 0x3b0   : > { %6523 = vmatpush3.bf16.msra.mxu0 %v1463_v52 }
 0x3b1   : > { %6534 = vmatprep.subr.bf16.mxu0 %v7063_v13 }
 0x3b2   : > { %v1508_v57 = vpop.permute.xlu1 %1507 }
 0x3b3   : > { %v1513_v0 = vsel %vm1286_vm5, %v1508_v57, 0 }
 0x3b4   : > { %v6942_v53 = vpop.eup %6941 }
 0x3b5   : > { %v1396_v54 = vsel %vm1286_vm5, %v6942_v53, 0.0 }
 0x3b6   : > { %1397 = vadd.xlane.f32.xlu0 %v1396_v54 }
 0x3b8   : > { %v6944_v55 = vpop.eup %6943 }
 0x3b9   : > { %v1399_v56 = vsel %vm1286_vm5, %v6944_v55, 0.0 }
 0x3ba   : > { %1400 = vadd.xlane.f32.xlu1 %v1399_v56 }
 0x3cb   : > { %1557 = vrot.lane.b32.xlu1 %v7368_v26, %s7067_s4 }
 0x3cc   : > { %1505 = vrot.lane.b32.xlu0 %v7364_v22, %s7068_s25 }
 0x3cf   : > { %1555 = vrot.lane.b32.xlu1 %v7368_v26, %s7068_s25 }
 0x43f   : > { %v1398_v58 = vpop.xlane.xlu0 %1397 }
 0x440   : > { %6945 = vrcp.f32 %v1398_v58 }
 0x443   : > { %v1401_v59 = vpop.xlane.xlu1 %1400  ;;  %v1506_v5 = vpop.permute.xlu0 %1505 }
 0x444   : > { %6947 = vrcp.f32 %v1401_v59 }
 0x447   : > { %v1558_v2 = vpop.permute.xlu1 %1557 }
 0x448   : > { %v1563_v4 = vsel %vm1286_vm5, %v1558_v2, 0 }
 0x44b   : > { %v1556_v6 = vpop.permute.xlu1 %1555 }
 0x44d   : > { %v6946_v60 = vpop.eup %6945 }
 0x44e   : > { %v1404_v61 = vmul.f32 %v6946_v60, %v6942_v53 }
 0x450   : > { %v1406_v62 = vpack.c.bf16 %v1404_v61, %v1404_v61 }
 0x451   : > { %v6948_v63 = vpop.eup %6947 }
 0x452   : > { %6519 = vmatmul.mubr.msk.bf16.vlgmr.msra.gmra.mxu1 %vm1286_vm5, %v1406_v62  ;;  %v1405_v1 = vmul.f32 %v6948_v63, %v6944_v55 }
 0x453   : > { %6529 = vmatpush3.bf16.xpose.msra.mxu1 %v1513_v0  ;;  %6530 = vmatprep.mubr.msk.bf16.mxu1 %vm7064_vm3, %v7063_v13 }
 0x454   : > { %v1407_v3 = vpack.c.bf16 %v1405_v1, %v1405_v1  ;;  %6540 = vmatprep.subr.bf16.mxu1 %v7063_v13 }
 0x456   : > { %6525 = vmatmul.mubr.msk.bf16.vlgmr.msra.gmra.mxu0 %vm1286_vm5, %v1407_v3 }
 0x457   : > { %6535 = vmatpush3.bf16.xpose.msra.mxu0 %v1563_v4  ;;  %6536 = vmatprep.mubr.msk.bf16.mxu0 %vm7064_vm3, %v7063_v13 }
 0x458   : > { %6546 = vmatprep.subr.bf16.mxu0 %v7063_v13 }
 0x45a   : > { %6531 = vmatmul.mubr.msk.bf16.vlgmr.msra.gmra.mxu1 %vm1286_vm5, %v1506_v5 }
 0x45b   : > { %6542 = vmatprep.mubr.msk.bf16.mxu1 %vm7064_vm3, %v7063_v13 }
 0x45e   : > { %6537 = vmatmul.mubr.msk.bf16.vlgmr.msra.gmra.mxu0 %vm1286_vm5, %v1556_v6 }
 0x45f   : > { %6548 = vmatprep.mubr.msk.bf16.mxu0 %vm7064_vm3, %v7063_v13 }
 0x512   : > { %v7418_v7 = vpop.f32.mrf.mxu1 }
 0x514   : > { %v6520_v8 = vpop.f32.mrf.mxu1 }
 0x516   : > { %v1454_v9 = vpop.f32.mrf.mxu1  ;;  %v7420_v10 = vpop.f32.mrf.mxu0 }
 0x518   : > { %v6521_v11 = vpop.f32.mrf.mxu1  ;;  %v6526_v12 = vpop.f32.mrf.mxu0 }
 0x51a   : > { %v1502_v14 = vpop.f32.mrf.mxu0  ;;  %v1549_v15 = vpop.f32.mrf.mxu1 }
 0x51b   : > { %v1605_v16 = vmul.f32 0.35355338, %v1549_v15 }
 0x51c   : > { %v6527_v17 = vpop.f32.mrf.mxu0  ;;  %v6532_v18 = vpop.f32.mrf.mxu1 }
 0x51d   : > { %v1607_v19 = vsel %vm1286_vm5, %v1605_v16, -inf }
 0x51e   : > { %1608 = vmax.xlane.f32.xlu1 %v1607_v19  ;;  %v1552_v20 = vpop.f32.mrf.mxu1  ;;  %v1599_v21 = vpop.f32.mrf.mxu0 }
 0x51f   : > { %v1606_v23 = vmul.f32 0.35355338, %v1599_v21 }
 0x520   : > { %v6533_v24 = vpop.f32.mrf.mxu1  ;;  %v6538_v25 = vpop.f32.mrf.mxu0 }
 0x521   : > { %v1610_v27 = vsel %vm1286_vm5, %v1606_v23, -inf }
 0x522   : > { %1611 = vmax.xlane.f32.xlu0 %v1610_v27  ;;  %v1602_v28 = vpop.f32.mrf.mxu0 }
 0x524   : > { %v6539_v29 = vpop.f32.mrf.mxu0 }
 0x52f   : > { %1631 = vrot.lane.b32.xlu1 %v7364_v22, %s7069_s14 }
 0x533   : > { %1729 = vrot.lane.b32.xlu1 %v7364_v22, %s7070_s23 }
 0x538   : > { %1679 = vrot.lane.b32.xlu0 %v7368_v26, %s7069_s14  ;;  %s8190_s14 = sld [smem:[#allocation9_spill]] }
 0x53c   : > { %1727 = vrot.lane.b32.xlu0 %v7364_v22, %s7071_s18 }
 0x5a7   : > { %v1609_v30 = vpop.xlane.xlu1 %1608 }
 0x5a8   : > { %v1613_v31 = vsub.f32 %v1605_v16, %v1609_v30 }
 0x5aa   : > { %v1615_v32 = vmul.f32 1.442695, %v1613_v31 }
 0x5ab   : > { %v1632_v33 = vpop.permute.xlu1 %1631  ;;  %v1612_v34 = vpop.xlane.xlu0 %1611 }
 0x5ac   : > { %6949 = vpow2.f32 %v1615_v32  ;;  %v1637_v35 = vsel %vm1413_vm6, %v1632_v33, 0  ;;  %v1614_v36 = vsub.f32 %v1606_v23, %v1612_v34 }
 0x5ad   : > { %6541 = vmatpush3.bf16.msra.mxu1 %v1637_v35 }
 0x5ae   : > { %v1617_v37 = vmul.f32 1.442695, %v1614_v36  ;;  %6552 = vmatprep.subr.bf16.mxu1 %v7063_v13 }
 0x5af   : > { %v1680_v38 = vpop.permute.xlu0 %1679  ;;  %v1730_v44 = vpop.permute.xlu1 %1729 }
 0x5b0   : > { %6951 = vpow2.f32 %v1617_v37  ;;  %v1685_v39 = vsel %vm1413_vm6, %v1680_v38, 0  ;;  %v1735_v51 = vsel %vm1286_vm5, %v1730_v44, 0 }
 0x5b1   : > { %6547 = vmatpush3.bf16.msra.mxu0 %v1685_v39 }
 0x5b2   : > { %6558 = vmatprep.subr.bf16.mxu0 %v7063_v13 }
 0x5b3   : > { %v1728_v56 = vpop.permute.xlu0 %1727 }
 0x5b9   : > { %v6950_v40 = vpop.eup %6949 }
 0x5ba   : > { %v1619_v41 = vsel %vm1286_vm5, %v6950_v40, 0.0 }
 0x5bb   : > { %1620 = vadd.xlane.f32.xlu1 %v1619_v41 }
 0x5bd   : > { %v6952_v42 = vpop.eup %6951 }
 0x5be   : > { %v1622_v43 = vsel %vm1286_vm5, %v6952_v42, 0.0 }
 0x5bf   : > { %1623 = vadd.xlane.f32.xlu1 %v1622_v43 }
 0x5d0   : > { %1779 = vrot.lane.b32.xlu1 %v7368_v26, %s7070_s23 }
 0x5d4   : > { %1777 = vrot.lane.b32.xlu1 %v7368_v26, %s7071_s18 }
 0x644   : > { %v1621_v45 = vpop.xlane.xlu1 %1620 }
 0x645   : > { %6953 = vrcp.f32 %v1621_v45 }
 0x648   : > { %v1624_v46 = vpop.xlane.xlu1 %1623 }
 0x649   : > { %6955 = vrcp.f32 %v1624_v46 }
 0x64c   : > { %v1780_v53 = vpop.permute.xlu1 %1779 }
 0x64d   : > { %v1785_v55 = vsel %vm1286_vm5, %v1780_v53, 0 }
 0x650   : > { %v1778_v57 = vpop.permute.xlu1 %1777 }
 0x652   : > { %v6954_v47 = vpop.eup %6953 }
 0x653   : > { %v1627_v48 = vmul.f32 %v6954_v47, %v6950_v40 }
 0x655   : > { %v1629_v49 = vpack.c.bf16 %v1627_v48, %v1627_v48 }
 0x656   : > { %v6956_v50 = vpop.eup %6955 }
 0x657   : > { %6543 = vmatmul.mubr.msk.bf16.vlgmr.msra.gmra.mxu1 %vm1286_vm5, %v1629_v49  ;;  %v1628_v52 = vmul.f32 %v6956_v50, %v6952_v42 }
 0x658   : > { %6553 = vmatpush3.bf16.xpose.msra.mxu1 %v1735_v51  ;;  %6554 = vmatprep.mubr.msk.bf16.mxu1 %vm7064_vm3, %v7063_v13 }
 0x659   : > { %v1630_v54 = vpack.c.bf16 %v1628_v52, %v1628_v52  ;;  %6564 = vmatprep.subr.bf16.mxu1 %v7063_v13 }
 0x65b   : > { %6549 = vmatmul.mubr.msk.bf16.vlgmr.msra.gmra.mxu0 %vm1286_vm5, %v1630_v54 }
 0x65c   : > { %6559 = vmatpush3.bf16.xpose.msra.mxu0 %v1785_v55  ;;  %6560 = vmatprep.mubr.msk.bf16.mxu0 %vm7064_vm3, %v7063_v13 }
 0x65d   : > { %6570 = vmatprep.subr.bf16.mxu0 %v7063_v13 }
 0x65f   : > { %6555 = vmatmul.mubr.msk.bf16.vlgmr.msra.gmra.mxu1 %vm1286_vm5, %v1728_v56 }
 0x660   : > { %6566 = vmatprep.mubr.msk.bf16.mxu1 %vm7064_vm3, %v7063_v13 }
 0x663   : > { %6561 = vmatmul.mubr.msk.bf16.vlgmr.msra.gmra.mxu0 %vm1286_vm5, %v1778_v57 }
 0x664   : > { %6572 = vmatprep.mubr.msk.bf16.mxu0 %vm7064_vm3, %v7063_v13 }
 0x717   : > { %v7456_v58 = vpop.f32.mrf.mxu1 }
 0x719   : > { %v6544_v59 = vpop.f32.mrf.mxu1 }
 0x71b   : > { %v1676_v60 = vpop.f32.mrf.mxu1  ;;  %v7458_v61 = vpop.f32.mrf.mxu0 }
 0x71c   : > { %v6773_v62 = vpack.i.bf16 %v7458_v61, %v7456_v58 }
 0x71d   : > { %v6545_v63 = vpop.f32.mrf.mxu1  ;;  %v6550_v0 = vpop.f32.mrf.mxu0 }
 0x71f   : > { %v1724_v1 = vpop.f32.mrf.mxu0  ;;  %v1771_v2 = vpop.f32.mrf.mxu1 }
 0x720   : > { %v1827_v3 = vmul.f32 0.35355338, %v1771_v2 }
 0x721   : > { %v6551_v4 = vpop.f32.mrf.mxu0  ;;  %v6556_v5 = vpop.f32.mrf.mxu1 }
 0x722   : > { %v1829_v6 = vsel %vm1286_vm5, %v1827_v3, -inf }
 0x723   : > { %1830 = vmax.xlane.f32.xlu0 %v1829_v6  ;;  %v1774_v8 = vpop.f32.mrf.mxu1  ;;  %v1821_v9 = vpop.f32.mrf.mxu0 }
 0x724   : > { %v1828_v11 = vmul.f32 0.35355338, %v1821_v9 }
 0x725   : > { %v6557_v12 = vpop.f32.mrf.mxu1  ;;  %v6562_v14 = vpop.f32.mrf.mxu0 }
 0x726   : > { %v1832_v15 = vsel %vm1286_vm5, %v1828_v11, -inf }
 0x727   : > { %1833 = vmax.xlane.f32.xlu1 %v1832_v15  ;;  %v1824_v16 = vpop.f32.mrf.mxu0 }
 0x729   : > { %v6563_v17 = vpop.f32.mrf.mxu0 }
 0x738   : > { %1853 = vrot.lane.b32.xlu1 %v7364_v22, %s7072_s5 }
 0x73c   : > { %1951 = vrot.lane.b32.xlu1 %v7364_v22, %s7073_s3 }
 0x740   : > { %2001 = vrot.lane.b32.xlu1 %v7368_v26, %s7073_s3 }
 0x744   : > { %1999 = vrot.lane.b32.xlu1 %v7368_v26, %s7074_s30 }
 0x7ac   : > { %v1831_v18 = vpop.xlane.xlu0 %1830 }
 0x7ad   : > { %v1835_v19 = vsub.f32 %v1827_v3, %v1831_v18 }
 0x7af   : > { %v1837_v20 = vmul.f32 1.442695, %v1835_v19 }
 0x7b0   : > { %v1834_v21 = vpop.xlane.xlu1 %1833 }
 0x7b1   : > { %6957 = vpow2.f32 %v1837_v20  ;;  %v1836_v23 = vsub.f32 %v1828_v11, %v1834_v21 }
 0x7b3   : > { %v1839_v24 = vmul.f32 1.442695, %v1836_v23 }
 0x7b4   : > { %v1854_v25 = vpop.permute.xlu1 %1853 }
 0x7b5   : > { %6959 = vpow2.f32 %v1839_v24  ;;  %v1859_v27 = vsel %vm1413_vm6, %v1854_v25, 0 }
 0x7b6   : > { %6565 = vmatpush3.bf16.msra.mxu1 %v1859_v27 }
 0x7b7   : > { %6576 = vmatprep.subr.bf16.mxu1 %v7063_v13 }
 0x7b8   : > { %v1952_v37 = vpop.permute.xlu1 %1951 }
 0x7b9   : > { %v1957_v41 = vsel %vm1286_vm5, %v1952_v37, 0 }
 0x7bc   : > { %v2002_v43 = vpop.permute.xlu1 %2001 }
 0x7bd   : > { %v2007_v45 = vsel %vm1286_vm5, %v2002_v43, 0 }
 0x7be   : > { %v6958_v28 = vpop.eup %6957 }
 0x7bf   : > { %v1841_v29 = vsel %vm1286_vm5, %v6958_v28, 0.0 }
 0x7c0   : > { %1842 = vadd.xlane.f32.xlu0 %v1841_v29  ;;  %v2000_v47 = vpop.permute.xlu1 %1999 }
 0x7c2   : > { %v6960_v30 = vpop.eup %6959 }
 0x7c3   : > { %v1844_v31 = vsel %vm1286_vm5, %v6960_v30, 0.0 }
 0x7c4   : > { %1845 = vadd.xlane.f32.xlu0 %v1844_v31  ;;  %v6806_v31 = vld [vmem:[%s8190_s14] sm:$0xff]  }
 0x7da   : > { %1901 = vrot.lane.b32.xlu0 %v7368_v26, %s7072_s5  ;;  %s8144_s5 = smov 24  }
 0x7de   : > { %1949 = vrot.lane.b32.xlu0 %v7364_v22, %s7074_s30 }
 0x849   : > { %v1843_v32 = vpop.xlane.xlu0 %1842 }
 0x84a   : > { %6961 = vrcp.f32 %v1843_v32 }
 0x84d   : > { %v1846_v33 = vpop.xlane.xlu0 %1845 }
 0x84e   : > { %6963 = vrcp.f32 %v1846_v33 }
 0x851   : > { %v1902_v34 = vpop.permute.xlu0 %1901 }
 0x852   : > { %v1907_v35 = vsel %vm1413_vm6, %v1902_v34, 0 }
 0x853   : > { %6571 = vmatpush3.bf16.msra.mxu0 %v1907_v35 }
 0x854   : > { %6582 = vmatprep.subr.bf16.mxu0 %v7063_v13 }
 0x855   : > { %v1950_v46 = vpop.permute.xlu0 %1949 }
 0x857   : > { %v6962_v36 = vpop.eup %6961 }
 0x858   : > { %v1849_v38 = vmul.f32 %v6962_v36, %v6958_v28 }
 0x85a   : > { %v1851_v39 = vpack.c.bf16 %v1849_v38, %v1849_v38 }
 0x85b   : > { %v6964_v40 = vpop.eup %6963 }
 0x85c   : > { %6567 = vmatmul.mubr.msk.bf16.vlgmr.msra.gmra.mxu1 %vm1286_vm5, %v1851_v39  ;;  %v1850_v42 = vmul.f32 %v6964_v40, %v6960_v30  ;;  %v6805_v30 = vld [vmem:[%s8190_s14 + $0x8] sm:$0xff]  }
 0x85d   : > { %6577 = vmatpush3.bf16.xpose.msra.mxu1 %v1957_v41  ;;  %6578 = vmatprep.mubr.msk.bf16.mxu1 %vm7064_vm3, %v7063_v13 }
 0x85e   : > { %v1852_v44 = vpack.c.bf16 %v1850_v42, %v1850_v42  ;;  %6588 = vmatprep.subr.bf16.mxu1 %v7063_v13 }
 0x860   : > { %6573 = vmatmul.mubr.msk.bf16.vlgmr.msra.gmra.mxu0 %vm1286_vm5, %v1852_v44 }
 0x861   : > { %6583 = vmatpush3.bf16.xpose.msra.mxu0 %v2007_v45  ;;  %6584 = vmatprep.mubr.msk.bf16.mxu0 %vm7064_vm3, %v7063_v13 }
 0x862   : > { %6594 = vmatprep.subr.bf16.mxu0 %v7063_v13 }
 0x864   : > { %6579 = vmatmul.mubr.msk.bf16.vlgmr.msra.gmra.mxu1 %vm1286_vm5, %v1950_v46 }
 0x865   : > { %6590 = vmatprep.mubr.msk.bf16.mxu1 %vm7064_vm3, %v7063_v13 }
 0x868   : > { %6585 = vmatmul.mubr.msk.bf16.vlgmr.msra.gmra.mxu0 %vm1286_vm5, %v2000_v47 }
 0x869   : > { %6596 = vmatprep.mubr.msk.bf16.mxu0 %vm7064_vm3, %v7063_v13 }
 0x91c   : > { %v1895_v48 = vpop.f32.mrf.mxu1 }
 0x91e   : > { %v6568_v49 = vpop.f32.mrf.mxu1 }
 0x920   : > { %v1898_v50 = vpop.f32.mrf.mxu1  ;;  %v1943_v51 = vpop.f32.mrf.mxu0 }
 0x921   : > { %v6778_v8 = vpack.i.bf16 %v1943_v51, %v1895_v48 }
 0x922   : > { %v6569_v52 = vpop.f32.mrf.mxu1  ;;  %v6574_v53 = vpop.f32.mrf.mxu0 }
 0x924   : > { %v1946_v54 = vpop.f32.mrf.mxu0  ;;  %v1993_v55 = vpop.f32.mrf.mxu1 }
 0x925   : > { %v2049_v56 = vmul.f32 0.35355338, %v1993_v55 }
 0x926   : > { %v6575_v57 = vpop.f32.mrf.mxu0  ;;  %v6580_v59 = vpop.f32.mrf.mxu1 }
 0x927   : > { %v2051_v60 = vsel %vm1286_vm5, %v2049_v56, -inf }
 0x928   : > { %2052 = vmax.xlane.f32.xlu0 %v2051_v60  ;;  %v1996_v63 = vpop.f32.mrf.mxu1  ;;  %v2043_v0 = vpop.f32.mrf.mxu0  ;;  %v7017_v60 = vld [vmem:[#allocation2] sm:$0xff] }
 0x929   : > { %v2050_v1 = vmul.f32 0.35355338, %v2043_v0 }
 0x92a   : > { %v6581_v2 = vpop.f32.mrf.mxu1  ;;  %v6586_v3 = vpop.f32.mrf.mxu0 }
 0x92b   : > { %v2054_v4 = vsel %vm1286_vm5, %v2050_v1, -inf }
 0x92c   : > { %2055 = vmax.xlane.f32.xlu1 %v2054_v4  ;;  %v2046_v5 = vpop.f32.mrf.mxu0  ;;  %v7018_v4 = vld [vmem:[#allocation2 + $0x8] sm:$0xff] }
 0x92e   : > { %v6587_v6 = vpop.f32.mrf.mxu0 }
 0x93d   : > { %2075 = vrot.lane.b32.xlu1 %v7364_v22, %s7075_s11 }
 0x941   : > { %6774 = vrot.lane.b32.xlu1 %v6773_v62, %s7076_s29 }
 0x945   : > { %6779 = vrot.lane.b32.xlu1 %v6778_v8, %s8145_s2 }
 0x9b1   : > { %v2053_v9 = vpop.xlane.xlu0 %2052 }
 0x9b2   : > { %v2057_v11 = vsub.f32 %v2049_v56, %v2053_v9 }
 0x9b4   : > { %v2059_v12 = vmul.f32 1.442695, %v2057_v11 }
 0x9b5   : > { %v2056_v14 = vpop.xlane.xlu1 %2055 }
 0x9b6   : > { %6965 = vpow2.f32 %v2059_v12  ;;  %v2058_v15 = vsub.f32 %v2050_v1, %v2056_v14 }
 0x9b8   : > { %v2061_v16 = vmul.f32 1.442695, %v2058_v15 }
 0x9b9   : > { %v2076_v17 = vpop.permute.xlu1 %2075 }
 0x9ba   : > { %6967 = vpow2.f32 %v2061_v16  ;;  %v2081_v22 = vsel %vm1413_vm6, %v2076_v17, 0 }
 0x9bb   : > { %6589 = vmatpush3.bf16.msra.mxu1 %v2081_v22 }
 0x9bc   : > { %6600 = vmatprep.subr.bf16.mxu1 %v7063_v13 }
 0x9bd   : > { %v6775_v41 = vpop.permute.xlu1 %6774 }
 0x9be   : > { %v6777_v43 = vunpack.i.h.bf16 %v6775_v41  ;;  %v6776_v44 = vunpack.i.l.bf16 %v6775_v41 }
 0x9c0   : > { %v2196_v48 = vsel %vm1286_vm5, %v7420_v10, %v6777_v43  ;;  %v2195_v49 = vsel %vm1286_vm5, %v7418_v7, %v6776_v44  ;;  %v6005_v7 = vld [vmem:[%s8192_s28] ss:$0 sm:$0xff] }
 0x9c1   : > { %v6780_v42 = vpop.permute.xlu1 %6779 }
 0x9c2   : > { %v6782_v45 = vunpack.i.h.bf16 %v6780_v42  ;;  %v6781_v46 = vunpack.i.l.bf16 %v6780_v42 }
 0x9c3   : > { %v6966_v58 = vpop.eup %6965 }
 0x9c4   : > { %v2063_v61 = vsel %vm1286_vm5, %v6966_v58, 0.0  ;;  %v2198_v52 = vsel %vm2197_vm7, %v2195_v49, %v6781_v46  ;;  %v2199_v53 = vsel %vm2197_vm7, %v2196_v48, %v6782_v45 }
 0x9c5   : > { %2064 = vadd.xlane.f32.xlu0 %v2063_v61  ;;  %v6807_v61 = vld [vmem:[%s7281_s26 + $0x8] sm:$0xff]  }
 0x9c7   : > { %v6968_v62 = vpop.eup %6967 }
 0x9c8   : > { %v2066_v18 = vsel %vm1286_vm5, %v6968_v62, 0.0 }
 0x9c9   : > { %2067 = vadd.xlane.f32.xlu0 %v2066_v18 }
 0x9df   : > { %2123 = vrot.lane.b32.xlu0 %v7368_v26, %s7075_s11  ;;  %s8193_s11 = sld [smem:[#allocation13_spill]] }
 0x9e5   : > { %v1210_v18 = vld [vmem:[%s8193_s11] sm:$0xff] }
 0xa4e   : > { %v2065_v19 = vpop.xlane.xlu0 %2064 }
 0xa4f   : > { %6969 = vrcp.f32 %v2065_v19  ;;  %v1211_v19 = vld [vmem:[%s8193_s11 + $0x8] sm:$0xff] }
 0xa52   : > { %v2068_v20 = vpop.xlane.xlu0 %2067 }
 0xa53   : > { %6971 = vrcp.f32 %v2068_v20  ;;  %v2386_v20 = vpack.c.bf16 %v1211_v19, %v1210_v18 }
 0xa56   : > { %v2124_v21 = vpop.permute.xlu0 %2123 }
 0xa57   : > { %v2129_v23 = vsel %vm1413_vm6, %v2124_v21, 0  ;;  %v6809_v21 = vld [vmem:[%s7272_s1 + $0x8] sm:$0xff]  }
 0xa58   : > { %6595 = vmatpush3.bf16.msra.mxu0 %v2129_v23  ;;  %v6810_v23 = vld [vmem:[%s7272_s1] sm:$0xff]   ;;  %s8194_s1 = sld [smem:[#allocation18_spill]] }
 0xa59   : > { %6608 = vmatprep.subr.bf16.mxu0 %v7063_v13 }
 0xa5c   : > { %v6970_v24 = vpop.eup %6969 }
 0xa5d   : > { %v2071_v25 = vmul.f32 %v6970_v24, %v6966_v58 }
 0xa5e   : > { %s8195_s28 = scalar_lea.vmem %s8194_s1, %s7240_s9  ;;  %s8198_s1 = scalar_lea.vmem %s8120_s13, %s7240_s9 }
 0xa5f   : > { %v2073_v27 = vpack.c.bf16 %v2071_v25, %v2071_v25  ;;  %v6015_v41 = vld [vmem:[%s8198_s1] ss:$0 sm:$0xff] }
 0xa60   : > { %v6972_v28 = vpop.eup %6971 }
 0xa61   : > { %6591 = vmatmul.mubr.msk.bf16.vlgmr.msra.gmra.mxu1 %vm1286_vm5, %v2073_v27  ;;  %v2072_v29 = vmul.f32 %v6972_v28, %v6968_v62  ;;  %v6808_v62 = vld [vmem:[%s7281_s26] sm:$0xff]   ;;  %s8205_s26 = scalar_lea.vmem %s8124_s17, %s7240_s9 }
 0xa62   : > { %6604 = vmatprep.mubr.msk.bf16.mxu1 %vm7064_vm3, %v7063_v13  ;;  %6601 = vmatpush3.bf16.msra.mxu1 %v6805_v30 }
 0xa63   : > { %v2074_v26 = vpack.c.bf16 %v2072_v29, %v2072_v29  ;;  %6602 = vmatprep.subr.bf16.mxu1 %v7063_v13 }
 0xa65   : > { %6597 = vmatmul.mubr.msk.bf16.vlgmr.msra.gmra.mxu0 %vm1286_vm5, %v2074_v26 }
 0xa66   : > { %6612 = vmatprep.mubr.msk.bf16.mxu0 %vm7064_vm3, %v7063_v13  ;;  %6603 = vmatpush3.bf16.msra.mxu1 %v6806_v31 }
 0xa67   : > { %6616 = vmatprep.subr.bf16.mxu1 %v7063_v13  ;;  %6609 = vmatpush3.bf16.msra.mxu0 %v6809_v21 }
 0xa68   : > { %6610 = vmatprep.subr.bf16.mxu0 %v7063_v13 }
 0xa6b   : > { %6611 = vmatpush3.bf16.msra.mxu0 %v6810_v23 }
 0xa6c   : > { %6624 = vmatprep.subr.bf16.mxu0 %v7063_v13 }
 0xb21   : > { %v2117_v32 = vpop.f32.mrf.mxu1 }
 0xb23   : > { %v6592_v33 = vpop.f32.mrf.mxu1 }
 0xb25   : > { %v2120_v34 = vpop.f32.mrf.mxu1  ;;  %v2165_v35 = vpop.f32.mrf.mxu0 }
 0xb26   : > { %v6783_v36 = vpack.i.bf16 %v2165_v35, %v2117_v32  ;;  %v6009_v32 = vld [vmem:[%s8195_s28] ss:$0 sm:$0xff]  ;;  %s8199_s28 = sld [smem:[#allocation21_spill]] }
 0xb27   : > { %v6593_v37 = vpop.f32.mrf.mxu1  ;;  %v6598_v38 = vpop.f32.mrf.mxu0 }
 0xb28   : > { %6784 = vrot.lane.b32.xlu0 %v6783_v36, %s8144_s5  ;;  %s8196_s5 = sld [smem:[#allocation19_spill]] }
 0xb29   : > { %v2168_v39 = vpop.f32.mrf.mxu0 }
 0xb2b   : > { %v6599_v40 = vpop.f32.mrf.mxu0 }
 0xb2c   : > { %s8200_s10 = scalar_lea.vmem %s8199_s28, %s7240_s9 }
 0xb2e   : > { %s8197_s2 = scalar_lea.vmem %s8196_s5, %s7240_s9 }
 0xb2f   : > { %v6010_v36 = vld [vmem:[%s8197_s2] ss:$0 sm:$0xff]  ;;  %s8207_s2 = scalar_lea.vmem %s8129_s22, %s7240_s9 }
 0xb9a   : > { %v6785_v47 = vpop.permute.xlu0 %6784 }
 0xb9b   : > { %v6787_v50 = vunpack.i.h.bf16 %v6785_v47  ;;  %v6786_v51 = vunpack.i.l.bf16 %v6785_v47 }
 0xb9d   : > { %v2202_v54 = vsel %vm2200_vm8, %v2199_v53, %v6787_v50  ;;  %v2201_v55 = vsel %vm2200_vm8, %v2198_v52, %v6786_v51  ;;  %v6011_v52 = vld [vmem:[%s8200_s10] ss:$0 sm:$0xff]  ;;  %s8208_s10 = sld [smem:[#allocation25_spill]] }
 0xb9e   : > { %v2203_v56 = vpack.c.bf16 %v2202_v54, %v2201_v55 }
 0xba0   : > { %6605 = vmatmul.mubr.msk.bf16.vlgmr.msra.gmra.mxu1 %vm1236_vm4, %v2203_v56 }
 0xba1   : > { %6620 = vmatprep.mubr.msk.bf16.mxu1 %vm7064_vm3, %v7063_v13  ;;  %6617 = vmatpush3.bf16.msra.mxu1 %v6807_v61 }
 0xba2   : > { %6618 = vmatprep.subr.bf16.mxu1 %v7063_v13 }
 0xba5   : > { %6619 = vmatpush3.bf16.msra.mxu1 %v6808_v62 }
 0xba6   : > { %6630 = vmatprep.subr.bf16.mxu1 %v7063_v13 }
 0xba8   : > { %6621 = vmatmul.mubr.msk.bf16.vlgmr.msra.gmra.mxu1 %vm1236_vm4, %v2386_v20 }
 0xba9   : > { %6632 = vmatprep.mubr.msk.bf16.mxu1 %vm7064_vm3, %v7063_v13 }
 0xc60   : > { %v2264_v10 = vpop.f32.mrf.mxu1 }
 0xc61   : > { %v2265_v57 = vadd.f32 %v6005_v7, %v2264_v10 }
 0xc62   : > { %v6606_v59 = vpop.f32.mrf.mxu1 }
 0xc63   : > { %v2271_v63 = vadd.f32 %v7017_v60, %v2265_v57 }
 0xc64   : > { %v2267_v0 = vpop.f32.mrf.mxu1 }
 0xc65   : > { %v2268_v1 = vadd.f32 %v6005_v7, %v2267_v0  ;;  %v2275_v2 = vsel %vm1236_vm4, %v2271_v63, 0.0 }
 0xc66   : > { %2276 = vadd.xlane.f32.xlu1 %v2275_v2  ;;  %v6607_v3 = vpop.f32.mrf.mxu1 }
 0xc67   : > { %v2272_v5 = vadd.f32 %v7018_v4, %v2268_v1 }
 0xc68   : > { %v2447_v42 = vpop.f32.mrf.mxu1 }
 0xc69   : > { %v2278_v6 = vsel %vm1236_vm4, %v2272_v5, 0.0  ;;  %v2448_v43 = vadd.f32 %v6015_v41, %v2447_v42 }
 0xc6a   : > { %2279 = vadd.xlane.f32.xlu0 %v2278_v6  ;;  %v6622_v44 = vpop.f32.mrf.mxu1 }
 0xc6b   : > { %v7583_v45 = vpack.c.bf16 %v2448_v43, %v2448_v43 }
 0xc6c   : > { %v2450_v46 = vpop.f32.mrf.mxu1 }
 0xc6d   : > { %v2451_v47 = vadd.f32 %v6015_v41, %v2450_v46  ;;  %v2462_v48 = vsel %vm1286_vm5, %v7583_v45, 0 }
 0xc6e   : > { %v6623_v49 = vpop.f32.mrf.mxu1 }
 0xc6f   : > { %v7587_v50 = vpack.c.bf16 %v2451_v47, %v2451_v47 }
 0xc71   : > { %v2508_v51 = vsel %vm1286_vm5, %v7587_v50, 0 }
 0xc72   : > { %6631 = vmatpush3.bf16.xpose.msra.mxu1 %v2508_v51 }
 0xc73   : > { %6642 = vmatprep.subr.bf16.mxu1 %v7063_v13 }
 0xcef   : > { %v2277_v8 = vpop.xlane.xlu1 %2276 }
 0xcf0   : > { %v2282_v9 = vmul.f32 0.03125, %v2277_v8 }
 0xcf2   : > { %v2284_v11 = vsub.f32 %v2271_v63, %v2282_v9 }
 0xcf3   : > { %v2280_v12 = vpop.xlane.xlu0 %2279 }
 0xcf4   : > { %v2283_v14 = vmul.f32 0.03125, %v2280_v12  ;;  %v2286_v15 = vmul.f32 %v2284_v11, %v2284_v11 }
 0xcf6   : > { %v2285_v16 = vsub.f32 %v2272_v5, %v2283_v14  ;;  %v2288_v17 = vsel %vm1236_vm4, %v2286_v15, 0.0 }
 0xcf7   : > { %2289 = vadd.xlane.f32.xlu0 %v2288_v17 }
 0xcf8   : > { %v2287_v22 = vmul.f32 %v2285_v16, %v2285_v16 }
 0xcfa   : > { %v2291_v58 = vsel %vm1236_vm4, %v2287_v22, 0.0 }
 0xcfb   : > { %2292 = vadd.xlane.f32.xlu1 %v2291_v58 }
 0xd80   : > { %v2290_v24 = vpop.xlane.xlu0 %2289 }
 0xd81   : > { %v2294_v25 = vmul.f32 0.03125, %v2290_v24 }
 0xd83   : > { %v2296_v27 = vadd.f32 1e-05, %v2294_v25 }
 0xd84   : > { %v2293_v28 = vpop.xlane.xlu1 %2292 }
 0xd85   : > { %6973 = vrsqrt.f32 %v2296_v27  ;;  %v2295_v29 = vmul.f32 0.03125, %v2293_v28 }
 0xd87   : > { %v2297_v26 = vadd.f32 1e-05, %v2295_v29 }
 0xd89   : > { %6975 = vrsqrt.f32 %v2297_v26 }
 0xd92   : > { %v6974_v30 = vpop.eup %6973 }
 0xd93   : > { %v2300_v31 = vmul.f32 %v6974_v30, %v2284_v11 }
 0xd95   : > { %v2308_v35 = vmul.f32 %v6009_v32, %v2300_v31 }
 0xd96   : > { %v6976_v33 = vpop.eup %6975 }
 0xd97   : > { %v2301_v34 = vmul.f32 %v6976_v33, %v2285_v16  ;;  %v7569_v38 = vadd.f32 %v6010_v36, %v2308_v35 }
 0xd99   : > { %v2309_v37 = vmul.f32 %v6009_v32, %v2301_v34 }
 0xd9b   : > { %v7571_v39 = vadd.f32 %v6010_v36, %v2309_v37 }
 0xd9d   : > { %v2318_v40 = vpack.c.bf16 %v7571_v39, %v7569_v38 }
 0xd9f   : > { %6613 = vmatmul.mubr.msk.bf16.vlgmr.msra.gmra.mxu0 %vm1236_vm4, %v2318_v40 }
 0xda0   : > { %6626 = vmatprep.mubr.msk.bf16.mxu0 %vm7064_vm3, %v7063_v13  ;;  %6625 = vmatpush3.bf16.xpose.msra.mxu0 %v2462_v48 }
 0xda1   : > { %6636 = vmatprep.subr.bf16.mxu0 %v7063_v13 }
 0xe5f   : > { %v2379_v53 = vpop.f32.mrf.mxu0 }
 0xe60   : > { %v2380_v54 = vadd.f32 %v6011_v52, %v2379_v53 }
 0xe61   : > { %v6614_v55 = vpop.f32.mrf.mxu0 }
 0xe62   : > { %v7598_v56 = vpack.c.bf16 %v2380_v54, %v2380_v54 }
 0xe63   : > { %v2382_v7 = vpop.f32.mrf.mxu0 }
 0xe64   : > { %v2383_v10 = vadd.f32 %v6011_v52, %v2382_v7  ;;  %6627 = vmatmul.mubr.msk.bf16.vlgmr.msra.gmra.mxu0 %vm1286_vm5, %v7598_v56 }
 0xe65   : > { %v6615_v57 = vpop.f32.mrf.mxu0  ;;  %6638 = vmatprep.mubr.msk.bf16.mxu0 %vm7064_vm3, %v7063_v13 }
 0xe66   : > { %v7604_v59 = vpack.c.bf16 %v2383_v10, %v2383_v10 }
 0xe68   : > { %6633 = vmatmul.mubr.msk.bf16.vlgmr.msra.gmra.mxu1 %vm1286_vm5, %v7604_v59 }
 0xe69   : > { %6644 = vmatprep.mubr.msk.bf16.mxu1 %vm7064_vm3, %v7063_v13 }
 0xf24   : > { %v2498_v60 = vpop.f32.mrf.mxu0 }
 0xf25   : > { %v2550_v63 = vmul.f32 0.35355338, %v2498_v60 }
 0xf26   : > { %v6628_v0 = vpop.f32.mrf.mxu0 }
 0xf27   : > { %v2552_v1 = vsel %vm1286_vm5, %v2550_v63, -inf }
 0xf28   : > { %v2544_v2 = vpop.f32.mrf.mxu1  ;;  %2553 = vmax.xlane.f32.xlu0 %v2552_v1  ;;  %v2501_v3 = vpop.f32.mrf.mxu0 }
 0xf29   : > { %v2551_v4 = vmul.f32 0.35355338, %v2544_v2 }
 0xf2a   : > { %v6629_v5 = vpop.f32.mrf.mxu0  ;;  %v6634_v6 = vpop.f32.mrf.mxu1 }
 0xf2b   : > { %v2555_v8 = vsel %vm1286_vm5, %v2551_v4, -inf }
 0xf2c   : > { %2556 = vmax.xlane.f32.xlu1 %v2555_v8  ;;  %v2547_v9 = vpop.f32.mrf.mxu1 }
 0xf2e   : > { %v6635_v11 = vpop.f32.mrf.mxu1 }
 0xf3d   : > { %2626 = vrot.lane.b32.xlu1 %v7587_v50, %s7065_s27 }
 0xf3e   : > { %2577 = vrot.lane.b32.xlu0 %v7583_v45, %s7065_s27  ;;  %s8201_s27 = smov 16  }
 0xfb1   : > { %v2554_v12 = vpop.xlane.xlu0 %2553 }
 0xfb2   : > { %v2558_v14 = vsub.f32 %v2550_v63, %v2554_v12 }
 0xfb4   : > { %v2560_v15 = vmul.f32 1.442695, %v2558_v14 }
 0xfb5   : > { %v2557_v16 = vpop.xlane.xlu1 %2556  ;;  %v2578_v17 = vpop.permute.xlu0 %2577 }
 0xfb6   : > { %6977 = vpow2.f32 %v2560_v15  ;;  %v2559_v22 = vsub.f32 %v2551_v4, %v2557_v16  ;;  %v2583_v58 = vsel %vm1413_vm6, %v2578_v17, 0 }
 0xfb7   : > { %6637 = vmatpush3.bf16.msra.mxu0 %v2583_v58 }
 0xfb8   : > { %v2562_v61 = vmul.f32 1.442695, %v2559_v22  ;;  %6648 = vmatprep.subr.bf16.mxu0 %v7063_v13 }
 0xfb9   : > { %v2627_v62 = vpop.permute.xlu1 %2626 }
 0xfba   : > { %6979 = vpow2.f32 %v2562_v61  ;;  %v2632_v18 = vsel %vm1413_vm6, %v2627_v62, 0 }
 0xfbb   : > { %6643 = vmatpush3.bf16.msra.mxu1 %v2632_v18 }
 0xfbc   : > { %6654 = vmatprep.subr.bf16.mxu1 %v7063_v13 }
 0xfc3   : > { %v6978_v19 = vpop.eup %6977 }
 0xfc4   : > { %v2564_v20 = vsel %vm1286_vm5, %v6978_v19, 0.0 }
 0xfc5   : > { %2565 = vadd.xlane.f32.xlu0 %v2564_v20 }
 0xfc7   : > { %v6980_v21 = vpop.eup %6979 }
 0xfc8   : > { %v2567_v23 = vsel %vm1286_vm5, %v6980_v21, 0.0 }
 0xfc9   : > { %2568 = vadd.xlane.f32.xlu1 %v2567_v23 }
 0xfda   : > { %2677 = vrot.lane.b32.xlu1 %v7583_v45, %s7068_s25 }
 0xfdb   : > { %2728 = vrot.lane.b32.xlu0 %v7587_v50, %s7068_s25 }
 0xfde   : > { %2675 = vrot.lane.b32.xlu1 %v7598_v56, %s7068_s25 }
 0xfdf   : > { %2726 = vrot.lane.b32.xlu0 %v7604_v59, %s7068_s25 }
0x104e   : > { %v2566_v24 = vpop.xlane.xlu0 %2565 }
0x104f   : > { %6981 = vrcp.f32 %v2566_v24 }
0x1052   : > { %v2569_v25 = vpop.xlane.xlu1 %2568  ;;  %v2729_v33 = vpop.permute.xlu0 %2728 }
0x1053   : > { %6983 = vrcp.f32 %v2569_v25  ;;  %v2734_v35 = vsel %vm1286_vm5, %v2729_v33, 0 }
0x1056   : > { %v2678_v29 = vpop.permute.xlu1 %2677  ;;  %v2727_v37 = vpop.permute.xlu0 %2726 }
0x1057   : > { %v2683_v31 = vsel %vm1286_vm5, %v2678_v29, 0 }
0x105a   : > { %v2676_v36 = vpop.permute.xlu1 %2675 }
0x105c   : > { %v6982_v27 = vpop.eup %6981 }
0x105d   : > { %v2572_v28 = vmul.f32 %v6982_v27, %v6978_v19 }
0x105f   : > { %v2574_v26 = vpack.c.bf16 %v2572_v28, %v2572_v28 }
0x1060   : > { %v6984_v30 = vpop.eup %6983 }
0x1061   : > { %6639 = vmatmul.mubr.msk.bf16.vlgmr.msra.gmra.mxu0 %vm1286_vm5, %v2574_v26  ;;  %v2573_v32 = vmul.f32 %v6984_v30, %v6980_v21 }
0x1062   : > { %6649 = vmatpush3.bf16.xpose.msra.mxu0 %v2683_v31  ;;  %6650 = vmatprep.mubr.msk.bf16.mxu0 %vm7064_vm3, %v7063_v13 }
0x1063   : > { %v2575_v34 = vpack.c.bf16 %v2573_v32, %v2573_v32  ;;  %6660 = vmatprep.subr.bf16.mxu0 %v7063_v13 }
0x1065   : > { %6645 = vmatmul.mubr.msk.bf16.vlgmr.msra.gmra.mxu1 %vm1286_vm5, %v2575_v34 }
0x1066   : > { %6655 = vmatpush3.bf16.xpose.msra.mxu1 %v2734_v35  ;;  %6656 = vmatprep.mubr.msk.bf16.mxu1 %vm7064_vm3, %v7063_v13 }
0x1067   : > { %6666 = vmatprep.subr.bf16.mxu1 %v7063_v13 }
0x1069   : > { %6651 = vmatmul.mubr.msk.bf16.vlgmr.msra.gmra.mxu0 %vm1286_vm5, %v2676_v36 }
0x106a   : > { %6662 = vmatprep.mubr.msk.bf16.mxu0 %vm7064_vm3, %v7063_v13 }
0x106d   : > { %6657 = vmatmul.mubr.msk.bf16.vlgmr.msra.gmra.mxu1 %vm1286_vm5, %v2727_v37 }
0x106e   : > { %6668 = vmatprep.mubr.msk.bf16.mxu1 %vm7064_vm3, %v7063_v13 }
0x1121   : > { %v7646_v40 = vpop.f32.mrf.mxu0 }
0x1123   : > { %v6640_v41 = vpop.f32.mrf.mxu0 }
0x1125   : > { %v2622_v42 = vpop.f32.mrf.mxu0  ;;  %v7648_v43 = vpop.f32.mrf.mxu1 }
0x1127   : > { %v6641_v44 = vpop.f32.mrf.mxu0  ;;  %v6646_v46 = vpop.f32.mrf.mxu1 }
0x1129   : > { %v2671_v47 = vpop.f32.mrf.mxu1  ;;  %v2719_v48 = vpop.f32.mrf.mxu0 }
0x112a   : > { %v2776_v49 = vmul.f32 0.35355338, %v2719_v48 }
0x112b   : > { %v6647_v51 = vpop.f32.mrf.mxu1  ;;  %v6652_v52 = vpop.f32.mrf.mxu0 }
0x112c   : > { %v2778_v53 = vsel %vm1286_vm5, %v2776_v49, -inf }
0x112d   : > { %v2770_v54 = vpop.f32.mrf.mxu1  ;;  %2779 = vmax.xlane.f32.xlu1 %v2778_v53  ;;  %v2722_v55 = vpop.f32.mrf.mxu0 }
0x112e   : > { %v2777_v7 = vmul.f32 0.35355338, %v2770_v54 }
0x112f   : > { %v6653_v10 = vpop.f32.mrf.mxu0  ;;  %v6658_v57 = vpop.f32.mrf.mxu1 }
0x1130   : > { %v2781_v60 = vsel %vm1286_vm5, %v2777_v7, -inf }
0x1131   : > { %2782 = vmax.xlane.f32.xlu0 %v2781_v60  ;;  %v2773_v63 = vpop.f32.mrf.mxu1 }
0x1133   : > { %v6659_v0 = vpop.f32.mrf.mxu1 }
0x113e   : > { %2850 = vrot.lane.b32.xlu1 %v7587_v50, %s7067_s4 }
0x1147   : > { %2802 = vrot.lane.b32.xlu0 %v7583_v45, %s7067_s4  ;;  %s8202_s4 = smov 24  }
0x11b6   : > { %v2780_v1 = vpop.xlane.xlu1 %2779 }
0x11b7   : > { %v2784_v2 = vsub.f32 %v2776_v49, %v2780_v1 }
0x11b9   : > { %v2786_v3 = vmul.f32 1.442695, %v2784_v2 }
0x11ba   : > { %v2783_v4 = vpop.xlane.xlu0 %2782  ;;  %v2851_v5 = vpop.permute.xlu1 %2850 }
0x11bb   : > { %6985 = vpow2.f32 %v2786_v3  ;;  %v2785_v6 = vsub.f32 %v2777_v7, %v2783_v4  ;;  %v2856_v8 = vsel %vm1413_vm6, %v2851_v5, 0 }
0x11bc   : > { %6667 = vmatpush3.bf16.msra.mxu1 %v2856_v8 }
0x11bd   : > { %v2788_v9 = vmul.f32 1.442695, %v2785_v6  ;;  %6678 = vmatprep.subr.bf16.mxu1 %v7063_v13 }
0x11be   : > { %v2803_v11 = vpop.permute.xlu0 %2802 }
0x11bf   : > { %6987 = vpow2.f32 %v2788_v9  ;;  %v2808_v12 = vsel %vm1413_vm6, %v2803_v11, 0 }
0x11c0   : > { %6661 = vmatpush3.bf16.msra.mxu0 %v2808_v12 }
0x11c1   : > { %6672 = vmatprep.subr.bf16.mxu0 %v7063_v13 }
0x11c8   : > { %v6986_v14 = vpop.eup %6985 }
0x11c9   : > { %v2790_v15 = vsel %vm1286_vm5, %v6986_v14, 0.0 }
0x11ca   : > { %2791 = vadd.xlane.f32.xlu0 %v2790_v15 }
0x11cc   : > { %v6988_v16 = vpop.eup %6987 }
0x11cd   : > { %v2793_v17 = vsel %vm1286_vm5, %v6988_v16, 0.0 }
0x11ce   : > { %2794 = vadd.xlane.f32.xlu1 %v2793_v17 }
0x11df   : > { %2900 = vrot.lane.b32.xlu1 %v7583_v45, %s7071_s18 }
0x11e0   : > { %2950 = vrot.lane.b32.xlu0 %v7587_v50, %s7071_s18 }
0x11e3   : > { %2898 = vrot.lane.b32.xlu1 %v7598_v56, %s7071_s18 }
0x11e4   : > { %2948 = vrot.lane.b32.xlu0 %v7604_v59, %s7071_s18 }
0x1253   : > { %v2792_v22 = vpop.xlane.xlu0 %2791 }
0x1254   : > { %6989 = vrcp.f32 %v2792_v22 }
0x1257   : > { %v2795_v58 = vpop.xlane.xlu1 %2794  ;;  %v2951_v24 = vpop.permute.xlu0 %2950 }
0x1258   : > { %6991 = vrcp.f32 %v2795_v58  ;;  %v2956_v27 = vsel %vm1286_vm5, %v2951_v24, 0 }
0x125b   : > { %v2901_v18 = vpop.permute.xlu1 %2900  ;;  %v2949_v29 = vpop.permute.xlu0 %2948 }
0x125c   : > { %v2906_v21 = vsel %vm1286_vm5, %v2901_v18, 0 }
0x125f   : > { %v2899_v28 = vpop.permute.xlu1 %2898 }
0x1261   : > { %v6990_v61 = vpop.eup %6989 }
0x1262   : > { %v2798_v62 = vmul.f32 %v6990_v61, %v6986_v14 }
0x1264   : > { %v2800_v19 = vpack.c.bf16 %v2798_v62, %v2798_v62 }
0x1265   : > { %v6992_v20 = vpop.eup %6991 }
0x1266   : > { %6663 = vmatmul.mubr.msk.bf16.vlgmr.msra.gmra.mxu0 %vm1286_vm5, %v2800_v19  ;;  %v2799_v23 = vmul.f32 %v6992_v20, %v6988_v16 }
0x1267   : > { %6673 = vmatpush3.bf16.xpose.msra.mxu0 %v2906_v21  ;;  %6674 = vmatprep.mubr.msk.bf16.mxu0 %vm7064_vm3, %v7063_v13 }
0x1268   : > { %v2801_v25 = vpack.c.bf16 %v2799_v23, %v2799_v23  ;;  %6684 = vmatprep.subr.bf16.mxu0 %v7063_v13 }
0x126a   : > { %6669 = vmatmul.mubr.msk.bf16.vlgmr.msra.gmra.mxu1 %vm1286_vm5, %v2801_v25 }
0x126b   : > { %6679 = vmatpush3.bf16.xpose.msra.mxu1 %v2956_v27  ;;  %6680 = vmatprep.mubr.msk.bf16.mxu1 %vm7064_vm3, %v7063_v13 }
0x126c   : > { %6690 = vmatprep.subr.bf16.mxu1 %v7063_v13 }
0x126e   : > { %6675 = vmatmul.mubr.msk.bf16.vlgmr.msra.gmra.mxu0 %vm1286_vm5, %v2899_v28 }
0x126f   : > { %6686 = vmatprep.mubr.msk.bf16.mxu0 %vm7064_vm3, %v7063_v13 }
0x1272   : > { %6681 = vmatmul.mubr.msk.bf16.vlgmr.msra.gmra.mxu1 %vm1286_vm5, %v2949_v29 }
0x1273   : > { %6692 = vmatprep.mubr.msk.bf16.mxu1 %vm7064_vm3, %v7063_v13 }
0x1326   : > { %v7686_v26 = vpop.f32.mrf.mxu0 }
0x1328   : > { %v6664_v30 = vpop.f32.mrf.mxu0 }
0x132a   : > { %v2847_v31 = vpop.f32.mrf.mxu0  ;;  %v7688_v32 = vpop.f32.mrf.mxu1 }
0x132b   : > { %v6788_v33 = vpack.i.bf16 %v7688_v32, %v7686_v26 }
0x132c   : > { %v6665_v34 = vpop.f32.mrf.mxu0  ;;  %v6670_v35 = vpop.f32.mrf.mxu1 }
0x132e   : > { %v2895_v36 = vpop.f32.mrf.mxu1  ;;  %v2942_v37 = vpop.f32.mrf.mxu0 }
0x132f   : > { %v2998_v41 = vmul.f32 0.35355338, %v2942_v37 }
0x1330   : > { %v6671_v42 = vpop.f32.mrf.mxu1  ;;  %v6676_v44 = vpop.f32.mrf.mxu0 }
0x1331   : > { %v3000_v46 = vsel %vm1286_vm5, %v2998_v41, -inf }
0x1332   : > { %v2992_v47 = vpop.f32.mrf.mxu1  ;;  %3001 = vmax.xlane.f32.xlu1 %v3000_v46  ;;  %v2945_v48 = vpop.f32.mrf.mxu0 }
0x1333   : > { %v2999_v49 = vmul.f32 0.35355338, %v2992_v47 }
0x1334   : > { %v6677_v51 = vpop.f32.mrf.mxu0  ;;  %v6682_v52 = vpop.f32.mrf.mxu1 }
0x1335   : > { %v3003_v53 = vsel %vm1286_vm5, %v2999_v49, -inf }
0x1336   : > { %3004 = vmax.xlane.f32.xlu0 %v3003_v53  ;;  %v2995_v54 = vpop.f32.mrf.mxu1 }
0x1338   : > { %v6683_v55 = vpop.f32.mrf.mxu1 }
0x1343   : > { %3072 = vrot.lane.b32.xlu1 %v7587_v50, %s7070_s23 }
0x134c   : > { %3024 = vrot.lane.b32.xlu0 %v7583_v45, %s7070_s23  ;;  %s8203_s23 = scalar_lea.vmem %s8122_s15, %s7240_s9 }
0x13bb   : > { %v3002_v7 = vpop.xlane.xlu1 %3001 }
0x13bc   : > { %v3006_v10 = vsub.f32 %v2998_v41, %v3002_v7 }
0x13be   : > { %v3008_v57 = vmul.f32 1.442695, %v3006_v10 }
0x13bf   : > { %v3005_v60 = vpop.xlane.xlu0 %3004  ;;  %v3073_v63 = vpop.permute.xlu1 %3072 }
0x13c0   : > { %6993 = vpow2.f32 %v3008_v57  ;;  %v3007_v0 = vsub.f32 %v2999_v49, %v3005_v60  ;;  %v3078_v1 = vsel %vm1413_vm6, %v3073_v63, 0 }
0x13c1   : > { %6691 = vmatpush3.bf16.msra.mxu1 %v3078_v1 }
0x13c2   : > { %v3010_v2 = vmul.f32 1.442695, %v3007_v0  ;;  %6702 = vmatprep.subr.bf16.mxu1 %v7063_v13 }
0x13c3   : > { %v3025_v3 = vpop.permute.xlu0 %3024 }
0x13c4   : > { %6995 = vpow2.f32 %v3010_v2  ;;  %v3030_v4 = vsel %vm1413_vm6, %v3025_v3, 0 }
0x13c5   : > { %6685 = vmatpush3.bf16.msra.mxu0 %v3030_v4 }
0x13c6   : > { %6696 = vmatprep.subr.bf16.mxu0 %v7063_v13 }
0x13cd   : > { %v6994_v5 = vpop.eup %6993 }
0x13ce   : > { %v3012_v6 = vsel %vm1286_vm5, %v6994_v5, 0.0 }
0x13cf   : > { %3013 = vadd.xlane.f32.xlu0 %v3012_v6 }
0x13d1   : > { %v6996_v8 = vpop.eup %6995 }
0x13d2   : > { %v3015_v9 = vsel %vm1286_vm5, %v6996_v8, 0.0 }
0x13d3   : > { %3016 = vadd.xlane.f32.xlu1 %v3015_v9  ;;  %v6812_v9 = vld [vmem:[%s7290_s7] sm:$0xff]  }
0x13e4   : > { %3122 = vrot.lane.b32.xlu1 %v7583_v45, %s7074_s30 }
0x13e5   : > { %3172 = vrot.lane.b32.xlu0 %v7587_v50, %s7074_s30 }
0x13e8   : > { %3120 = vrot.lane.b32.xlu1 %v7598_v56, %s7074_s30 }
0x13e9   : > { %3170 = vrot.lane.b32.xlu0 %v7604_v59, %s7074_s30  ;;  %s8204_s30 = scalar_lea.vmem %s8123_s16, %s7240_s9 }
0x1458   : > { %v3014_v11 = vpop.xlane.xlu0 %3013 }
0x1459   : > { %6997 = vrcp.f32 %v3014_v11 }
0x145c   : > { %v3017_v12 = vpop.xlane.xlu1 %3016  ;;  %v3173_v62 = vpop.permute.xlu0 %3172 }
0x145d   : > { %6999 = vrcp.f32 %v3017_v12  ;;  %v3178_v59 = vsel %vm1286_vm5, %v3173_v62, 0 }
0x1460   : > { %v3123_v16 = vpop.permute.xlu1 %3122  ;;  %v3171_v19 = vpop.permute.xlu0 %3170 }
0x1461   : > { %v3128_v58 = vsel %vm1286_vm5, %v3123_v16, 0 }
0x1464   : > { %v3121_v18 = vpop.permute.xlu1 %3120 }
0x1466   : > { %v6998_v14 = vpop.eup %6997 }
0x1467   : > { %v3020_v15 = vmul.f32 %v6998_v14, %v6994_v5 }
0x1469   : > { %v3022_v17 = vpack.c.bf16 %v3020_v15, %v3020_v15 }
0x146a   : > { %v7000_v22 = vpop.eup %6999 }
0x146b   : > { %6687 = vmatmul.mubr.msk.bf16.vlgmr.msra.gmra.mxu0 %vm1286_vm5, %v3022_v17  ;;  %v3021_v61 = vmul.f32 %v7000_v22, %v6996_v8  ;;  %v6811_v8 = vld [vmem:[%s7290_s7 + $0x8] sm:$0xff]  }
0x146c   : > { %6697 = vmatpush3.bf16.xpose.msra.mxu0 %v3128_v58  ;;  %6698 = vmatprep.mubr.msk.bf16.mxu0 %vm7064_vm3, %v7063_v13 }
0x146d   : > { %v3023_v56 = vpack.c.bf16 %v3021_v61, %v3021_v61  ;;  %6708 = vmatprep.subr.bf16.mxu0 %v7063_v13 }
0x146f   : > { %6693 = vmatmul.mubr.msk.bf16.vlgmr.msra.gmra.mxu1 %vm1286_vm5, %v3023_v56 }
0x1470   : > { %6703 = vmatpush3.bf16.xpose.msra.mxu1 %v3178_v59  ;;  %6704 = vmatprep.mubr.msk.bf16.mxu1 %vm7064_vm3, %v7063_v13 }
0x1471   : > { %6714 = vmatprep.subr.bf16.mxu1 %v7063_v13 }
0x1473   : > { %6699 = vmatmul.mubr.msk.bf16.vlgmr.msra.gmra.mxu0 %vm1286_vm5, %v3121_v18 }
0x1474   : > { %6710 = vmatprep.mubr.msk.bf16.mxu0 %vm7064_vm3, %v7063_v13 }
0x1477   : > { %6705 = vmatmul.mubr.msk.bf16.vlgmr.msra.gmra.mxu1 %vm1286_vm5, %v3171_v19 }
0x1478   : > { %6716 = vmatprep.mubr.msk.bf16.mxu1 %vm7064_vm3, %v7063_v13 }
0x152b   : > { %v3066_v20 = vpop.f32.mrf.mxu0 }
0x152d   : > { %v6688_v21 = vpop.f32.mrf.mxu0 }
0x152f   : > { %v3069_v23 = vpop.f32.mrf.mxu0  ;;  %v3114_v24 = vpop.f32.mrf.mxu1 }
0x1530   : > { %v6793_v25 = vpack.i.bf16 %v3114_v24, %v3066_v20 }
0x1531   : > { %v6689_v27 = vpop.f32.mrf.mxu0  ;;  %v6694_v28 = vpop.f32.mrf.mxu1 }
0x1533   : > { %v3117_v29 = vpop.f32.mrf.mxu1  ;;  %v3164_v30 = vpop.f32.mrf.mxu0 }
0x1534   : > { %v3220_v31 = vmul.f32 0.35355338, %v3164_v30 }
0x1535   : > { %v6695_v34 = vpop.f32.mrf.mxu1  ;;  %v6700_v35 = vpop.f32.mrf.mxu0 }
0x1536   : > { %v3222_v36 = vsel %vm1286_vm5, %v3220_v31, -inf }
0x1537   : > { %v3214_v37 = vpop.f32.mrf.mxu1  ;;  %3223 = vmax.xlane.f32.xlu1 %v3222_v36  ;;  %v3167_v41 = vpop.f32.mrf.mxu0 }
0x1538   : > { %v3221_v42 = vmul.f32 0.35355338, %v3214_v37 }
0x1539   : > { %v6701_v44 = vpop.f32.mrf.mxu0  ;;  %v6706_v46 = vpop.f32.mrf.mxu1 }
0x153a   : > { %v3225_v47 = vsel %vm1286_vm5, %v3221_v42, -inf }
0x153b   : > { %3226 = vmax.xlane.f32.xlu0 %v3225_v47  ;;  %v3217_v48 = vpop.f32.mrf.mxu1 }
0x153d   : > { %v6707_v49 = vpop.f32.mrf.mxu1 }
0x15c0   : > { %v3224_v51 = vpop.xlane.xlu1 %3223 }
0x15c1   : > { %v3228_v52 = vsub.f32 %v3220_v31, %v3224_v51 }
0x15c3   : > { %v3230_v53 = vmul.f32 1.442695, %v3228_v52 }
0x15c4   : > { %v3227_v54 = vpop.xlane.xlu0 %3226 }
0x15c5   : > { %7001 = vpow2.f32 %v3230_v53  ;;  %v3229_v55 = vsub.f32 %v3221_v42, %v3227_v54 }
0x15c7   : > { %v3232_v7 = vmul.f32 1.442695, %v3229_v55 }
0x15c9   : > { %7003 = vpow2.f32 %v3232_v7 }
0x15d2   : > { %v7002_v10 = vpop.eup %7001 }
0x15d3   : > { %v3234_v57 = vsel %vm1286_vm5, %v7002_v10, 0.0 }
0x15d4   : > { %3235 = vadd.xlane.f32.xlu0 %v3234_v57  ;;  %v3493_v57 = vld [vmem:[%s7308_s0 + $0xc0] sm:$0xff] }
0x15d6   : > { %v7004_v60 = vpop.eup %7003 }
0x15d7   : > { %v3237_v63 = vsel %vm1286_vm5, %v7004_v60, 0.0 }
0x15d8   : > { %3238 = vadd.xlane.f32.xlu1 %v3237_v63 }
0x15e9   : > { %3294 = vrot.lane.b32.xlu1 %v7587_v50, %s7073_s3 }
0x15ea   : > { %3246 = vrot.lane.b32.xlu0 %v7583_v45, %s7073_s3 }
0x15ed   : > { %6789 = vrot.lane.b32.xlu1 %v6788_v33, %s7076_s29 }
0x15ee   : > { %6794 = vrot.lane.b32.xlu0 %v6793_v25, %s8201_s27  ;;  %s8209_s27 = scalar_lea.vmem %s8208_s10, %s7240_s9 }
0x165d   : > { %v3236_v0 = vpop.xlane.xlu0 %3235 }
0x165e   : > { %7005 = vrcp.f32 %v3236_v0  ;;  %v3494_v0 = vld [vmem:[%s7308_s0 + $0xc8] sm:$0xff] }
0x1661   : > { %v3247_v1 = vpop.permute.xlu0 %3246  ;;  %v3239_v2 = vpop.xlane.xlu1 %3238 }
0x1662   : > { %v3252_v3 = vsel %vm1413_vm6, %v3247_v1, 0  ;;  %7007 = vrcp.f32 %v3239_v2 }
0x1663   : > { %6709 = vmatpush3.bf16.msra.mxu0 %v3252_v3 }
0x1664   : > { %6720 = vmatprep.subr.bf16.mxu0 %v7063_v13 }
0x1665   : > { %v3295_v45 = vpop.permute.xlu1 %3294  ;;  %v6795_v18 = vpop.permute.xlu0 %6794 }
0x1666   : > { %v3300_v50 = vsel %vm1413_vm6, %v3295_v45, 0  ;;  %v6797_v20 = vunpack.i.h.bf16 %v6795_v18  ;;  %v6796_v21 = vunpack.i.l.bf16 %v6795_v18  ;;  %v3487_v45 = vld [vmem:[%s7308_s0] sm:$0xff] }
0x1667   : > { %6715 = vmatpush3.bf16.msra.mxu1 %v3300_v50  ;;  %v3489_v50 = vld [vmem:[%s7308_s0 + $0x40] sm:$0xff] }
0x1669   : > { %v6790_v62 = vpop.permute.xlu1 %6789 }
0x166a   : > { %v6792_v56 = vunpack.i.h.bf16 %v6790_v62  ;;  %v6791_v59 = vunpack.i.l.bf16 %v6790_v62 }
0x166b   : > { %v7006_v26 = vpop.eup %7005 }
0x166c   : > { %v3242_v32 = vmul.f32 %v7006_v26, %v7002_v10  ;;  %v3366_v19 = vsel %vm1286_vm5, %v7646_v40, %v6791_v59  ;;  %v6035_v40 = vld [vmem:[%s8203_s23] ss:$0 sm:$0xff]  ;;  %v3488_v26 = vld [vmem:[%s7308_s0 + $0x8] sm:$0xff] }
0x166d   : > { %v3368_v27 = vsel %vm2197_vm7, %v3366_v19, %v6796_v21  ;;  %v3491_v10 = vld [vmem:[%s7308_s0 + $0x80] sm:$0xff] }
0x166e   : > { %v3244_v33 = vpack.c.bf16 %v3242_v32, %v3242_v32  ;;  %v6046_v63 = vcombine.high %v3491_v10, %v3493_v57  ;;  %v6045_v1 = vcombine.low %v3491_v10, %v3493_v57  ;;  %v6042_v32 = vcombine.high %v3487_v45, %v3489_v50  ;;  %v6827_v10 = vld [vmem:[%s7323_s24 + $0x120] sm:$0xff]  }
0x166f   : > { %v7008_v4 = vpop.eup %7007  ;;  %v6828_v57 = vld [vmem:[%s7323_s24 + $0x1a0] sm:$0xff]  }
0x1670   : > { %6711 = vmatmul.mubr.msk.bf16.vlgmr.msra.gmra.mxu0 %vm1286_vm5, %v3244_v33  ;;  %v3243_v5 = vmul.f32 %v7008_v4, %v7004_v60  ;;  %v3492_v60 = vld [vmem:[%s7308_s0 + $0x88] sm:$0xff]  ;;  %3572 = vmatprep.subr.bf16.mxu1 %v6046_v63  ;;  %v6041_v4 = vcombine.low %v3487_v45, %v3489_v50  ;;  %v6830_v63 = vld [vmem:[%s7323_s24 + $0x1d8] sm:$0xff]   ;;  %v6835_v45 = vld [vmem:[%s7323_s24 + $0x110] sm:$0xff]  }
0x1671   : > { %6724 = vmatprep.mubr.msk.bf16.mxu0 %vm7064_vm3, %v7063_v13  ;;  %6721 = vmatpush3.bf16.msra.mxu0 %v6811_v8  ;;  %v6047_v2 = vcombine.low %v3492_v60, %v3494_v0  ;;  %v6048_v3 = vcombine.high %v3492_v60, %v3494_v0  ;;  %v3490_v33 = vld [vmem:[%s7308_s0 + $0x48] sm:$0xff]  ;;  %v3726_v8 = vld [vmem:[%s7308_s0 + $0x90] sm:$0xff]  ;;  %v6829_v60 = vld [vmem:[%s7323_s24 + $0x158] sm:$0xff]  }
0x1672   : > { %v3245_v6 = vpack.c.bf16 %v3243_v5, %v3243_v5  ;;  %6722 = vmatprep.subr.bf16.mxu0 %v7063_v13  ;;  %v3367_v13 = vsel %vm1286_vm5, %v7648_v43, %v6792_v56  ;;  %v6043_v5 = vcombine.low %v3488_v26, %v3490_v33  ;;  %v6831_v0 = vld [vmem:[%s7323_s24 + $0x118] sm:$0xff]   ;;  %v6836_v50 = vld [vmem:[%s7323_s24 + $0x190] sm:$0xff]  }
0x1673   : > { %v3369_v28 = vsel %vm2197_vm7, %v3367_v13, %v6797_v20  ;;  %v6039_v20 = vld [vmem:[%s8204_s30] ss:$0 sm:$0xff] }
0x1674   : > { %6717 = vmatmul.mubr.msk.bf16.vlgmr.msra.gmra.mxu1 %vm1286_vm5, %v3245_v6  ;;  %v6044_v6 = vcombine.high %v3488_v26, %v3490_v33  ;;  %v6837_v26 = vld [vmem:[%s7323_s24 + $0x148] sm:$0xff]  }
0x1675   : > { %6723 = vmatpush3.bf16.msra.mxu0 %v6812_v9  ;;  %3573 = vmatpush1.bf16.msra.mxu1 %v6045_v1  ;;  %v3728_v9 = vld [vmem:[%s7308_s0 + $0xd0] sm:$0xff]  ;;  %v6832_v1 = vld [vmem:[%s7323_s24 + $0x198] sm:$0xff]   ;;  %v6839_v33 = vld [vmem:[%s7323_s24 + $0x108] sm:$0xff]  }
0x1676   : > { %3615 = vmatprep.subr.bf16.mxu0 %v6048_v3  ;;  %3574 = vmatprep.subr.bf16.mxu1 %v6042_v32  ;;  %v6834_v3 = vld [vmem:[%s7323_s24 + $0x1d0] sm:$0xff]   ;;  %v6838_v32 = vld [vmem:[%s7323_s24 + $0x1c8] sm:$0xff]  }
0x1679   : > { %3575 = vmatpush1.bf16.msra.mxu1 %v6041_v4  ;;  %v6840_v4 = vld [vmem:[%s7323_s24 + $0x188] sm:$0xff]  }
0x1730   : > { %v3288_v11 = vpop.f32.mrf.mxu0 }
0x1732   : > { %v6712_v12 = vpop.f32.mrf.mxu0 }
0x1733   : > { %v7079_v12 = vmov 0  }
0x1734   : > { %v3291_v14 = vpop.f32.mrf.mxu0  ;;  %v3336_v15 = vpop.f32.mrf.mxu1  ;;  %3592 = vmatprep.mubr.bf16.mxu1 %v7079_v12 }
0x1735   : > { %v6798_v16 = vpack.i.bf16 %v3336_v15, %v3288_v11  ;;  %v3727_v11 = vld [vmem:[%s7308_s0 + $0x98] sm:$0xff]  ;;  %v6056_v14 = vcombine.high %v3726_v8, %v3728_v9 }
0x1736   : > { %v6713_v17 = vpop.f32.mrf.mxu0  ;;  %v6718_v22 = vpop.f32.mrf.mxu1  ;;  %v3729_v15 = vld [vmem:[%s7308_s0 + $0xd8] sm:$0xff] }
0x1737   : > { %6799 = vrot.lane.b32.xlu1 %v6798_v16, %s8202_s4  ;;  %v6055_v16 = vcombine.low %v3726_v8, %v3728_v9  ;;  %v6057_v17 = vcombine.low %v3727_v11, %v3729_v15  ;;  %v6058_v22 = vcombine.high %v3727_v11, %v3729_v15  ;;  %3804 = vmatprep.subr.bf16.mxu1 %v6056_v14  ;;  %v6843_v8 = vld [vmem:[%s7323_s24 + $0x100] sm:$0xff]   ;;  %v6845_v11 = vld [vmem:[%s7323_s24 + $0x78] sm:$0xff]   ;;  %v3497_v15 = vlaneseq  ;;  %s8210_s4 = sld [smem:[#allocation7_spill]] }
0x1738   : > { %v3339_v58 = vpop.f32.mrf.mxu1  ;;  %v6844_v9 = vld [vmem:[%s7323_s24 + $0x180] sm:$0xff]   ;;  %v6846_v14 = vld [vmem:[%s7323_s24 + $0xf8] sm:$0xff]  }
0x173a   : > { %v6719_v61 = vpop.f32.mrf.mxu1 }
0x173d   : > { %p6212_p5 = scmp.ne.s32.totalorder %s8210_s4, 1 }
0x173e   : > { %s8211_s25 = sld [smem:[#allocation28_spill]] (!%p6212_p5) }
0x173f   : > { %s8212_s29 = sld [smem:[#allocation26_spill]] (!%p6212_p5) }
0x1740   : > { %s8214_s8 = sld [smem:[#allocation29_spill]] (!%p6212_p5) }
0x17a9   : > { %v6800_v23 = vpop.permute.xlu1 %6799 }
0x17aa   : > { %v6802_v24 = vunpack.i.h.bf16 %v6800_v23  ;;  %v6801_v25 = vunpack.i.l.bf16 %v6800_v23 }
0x17ac   : > { %v3371_v29 = vsel %vm2200_vm8, %v3369_v28, %v6802_v24  ;;  %v3370_v30 = vsel %vm2200_vm8, %v3368_v27, %v6801_v25  ;;  %v6040_v25 = vld [vmem:[%s8205_s26] ss:$0 sm:$0xff]  ;;  %v3722_v28 = vld [vmem:[%s7308_s0 + $0x10] sm:$0xff] }
0x17ad   : > { %v3372_v31 = vpack.c.bf16 %v3371_v29, %v3370_v30  ;;  %v3724_v29 = vld [vmem:[%s7308_s0 + $0x50] sm:$0xff]  ;;  %v3723_v30 = vld [vmem:[%s7308_s0 + $0x18] sm:$0xff] }
0x17af   : > { %6725 = vmatmul.mubr.msk.bf16.vlgmr.msra.gmra.mxu0 %vm1236_vm4, %v3372_v31  ;;  %v3725_v31 = vld [vmem:[%s7308_s0 + $0x58] sm:$0xff] }
0x17b0   : > { %3616 = vmatpush1.bf16.msra.mxu0 %v6047_v2  ;;  %3635 = vmatprep.mubr.bf16.mxu0 %v7079_v12  ;;  %v6833_v2 = vld [vmem:[%s7323_s24 + $0x150] sm:$0xff]  }
0x17b1   : > { %3617 = vmatprep.subr.bf16.mxu0 %v6044_v6  ;;  %v6842_v6 = vld [vmem:[%s7323_s24 + $0x1c0] sm:$0xff]  }
0x17b4   : > { %3618 = vmatpush1.bf16.msra.mxu0 %v6043_v5  ;;  %v6841_v5 = vld [vmem:[%s7323_s24 + $0x140] sm:$0xff]  }
0x17b5   : > { %3847 = vmatprep.subr.bf16.mxu0 %v6058_v22 }
0x186f   : > { %v3433_v43 = vpop.f32.mrf.mxu0 }
0x1870   : > { %v3434_v34 = vadd.f32 %v6035_v40, %v3433_v43 }
0x1871   : > { %v6726_v35 = vpop.f32.mrf.mxu0 }
0x1872   : > { %v3440_v36 = vadd.f32 %v3434_v34, %v7569_v38  ;;  %v6052_v35 = vcombine.high %v3722_v28, %v3724_v29 }
0x1873   : > { %v3436_v37 = vpop.f32.mrf.mxu0 }
0x1874   : > { %v3437_v41 = vadd.f32 %v6035_v40, %v3436_v37  ;;  %v3444_v42 = vsel %vm1236_vm4, %v3440_v36, 0.0  ;;  %v6051_v37 = vcombine.low %v3722_v28, %v3724_v29 }
0x1875   : > { %3445 = vadd.xlane.f32.xlu0 %v3444_v42  ;;  %v6727_v44 = vpop.f32.mrf.mxu0  ;;  %v6813_v42 = vld [vmem:[%s7323_s24 + $0x178] sm:$0xff]  }
0x1876   : > { %v3441_v46 = vadd.f32 %v3437_v41, %v7571_v39  ;;  %v6053_v41 = vcombine.low %v3723_v30, %v3725_v31  ;;  %v6814_v44 = vld [vmem:[%s7323_s24 + $0x1f8] sm:$0xff]  }
0x1878   : > { %v3447_v47 = vsel %vm1236_vm4, %v3441_v46, 0.0 }
0x1879   : > { %3448 = vadd.xlane.f32.xlu1 %v3447_v47  ;;  %v6816_v47 = vld [vmem:[%s7323_s24 + $0x1b8] sm:$0xff]  }
0x18fe   : > { %v3446_v48 = vpop.xlane.xlu0 %3445 }
0x18ff   : > { %v3450_v49 = vmul.f32 0.03125, %v3446_v48  ;;  %v6817_v48 = vld [vmem:[%s7323_s24 + $0x170] sm:$0xff]  }
0x1901   : > { %v3452_v51 = vsub.f32 %v3440_v36, %v3450_v49  ;;  %v6054_v36 = vcombine.high %v3723_v30, %v3725_v31  ;;  %v6818_v49 = vld [vmem:[%s7323_s24 + $0x1f0] sm:$0xff]  }
0x1902   : > { %v3449_v52 = vpop.xlane.xlu1 %3448 }
0x1903   : > { %v3451_v38 = vmul.f32 0.03125, %v3449_v52  ;;  %v3454_v53 = vmul.f32 %v3452_v51, %v3452_v51  ;;  %v6820_v52 = vld [vmem:[%s7323_s24 + $0x1b0] sm:$0xff]  }
0x1905   : > { %v3453_v54 = vsub.f32 %v3441_v46, %v3451_v38  ;;  %v3456_v55 = vsel %vm1236_vm4, %v3454_v53, 0.0  ;;  %v6815_v46 = vld [vmem:[%s7323_s24 + $0x138] sm:$0xff]   ;;  %v6821_v38 = vld [vmem:[%s7323_s24 + $0x168] sm:$0xff]  }
0x1906   : > { %3457 = vadd.xlane.f32.xlu0 %v3456_v55  ;;  %v6822_v53 = vld [vmem:[%s7323_s24 + $0x1e8] sm:$0xff]  }
0x1907   : > { %v3455_v7 = vmul.f32 %v3453_v54, %v3453_v54  ;;  %v6824_v55 = vld [vmem:[%s7323_s24 + $0x1a8] sm:$0xff]  }
0x1909   : > { %v3459_v39 = vsel %vm1236_vm4, %v3455_v7, 0.0  ;;  %v6825_v7 = vld [vmem:[%s7323_s24 + $0x160] sm:$0xff]  }
0x190a   : > { %3460 = vadd.xlane.f32.xlu0 %v3459_v39  ;;  %v6826_v39 = vld [vmem:[%s7323_s24 + $0x1e0] sm:$0xff]  }
0x198f   : > { %v3458_v58 = vpop.xlane.xlu0 %3457 }
0x1990   : > { %v3462_v61 = vmul.f32 0.03125, %v3458_v58 }
0x1992   : > { %v3464_v62 = vadd.f32 1e-05, %v3462_v61  ;;  %v3498_v61 = vshrl.u32 %v3497_v15, 7  ;;  %v6849_v15 = vld [vmem:[%s7323_s24 + $0x70] sm:$0xff]  }
0x1993   : > { %v3461_v56 = vpop.xlane.xlu0 %3460 }
0x1994   : > { %7009 = vrsqrt.f32 %v3464_v62  ;;  %v3463_v59 = vmul.f32 0.03125, %v3461_v56 }
0x1996   : > { %v3465_v18 = vadd.f32 1e-05, %v3463_v59 }
0x1998   : > { %7011 = vrsqrt.f32 %v3465_v18 }
0x19a1   : > { %v7010_v13 = vpop.eup %7009 }
0x19a2   : > { %v3468_v19 = vmul.f32 %v7010_v13, %v3452_v51  ;;  %v6819_v51 = vld [vmem:[%s7323_s24 + $0x130] sm:$0xff]   ;;  %v7860_v13 = vsub.s32 1, %v3498_v61 }
0x19a4   : > { %v3476_v23 = vmul.f32 %v6039_v20, %v3468_v19  ;;  %v7862_v19 = vsub.s32 3, %v3498_v61 }
0x19a5   : > { %v7012_v21 = vpop.eup %7011 }
0x19a6   : > { %v3469_v24 = vmul.f32 %v7012_v21, %v3453_v54  ;;  %v7800_v40 = vadd.f32 %v6040_v25, %v3476_v23  ;;  %v6823_v54 = vld [vmem:[%s7323_s24 + $0x128] sm:$0xff]   ;;  %v7865_v21 = vsub.s32 0, %v3498_v61  ;;  %v7867_v23 = vsub.s32 2, %v3498_v61 }
0x19a8   : > { %v3477_v27 = vmul.f32 %v6039_v20, %v3469_v24  ;;  %v3730_v20 = vld [vmem:[%s7313_s6 + $0x4] sm:$0xf] }
0x19a9   : > { %v3747_v28 = vrot.slane %v3730_v20, %v7862_v19  ;;  %v3735_v29 = vrot.slane %v3730_v20, %v7865_v21  ;;  %v3743_v30 = vrot.slane %v3730_v20, %v7867_v23 }
0x19aa   : > { %v7802_v43 = vadd.f32 %v6040_v25, %v3477_v27  ;;  %v3739_v27 = vrot.slane %v3730_v20, %v7860_v13  ;;  %v6853_v20 = vld [vmem:[%s7323_s24 + $0x68] sm:$0xff]  }
0x19ac   : > { %v7806_v34 = vpack.c.bf16 %v7802_v43, %v7800_v40 }
0x19ae   : > { %6049 = vmatmul.mubr.msk.bf16.vlgmr.msra.gmra.mxu1 %vm1236_vm4, %v7806_v34  ;;  %6050 = vmatmul.mubr.msk.bf16.vlgmr.msra.gmra.mxu0 %vm1236_vm4, %v7806_v34 }
0x19af   : > { %3805 = vmatpush1.bf16.msra.mxu1 %v6055_v16  ;;  %3848 = vmatpush1.bf16.msra.mxu0 %v6057_v17 }
0x19b0   : > { %3806 = vmatprep.subr.bf16.mxu1 %v6052_v35  ;;  %3849 = vmatprep.subr.bf16.mxu0 %v6054_v36  ;;  %v7874_v36 = vld [vmem:[%s7313_s6] sm:$0xf] }
0x19b1   : > { %3824 = vmatprep.mubr.bf16.mxu1 %v7079_v12  ;;  %3867 = vmatprep.mubr.bf16.mxu0 %v7079_v12 }
0x19b3   : > { %3807 = vmatpush1.bf16.msra.mxu1 %v6051_v37  ;;  %3850 = vmatpush1.bf16.msra.mxu0 %v6053_v41  ;;  %v3504_v37 = vrot.slane %v7874_v36, %v7860_v13  ;;  %v3512_v41 = vrot.slane %v7874_v36, %v7862_v19 }
0x19b4   : > { %6311 = vmatprep.subr.bf16.mxu1 %v6813_v42  ;;  %6333 = vmatprep.subr.bf16.mxu0 %v6814_v44 }
0x19b6   : > { %6059 = vmatmul.mubr.msk.bf16.vlgmr.msra.gmra.mxu1 %vm1236_vm4, %v7806_v34  ;;  %6060 = vmatmul.mubr.msk.bf16.vlgmr.msra.gmra.mxu0 %vm1236_vm4, %v7806_v34 }
0x19b7   : > { %6312 = vmatpush3.bf16.msra.mxu1 %v6815_v46  ;;  %6334 = vmatpush3.bf16.msra.mxu0 %v6816_v47 }
0x19b8   : > { %6313 = vmatprep.subr.bf16.mxu1 %v6817_v48  ;;  %6335 = vmatprep.subr.bf16.mxu0 %v6818_v49 }
0x19bb   : > { %6314 = vmatpush3.bf16.msra.mxu1 %v6819_v51  ;;  %6336 = vmatpush3.bf16.msra.mxu0 %v6820_v52 }
0x19bc   : > { %6315 = vmatprep.subr.bf16.mxu1 %v6821_v38  ;;  %6337 = vmatprep.subr.bf16.mxu0 %v6822_v53 }
0x19bf   : > { %6316 = vmatpush3.bf16.msra.mxu1 %v6823_v54  ;;  %6338 = vmatpush3.bf16.msra.mxu0 %v6824_v55 }
0x19c0   : > { %6317 = vmatprep.subr.bf16.mxu1 %v6825_v7  ;;  %6339 = vmatprep.subr.bf16.mxu0 %v6826_v39 }
0x19c3   : > { %6318 = vmatpush3.bf16.msra.mxu1 %v6827_v10  ;;  %6340 = vmatpush3.bf16.msra.mxu0 %v6828_v57 }
0x19c4   : > { %6319 = vmatprep.subr.bf16.mxu1 %v6829_v60  ;;  %6341 = vmatprep.subr.bf16.mxu0 %v6830_v63 }
0x19c7   : > { %6320 = vmatpush3.bf16.msra.mxu1 %v6831_v0  ;;  %6342 = vmatpush3.bf16.msra.mxu0 %v6832_v1 }
0x19c8   : > { %6321 = vmatprep.subr.bf16.mxu1 %v6833_v2  ;;  %6343 = vmatprep.subr.bf16.mxu0 %v6834_v3 }
0x19cb   : > { %6322 = vmatpush3.bf16.msra.mxu1 %v6835_v45  ;;  %6344 = vmatpush3.bf16.msra.mxu0 %v6836_v50 }
0x19cc   : > { %6323 = vmatprep.subr.bf16.mxu1 %v6837_v26  ;;  %6345 = vmatprep.subr.bf16.mxu0 %v6838_v32 }
0x19cf   : > { %6324 = vmatpush3.bf16.msra.mxu1 %v6839_v33  ;;  %6346 = vmatpush3.bf16.msra.mxu0 %v6840_v4 }
0x19d0   : > { %6325 = vmatprep.subr.bf16.mxu1 %v6841_v5  ;;  %6347 = vmatprep.subr.bf16.mxu0 %v6842_v6  ;;  %v6847_v5 = vld [vmem:[%s7323_s24 + $0x38] sm:$0xff]  }
0x19d1   : > { %v6848_v6 = vld [vmem:[%s7323_s24 + $0xb8] sm:$0xff]  }
0x19d3   : > { %6326 = vmatpush3.bf16.msra.mxu1 %v6843_v8  ;;  %6348 = vmatpush3.bf16.msra.mxu0 %v6844_v9 }
0x19d4   : > { %6355 = vmatprep.subr.bf16.mxu1 %v6845_v11  ;;  %6377 = vmatprep.subr.bf16.mxu0 %v6846_v14 }
0x1a6e   : > { %v7852_v16 = vpop.f32.mrf.mxu1  ;;  %v7854_v17 = vpop.f32.mrf.mxu0 }
0x1a70   : > { %v3596_v22 = vpop.f32.mrf.mxu1  ;;  %v3639_v58 = vpop.f32.mrf.mxu0 }
0x1a71   : > { %v3597_v10 = vadd.f32 %v3596_v22, %v3504_v37  ;;  %v3640_v57 = vadd.f32 %v3639_v58, %v3512_v41  ;;  %v6850_v22 = vld [vmem:[%s7323_s24 + $0xf0] sm:$0xff]  }
0x1a72   : > { %v7856_v62 = vpop.f32.mrf.mxu1  ;;  %v7858_v56 = vpop.f32.mrf.mxu0 }
0x1a73   : > { %v3647_v8 = vmax.f32 %v3597_v10, 0.0  ;;  %v3649_v9 = vmax.f32 %v3640_v57, 0.0  ;;  %v6874_v10 = vld [vmem:[%s7323_s24 + $0xc0] sm:$0xff]  }
0x1a74   : > { %v3600_v59 = vpop.f32.mrf.mxu1  ;;  %v3643_v18 = vpop.f32.mrf.mxu0  ;;  %v4506_v57 = vld [vmem:[%s7308_s0 + $0xa0] sm:$0xff] }
0x1a75   : > { %v3601_v51 = vadd.f32 %v3600_v59, %v3504_v37  ;;  %v3644_v52 = vadd.f32 %v3643_v18, %v3512_v41  ;;  %v6851_v59 = vld [vmem:[%s7323_s24 + $0x30] sm:$0xff]   ;;  %v6862_v37 = vld [vmem:[%s7323_s24 + $0xd8] sm:$0xff]  }
0x1a76   : > { %v3826_v24 = vpop.f32.mrf.mxu1  ;;  %v3869_v25 = vpop.f32.mrf.mxu0  ;;  %v6852_v18 = vld [vmem:[%s7323_s24 + $0xb0] sm:$0xff]   ;;  %v6863_v41 = vld [vmem:[%s7323_s24 + $0x18] sm:$0xff]  }
0x1a77   : > { %v3827_v38 = vadd.f32 %v3826_v24, %v3735_v29  ;;  %v3870_v53 = vadd.f32 %v3869_v25, %v3743_v30  ;;  %v3651_v45 = vmax.f32 %v3601_v51, 0.0  ;;  %v3653_v50 = vmax.f32 %v3644_v52, 0.0  ;;  %v6854_v24 = vld [vmem:[%s7323_s24 + $0xe8] sm:$0xff]  }
0x1a78   : > { %v3828_v31 = vpop.f32.mrf.mxu1  ;;  %v3871_v35 = vpop.f32.mrf.mxu0  ;;  %v6855_v25 = vld [vmem:[%s7323_s24 + $0x28] sm:$0xff]   ;;  %v3500_v52 = vrot.slane %v7874_v36, %v7865_v21 }
0x1a79   : > { %v3829_v46 = vadd.f32 %v3828_v31, %v3739_v27  ;;  %v3872_v47 = vadd.f32 %v3871_v35, %v3747_v28  ;;  %v3878_v26 = vmax.f32 %v3827_v38, 0.0  ;;  %v3880_v32 = vmax.f32 %v3870_v53, 0.0  ;;  %v6860_v31 = vld [vmem:[%s7323_s24 + $0xa0] sm:$0xff]   ;;  %v6861_v35 = vld [vmem:[%s7323_s24 + $0x58] sm:$0xff]   ;;  %v6870_v51 = vld [vmem:[%s7323_s24 + $0xc8] sm:$0xff]  }
0x1a7a   : > { %v3830_v42 = vpop.f32.mrf.mxu1  ;;  %v3873_v44 = vpop.f32.mrf.mxu0  ;;  %v3655_v58 = vpack.c.bf16 %v3651_v45, %v3647_v8  ;;  %v3657_v61 = vpack.c.bf16 %v3653_v50, %v3649_v9  ;;  %v3508_v38 = vrot.slane %v7874_v36, %v7867_v23  ;;  %v6871_v53 = vld [vmem:[%s7323_s24 + $0x8] sm:$0xff]  }
0x1a7b   : > { %v3831_v48 = vadd.f32 %v3830_v42, %v3735_v29  ;;  %v3874_v49 = vadd.f32 %v3873_v44, %v3743_v30  ;;  %v3879_v0 = vmax.f32 %v3829_v46, 0.0  ;;  %v3881_v1 = vmax.f32 %v3872_v47, 0.0  ;;  %v6858_v29 = vld [vmem:[%s7323_s24 + $0xe0] sm:$0xff]   ;;  %v6864_v42 = vld [vmem:[%s7323_s24 + $0x98] sm:$0xff]   ;;  %v6865_v44 = vld [vmem:[%s7323_s24 + $0x50] sm:$0xff]  }
0x1a7c   : > { %v3832_v54 = vpop.f32.mrf.mxu1  ;;  %v3875_v55 = vpop.f32.mrf.mxu0  ;;  %v6859_v30 = vld [vmem:[%s7323_s24 + $0x20] sm:$0xff]   ;;  %v6866_v46 = vld [vmem:[%s7323_s24 + $0xd0] sm:$0xff]   ;;  %v4509_v36 = vld [vmem:[%s7308_s0 + $0xe8] sm:$0xff] }
0x1a7d   : > { %v3833_v7 = vadd.f32 %v3832_v54, %v3739_v27  ;;  %v3876_v39 = vadd.f32 %v3875_v55, %v3747_v28  ;;  %v3882_v60 = vmax.f32 %v3831_v48, 0.0  ;;  %v3884_v63 = vmax.f32 %v3874_v49, 0.0  ;;  %v6856_v27 = vld [vmem:[%s7323_s24 + $0xa8] sm:$0xff]   ;;  %v6857_v28 = vld [vmem:[%s7323_s24 + $0x60] sm:$0xff]   ;;  %v6867_v47 = vld [vmem:[%s7323_s24 + $0x10] sm:$0xff]  }
0x1a7e   : > { %v6868_v48 = vld [vmem:[%s7323_s24 + $0x90] sm:$0xff]   ;;  %v6869_v49 = vld [vmem:[%s7323_s24 + $0x48] sm:$0xff]   ;;  %v3599_v55 = vadd.f32 %v7856_v62, %v3500_v52  ;;  %v6875_v62 = vld [vmem:[%s7323_s24] sm:$0xff]  }
0x1a7f   : > { %v3883_v2 = vmax.f32 %v3833_v7, 0.0  ;;  %v3885_v3 = vmax.f32 %v3876_v39, 0.0  ;;  %v3886_v11 = vpack.c.bf16 %v3882_v60, %v3878_v26  ;;  %v3888_v14 = vpack.c.bf16 %v3884_v63, %v3880_v32  ;;  %v6872_v54 = vld [vmem:[%s7323_s24 + $0x88] sm:$0xff]   ;;  %v6873_v39 = vld [vmem:[%s7323_s24 + $0x40] sm:$0xff]  }
0x1a80   : > { %v3642_v7 = vadd.f32 %v7858_v56, %v3508_v38  ;;  %v4508_v60 = vld [vmem:[%s7308_s0 + $0xe0] sm:$0xff]  ;;  %v4507_v63 = vld [vmem:[%s7308_s0 + $0xa8] sm:$0xff] }
0x1a81   : > { %v3887_v33 = vpack.c.bf16 %v3883_v2, %v3879_v0  ;;  %v3889_v4 = vpack.c.bf16 %v3885_v3, %v3881_v1  ;;  %v3595_v0 = vadd.f32 %v7852_v16, %v3500_v52  ;;  %v3638_v1 = vadd.f32 %v7854_v17, %v3508_v38  ;;  %v6876_v56 = vld [vmem:[%s7323_s24 + $0x80] sm:$0xff]   ;;  %v6899_v52 = vld [vmem:[%s7323_s24 + $0x210] sm:$0xff]  }
0x1a82   : > { %v3650_v2 = vmax.f32 %v3599_v55, 0.0  ;;  %v3652_v3 = vmax.f32 %v3642_v7, 0.0  ;;  %v6130_v45 = vcombine.high %v4506_v57, %v4508_v60  ;;  %v6132_v50 = vcombine.high %v4507_v63, %v4509_v36  ;;  %v4502_v26 = vld [vmem:[%s7308_s0 + $0x20] sm:$0xff]  ;;  %v6900_v38 = vld [vmem:[%s7323_s24 + $0x290] sm:$0xff]   ;;  %v6903_v55 = vld [vmem:[%s7323_s24 + $0x208] sm:$0xff]  }
0x1a83   : > { %4178 = vmatprep.mubr.bf16.mxu1 %v3887_v33  ;;  %4219 = vmatprep.mubr.bf16.mxu0 %v3889_v4  ;;  %v4504_v32 = vld [vmem:[%s7308_s0 + $0x60] sm:$0xff]  ;;  %v4503_v33 = vld [vmem:[%s7308_s0 + $0x28] sm:$0xff]  ;;  %v6129_v16 = vcombine.low %v4506_v57, %v4508_v60  ;;  %v6131_v17 = vcombine.low %v4507_v63, %v4509_v36  ;;  %v7965_v63 = vld [vmem:[%s7308_s0 + $0xb0] sm:$0xff] }
0x1a84   : > { %4179 = vmatmul.mubr.bf16.vlgmr.msra.gmra.mxu1 %v3886_v11  ;;  %4220 = vmatmul.mubr.bf16.vlgmr.msra.gmra.mxu0 %v3888_v14  ;;  %v4505_v4 = vld [vmem:[%s7308_s0 + $0x68] sm:$0xff]  ;;  %v6126_v8 = vcombine.high %v4502_v26, %v4504_v32  ;;  %v6907_v57 = vld [vmem:[%s7323_s24 + $0x200] sm:$0xff]   ;;  %v7968_v36 = vld [vmem:[%s7308_s0 + $0xf0] sm:$0xff] }
0x1a85   : > { %6356 = vmatpush3.bf16.msra.mxu1 %v6847_v5  ;;  %6378 = vmatpush3.bf16.msra.mxu0 %v6848_v6  ;;  %v3646_v5 = vmax.f32 %v3595_v0, 0.0  ;;  %v3648_v6 = vmax.f32 %v3638_v1, 0.0  ;;  %v6128_v14 = vcombine.high %v4503_v33, %v4505_v4  ;;  %v6904_v7 = vld [vmem:[%s7323_s24 + $0x288] sm:$0xff]   ;;  %v6908_v60 = vld [vmem:[%s7323_s24 + $0x280] sm:$0xff]   ;;  %v7971_v0 = vld [vmem:[%s7308_s0 + $0xb8] sm:$0xff]  ;;  %v6172_v1 = vcombine.high %v7965_v63, %v7968_v36 }
0x1a86   : > { %4452 = vmatprep.mubr.bf16.mxu1 %v3655_v58  ;;  %4493 = vmatprep.mubr.bf16.mxu0 %v3657_v61  ;;  %v6877_v58 = vld [vmem:[%s7323_s24 + $0x278] sm:$0xff]  }
0x1a87   : > { %6357 = vmatprep.subr.bf16.mxu1 %v6849_v15  ;;  %6379 = vmatprep.subr.bf16.mxu0 %v6850_v22  ;;  %v3654_v9 = vpack.c.bf16 %v3650_v2, %v3646_v5  ;;  %v3656_v11 = vpack.c.bf16 %v3652_v3, %v3648_v6  ;;  %v6125_v15 = vcombine.low %v4502_v26, %v4504_v32  ;;  %v6878_v61 = vld [vmem:[%s7323_s24 + $0x2f8] sm:$0xff]  }
0x1a88   : > { %v6127_v22 = vcombine.low %v4503_v33, %v4505_v4 }
0x1a89   : > { %6358 = vmatpush3.bf16.msra.mxu1 %v6851_v59  ;;  %6380 = vmatpush3.bf16.msra.mxu0 %v6852_v18  ;;  %v6879_v59 = vld [vmem:[%s7323_s24 + $0x238] sm:$0xff]  }
0x1a8a   : > { %6359 = vmatprep.subr.bf16.mxu1 %v6853_v20  ;;  %6381 = vmatprep.subr.bf16.mxu0 %v6854_v24  ;;  %v6880_v18 = vld [vmem:[%s7323_s24 + $0x2b8] sm:$0xff]   ;;  %v6881_v20 = vld [vmem:[%s7323_s24 + $0x270] sm:$0xff]  }
0x1a8b   : > { %v6882_v24 = vld [vmem:[%s7323_s24 + $0x2f0] sm:$0xff]  }
0x1a8d   : > { %6360 = vmatpush3.bf16.msra.mxu1 %v6855_v25  ;;  %6382 = vmatpush3.bf16.msra.mxu0 %v6856_v27  ;;  %v6883_v25 = vld [vmem:[%s7323_s24 + $0x230] sm:$0xff]  }
0x1a8e   : > { %6361 = vmatprep.subr.bf16.mxu1 %v6857_v28  ;;  %6383 = vmatprep.subr.bf16.mxu0 %v6858_v29  ;;  %v6884_v27 = vld [vmem:[%s7323_s24 + $0x2b0] sm:$0xff]   ;;  %v6885_v28 = vld [vmem:[%s7323_s24 + $0x268] sm:$0xff]  }
0x1a8f   : > { %v6886_v29 = vld [vmem:[%s7323_s24 + $0x2e8] sm:$0xff]  }
0x1a91   : > { %6362 = vmatpush3.bf16.msra.mxu1 %v6859_v30  ;;  %6384 = vmatpush3.bf16.msra.mxu0 %v6860_v31  ;;  %v6887_v30 = vld [vmem:[%s7323_s24 + $0x228] sm:$0xff]  }
0x1a92   : > { %6363 = vmatprep.subr.bf16.mxu1 %v6861_v35  ;;  %6385 = vmatprep.subr.bf16.mxu0 %v6862_v37  ;;  %v6888_v31 = vld [vmem:[%s7323_s24 + $0x2a8] sm:$0xff]   ;;  %v6889_v35 = vld [vmem:[%s7323_s24 + $0x260] sm:$0xff]  }
0x1a93   : > { %v6890_v37 = vld [vmem:[%s7323_s24 + $0x2e0] sm:$0xff]  }
0x1a95   : > { %6364 = vmatpush3.bf16.msra.mxu1 %v6863_v41  ;;  %6386 = vmatpush3.bf16.msra.mxu0 %v6864_v42  ;;  %v6891_v41 = vld [vmem:[%s7323_s24 + $0x220] sm:$0xff]  }
0x1a96   : > { %6365 = vmatprep.subr.bf16.mxu1 %v6865_v44  ;;  %6387 = vmatprep.subr.bf16.mxu0 %v6866_v46  ;;  %v6892_v42 = vld [vmem:[%s7323_s24 + $0x2a0] sm:$0xff]   ;;  %v6893_v44 = vld [vmem:[%s7323_s24 + $0x258] sm:$0xff]  }
0x1a97   : > { %v6894_v46 = vld [vmem:[%s7323_s24 + $0x2d8] sm:$0xff]  }
0x1a99   : > { %6366 = vmatpush3.bf16.msra.mxu1 %v6867_v47  ;;  %6388 = vmatpush3.bf16.msra.mxu0 %v6868_v48  ;;  %v6895_v47 = vld [vmem:[%s7323_s24 + $0x218] sm:$0xff]  }
0x1a9a   : > { %6367 = vmatprep.subr.bf16.mxu1 %v6869_v49  ;;  %6389 = vmatprep.subr.bf16.mxu0 %v6870_v51  ;;  %v6896_v48 = vld [vmem:[%s7323_s24 + $0x298] sm:$0xff]   ;;  %v6897_v49 = vld [vmem:[%s7323_s24 + $0x250] sm:$0xff]  }
0x1a9b   : > { %v6898_v51 = vld [vmem:[%s7323_s24 + $0x2d0] sm:$0xff]  }
0x1a9d   : > { %6368 = vmatpush3.bf16.msra.mxu1 %v6871_v53  ;;  %6390 = vmatpush3.bf16.msra.mxu0 %v6872_v54  ;;  %v6901_v53 = vld [vmem:[%s7323_s24 + $0x248] sm:$0xff]  }
0x1a9e   : > { %6369 = vmatprep.subr.bf16.mxu1 %v6873_v39  ;;  %6391 = vmatprep.subr.bf16.mxu0 %v6874_v10  ;;  %v6902_v54 = vld [vmem:[%s7323_s24 + $0x2c8] sm:$0xff]   ;;  %v6905_v39 = vld [vmem:[%s7323_s24 + $0x240] sm:$0xff]  }
0x1a9f   : > { %v6906_v10 = vld [vmem:[%s7323_s24 + $0x2c0] sm:$0xff]  }
0x1aa1   : > { %6370 = vmatpush3.bf16.msra.mxu1 %v6875_v62  ;;  %6392 = vmatpush3.bf16.msra.mxu0 %v6876_v56  ;;  %v7976_v62 = vld [vmem:[%s7308_s0 + $0xf8] sm:$0xff]  ;;  %v6171_v56 = vcombine.low %v7965_v63, %v7968_v36 }
0x1aa2   : > { %4584 = vmatprep.subr.bf16.mxu1 %v6130_v45  ;;  %4627 = vmatprep.subr.bf16.mxu0 %v6132_v50  ;;  %v6173_v2 = vcombine.low %v7971_v0, %v7976_v62  ;;  %v6174_v3 = vcombine.high %v7971_v0, %v7976_v62  ;;  %v6911_v63 = vld [vmem:[%s7323_s24 + $0x338] sm:$0xff]   ;;  %v6913_v0 = vld [vmem:[%s7323_s24 + $0x370] sm:$0xff]  }
0x1aa3   : > { %v6912_v36 = vld [vmem:[%s7323_s24 + $0x3b8] sm:$0xff]   ;;  %v6914_v62 = vld [vmem:[%s7323_s24 + $0x3f0] sm:$0xff]  }
0x1aa4   : > { %4453 = vmatmul.mubr.bf16.vlgmr.msra.gmra.mxu1 %v3654_v9  ;;  %4494 = vmatmul.mubr.bf16.vlgmr.msra.gmra.mxu0 %v3656_v11 }
0x1aa5   : > { %4585 = vmatpush1.bf16.msra.mxu1 %v6129_v16  ;;  %4628 = vmatpush1.bf16.msra.mxu0 %v6131_v17 }
0x1aa6   : > { %4586 = vmatprep.subr.bf16.mxu1 %v6126_v8  ;;  %4629 = vmatprep.subr.bf16.mxu0 %v6128_v14 }
0x1aa7   : > { %4604 = vmatprep.mubr.bf16.mxu1 %v7079_v12  ;;  %4647 = vmatprep.mubr.bf16.mxu0 %v7079_v12 }
0x1aa9   : > { %4587 = vmatpush1.bf16.msra.mxu1 %v6125_v15  ;;  %4630 = vmatpush1.bf16.msra.mxu0 %v6127_v22 }
0x1aaa   : > { %6399 = vmatprep.subr.bf16.mxu1 %v6877_v58  ;;  %6421 = vmatprep.subr.bf16.mxu0 %v6878_v61 }
0x1aac   : > { %6133 = vmatmul.mubr.msk.bf16.vlgmr.msra.gmra.mxu1 %vm1236_vm4, %v7806_v34  ;;  %6134 = vmatmul.mubr.msk.bf16.vlgmr.msra.gmra.mxu0 %vm1236_vm4, %v7806_v34 }
0x1aad   : > { %6400 = vmatpush3.bf16.msra.mxu1 %v6879_v59  ;;  %6422 = vmatpush3.bf16.msra.mxu0 %v6880_v18 }
0x1aae   : > { %6401 = vmatprep.subr.bf16.mxu1 %v6881_v20  ;;  %6423 = vmatprep.subr.bf16.mxu0 %v6882_v24 }
0x1ab1   : > { %6402 = vmatpush3.bf16.msra.mxu1 %v6883_v25  ;;  %6424 = vmatpush3.bf16.msra.mxu0 %v6884_v27 }
0x1ab2   : > { %6403 = vmatprep.subr.bf16.mxu1 %v6885_v28  ;;  %6425 = vmatprep.subr.bf16.mxu0 %v6886_v29 }
0x1ab5   : > { %6404 = vmatpush3.bf16.msra.mxu1 %v6887_v30  ;;  %6426 = vmatpush3.bf16.msra.mxu0 %v6888_v31 }
0x1ab6   : > { %6405 = vmatprep.subr.bf16.mxu1 %v6889_v35  ;;  %6427 = vmatprep.subr.bf16.mxu0 %v6890_v37  ;;  %v4510_v35 = vld [vmem:[%s7313_s6 + $0x8] sm:$0xf] }
0x1ab9   : > { %6406 = vmatpush3.bf16.msra.mxu1 %v6891_v41  ;;  %6428 = vmatpush3.bf16.msra.mxu0 %v6892_v42 }
0x1aba   : > { %6407 = vmatprep.subr.bf16.mxu1 %v6893_v44  ;;  %6429 = vmatprep.subr.bf16.mxu0 %v6894_v46  ;;  %v4519_v44 = vrot.slane %v4510_v35, %v7860_v13  ;;  %v4527_v46 = vrot.slane %v4510_v35, %v7862_v19 }
0x1abd   : > { %6408 = vmatpush3.bf16.msra.mxu1 %v6895_v47  ;;  %6430 = vmatpush3.bf16.msra.mxu0 %v6896_v48  ;;  %v4515_v47 = vrot.slane %v4510_v35, %v7865_v21  ;;  %v4523_v48 = vrot.slane %v4510_v35, %v7867_v23  ;;  %v6923_v35 = vld [vmem:[%s7323_s24 + $0x320] sm:$0xff]  }
0x1abe   : > { %6409 = vmatprep.subr.bf16.mxu1 %v6897_v49  ;;  %6431 = vmatprep.subr.bf16.mxu0 %v6898_v51 }
0x1ac1   : > { %6410 = vmatpush3.bf16.msra.mxu1 %v6899_v52  ;;  %6432 = vmatpush3.bf16.msra.mxu0 %v6900_v38 }
0x1ac2   : > { %6411 = vmatprep.subr.bf16.mxu1 %v6901_v53  ;;  %6433 = vmatprep.subr.bf16.mxu0 %v6902_v54 }
0x1ac5   : > { %6412 = vmatpush3.bf16.msra.mxu1 %v6903_v55  ;;  %6434 = vmatpush3.bf16.msra.mxu0 %v6904_v7 }
0x1ac6   : > { %6413 = vmatprep.subr.bf16.mxu1 %v6905_v39  ;;  %6435 = vmatprep.subr.bf16.mxu0 %v6906_v10 }
0x1ac9   : > { %6414 = vmatpush3.bf16.msra.mxu1 %v6907_v57  ;;  %6436 = vmatpush3.bf16.msra.mxu0 %v6908_v60 }
0x1aca   : > { %5092 = vmatprep.subr.bf16.mxu1 %v6172_v1  ;;  %5135 = vmatprep.subr.bf16.mxu0 %v6174_v3 }
0x1b44   : > { %v6327_v45 = vpop.f32.mrf.mxu1  ;;  %v6349_v50 = vpop.f32.mrf.mxu0 }
0x1b46   : > { %v6328_v26 = vpop.f32.mrf.mxu1  ;;  %v6350_v32 = vpop.f32.mrf.mxu0 }
0x1b47   : > { %v6329_v33 = vadd.f32 %v6328_v26, %v6327_v45  ;;  %v6351_v4 = vadd.f32 %v6350_v32, %v6349_v50  ;;  %v5010_v32 = vld [vmem:[%s7308_s0 + $0x30] sm:$0xff] }
0x1b48   : > { %v6330_v5 = vpop.f32.mrf.mxu1  ;;  %v6352_v6 = vpop.f32.mrf.mxu0 }
0x1b49   : > { %v4222_v16 = vadd.f32 %v6351_v4, %v6329_v33  ;;  %v5012_v33 = vld [vmem:[%s7308_s0 + $0x70] sm:$0xff] }
0x1b4a   : > { %v6331_v17 = vpop.f32.mrf.mxu1  ;;  %v6353_v8 = vpop.f32.mrf.mxu0 }
0x1b4b   : > { %v6332_v9 = vadd.f32 %v6331_v17, %v6330_v5  ;;  %v6354_v11 = vadd.f32 %v6353_v8, %v6352_v6  ;;  %v5011_v17 = vld [vmem:[%s7308_s0 + $0x38] sm:$0xff] }
0x1b4c   : > { %v5013_v8 = vld [vmem:[%s7308_s0 + $0x78] sm:$0xff] }
0x1b4d   : > { %v4225_v14 = vadd.f32 %v6354_v11, %v6332_v9 }
0x1b64   : > { %v6371_v15 = vpop.f32.mrf.mxu1  ;;  %v6393_v22 = vpop.f32.mrf.mxu0 }
0x1b66   : > { %v6372_v58 = vpop.f32.mrf.mxu1  ;;  %v6394_v61 = vpop.f32.mrf.mxu0 }
0x1b67   : > { %v6373_v59 = vadd.f32 %v6372_v58, %v6371_v15  ;;  %v6395_v18 = vadd.f32 %v6394_v61, %v6393_v22  ;;  %v6168_v61 = vcombine.high %v5010_v32, %v5012_v33 }
0x1b68   : > { %v6374_v20 = vpop.f32.mrf.mxu1  ;;  %v6396_v24 = vpop.f32.mrf.mxu0 }
0x1b69   : > { %v4455_v25 = vadd.f32 %v6373_v59, %v4222_v16  ;;  %v6170_v59 = vcombine.high %v5011_v17, %v5013_v8 }
0x1b6a   : > { %v6375_v27 = vpop.f32.mrf.mxu1  ;;  %v6397_v28 = vpop.f32.mrf.mxu0 }
0x1b6b   : > { %v7984_v29 = vadd.f32 %v6395_v18, %v4455_v25  ;;  %v6376_v30 = vadd.f32 %v6375_v27, %v6374_v20  ;;  %v6398_v31 = vadd.f32 %v6397_v28, %v6396_v24  ;;  %v6167_v18 = vcombine.low %v5010_v32, %v5012_v33  ;;  %v6909_v24 = vld [vmem:[%s7323_s24 + $0x378] sm:$0xff]   ;;  %v6918_v27 = vld [vmem:[%s7323_s24 + $0x3e8] sm:$0xff]  }
0x1b6c   : > { %v4606_v37 = vpop.f32.mrf.mxu1  ;;  %v4649_v41 = vpop.f32.mrf.mxu0  ;;  %v6169_v20 = vcombine.low %v5011_v17, %v5013_v8  ;;  %v6910_v25 = vld [vmem:[%s7323_s24 + $0x3f8] sm:$0xff]   ;;  %v6919_v28 = vld [vmem:[%s7323_s24 + $0x328] sm:$0xff]  }
0x1b6d   : > { %v4458_v42 = vadd.f32 %v6376_v30, %v4225_v14  ;;  %v4607_v10 = vadd.f32 %v4606_v37, %v4515_v47  ;;  %v4650_v57 = vadd.f32 %v4649_v41, %v4523_v48  ;;  %v6920_v30 = vld [vmem:[%s7323_s24 + $0x3a8] sm:$0xff]   ;;  %v6924_v37 = vld [vmem:[%s7323_s24 + $0x3a0] sm:$0xff]   ;;  %v6925_v41 = vld [vmem:[%s7323_s24 + $0x358] sm:$0xff]  }
0x1b6e   : > { %v4608_v49 = vpop.f32.mrf.mxu1  ;;  %v4651_v51 = vpop.f32.mrf.mxu0 }
0x1b6f   : > { %v7991_v52 = vadd.f32 %v6398_v31, %v4458_v42  ;;  %v4609_v54 = vadd.f32 %v4608_v49, %v4519_v44  ;;  %v4652_v55 = vadd.f32 %v4651_v51, %v4527_v46  ;;  %v4658_v9 = vmax.f32 %v4607_v10, 0.0  ;;  %v6922_v31 = vld [vmem:[%s7323_s24 + $0x3e0] sm:$0xff]   ;;  %v6926_v42 = vld [vmem:[%s7323_s24 + $0x3d8] sm:$0xff]   ;;  %v6931_v49 = vld [vmem:[%s7323_s24 + $0x310] sm:$0xff]  }
0x1b70   : > { %v4610_v38 = vpop.f32.mrf.mxu1  ;;  %v4653_v53 = vpop.f32.mrf.mxu0  ;;  %v4660_v11 = vmax.f32 %v4650_v57, 0.0  ;;  %v6932_v51 = vld [vmem:[%s7323_s24 + $0x390] sm:$0xff]   ;;  %v6939_v10 = vld [vmem:[%s7323_s24 + $0x300] sm:$0xff]  }
0x1b71   : > { %v4611_v7 = vadd.f32 %v4610_v38, %v4515_v47  ;;  %v4654_v39 = vadd.f32 %v4653_v53, %v4523_v48  ;;  %v4659_v4 = vmax.f32 %v4609_v54, 0.0  ;;  %v4661_v5 = vmax.f32 %v4652_v55, 0.0  ;;  %v6929_v47 = vld [vmem:[%s7323_s24 + $0x350] sm:$0xff]   ;;  %v6933_v38 = vld [vmem:[%s7323_s24 + $0x348] sm:$0xff]   ;;  %v6940_v57 = vld [vmem:[%s7323_s24 + $0x380] sm:$0xff]  }
0x1b72   : > { %v4612_v60 = vpop.f32.mrf.mxu1  ;;  %v4655_v1 = vpop.f32.mrf.mxu0  ;;  %v6930_v48 = vld [vmem:[%s7323_s24 + $0x3d0] sm:$0xff]   ;;  %v6934_v53 = vld [vmem:[%s7323_s24 + $0x3c8] sm:$0xff]  }
0x1b73   : > { %v4613_v3 = vadd.f32 %v4612_v60, %v4519_v44  ;;  %v4656_v45 = vadd.f32 %v4655_v1, %v4527_v46  ;;  %v4662_v50 = vmax.f32 %v4611_v7, 0.0  ;;  %v4664_v26 = vmax.f32 %v4654_v39, 0.0  ;;  %v6927_v44 = vld [vmem:[%s7323_s24 + $0x318] sm:$0xff]   ;;  %v6935_v54 = vld [vmem:[%s7323_s24 + $0x308] sm:$0xff]   ;;  %v6937_v7 = vld [vmem:[%s7323_s24 + $0x340] sm:$0xff]  }
0x1b74   : > { %v6928_v46 = vld [vmem:[%s7323_s24 + $0x398] sm:$0xff]   ;;  %v6936_v55 = vld [vmem:[%s7323_s24 + $0x388] sm:$0xff]   ;;  %v6938_v39 = vld [vmem:[%s7323_s24 + $0x3c0] sm:$0xff]  }
0x1b75   : > { %v4663_v6 = vmax.f32 %v4613_v3, 0.0  ;;  %v4665_v16 = vmax.f32 %v4656_v45, 0.0  ;;  %v4666_v22 = vpack.c.bf16 %v4662_v50, %v4658_v9  ;;  %v4668_v58 = vpack.c.bf16 %v4664_v26, %v4660_v11  ;;  %v5018_v9 = vld [vmem:[%s7313_s6 + $0xc] sm:$0xf]  ;;  %s8213_s6 = sld [smem:[#allocation27_spill]] (!%p6212_p5) }
0x1b77   : > { %v4667_v14 = vpack.c.bf16 %v4663_v6, %v4659_v4  ;;  %v4669_v15 = vpack.c.bf16 %v4665_v16, %v4661_v5 }
0x1b79   : > { %4958 = vmatprep.mubr.bf16.mxu1 %v4667_v14  ;;  %4999 = vmatprep.mubr.bf16.mxu0 %v4669_v15 }
0x1b7a   : > { %4959 = vmatmul.mubr.bf16.vlgmr.msra.gmra.mxu1 %v4666_v22  ;;  %5000 = vmatmul.mubr.bf16.vlgmr.msra.gmra.mxu0 %v4668_v58  ;;  %v5027_v22 = vrot.slane %v5018_v9, %v7860_v13  ;;  %v5035_v58 = vrot.slane %v5018_v9, %v7862_v19 }
0x1b7b   : > { %5093 = vmatpush1.bf16.msra.mxu1 %v6171_v56  ;;  %5136 = vmatpush1.bf16.msra.mxu0 %v6173_v2  ;;  %v6916_v56 = vld [vmem:[%s7323_s24 + $0x3b0] sm:$0xff]   ;;  %v6917_v2 = vld [vmem:[%s7323_s24 + $0x368] sm:$0xff]  }
0x1b7c   : > { %5094 = vmatprep.subr.bf16.mxu1 %v6168_v61  ;;  %5137 = vmatprep.subr.bf16.mxu0 %v6170_v59  ;;  %v5023_v61 = vrot.slane %v5018_v9, %v7865_v21  ;;  %v5031_v59 = vrot.slane %v5018_v9, %v7867_v23 }
0x1b7d   : > { %5112 = vmatprep.mubr.bf16.mxu1 %v7079_v12  ;;  %5155 = vmatprep.mubr.bf16.mxu0 %v7079_v12  ;;  %v6915_v12 = vld [vmem:[%s7323_s24 + $0x330] sm:$0xff]  }
0x1b7f   : > { %5095 = vmatpush1.bf16.msra.mxu1 %v6167_v18  ;;  %5138 = vmatpush1.bf16.msra.mxu0 %v6169_v20 }
0x1b80   : > { %6443 = vmatprep.subr.bf16.mxu1 %v6909_v24  ;;  %6465 = vmatprep.subr.bf16.mxu0 %v6910_v25 }
0x1b82   : > { %6175 = vmatmul.mubr.msk.bf16.vlgmr.msra.gmra.mxu1 %vm1236_vm4, %v7806_v34  ;;  %6176 = vmatmul.mubr.msk.bf16.vlgmr.msra.gmra.mxu0 %vm1236_vm4, %v7806_v34  ;;  %v6921_v34 = vld [vmem:[%s7323_s24 + $0x360] sm:$0xff]   ;;  %s8206_s24 = scalar_lea.vmem %s8128_s21, %s7240_s9 }
0x1b83   : > { %6444 = vmatpush3.bf16.msra.mxu1 %v6911_v63  ;;  %6466 = vmatpush3.bf16.msra.mxu0 %v6912_v36 }
0x1b84   : > { %6445 = vmatprep.subr.bf16.mxu1 %v6913_v0  ;;  %6467 = vmatprep.subr.bf16.mxu0 %v6914_v62 }
0x1b87   : > { %6446 = vmatpush3.bf16.msra.mxu1 %v6915_v12  ;;  %6468 = vmatpush3.bf16.msra.mxu0 %v6916_v56 }
0x1b88   : > { %6447 = vmatprep.subr.bf16.mxu1 %v6917_v2  ;;  %6469 = vmatprep.subr.bf16.mxu0 %v6918_v27 }
0x1b8b   : > { %6448 = vmatpush3.bf16.msra.mxu1 %v6919_v28  ;;  %6470 = vmatpush3.bf16.msra.mxu0 %v6920_v30 }
0x1b8c   : > { %6449 = vmatprep.subr.bf16.mxu1 %v6921_v34  ;;  %6471 = vmatprep.subr.bf16.mxu0 %v6922_v31 }
0x1b8f   : > { %6450 = vmatpush3.bf16.msra.mxu1 %v6923_v35  ;;  %6472 = vmatpush3.bf16.msra.mxu0 %v6924_v37 }
0x1b90   : > { %6451 = vmatprep.subr.bf16.mxu1 %v6925_v41  ;;  %6473 = vmatprep.subr.bf16.mxu0 %v6926_v42 }
0x1b93   : > { %6452 = vmatpush3.bf16.msra.mxu1 %v6927_v44  ;;  %6474 = vmatpush3.bf16.msra.mxu0 %v6928_v46 }
0x1b94   : > { %6453 = vmatprep.subr.bf16.mxu1 %v6929_v47  ;;  %6475 = vmatprep.subr.bf16.mxu0 %v6930_v48 }
0x1b97   : > { %6454 = vmatpush3.bf16.msra.mxu1 %v6931_v49  ;;  %6476 = vmatpush3.bf16.msra.mxu0 %v6932_v51 }
0x1b98   : > { %6455 = vmatprep.subr.bf16.mxu1 %v6933_v38  ;;  %6477 = vmatprep.subr.bf16.mxu0 %v6934_v53 }
0x1b9b   : > { %6456 = vmatpush3.bf16.msra.mxu1 %v6935_v54  ;;  %6478 = vmatpush3.bf16.msra.mxu0 %v6936_v55 }
0x1b9c   : > { %6457 = vmatprep.subr.bf16.mxu1 %v6937_v7  ;;  %6479 = vmatprep.subr.bf16.mxu0 %v6938_v39 }
0x1b9f   : > { %6458 = vmatpush3.bf16.msra.mxu1 %v6939_v10  ;;  %6480 = vmatpush3.bf16.msra.mxu0 %v6940_v57  ;;  %v6209_v10 = vld [vmem:[%s8206_s24] ss:$0 sm:$0xff] }
0x1c3a   : > { %v6415_v60 = vpop.f32.mrf.mxu1  ;;  %v6437_v1 = vpop.f32.mrf.mxu0 }
0x1c3c   : > { %v6416_v3 = vpop.f32.mrf.mxu1  ;;  %v6438_v45 = vpop.f32.mrf.mxu0 }
0x1c3d   : > { %v6417_v50 = vadd.f32 %v6416_v3, %v6415_v60  ;;  %v6439_v26 = vadd.f32 %v6438_v45, %v6437_v1 }
0x1c3e   : > { %v6418_v32 = vpop.f32.mrf.mxu1  ;;  %v6440_v33 = vpop.f32.mrf.mxu0 }
0x1c3f   : > { %v5002_v4 = vadd.f32 %v6439_v26, %v6417_v50 }
0x1c40   : > { %v6419_v5 = vpop.f32.mrf.mxu1  ;;  %v6441_v6 = vpop.f32.mrf.mxu0 }
0x1c41   : > { %v5008_v16 = vadd.f32 %v5002_v4, %v7984_v29  ;;  %v6420_v17 = vadd.f32 %v6419_v5, %v6418_v32  ;;  %v6442_v8 = vadd.f32 %v6441_v6, %v6440_v33 }
0x1c42   : > { %v5114_v11 = vpop.f32.mrf.mxu1  ;;  %v5157_v14 = vpop.f32.mrf.mxu0 }
0x1c43   : > { %v5005_v15 = vadd.f32 %v6442_v8, %v6420_v17  ;;  %v5115_v12 = vadd.f32 %v5114_v11, %v5023_v61  ;;  %v5158_v56 = vadd.f32 %v5157_v14, %v5031_v59 }
0x1c44   : > { %v5116_v18 = vpop.f32.mrf.mxu1  ;;  %v5159_v20 = vpop.f32.mrf.mxu0 }
0x1c45   : > { %v5009_v24 = vadd.f32 %v5005_v15, %v7991_v52  ;;  %v5117_v63 = vadd.f32 %v5116_v18, %v5027_v22  ;;  %v5160_v36 = vadd.f32 %v5159_v20, %v5035_v58  ;;  %v5166_v35 = vmax.f32 %v5115_v12, 0.0 }
0x1c46   : > { %v5118_v25 = vpop.f32.mrf.mxu1  ;;  %v5161_v29 = vpop.f32.mrf.mxu0  ;;  %v5168_v52 = vmax.f32 %v5158_v56, 0.0 }
0x1c47   : > { %v5119_v0 = vadd.f32 %v5118_v25, %v5023_v61  ;;  %v5162_v62 = vadd.f32 %v5161_v29, %v5031_v59  ;;  %v5167_v30 = vmax.f32 %v5117_v63, 0.0  ;;  %v5169_v23 = vmax.f32 %v5160_v36, 0.0  ;;  %v6210_v25 = vld [vmem:[%s8207_s2] ss:$0 sm:$0xff] }
0x1c48   : > { %v5120_v2 = vpop.f32.mrf.mxu1  ;;  %v5163_v13 = vpop.f32.mrf.mxu0  ;;  %v6211_v63 = vld [vmem:[%s8209_s27] ss:$0 sm:$0xff] }
0x1c49   : > { %v5121_v27 = vadd.f32 %v5120_v2, %v5027_v22  ;;  %v5164_v19 = vadd.f32 %v5163_v13, %v5035_v58  ;;  %v5170_v28 = vmax.f32 %v5119_v0, 0.0  ;;  %v5172_v21 = vmax.f32 %v5162_v62, 0.0 }
0x1c4b   : > { %v5171_v34 = vmax.f32 %v5121_v27, 0.0  ;;  %v5173_v31 = vmax.f32 %v5164_v19, 0.0  ;;  %v5174_v42 = vpack.c.bf16 %v5170_v28, %v5166_v35  ;;  %v5176_v44 = vpack.c.bf16 %v5172_v21, %v5168_v52 }
0x1c4d   : > { %v5175_v37 = vpack.c.bf16 %v5171_v34, %v5167_v30  ;;  %v5177_v41 = vpack.c.bf16 %v5173_v31, %v5169_v23 }
0x1c4f   : > { %5466 = vmatprep.mubr.bf16.mxu1 %v5175_v37  ;;  %5507 = vmatprep.mubr.bf16.mxu0 %v5177_v41 }
0x1c50   : > { %5467 = vmatmul.mubr.bf16.vlgmr.msra.gmra.mxu1 %v5174_v42  ;;  %5508 = vmatmul.mubr.bf16.vlgmr.msra.gmra.mxu0 %v5176_v44 }
0x1d10   : > { %v6459_v46 = vpop.f32.mrf.mxu1  ;;  %v6481_v47 = vpop.f32.mrf.mxu0 }
0x1d12   : > { %v6460_v48 = vpop.f32.mrf.mxu1  ;;  %v6482_v49 = vpop.f32.mrf.mxu0 }
0x1d13   : > { %v6461_v51 = vadd.f32 %v6460_v48, %v6459_v46  ;;  %v6483_v38 = vadd.f32 %v6482_v49, %v6481_v47 }
0x1d14   : > { %v6462_v53 = vpop.f32.mrf.mxu1  ;;  %v6484_v54 = vpop.f32.mrf.mxu0 }
0x1d15   : > { %v5510_v55 = vadd.f32 %v6483_v38, %v6461_v51 }
0x1d16   : > { %v6463_v7 = vpop.f32.mrf.mxu1  ;;  %v6485_v39 = vpop.f32.mrf.mxu0 }
0x1d17   : > { %v5516_v57 = vadd.f32 %v5510_v55, %v5008_v16  ;;  %v6464_v60 = vadd.f32 %v6463_v7, %v6462_v53  ;;  %v6486_v1 = vadd.f32 %v6485_v39, %v6484_v54 }
0x1d19   : > { %v5513_v3 = vadd.f32 %v6486_v1, %v6464_v60  ;;  %v5525_v45 = vadd.f32 %v6209_v10, %v5516_v57 }
0x1d1b   : > { %v5517_v50 = vadd.f32 %v5513_v3, %v5009_v24  ;;  %v5527_v26 = vadd.f32 %v5525_v45, %v7800_v40 }
0x1d1d   : > { %v5531_v32 = vsel %vm1236_vm4, %v5527_v26, 0.0  ;;  %v5526_v33 = vadd.f32 %v6209_v10, %v5517_v50 }
0x1d1e   : > { %5532 = vadd.xlane.f32.xlu1 %v5531_v32 }
0x1d1f   : > { %v5528_v4 = vadd.f32 %v5526_v33, %v7802_v43 }
0x1d21   : > { %v5534_v5 = vsel %vm1236_vm4, %v5528_v4, 0.0 }
0x1d22   : > { %5535 = vadd.xlane.f32.xlu0 %v5534_v5 }
0x1da7   : > { %v5533_v6 = vpop.xlane.xlu1 %5532 }
0x1da8   : > { %v5537_v17 = vmul.f32 0.03125, %v5533_v6 }
0x1daa   : > { %v5539_v8 = vsub.f32 %v5527_v26, %v5537_v17 }
0x1dab   : > { %v5536_v16 = vpop.xlane.xlu0 %5535 }
0x1dac   : > { %v5538_v9 = vmul.f32 0.03125, %v5536_v16  ;;  %v5541_v11 = vmul.f32 %v5539_v8, %v5539_v8 }
0x1dae   : > { %v5540_v14 = vsub.f32 %v5528_v4, %v5538_v9  ;;  %v5543_v15 = vsel %vm1236_vm4, %v5541_v11, 0.0 }
0x1daf   : > { %5544 = vadd.xlane.f32.xlu1 %v5543_v15 }
0x1db0   : > { %v5542_v40 = vmul.f32 %v5540_v14, %v5540_v14 }
0x1db2   : > { %v5546_v22 = vsel %vm1236_vm4, %v5542_v40, 0.0 }
0x1db3   : > { %5547 = vadd.xlane.f32.xlu0 %v5546_v22 }
0x1e38   : > { %v5545_v43 = vpop.xlane.xlu1 %5544 }
0x1e39   : > { %v5549_v58 = vmul.f32 0.03125, %v5545_v43 }
0x1e3b   : > { %v5551_v61 = vadd.f32 1e-05, %v5549_v58 }
0x1e3c   : > { %v5548_v59 = vpop.xlane.xlu0 %5547 }
0x1e3d   : > { %7013 = vrsqrt.f32 %v5551_v61  ;;  %v5550_v18 = vmul.f32 0.03125, %v5548_v59 }
0x1e3f   : > { %v5552_v20 = vadd.f32 1e-05, %v5550_v18 }
0x1e41   : > { %7015 = vrsqrt.f32 %v5552_v20 }
0x1e4a   : > { %v7014_v24 = vpop.eup %7013 }
0x1e4b   : > { %v5555_v29 = vmul.f32 %v7014_v24, %v5539_v8 }
0x1e4d   : > { %v5563_v36 = vmul.f32 %v6210_v25, %v5555_v29 }
0x1e4e   : > { %v7016_v0 = vpop.eup %7015 }
0x1e4f   : > { %v5571_v62 = vadd.f32 %v6211_v63, %v5563_v36  ;;  %v5556_v12 = vmul.f32 %v7016_v0, %v5540_v14 }
0x1e51   : > { %5573 = vst.msk [vmem:[#allocation2] sm:$0xff] %vm1236_vm4, %v5571_v62  ;;  %v5564_v56 = vmul.f32 %v6210_v25, %v5556_v12  ;;  %5578 = sbr.rel (%p6212_p5) target bundleno = 8292 (0x2064), region = 140 }
0x1e53   : > { %v5572_v2 = vadd.f32 %v6211_v63, %v5564_v56 }
0x1e55   : > { %5574 = vst.msk [vmem:[#allocation2 + $0x8] sm:$0xff] %vm1236_vm4, %v5572_v2 }
0x1e56   : > { %v5583_v13 = vrot.slane %v5572_v2, 7  ;;  %vm5590_vm9 = vcmask 253952   ;;  %vm5586_vm10 = vcmask 261127   ;;  %v7019_v46 = vld [vmem:[%s8211_s25 + $0x8] sm:$0xff]   ;;  %v7080_v47 = vmov 0.0   ;;  %v7020_v48 = vld [vmem:[%s8211_s25] sm:$0xff]  }
0x1e57   : > { %v5587_v19 = vsel %vm5586_vm10, %v5571_v62, 0.0  ;;  %6728 = vmatprep.subr.bf16.mxu0 %v7080_v47  ;;  %vm7081_vm11 = vmmov 0   ;;  %v6213_v10 = vld [vmem:[%s8212_s29] ss:$0 sm:$0xff]  ;;  %vm5664_vm12 = vcmask 1041409   ;;  %vm5722_vm13 = vcmask 74752  }
0x1e58   : > { %v5591_v27 = vsel %vm5590_vm9, %v5583_v13, 0.0  ;;  %6732 = vmatprep.mubr.msk.bf16.mxu0 %vm7081_vm11, %v7080_v47  ;;  %6729 = vmatpush3.bf16.msra.mxu0 %v7019_v46  ;;  %v6214_v1 = vld [vmem:[%s8213_s6] ss:$0 sm:$0xff] }
0x1e59   : > { %5592 = vadd.xlane.f32.xlu0 %v5591_v27  ;;  %6730 = vmatprep.subr.bf16.mxu0 %v7080_v47  ;;  %v6215_v11 = vld [vmem:[%s8214_s8] ss:$0 sm:$0xff] }
0x1e5c   : > { %6731 = vmatpush3.bf16.msra.mxu0 %v7020_v48 }
0x1e5d   : > { %5588 = vadd.xlane.f32.xlu0 %v5587_v19 }
0x1ee2   : > { %v5593_v28 = vpop.xlane.xlu0 %5592 }
0x1ee3   : > { %v5595_v21 = vmul.f32 0.03125, %v5593_v28 }
0x1ee5   : > { %v5598_v30 = vrot.slane %v5595_v21, 1 }
0x1ee6   : > { %v5589_v23 = vpop.xlane.xlu0 %5588 }
0x1ee7   : > { %v5602_v34 = vsub.f32 %v5572_v2, %v5598_v30  ;;  %v5594_v31 = vmul.f32 0.03125, %v5589_v23 }
0x1ee9   : > { %v5601_v35 = vsub.f32 %v5571_v62, %v5594_v31  ;;  %v5604_v52 = vmul.f32 %v5602_v34, %v5602_v34 }
0x1eeb   : > { %v5603_v37 = vmul.f32 %v5601_v35, %v5601_v35  ;;  %v5607_v41 = vrot.slane %v5604_v52, 7 }
0x1eed   : > { %v5613_v42 = vsel %vm5590_vm9, %v5607_v41, 0.0  ;;  %v5610_v44 = vsel %vm5586_vm10, %v5603_v37, 0.0 }
0x1eee   : > { %5614 = vadd.xlane.f32.xlu1 %v5613_v42 }
0x1ef2   : > { %5611 = vadd.xlane.f32.xlu1 %v5610_v44 }
0x1f77   : > { %v5615_v49 = vpop.xlane.xlu1 %5614 }
0x1f78   : > { %v5617_v51 = vmul.f32 0.03125, %v5615_v49 }
0x1f7a   : > { %v5619_v38 = vadd.f32 1e-05, %v5617_v51 }
0x1f7b   : > { %v5612_v53 = vpop.xlane.xlu1 %5611 }
0x1f7c   : > { %7021 = vrsqrt.f32 %v5619_v38  ;;  %v5616_v54 = vmul.f32 0.03125, %v5612_v53 }
0x1f7e   : > { %v5618_v55 = vadd.f32 1e-05, %v5616_v54 }
0x1f80   : > { %7023 = vrsqrt.f32 %v5618_v55 }
0x1f89   : > { %v7022_v7 = vpop.eup %7021 }
0x1f8a   : > { %v5624_v39 = vrot.slane %v7022_v7, 1 }
0x1f8c   : > { %v5628_v57 = vmul.f32 %v5624_v39, %v5602_v34 }
0x1f8d   : > { %v7024_v60 = vpop.eup %7023 }
0x1f8e   : > { %v5636_v3 = vmul.f32 %v6213_v10, %v5628_v57  ;;  %v5627_v45 = vmul.f32 %v7024_v60, %v5601_v35 }
0x1f90   : > { %v5635_v50 = vmul.f32 %v6213_v10, %v5627_v45  ;;  %v5644_v26 = vadd.f32 %v6214_v1, %v5636_v3 }
0x1f92   : > { %v5643_v32 = vadd.f32 %v6214_v1, %v5635_v50  ;;  %v5646_v33 = vpack.c.bf16 %v5644_v26, %v5644_v26 }
0x1f94   : > { %v5645_v4 = vpack.c.bf16 %v5643_v32, %v5643_v32  ;;  %v5661_v5 = vunpack.c.l.b16 %v5646_v33 }
0x1f96   : > { %v5660_v6 = vunpack.c.l.b16 %v5645_v4  ;;  %v5663_v8 = vrot.slane %v5661_v5, 6 }
0x1f98   : > { %v5662_v17 = vrot.slane %v5660_v6, 7 }
0x1f9a   : > { %v5665_v16 = vsel %vm5664_vm12, %v5663_v8, %v5662_v17 }
0x1f9b   : > { %v5666_v9 = vpack.c.b16 %v5665_v16, %v5665_v16 }
0x1f9d   : > { %6733 = vmatmul.mubr.msk.bf16.vlgmr.msra.gmra.mxu0 %vm1236_vm4, %v5666_v9 }
0x205d   : > { %v5716_v14 = vpop.f32.mrf.mxu0 }
0x205e   : > { %v5717_v15 = vadd.f32 %v6215_v11, %v5716_v14 }
0x205f   : > { %v6734_v40 = vpop.f32.mrf.mxu0 }
0x2060   : > { %5723 = vst.msk [vmem:[#allocation3] sm:$0x3] %vm5722_vm13, %v5717_v15 }
0x2061   : > { %v5719_v22 = vpop.f32.mrf.mxu0 }
0x2063   : > { %v6735_v43 = vpop.f32.mrf.mxu0 }
0x2064 PF: > { %s8215_s1 = sld [smem:[#allocation7_spill]]  ;;  %s7082_s2 = smov [#allocation3]  }
0x2065   : > { %s5731_s5 = sshll.u32 %s7082_s2, 4  ;;  %s5732_s5 = int_to_ptr.vmem [resolvable:$true] %s5731_s5 }
0x2066   : > { %s7025_s28 = scalar_lea.vmem %s5732_s5, 32  ;;  %p7032_p10 = scmp.lt.s32.totalorder %s5732_s5, %s5732_s5 }
0x2067   : > { %p7026_p7 = scmp.ne.s32.totalorder %s5732_s5, %s7025_s28  ;;  %p7033_p11 = scmp.lt.s32.totalorder %s7025_s28, %s7025_s28 }
0x2069   : > { %p7034_p12 = por %p7033_p11, %p7032_p10 }
0x206a   : > { %p6740_p6 = scmp.eq.s32.totalorder %s8215_s1, 1 }
0x206c   : > { %p7027_p8 = pnand %p7026_p7, %p6740_p6 }
0x206e   : > { %p7028_p9 = pneg %p7027_p8 }
0x2070   : > { %p7035_p13 = pnand %p7034_p12, %p7028_p9 }
0x2072   : > { %7038 = shalt.err (!%p7035_p13)
}
0x2073   : > { %s8216_s4 = sld [smem:[#allocation30_spill]] }
0x2079   : > { %6737 = dma.vmem_to_hbm [thread:$0]  (%p6740_p6), %s5732_s5, 32, %s8216_s4, [#allocation4]  }
0x207a   : > { %7054 = dma.done.wait (%p6740_p6), [#allocation4], 32  }
0x207b   : > { %7056 = vsyncadd (%p6740_p6), [#allocation4], 4294967264 }
0x207c PF: > { %s8217_s9 = sld [smem:[#allocation6_spill]] }
0x2082   : > { %s39_s8 = sadd.s32 1, %s8217_s9  }
0x2083   : > { %p36_p0 = scmp.ge.s32.totalorder %s39_s8, 4  }
0x2085   :  { %38 = sbr.rel (!%p36_p0) target bundleno = 23 (0x17), region = 224 }
0x208a   :  { %5744 = vsyncpa [#allocation4], 1 }
0x208b   :  { %5746 = vsyncpa [#allocation4 + $0x1], 1 }

</bundles_post_ra>
